<compile_context>
chip_gen: v7x
topology: tpu7x:2x2x1
jax: 0.10.0
libtpu: 0.0.40
codegen_flags: <defaults>
</compile_context>

<pallas_src>
import jax
import jax.numpy as jnp
from jax.experimental import pallas as pl
from jax.experimental.pallas import tpu as pltpu


D_IN = 92 * 112            # 10304  (multiple of 64, NOT of 128 -> keep full-dim blocks)
H1, H2, NCLS = 1024, 512, 20
TN = 256                   # layer-1 output-column tile (also W2 row-chunk size)
NH = H1 // TN              # 4 grid steps
assert H1 % TN == 0


def _fused_mlp_kernel(x_ref, w1_ref, s1_ref, b1_ref, w2_ref, s2_ref, b2_ref,
                      w3_ref, b3_ref, o_ref, acc2_ref):
    """Grid = tiles of H1 (layer-1 output columns == layer-2 reduction rows).

    Per step n:
      h1_tile = relu((x @ W1q[:, n*TN:(n+1)*TN]) * s1_tile + b1_tile)   (f32)
      acc2   += h1_tile @ W2q[n*TN:(n+1)*TN, :]                         (f32)
    Last step: h2 = relu(acc2 * s2 + b2); logits = h2 @ W3 + b3; log_softmax.
    """
    n = pl.program_id(0)

    @pl.when(n == 0)
    def _():
        acc2_ref[...] = jnp.zeros_like(acc2_ref)

    # ---- layer 1, output-column tile n ------------------------------------
    # int8 -> bf16 cast is exact (values in [-127, 127]); per-output-channel
    # scale is applied to the f32 MXU accumulation afterwards.
    x_bf = x_ref[...].astype(jnp.bfloat16)          # tiny (B, D_IN)
    w1_t = w1_ref[...].astype(jnp.bfloat16)         # (D_IN, TN), VPU dequant
    h1_t = jnp.dot(x_bf, w1_t, preferred_element_type=jnp.float32)
    h1_t = jnp.maximum(h1_t * s1_ref[...] + b1_ref[...], 0.0)

    # ---- layer 2, partial reduction over this H1 chunk ---------------------
    # s2 is per-OUTPUT-channel of layer 2, i.e. uniform across row chunks, so
    # it can be applied after the full accumulation (in the epilogue).
    w2_c = w2_ref[...].astype(jnp.float32)          # (TN, H2), exact
    acc2_ref[...] += jnp.dot(h1_t, w2_c, preferred_element_type=jnp.float32)

    # ---- epilogue: layer-2 scale/bias/relu, layer 3, log_softmax -----------
    @pl.when(n == pl.num_programs(0) - 1)
    def _():
        h2 = jnp.maximum(acc2_ref[...] * s2_ref[...] + b2_ref[...], 0.0)
        logits = jnp.dot(h2, w3_ref[...],
                         preferred_element_type=jnp.float32) + b3_ref[...]
        # Numerically stable log_softmax over dim=1.
        m = jnp.max(logits, axis=-1, keepdims=True)
        y = logits - m
        y = y - jnp.log(jnp.sum(jnp.exp(y), axis=-1, keepdims=True))
        o_ref[...] = y.astype(o_ref.dtype)


def orl_mlp_forward(x, kparams):
    """Fused forward pass. x: [B, 10304] f32 (unpadded); kparams from prepare_params()."""
    w1_q, s1, b1, w2_q, s2, b2, w3, b3 = kparams
    B = x.shape[0]
    return pl.pallas_call(
        _fused_mlp_kernel,
        out_shape=jax.ShapeDtypeStruct((B, NCLS), jnp.float32),
        grid_spec=pltpu.PrefetchScalarGridSpec(
            num_scalar_prefetch=0,
            grid=(NH,),
            in_specs=[
                pl.BlockSpec((B, D_IN), lambda n: (0, 0)),      # x, f32, resident
                pl.BlockSpec((D_IN, TN), lambda n: (0, n)),     # W1 int8 column tile
                pl.BlockSpec((1, TN), lambda n: (0, n)),        # s1 tile (f32)
                pl.BlockSpec((1, TN), lambda n: (0, n)),        # b1 tile (f32)
                pl.BlockSpec((TN, H2), lambda n: (n, 0)),       # W2 int8 row chunk
                pl.BlockSpec((1, H2), lambda n: (0, 0)),        # s2, resident
                pl.BlockSpec((1, H2), lambda n: (0, 0)),        # b2, resident
                pl.BlockSpec((H2, NCLS), lambda n: (0, 0)),     # W3 f32, resident
                pl.BlockSpec((1, NCLS), lambda n: (0, 0)),      # b3, resident
            ],
            out_specs=pl.BlockSpec((B, NCLS), lambda n: (0, 0)),
            scratch_shapes=[pltpu.VMEM((B, H2), jnp.float32)],  # layer-2 accumulator
        ),
        compiler_params=pltpu.CompilerParams(
            # Single grid axis carries the layer-2 accumulator -> reduction axis.
            dimension_semantics=("arbitrary",),
            # Explicit limit (review): footprint ~13 MiB, comfortably below 32 MiB
            # on every generation (v5e/v6e physical 128 MiB, v7x 64 MiB).
            vmem_limit_bytes=32 * 1024 * 1024,
        ),
    )(x, w1_q, s1, b1, w2_q, s2, b2, w3, b3)


def init_params(key):
    """Deterministic init mimicking torch.nn.Linear default (U(-1/sqrt(fan_in), +)),
    weights stored [in_features, out_features]."""
    dims = [(D_IN, H1), (H1, H2), (H2, NCLS)]
    params = []
    for fan_in, fan_out in dims:
        key, kw, kb = jax.random.split(key, 3)
        bound = 1.0 / jnp.sqrt(float(fan_in))
        w = jax.random.uniform(kw, (fan_in, fan_out), jnp.float32, -bound, bound)
        b = jax.random.uniform(kb, (fan_out,), jnp.float32, -bound, bound)
        params.append((w, b))
    return params


def _quantize_per_out_channel(w):
    """Symmetric int8 quantization with one f32 scale per output channel (column)."""
    amax = jnp.max(jnp.abs(w), axis=0, keepdims=True)          # (1, out)
    scale = jnp.maximum(amax, 1e-12) / 127.0
    q = jnp.clip(jnp.round(w / scale), -127.0, 127.0).astype(jnp.int8)
    return q, scale.astype(jnp.float32)


def prepare_params(params):
    """One-time conversion to the kernel layout: int8 W1/W2 + per-channel scales,
    f32 W3, f32 biases as (1, N) rows.  No padding needed."""
    (w1, b1), (w2, b2), (w3, b3) = params
    w1_q, s1 = _quantize_per_out_channel(w1)
    w2_q, s2 = _quantize_per_out_channel(w2)
    return (
        w1_q, s1, b1.reshape(1, H1).astype(jnp.float32),
        w2_q, s2, b2.reshape(1, H2).astype(jnp.float32),
        w3.astype(jnp.float32), b3.reshape(1, NCLS).astype(jnp.float32),
    )


def reference_forward_f32(x, params):
    """Plain-JAX f32 reference matching the original PyTorch module."""
    (w1, b1), (w2, b2), (w3, b3) = params
    h = jnp.maximum(x @ w1 + b1, 0.0)
    h = jnp.maximum(h @ w2 + b2, 0.0)
    logits = h @ w3 + b3
    return jax.nn.log_softmax(logits, axis=1)


def reference_forward_quant(x, kparams):
    """Same math as the kernel (int8 weights dequantized exactly, f32 accumulation,
    per-channel scale applied after the dot)."""
    w1_q, s1, b1, w2_q, s2, b2, w3, b3 = kparams
    xb = x.astype(jnp.bfloat16)
    h1 = jnp.maximum(
        jnp.dot(xb, w1_q.astype(jnp.bfloat16),
                preferred_element_type=jnp.float32) * s1 + b1, 0.0)
    h2 = jnp.maximum(
        jnp.dot(h1, w2_q.astype(jnp.float32),
                preferred_element_type=jnp.float32) * s2 + b2, 0.0)
    logits = jnp.dot(h2, w3, preferred_element_type=jnp.float32) + b3
    return jax.nn.log_softmax(logits, axis=1)


if __name__ == "__main__":
    key = jax.random.PRNGKey(0)
    kp, kx = jax.random.split(key)

    params = init_params(kp)          # f32 "PyTorch" parameters
    kparams = prepare_params(params)  # one-time: int8 quantization + scales

    # Small batch of flattened 92x112 grayscale "images" in [0, 1].
    batch = 2
    x = jax.random.uniform(kx, (batch, D_IN), jnp.float32)

    fwd = jax.jit(orl_mlp_forward)
    out = jax.block_until_ready(fwd(x, kparams))

    # Sanity checks: shape, finiteness, prob rows sum to 1, agreement with
    # (a) a plain-JAX reference doing the same quantized math as the kernel (tight),
    # (b) the full-f32 reference of the original module (loose: int8 quantization).
    assert out.shape == (batch, NCLS), out.shape
    assert bool(jnp.all(jnp.isfinite(out)))
    assert bool(jnp.allclose(jnp.sum(jnp.exp(out), axis=1), 1.0, atol=1e-3))
    ref_q = reference_forward_quant(x, kparams)
    assert bool(jnp.allclose(out, ref_q, atol=5e-3, rtol=5e-3))
    ref_f = reference_forward_f32(x, params)
    assert bool(jnp.allclose(out, ref_f, atol=5e-2, rtol=5e-2))

    print("KERNEL_OK")
</pallas_src>

<mosaic_0001>
module attributes {stable_mosaic.version = 11 : i64} {
  func.func @_fused_mlp_kernel(%arg0: i32, %arg1: memref<2x10304xf32, #tpu.memory_space<vmem>>, %arg2: memref<10304x256xi8, #tpu.memory_space<vmem>>, %arg3: memref<1x256xf32, #tpu.memory_space<vmem>>, %arg4: memref<1x256xf32, #tpu.memory_space<vmem>>, %arg5: memref<256x512xi8, #tpu.memory_space<vmem>>, %arg6: memref<1x512xf32, #tpu.memory_space<vmem>>, %arg7: memref<1x512xf32, #tpu.memory_space<vmem>>, %arg8: memref<512x20xf32, #tpu.memory_space<vmem>>, %arg9: memref<1x20xf32, #tpu.memory_space<vmem>>, %arg10: memref<2x20xf32, #tpu.memory_space<vmem>>, %arg11: memref<2x512xf32, #tpu.memory_space<vmem>>) attributes {dimension_semantics = [#tpu.dimension_semantics<arbitrary>], iteration_bounds = array<i64: 4>, scalar_prefetch = 0 : i64, scratch_operands = 1 : i64, tpu.core_type = #tpu.core_type<tc>, window_params = [{pipeline_mode = #tpu.pipeline_mode<synchronous>, transform_indices = @transform_0, window_bounds = array<i64: 2, 10304>}, {transform_indices = @transform_1, window_bounds = array<i64: 10304, 256>}, {transform_indices = @transform_2, window_bounds = array<i64: 1, 256>}, {transform_indices = @transform_3, window_bounds = array<i64: 1, 256>}, {transform_indices = @transform_4, window_bounds = array<i64: 256, 512>}, {pipeline_mode = #tpu.pipeline_mode<synchronous>, transform_indices = @transform_5, window_bounds = array<i64: 1, 512>}, {pipeline_mode = #tpu.pipeline_mode<synchronous>, transform_indices = @transform_6, window_bounds = array<i64: 1, 512>}, {pipeline_mode = #tpu.pipeline_mode<synchronous>, transform_indices = @transform_7, window_bounds = array<i64: 512, 20>}, {pipeline_mode = #tpu.pipeline_mode<synchronous>, transform_indices = @transform_8, window_bounds = array<i64: 1, 20>}, {pipeline_mode = #tpu.pipeline_mode<synchronous>, transform_indices = @transform_9, window_bounds = array<i64: 2, 20>}]} {
    %c0_i32 = arith.constant 0 : i32
    %0 = arith.cmpi eq, %arg0, %c0_i32 : i32
    %1 = arith.extui %0 : i1 to i32
    %c0_i32_0 = arith.constant 0 : i32
    %2 = arith.cmpi ne, %1, %c0_i32_0 : i32
    scf.if %2 {
      %cst_17 = arith.constant 0.000000e+00 : f32
      %25 = vector.broadcast %cst_17 : f32 to vector<2x512xf32>
      %c0_18 = arith.constant 0 : index
      %c0_19 = arith.constant 0 : index
      %26 = vector.load %arg11[%c0_18, %c0_19] : memref<2x512xf32, #tpu.memory_space<vmem>>, vector<2x512xf32>
      tpu.vector_store %arg11[%c0_18, %c0_19], %25 {strides = array<i32>} : memref<2x512xf32, #tpu.memory_space<vmem>>, vector<2x512xf32>,
    } else {
    }
    %c0 = arith.constant 0 : index
    %c0_1 = arith.constant 0 : index
    %3 = vector.load %arg1[%c0, %c0_1] : memref<2x10304xf32, #tpu.memory_space<vmem>>, vector<2x10304xf32>
    %4 = arith.truncf %3 : vector<2x10304xf32> to vector<2x10304xbf16>
    %c0_2 = arith.constant 0 : index
    %c0_3 = arith.constant 0 : index
    %5 = vector.load %arg2[%c0_2, %c0_3] : memref<10304x256xi8, #tpu.memory_space<vmem>>, vector<10304x256xi8>
    %6 = arith.sitofp %5 : vector<10304x256xi8> to vector<10304x256xbf16>
    %cst = arith.constant dense<0.000000e+00> : vector<2x256xf32>
    %7 = tpu.matmul %4, %6, %cst {dimension_numbers = #tpu.dot_dimension_numbers<[1], [0], [0], [1], [0, 0, 1, 1], [], []>} : vector<2x10304xbf16>, vector<10304x256xbf16>, vector<2x256xf32> -> vector<2x256xf32>
    %c0_4 = arith.constant 0 : index
    %c0_5 = arith.constant 0 : index
    %8 = vector.load %arg3[%c0_4, %c0_5] : memref<1x256xf32, #tpu.memory_space<vmem>>, vector<1x256xf32>
    %9 = vector.broadcast %8 : vector<1x256xf32> to vector<2x256xf32>
    %10 = arith.mulf %7, %9 : vector<2x256xf32>
    %c0_6 = arith.constant 0 : index
    %c0_7 = arith.constant 0 : index
    %11 = vector.load %arg4[%c0_6, %c0_7] : memref<1x256xf32, #tpu.memory_space<vmem>>, vector<1x256xf32>
    %12 = vector.broadcast %11 : vector<1x256xf32> to vector<2x256xf32>
    %13 = arith.addf %10, %12 : vector<2x256xf32>
    %cst_8 = arith.constant 0.000000e+00 : f32
    %14 = vector.broadcast %cst_8 : f32 to vector<2x256xf32>
    %15 = arith.maximumf %13, %14 : vector<2x256xf32>
    %c0_9 = arith.constant 0 : index
    %c0_10 = arith.constant 0 : index
    %16 = vector.load %arg5[%c0_9, %c0_10] : memref<256x512xi8, #tpu.memory_space<vmem>>, vector<256x512xi8>
    %17 = arith.sitofp %16 : vector<256x512xi8> to vector<256x512xf32>
    %c0_11 = arith.constant 0 : index
    %c0_12 = arith.constant 0 : index
    %18 = vector.load %arg11[%c0_11, %c0_12] : memref<2x512xf32, #tpu.memory_space<vmem>>, vector<2x512xf32>
    %cst_13 = arith.constant dense<0.000000e+00> : vector<2x512xf32>
    %19 = tpu.matmul %15, %17, %cst_13 {dimension_numbers = #tpu.dot_dimension_numbers<[1], [0], [0], [1], [0, 0, 1, 1], [], []>} : vector<2x256xf32>, vector<256x512xf32>, vector<2x512xf32> -> vector<2x512xf32>
    %20 = arith.addf %18, %19 : vector<2x512xf32>
    %c0_14 = arith.constant 0 : index
    %c0_15 = arith.constant 0 : index
    %21 = vector.load %arg11[%c0_14, %c0_15] : memref<2x512xf32, #tpu.memory_space<vmem>>, vector<2x512xf32>
    tpu.vector_store %arg11[%c0_14, %c0_15], %20 {strides = array<i32>} : memref<2x512xf32, #tpu.memory_space<vmem>>, vector<2x512xf32>,
    %c3_i32 = arith.constant 3 : i32
    %22 = arith.cmpi eq, %arg0, %c3_i32 : i32
    %23 = arith.extui %22 : i1 to i32
    %c0_i32_16 = arith.constant 0 : i32
    %24 = arith.cmpi ne, %23, %c0_i32_16 : i32
    scf.if %24 {
      %c0_17 = arith.constant 0 : index
      %c0_18 = arith.constant 0 : index
      %25 = vector.load %arg11[%c0_17, %c0_18] : memref<2x512xf32, #tpu.memory_space<vmem>>, vector<2x512xf32>
      %c0_19 = arith.constant 0 : index
      %c0_20 = arith.constant 0 : index
      %26 = vector.load %arg6[%c0_19, %c0_20] : memref<1x512xf32, #tpu.memory_space<vmem>>, vector<1x512xf32>
      %27 = vector.broadcast %26 : vector<1x512xf32> to vector<2x512xf32>
      %28 = arith.mulf %25, %27 : vector<2x512xf32>
      %c0_21 = arith.constant 0 : index
      %c0_22 = arith.constant 0 : index
      %29 = vector.load %arg7[%c0_21, %c0_22] : memref<1x512xf32, #tpu.memory_space<vmem>>, vector<1x512xf32>
      %30 = vector.broadcast %29 : vector<1x512xf32> to vector<2x512xf32>
      %31 = arith.addf %28, %30 : vector<2x512xf32>
      %cst_23 = arith.constant 0.000000e+00 : f32
      %32 = vector.broadcast %cst_23 : f32 to vector<2x512xf32>
      %33 = arith.maximumf %31, %32 : vector<2x512xf32>
      %c0_24 = arith.constant 0 : index
      %c0_25 = arith.constant 0 : index
      %34 = vector.load %arg8[%c0_24, %c0_25] : memref<512x20xf32, #tpu.memory_space<vmem>>, vector<512x20xf32>
      %cst_26 = arith.constant dense<0.000000e+00> : vector<2x20xf32>
      %35 = tpu.matmul %33, %34, %cst_26 {dimension_numbers = #tpu.dot_dimension_numbers<[1], [0], [0], [1], [0, 0, 1, 1], [], []>} : vector<2x512xf32>, vector<512x20xf32>, vector<2x20xf32> -> vector<2x20xf32>
      %c0_27 = arith.constant 0 : index
      %c0_28 = arith.constant 0 : index
      %36 = vector.load %arg9[%c0_27, %c0_28] : memref<1x20xf32, #tpu.memory_space<vmem>>, vector<1x20xf32>
      %37 = vector.broadcast %36 : vector<1x20xf32> to vector<2x20xf32>
      %38 = arith.addf %35, %37 : vector<2x20xf32>
      %cst_29 = arith.constant dense<0xFF800000> : vector<2xf32>
      %39 = vector.multi_reduction <maximumf>, %38, %cst_29 [1] : vector<2x20xf32> to vector<2xf32>
      %40 = vector.shape_cast %39 : vector<2xf32> to vector<2x1xf32>
      %41 = vector.broadcast %40 : vector<2x1xf32> to vector<2x20xf32>
      %42 = arith.subf %38, %41 : vector<2x20xf32>
      %43 = math.exp %42 : vector<2x20xf32>
      %cst_30 = arith.constant dense<0.000000e+00> : vector<2xf32>
      %44 = vector.multi_reduction <add>, %43, %cst_30 [1] : vector<2x20xf32> to vector<2xf32>
      %45 = vector.shape_cast %44 : vector<2xf32> to vector<2x1xf32>
      %46 = math.log %45 : vector<2x1xf32>
      %47 = vector.broadcast %46 : vector<2x1xf32> to vector<2x20xf32>
      %48 = arith.subf %42, %47 : vector<2x20xf32>
      %c0_31 = arith.constant 0 : index
      %c0_32 = arith.constant 0 : index
      %49 = vector.load %arg10[%c0_31, %c0_32] : memref<2x20xf32, #tpu.memory_space<vmem>>, vector<2x20xf32>
      tpu.vector_store %arg10[%c0_31, %c0_32], %48 {strides = array<i32>} : memref<2x20xf32, #tpu.memory_space<vmem>>, vector<2x20xf32>,
    } else {
    }
    return
  }
  func.func @transform_0(%arg0: i32) -> (i32, i32) {
    %c0_i32 = arith.constant 0 : i32
    %c0_i32_0 = arith.constant 0 : i32
    %c0_i32_1 = arith.constant 0 : i32
    return %c0_i32, %c0_i32_0 : i32, i32
  }
  func.func @transform_1(%arg0: i32) -> (i32, i32) {
    %c0_i32 = arith.constant 0 : i32
    %c0_i32_0 = arith.constant 0 : i32
    return %c0_i32, %arg0 : i32, i32
  }
  func.func @transform_2(%arg0: i32) -> (i32, i32) {
    %c0_i32 = arith.constant 0 : i32
    %c0_i32_0 = arith.constant 0 : i32
    return %c0_i32, %arg0 : i32, i32
  }
  func.func @transform_3(%arg0: i32) -> (i32, i32) {
    %c0_i32 = arith.constant 0 : i32
    %c0_i32_0 = arith.constant 0 : i32
    return %c0_i32, %arg0 : i32, i32
  }
  func.func @transform_4(%arg0: i32) -> (i32, i32) {
    %c0_i32 = arith.constant 0 : i32
    %c0_i32_0 = arith.constant 0 : i32
    return %arg0, %c0_i32 : i32, i32
  }
  func.func @transform_5(%arg0: i32) -> (i32, i32) {
    %c0_i32 = arith.constant 0 : i32
    %c0_i32_0 = arith.constant 0 : i32
    %c0_i32_1 = arith.constant 0 : i32
    return %c0_i32, %c0_i32_0 : i32, i32
  }
  func.func @transform_6(%arg0: i32) -> (i32, i32) {
    %c0_i32 = arith.constant 0 : i32
    %c0_i32_0 = arith.constant 0 : i32
    %c0_i32_1 = arith.constant 0 : i32
    return %c0_i32, %c0_i32_0 : i32, i32
  }
  func.func @transform_7(%arg0: i32) -> (i32, i32) {
    %c0_i32 = arith.constant 0 : i32
    %c0_i32_0 = arith.constant 0 : i32
    %c0_i32_1 = arith.constant 0 : i32
    return %c0_i32, %c0_i32_0 : i32, i32
  }
  func.func @transform_8(%arg0: i32) -> (i32, i32) {
    %c0_i32 = arith.constant 0 : i32
    %c0_i32_0 = arith.constant 0 : i32
    %c0_i32_1 = arith.constant 0 : i32
    return %c0_i32, %c0_i32_0 : i32, i32
  }
  func.func @transform_9(%arg0: i32) -> (i32, i32) {
    %c0_i32 = arith.constant 0 : i32
    %c0_i32_0 = arith.constant 0 : i32
    %c0_i32_1 = arith.constant 0 : i32
    return %c0_i32, %c0_i32_0 : i32, i32
  }
}

</mosaic_0001>

<bundles_post_ra>
// kernel: orl_mlp_forward.1
= control target key start
LH: loop header
LB: loop body
LE: loop exit
PB: predicated region body
PF: predicated region fallthrough
CT: control target
= control target key end

     0   :  { %s8275_s0 = inlined_call_operand.hbm [shape: f32[2,10304], index: 0, kind: input, shape index: {}]   ;;  %s8276_s1 = inlined_call_operand.hbm [shape: s8[10304,1024], index: 1, kind: input, shape index: {}]   ;;  %s8277_s2 = inlined_call_operand.hbm [shape: f32[1,1024], index: 2, kind: input, shape index: {}]   ;;  %s8278_s3 = inlined_call_operand.hbm [shape: f32[1,1024], index: 3, kind: input, shape index: {}]   ;;  %s8279_s4 = inlined_call_operand.hbm [shape: s8[1024,512], index: 4, kind: input, shape index: {}]   ;;  %s8280_s5 = inlined_call_operand.hbm [shape: f32[1,512], index: 5, kind: input, shape index: {}]   ;;  %s8281_s6 = inlined_call_operand.hbm [shape: f32[1,512], index: 6, kind: input, shape index: {}]   ;;  %s8282_s7 = inlined_call_operand.vmem [shape: f32[512,20], index: 7, kind: input, shape index: {}]   ;;  %s8283_s8 = inlined_call_operand.hbm [shape: f32[1,20], index: 8, kind: input, shape index: {}]   ;;  %s8284_s9 = inlined_call_operand.hbm [shape: f32[2,20], index: 9, kind: output, shape index: {}]  }
   0x1   :  { %8304 = sst [smem:[#allocation28_spill]] %s8276_s1 }
   0x2   :  { %8305 = sst [smem:[#allocation29_spill]] %s8280_s5 }
   0x3   :  { %8306 = sst [smem:[#allocation30_spill]] %s8282_s7 }
   0x4   :  { %8307 = sst [smem:[#allocation31_spill]] %s8284_s9 }
   0x5   :  { %14 = vsyncpa [#allocation4], 0 }
   0x6   :  { %15 = vsyncpa [#allocation7], 0 }
   0x7   :  { %17 = vsyncpa [#allocation7 + $0x1], 0 }
   0x8   :  { %18 = vsyncpa [#allocation10], 0 }
   0x9   :  { %20 = vsyncpa [#allocation10 + $0x1], 0 }
   0xa   :  { %21 = vsyncpa [#allocation13], 0 }
   0xb   :  { %22 = vsyncpa [#allocation16], 0 }
   0xc   :  { %23 = vsyncpa [#allocation5], 0  ;;  %s6630_s30 = smov 0   ;;  %s6632_s10 = smov 0  }
   0xd   :  { %s6634_s11 = smov 0   ;;  %s6636_s12 = smov 0  }
   0xe LB: > { %8308 = sst [smem:[#allocation24_spill]] %s6557_s11  ;;  %s6649_s13 = sadd.s32 4294967295, %s6561_s12   ;;  %s6561_s12 = sphi %s6636_s12, %s8343_s12   ;;  %s6557_s11 = sphi %s6634_s11, %s8345_s11   ;;  %s6553_s10 = sphi %s6632_s10, %s8347_s10   ;;  %s6549_s30 = sphi %s6630_s30, %s8346_s30  }
   0xf   : > { %p70_p0 = scmp.ne.s32.totalorder %s6553_s10, %s6549_s30  ;;  %p8285_p1 = scmp.eq.s32.totalorder %s6649_s13, 0 }
  0x10   : > { %p5653_p2 = scmp.ge.s32.totalorder %s6561_s12, 1  ;;  %p264_p3 = scmp.lt.s32.totalorder %s6561_s12, 5 }
  0x11   : > { %p6658_p5 = por %p8285_p1, %p70_p0  ;;  %s6563_s16 = smov [#allocation12]  }
  0x12   : > { %p6662_p6 = pnand %p5653_p2, %p264_p3  ;;  %s288_s17 = sshll.u32 %s6563_s16, 4  ;;  %s289_s17 = int_to_ptr.vmem [resolvable:$true] %s288_s17 }
  0x13   : > { %s8309_s14 = scalar_select %p6658_p5, 1, 0 }
  0x14   : > { %s8311_s15 = scalar_select %p6662_p6, 1, 0 }
  0x15   : > { %8310 = sst [smem:[#allocation25_spill]] %s8309_s14  ;;  %p6141_p7 = pneg %p6662_p6 }
  0x16   : > { %s6669_s18 = sadd.s32 1, %s6561_s12   ;;  %s57_s22 = sadd.s32 1, %s6557_s11 }
  0x17   : > { %8312 = sst [smem:[#allocation26_spill]] %s6669_s18  ;;  %p6673_p8 = pnand %p6141_p7, %p8285_p1 }
  0x18   : > { %s54_s20 = ssub.s32 %s6561_s12, %s6669_s18  ;;  %s8315_s5 = sld [smem:[#allocation29_spill]] }
  0x19   : > { %s8313_s19 = scalar_select %p6673_p8, 1, 0 }
  0x1a   : > { %p6679_p9 = scmp.eq.s32.totalorder %s54_s20, 0  ;;  %p6694_p12 = pneg %p6673_p8 }
  0x1c   : > { %s8314_s21 = scalar_select %p6679_p9, 1, 0 }
  0x1d   : > { %s8316_s28 = scalar_select %p6694_p12, 1, 0 }
  0x1e   : > { %s6249_s25 = scalar_lea.hbm %s8315_s5, 64 }
  0x1f   : > { %p6250_p11 = scmp.ne.s32.totalorder %s8315_s5, %s6249_s25  ;;  %p6256_p2 = scmp.lt.u32.totalorder %s6249_s25, %s8315_s5 }
  0x21   : > { %p6252_p13 = pnand %p6694_p12, %p6250_p11 }
  0x23   : > { %p6253_p0 = pneg %p6252_p13 }
  0x25   : > { %p6258_p3 = pnand %p6256_p2, %p6253_p0 }
  0x27   : > { %6261 = shalt.err (!%p6258_p3)
}
  0x28   : > { %s6262_s16 = scalar_lea.vmem %s289_s17, 64  ;;  %p6270_p10 = scmp.lt.s32.totalorder %s289_s17, %s289_s17 }
  0x29   : > { %p6263_p7 = scmp.ne.s32.totalorder %s289_s17, %s6262_s16  ;;  %p6271_p5 = scmp.lt.s32.totalorder %s6262_s16, %s6262_s16 }
  0x2b   : > { %p6265_p4 = pnand %p6263_p7, %p6694_p12  ;;  %p6272_p6 = por %p6271_p5, %p6270_p10 }
  0x2d   : > { %p6266_p1 = pneg %p6265_p4 }
  0x2f   : > { %p6273_p9 = pnand %p6272_p6, %p6266_p1 }
  0x31   : > { %6276 = shalt.err (!%p6273_p9)
}
  0x32   : > { %6147 = dma.hbm_to_vmem [thread:$0]  (!%p6673_p8), %s8315_s5, 64, %s289_s17, [#allocation13]  }
  0x33   : > { %p8317_p4 = scmp.ne.s32.totalorder %s8314_s21, 0  ;;  %p65_p1 = scmp.eq.s32.totalorder %s6561_s12, 0 }
  0x34   : > { %p6171_p5 = scmp.lt.s32.totalorder %s6561_s12, 4  ;;  %s8288_s25 = sand.u32 1, %s6561_s12  }
  0x35   : > { %s6713_s24 = scalar_select %p8317_p4, %s6557_s11, %s57_s22  }
  0x36   : > { %s6719_s26 = sand.u32 1, %s6557_s11   ;;  %p8319_p6 = scmp.ne.s32.totalorder %s6557_s11, %s6553_s10 }
  0x37   : > { %8318 = sst [smem:[#allocation27_spill]] %s6713_s24  ;;  %s6111_s27 = smul.u32 5152, %s6719_s26 }
  0x38   : > { %p66_p9 = por %p65_p1, %p8319_p6  ;;  %s5688_s29 = sshll.u32 %s6561_s12, 8 }
  0x39   : > { %s8320_s1 = sld [smem:[#allocation28_spill]]  ;;  %s328_s21 = scalar_lea.vmem [#allocation6], %s6111_s27 }
  0x3a   : > { %p6731_p10 = pnand %p6171_p5, %p66_p9  ;;  %s335_s22 = sshll.u32 %s328_s21, 4  ;;  %s6735_s22 = int_to_ptr.vmem [resolvable:$true] %s335_s22 }
  0x3b   : > { %s6740_s5 = scalar_lea.sflag [#allocation7], %s8288_s25 }
  0x3c   : > { %s8321_s17 = scalar_select %p6731_p10, 1, 0 }
  0x3d   : > { %p6746_p13 = pneg %p6731_p10 }
  0x3f   : > { %s6729_s20 = scalar_lea.hbm %s8320_s1, %s5688_s29  ;;  %s6282_s21 = scalar_lea.hbm %s8320_s1, 329728 }
  0x40   : > { %s6277_s30 = scalar_lea.hbm %s6729_s20, 82432  ;;  %p6283_p3 = scmp.lt.u32.totalorder %s6729_s20, %s8320_s1 }
  0x41   : > { %p6278_p11 = scmp.ne.s32.totalorder %s6729_s20, %s6277_s30  ;;  %p6284_p7 = scmp.lt.u32.totalorder %s6282_s21, %s6277_s30 }
  0x42   : > { %s8322_s29 = scalar_select %p6746_p13, 1, 0 }
  0x43   : > { %p6280_p0 = pnand %p6746_p13, %p6278_p11  ;;  %p6285_p4 = por %p6284_p7, %p6283_p3 }
  0x44   : > { %p6286_p1 = scmp.lt.u32.totalorder %s6277_s30, %s6729_s20 }
  0x45   : > { %p6281_p2 = pneg %p6280_p0 }
  0x46   : > { %p6287_p5 = por %p6286_p1, %p6285_p4 }
  0x48   : > { %p6288_p6 = pnand %p6287_p5, %p6281_p2 }
  0x4a   : > { %6291 = shalt.err (!%p6288_p6)
}
  0x4b   : > { %s6292_s25 = scalar_lea.vmem %s6735_s22, 82432  ;;  %s6564_s16 = smov [#allocation6]  }
  0x4c   : > { %p6293_p9 = scmp.ne.s32.totalorder %s6735_s22, %s6292_s25  ;;  %s6297_s27 = sshll.u32 %s6564_s16, 4  ;;  %s6298_s27 = int_to_ptr.vmem [resolvable:$false] %s6297_s27 }
  0x4d   : > { %s6299_s24 = scalar_lea.vmem %s6298_s27, 164864  ;;  %p6300_p8 = scmp.lt.s32.totalorder %s6735_s22, %s6298_s27 }
  0x4e   : > { %p6295_p11 = pnand %p6293_p9, %p6746_p13  ;;  %p6301_p12 = scmp.lt.s32.totalorder %s6299_s24, %s6292_s25 }
  0x50   : > { %p6296_p0 = pneg %p6295_p11  ;;  %p6302_p3 = por %p6301_p12, %p6300_p8 }
  0x52   : > { %p6303_p7 = pnand %p6302_p3, %p6296_p0 }
  0x54   : > { %6306 = shalt.err (!%p6303_p7)
}
  0x55   : > { %s6565_s23 = smov 1024   ;;  %s6566_s30 = smov 256  }
  0x56   : > { %s6567_s21 = smov 16   ;;  %s5689_s16 = sshll.u32 %s6561_s12, 5 }
  0x57   : > { %6157 = dma.hbm_to_vmem [thread:$0]  (!%p6731_p10), %s6729_s20, 82432, %s6735_s22, %s6740_s5, %s6565_s23, %s6566_s30, %s6567_s21  }
  0x58   : > { %s6774_s25 = scalar_lea.hbm %s8277_s2, %s5689_s16  ;;  %s6779_s18 = scalar_lea.hbm %s8278_s3, %s5689_s16 }
  0x59   : > { %s8323_s9 = sshll.u32 %s6719_s26, 1  ;;  %s6568_s20 = smov [#allocation3]  }
  0x5a   : > { %s368_s7 = scalar_lea.vmem [#allocation9], %s8323_s9  ;;  %s6785_s22 = sshll.u32 %s6568_s20, 4  ;;  %s278_s22 = int_to_ptr.vmem [resolvable:$true] %s6785_s22 }
  0x5b   : > { %s376_s14 = sshll.u32 %s368_s7, 4  ;;  %s8324_s1 = sand.u32 1, %s6561_s12   ;;  %s6783_s14 = int_to_ptr.vmem [resolvable:$true] %s376_s14 }
  0x5c   : > { %s6789_s23 = scalar_lea.sflag [#allocation10], %s8324_s1  ;;  %s6307_s30 = scalar_lea.hbm %s6779_s18, 32 }
  0x5d   : > { %p6308_p8 = scmp.ne.s32.totalorder %s6779_s18, %s6307_s30  ;;  %s6312_s16 = scalar_lea.hbm %s8278_s3, 128 }
  0x5e   : > { %p6313_p4 = scmp.lt.u32.totalorder %s6779_s18, %s8278_s3  ;;  %p6314_p1 = scmp.lt.u32.totalorder %s6312_s16, %s6307_s30 }
  0x5f   : > { %p6310_p12 = pnand %p6308_p8, %p6746_p13  ;;  %p6316_p6 = scmp.lt.u32.totalorder %s6307_s30, %s6779_s18 }
  0x60   : > { %p6315_p5 = por %p6314_p1, %p6313_p4 }
  0x61   : > { %p6311_p2 = pneg %p6310_p12 }
  0x62   : > { %p6317_p9 = por %p6316_p6, %p6315_p5 }
  0x64   : > { %p6318_p11 = pnand %p6317_p9, %p6311_p2 }
  0x66   : > { %6321 = shalt.err (!%p6318_p11)
}
  0x67   : > { %s6322_s7 = scalar_lea.vmem %s6783_s14, 32  ;;  %s6569_s24 = smov [#allocation9]  }
  0x68   : > { %p6323_p0 = scmp.ne.s32.totalorder %s6783_s14, %s6322_s7  ;;  %s6327_s20 = sshll.u32 %s6569_s24, 4  ;;  %s6328_s20 = int_to_ptr.vmem [resolvable:$false] %s6327_s20 }
  0x69   : > { %s6329_s1 = scalar_lea.vmem %s6328_s20, 64  ;;  %p6330_p8 = scmp.lt.s32.totalorder %s6783_s14, %s6328_s20 }
  0x6a   : > { %p6325_p3 = pnand %p6323_p0, %p6746_p13  ;;  %p6331_p12 = scmp.lt.s32.totalorder %s6329_s1, %s6322_s7 }
  0x6c   : > { %p6326_p7 = pneg %p6325_p3  ;;  %p6332_p4 = por %p6331_p12, %p6330_p8 }
  0x6e   : > { %p6333_p1 = pnand %p6332_p4, %p6326_p7 }
  0x70   : > { %6336 = shalt.err (!%p6333_p1)
}
  0x71   : > { %6163 = dma.hbm_to_vmem [thread:$0]  (!%p6731_p10), %s6779_s18, 32, %s6783_s14, %s6789_s23  }
  0x72   : > { %s6337_s21 = scalar_lea.hbm %s8275_s0, 2592  ;;  %p8325_p5 = scmp.ne.s32.totalorder %s8316_s28, 0 }
  0x73   : > { %p6338_p2 = scmp.ne.s32.totalorder %s8275_s0, %s6337_s21  ;;  %p6344_p11 = scmp.lt.u32.totalorder %s6337_s21, %s8275_s0 }
  0x75   : > { %p6340_p6 = pnand %p6338_p2, %p8325_p5 }
  0x77   : > { %p6341_p9 = pneg %p6340_p6 }
  0x79   : > { %p6346_p0 = pnand %p6344_p11, %p6341_p9 }
  0x7b   : > { %6349 = shalt.err (!%p6346_p0)
}
  0x7c   : > { %s6350_s24 = scalar_lea.vmem %s278_s22, 2592  ;;  %p6358_p12 = scmp.lt.s32.totalorder %s278_s22, %s278_s22 }
  0x7d   : > { %p6351_p3 = scmp.ne.s32.totalorder %s278_s22, %s6350_s24  ;;  %p6359_p4 = scmp.lt.s32.totalorder %s6350_s24, %s6350_s24 }
  0x7f   : > { %p6353_p7 = pnand %p6351_p3, %p8325_p5  ;;  %p6360_p1 = por %p6359_p4, %p6358_p12 }
  0x81   : > { %p6354_p8 = pneg %p6353_p7 }
  0x83   : > { %p6361_p10 = pnand %p6360_p1, %p6354_p8 }
  0x85   : > { %6364 = shalt.err (!%p6361_p10)
}
  0x86   : > { %p8326_p2 = scmp.ne.s32.totalorder %s8313_s19, 0  ;;  %s6570_s20 = smov [#allocation14]  }
  0x87   : > { %s299_s1 = sshll.u32 %s6570_s20, 4  ;;  %s6571_s30 = smov [#allocation15]   ;;  %s300_s1 = int_to_ptr.vmem [resolvable:$true] %s299_s1 }
  0x88   : > { %6144 = dma.hbm_to_vmem [thread:$0]  (!%p8326_p2), %s8275_s0, 2592, %s278_s22, [#allocation4]  }
  0x89   : > { %s313_s11 = sshll.u32 %s6571_s30, 4  ;;  %s6365_s27 = scalar_lea.hbm %s8281_s6, 64  ;;  %s314_s11 = int_to_ptr.vmem [resolvable:$true] %s313_s11 }
  0x8a   : > { %p6366_p10 = scmp.ne.s32.totalorder %s8281_s6, %s6365_s27  ;;  %p6372_p11 = scmp.lt.u32.totalorder %s6365_s27, %s8281_s6 }
  0x8c   : > { %p6368_p6 = pnand %p6366_p10, %p8325_p5 }
  0x8e   : > { %p6369_p9 = pneg %p6368_p6 }
  0x90   : > { %p6374_p0 = pnand %p6372_p11, %p6369_p9 }
  0x92   : > { %6377 = shalt.err (!%p6374_p0)
}
  0x93   : > { %s6378_s22 = scalar_lea.vmem %s300_s1, 64  ;;  %p6386_p12 = scmp.lt.s32.totalorder %s300_s1, %s300_s1 }
  0x94   : > { %p6379_p3 = scmp.ne.s32.totalorder %s300_s1, %s6378_s22  ;;  %p6387_p4 = scmp.lt.s32.totalorder %s6378_s22, %s6378_s22 }
  0x96   : > { %p6381_p7 = pnand %p6379_p3, %p8325_p5  ;;  %p6388_p1 = por %p6387_p4, %p6386_p12 }
  0x98   : > { %p6382_p8 = pneg %p6381_p7 }
  0x9a   : > { %p6389_p13 = pnand %p6388_p1, %p6382_p8 }
  0x9c   : > { %6392 = shalt.err (!%p6389_p13)
}
  0x9d   : > { %6150 = dma.hbm_to_vmem [thread:$0]  (!%p8326_p2), %s8281_s6, 64, %s300_s1, [#allocation13]  }
  0x9e   : > { %s8327_s30 = sshll.u32 %s6719_s26, 1  ;;  %s6393_s7 = scalar_lea.hbm %s8283_s8, 16 }
  0x9f   : > { %s349_s21 = scalar_lea.vmem [#allocation8], %s8327_s30  ;;  %p6394_p13 = scmp.ne.s32.totalorder %s8283_s8, %s6393_s7 }
  0xa0   : > { %s357_s16 = sshll.u32 %s349_s21, 4  ;;  %p6400_p9 = scmp.lt.u32.totalorder %s6393_s7, %s8283_s8  ;;  %s358_s16 = int_to_ptr.vmem [resolvable:$true] %s357_s16 }
  0xa1   : > { %p6396_p10 = pnand %p6394_p13, %p8325_p5 }
  0xa3   : > { %p6397_p6 = pneg %p6396_p10 }
  0xa5   : > { %p6402_p11 = pnand %p6400_p9, %p6397_p6 }
  0xa7   : > { %6405 = shalt.err (!%p6402_p11)
}
  0xa8   : > { %s6406_s1 = scalar_lea.vmem %s314_s11, 16  ;;  %s6413_s20 = scalar_lea.vmem %s314_s11, 32 }
  0xa9   : > { %p6407_p0 = scmp.ne.s32.totalorder %s314_s11, %s6406_s1  ;;  %p6414_p8 = scmp.lt.s32.totalorder %s314_s11, %s314_s11 }
  0xaa   : > { %p6415_p12 = scmp.lt.s32.totalorder %s6413_s20, %s6406_s1 }
  0xab   : > { %p6409_p3 = pnand %p6407_p0, %p8325_p5 }
  0xac   : > { %p6416_p4 = por %p6415_p12, %p6414_p8 }
  0xad   : > { %p6410_p7 = pneg %p6409_p3 }
  0xaf   : > { %p6417_p1 = pnand %p6416_p4, %p6410_p7 }
  0xb1   : > { %6420 = shalt.err (!%p6417_p1)
}
  0xb2   : > { %6153 = dma.hbm_to_vmem [thread:$0]  (!%p8326_p2), %s8283_s8, 16, %s314_s11, [#allocation16]  }
  0xb3   : > { %s5667_s28 = sshll.u32 %s6719_s26, 8  ;;  %s6421_s27 = scalar_lea.hbm %s6774_s25, 32 }
  0xb4   : > { %p6422_p5 = scmp.ne.s32.totalorder %s6774_s25, %s6421_s27  ;;  %p8328_p13 = scmp.ne.s32.totalorder %s8322_s29, 0 }
  0xb5   : > { %s6426_s19 = scalar_lea.hbm %s8277_s2, 128  ;;  %p6427_p9 = scmp.lt.u32.totalorder %s6774_s25, %s8277_s2 }
  0xb6   : > { %p6424_p10 = pnand %p6422_p5, %p8328_p13  ;;  %p6428_p11 = scmp.lt.u32.totalorder %s6426_s19, %s6421_s27 }
  0xb7   : > { %p6430_p3 = scmp.lt.u32.totalorder %s6421_s27, %s6774_s25 }
  0xb8   : > { %p6425_p6 = pneg %p6424_p10  ;;  %p6429_p0 = por %p6428_p11, %p6427_p9 }
  0xba   : > { %p6431_p7 = por %p6430_p3, %p6429_p0 }
  0xbc   : > { %p6432_p2 = pnand %p6431_p7, %p6425_p6 }
  0xbe   : > { %6435 = shalt.err (!%p6432_p2)
}
  0xbf   : > { %s6436_s11 = scalar_lea.vmem %s358_s16, 32  ;;  %s6572_s22 = smov [#allocation8]  }
  0xc0   : > { %p6437_p8 = scmp.ne.s32.totalorder %s358_s16, %s6436_s11  ;;  %s6441_s18 = sshll.u32 %s6572_s22, 4  ;;  %s6442_s18 = int_to_ptr.vmem [resolvable:$false] %s6441_s18 }
  0xc1   : > { %s6443_s1 = scalar_lea.vmem %s6442_s18, 64  ;;  %p6444_p1 = scmp.lt.s32.totalorder %s358_s16, %s6442_s18 }
  0xc2   : > { %p6439_p12 = pnand %p6437_p8, %p8328_p13  ;;  %p6445_p5 = scmp.lt.s32.totalorder %s6443_s1, %s6436_s11 }
  0xc4   : > { %p6440_p4 = pneg %p6439_p12  ;;  %p6446_p10 = por %p6445_p5, %p6444_p1 }
  0xc6   : > { %p6447_p9 = pnand %p6446_p10, %p6440_p4 }
  0xc8   : > { %6450 = shalt.err (!%p6447_p9)
}
  0xc9   : > { %p8329_p11 = scmp.ne.s32.totalorder %s8321_s17, 0  ;;  %s5692_s20 = sshll.u32 %s6561_s12, 12 }
  0xca   : > { %s6893_s27 = scalar_lea.hbm %s8279_s4, %s5692_s20  ;;  %s387_s9 = scalar_lea.vmem [#allocation11], %s5667_s28 }
  0xcb   : > { %6160 = dma.hbm_to_vmem [thread:$0]  (!%p8329_p11), %s6774_s25, 32, %s358_s16, %s6740_s5  }
  0xcc   : > { %s395_s7 = sshll.u32 %s387_s9, 4  ;;  %s6451_s19 = scalar_lea.hbm %s6893_s27, 4096  ;;  %s6897_s7 = int_to_ptr.vmem [resolvable:$true] %s395_s7 }
  0xcd   : > { %p6452_p6 = scmp.ne.s32.totalorder %s6893_s27, %s6451_s19  ;;  %s6456_s25 = scalar_lea.hbm %s8279_s4, 16384 }
  0xce   : > { %p6457_p7 = scmp.lt.u32.totalorder %s6893_s27, %s8279_s4  ;;  %p6458_p2 = scmp.lt.u32.totalorder %s6456_s25, %s6451_s19 }
  0xcf   : > { %p6454_p0 = pnand %p6452_p6, %p8328_p13  ;;  %p6460_p12 = scmp.lt.u32.totalorder %s6451_s19, %s6893_s27 }
  0xd0   : > { %p6459_p8 = por %p6458_p2, %p6457_p7 }
  0xd1   : > { %p6455_p3 = pneg %p6454_p0 }
  0xd2   : > { %p6461_p4 = por %p6460_p12, %p6459_p8 }
  0xd4   : > { %p6462_p1 = pnand %p6461_p4, %p6455_p3 }
  0xd6   : > { %6465 = shalt.err (!%p6462_p1)
}
  0xd7   : > { %s6466_s26 = scalar_lea.vmem %s6897_s7, 4096  ;;  %s6573_s28 = smov [#allocation11]  }
  0xd8   : > { %p6467_p5 = scmp.ne.s32.totalorder %s6897_s7, %s6466_s26  ;;  %s6471_s14 = sshll.u32 %s6573_s28, 4  ;;  %s6472_s14 = int_to_ptr.vmem [resolvable:$false] %s6471_s14 }
  0xd9   : > { %s6473_s11 = scalar_lea.vmem %s6472_s14, 8192  ;;  %p6474_p6 = scmp.lt.s32.totalorder %s6897_s7, %s6472_s14 }
  0xda   : > { %p6469_p10 = pnand %p6467_p5, %p8328_p13  ;;  %p6475_p0 = scmp.lt.s32.totalorder %s6473_s11, %s6466_s26 }
  0xdc   : > { %p6470_p9 = pneg %p6469_p10  ;;  %p6476_p7 = por %p6475_p0, %p6474_p6 }
  0xde   : > { %p6477_p2 = pnand %p6476_p7, %p6470_p9 }
  0xe0   : > { %6480 = shalt.err (!%p6477_p2)
}
  0xe1   : > { %s6574_s22 = smov 512   ;;  %s6575_s18 = smov 32  }
  0xe2   : > { %6166 = dma.hbm_to_vmem [thread:$0]  (!%p8329_p11), %s6893_s27, 4096, %s6897_s7, %s6789_s23, %s6574_s22, %s6574_s22, %s6575_s18  }
  0xe3   : > { %p8330_p13 = scmp.ne.s32.totalorder %s8311_s15, 0 }
  0xe4   : > { %p8331_p3 = scmp.eq.s32.totalorder (!%p8330_p13), %s6649_s13, 0 }
  0xe5   : > { %407 = sbr.rel (%p8330_p13) target bundleno = 2707 (0xa93), region = 56 }
  0xec   : > { %6524 = dma.done.wait (%p8331_p3), [#allocation4], 2592   ;;  %p8332_p8 = pmov %p8331_p3 }
  0xed   : > { %s8333_s29 = sld [smem:[#allocation25_spill]]  ;;  %s413_s1 = sand.u32 1, %s6649_s13  }
  0xee   : > { %6526 = vsyncadd (%p8332_p8), [#allocation4], 4294964704  ;;  %s415_s20 = sand.u32 1, %s6553_s10   ;;  %s414_s21 = scalar_lea.sflag [#allocation7], %s413_s1 }
  0xef   : > { %s6112_s30 = smul.u32 5152, %s415_s20 }
  0xf1   : > { %s6929_s9 = scalar_lea.vmem [#allocation6], %s6112_s30 }
  0xf3   : > { %p8334_p12 = scmp.ne.s32.totalorder %s8333_s29, 0 }
  0xf5   : > { %6528 = dma.done.wait (%p8334_p12), %s414_s21, 82464  }
  0xf6   : > { %6530 = vsyncadd (%p8334_p12), %s414_s21, 4294884832  ;;  %s5673_s15 = sshll.u32 %s415_s20, 1  ;;  %s432_s23 = scalar_lea.sflag [#allocation10], %s413_s1 }
  0xf7   : > { %s6935_s17 = scalar_lea.vmem [#allocation8], %s5673_s15  ;;  %s6937_s27 = scalar_lea.vmem [#allocation9], %s5673_s15 }
  0xf8   : > { %6532 = dma.done.wait (%p8334_p12), %s432_s23, 4128  }
  0xf9   : > { %6534 = vsyncadd (%p8334_p12), %s432_s23, 4294963168  ;;  %s5675_s7 = sshll.u32 %s415_s20, 8  ;;  %p8335_p11 = pmov %p8331_p3 }
  0xfa   : > { %s6943_s19 = scalar_lea.vmem [#allocation11], %s5675_s7 }
  0xfb   : > { %6536 = dma.done.wait (%p8335_p11), [#allocation13], 128   ;;  %p8336_p4 = pmov %p8331_p3 }
  0xfc   : > { %p8337_p1 = pmov %p8331_p3 }
  0xfd   : > { %6538 = vsyncadd (%p8336_p4), [#allocation13], 4294967168 }
  0xfe   : > { %6540 = dma.done.wait (%p8337_p1), [#allocation16], 16   ;;  %p8338_p5 = pmov %p8337_p1 }
  0xff   : > { %p8339_p10 = scmp.ne.s32.totalorder %s6649_s13, 0 }
 0x100   : > { %6542 = vsyncadd (%p8338_p5), [#allocation16], 4294967280  ;;  %v6576_v0 = vmov (!%p8339_p10), 0.0  }
 0x101   : > { %509 = sbr.rel (%p8339_p10) target bundleno = 264 (0x108), region = 92  ;;  %510 = vst [vmem:[#allocation2] sm:$0xff] (!%p8339_p10), %v6576_v0 }
 0x108 PF: > { %v1063_v1 = vld [vmem:[%s6929_s9 + $0x8] sm:$0xff]  ;;  %v1062_v3 = vld [vmem:[%s6929_s9] sm:$0xff]  ;;  %v1065_v11 = vld [vmem:[%s6929_s9 + $0x18] sm:$0xff]  ;;  %v557_v31 = vlaneseq  ;;  %v6577_v37 = vmov 1983009808   ;;  %vm2994_vm0 = vcmask 523264  }
 0x109   : > { %v1367_v2 = vld [vmem:[%s6929_s9 + $0x988] sm:$0xff]  ;;  %v1707_v4 = vunpack.c.l.s8.bf16 %v1063_v1  ;;  %v1709_v5 = vunpack.c.h.s8.bf16 %v1063_v1  ;;  %v1366_v8 = vld [vmem:[%s6929_s9 + $0x980] sm:$0xff]  ;;  %v1706_v9 = vunpack.c.l.s8.bf16 %v1062_v3  ;;  %v1369_v12 = vld [vmem:[%s6929_s9 + $0x998] sm:$0xff]  ;;  %v1708_v13 = vunpack.c.h.s8.bf16 %v1062_v3  ;;  %p5682_p9 = scmp.ne.s32.totalorder %s6649_s13, 3 }
 0x10a   : > { %v2315_v6 = vunpack.c.l.s8.bf16 %v1367_v2  ;;  %v2317_v7 = vunpack.c.h.s8.bf16 %v1367_v2  ;;  %v2314_v10 = vunpack.c.l.s8.bf16 %v1366_v8  ;;  %v2316_v14 = vunpack.c.h.s8.bf16 %v1366_v8  ;;  %v1064_v17 = vld [vmem:[%s6929_s9 + $0x10] sm:$0xff]  ;;  %v1067_v23 = vld [vmem:[%s6929_s9 + $0x28] sm:$0xff]  ;;  %v1066_v29 = vld [vmem:[%s6929_s9 + $0x20] sm:$0xff]  ;;  %s8340_s25 = sld [smem:[#allocation30_spill]] (!%p5682_p9) }
 0x10b   : > { %2998 = vmatprep.subr.bf16.mxu1 %v1707_v4  ;;  %v1711_v15 = vunpack.c.l.s8.bf16 %v1065_v11  ;;  %v2319_v16 = vunpack.c.l.s8.bf16 %v1369_v12  ;;  %v1368_v18 = vld [vmem:[%s6929_s9 + $0x990] sm:$0xff]  ;;  %v1710_v19 = vunpack.c.l.s8.bf16 %v1064_v17  ;;  %v1713_v21 = vunpack.c.h.s8.bf16 %v1065_v11  ;;  %v1371_v24 = vld [vmem:[%s6929_s9 + $0x9a8] sm:$0xff]  ;;  %v1370_v30 = vld [vmem:[%s6929_s9 + $0x9a0] sm:$0xff] }
 0x10c   : > { %3777 = vmatprep.subr.bf16.mxu0 %v2315_v6  ;;  %2999 = vmatpush1.bf16.msra.mxu1 %v1706_v9  ;;  %v2318_v20 = vunpack.c.l.s8.bf16 %v1368_v18  ;;  %v2321_v22 = vunpack.c.h.s8.bf16 %v1369_v12  ;;  %v1712_v25 = vunpack.c.h.s8.bf16 %v1064_v17  ;;  %v2320_v26 = vunpack.c.h.s8.bf16 %v1368_v18  ;;  %v520_v34 = vld [vmem:[#allocation3 + $0x48] sm:$0xff]  ;;  %v1069_v40 = vld [vmem:[%s6929_s9 + $0x38] sm:$0xff]  ;;  %v1068_v49 = vld [vmem:[%s6929_s9 + $0x30] sm:$0xff] }
 0x10d   : > { %3778 = vmatpush1.bf16.msra.mxu0 %v2314_v10  ;;  %3000 = vmatprep.subr.bf16.mxu1 %v1709_v5  ;;  %v1715_v27 = vunpack.c.l.s8.bf16 %v1067_v23  ;;  %v2323_v28 = vunpack.c.l.s8.bf16 %v1371_v24  ;;  %v1714_v32 = vunpack.c.l.s8.bf16 %v1066_v29  ;;  %v2322_v33 = vunpack.c.l.s8.bf16 %v1370_v30  ;;  %v1373_v41 = vld [vmem:[%s6929_s9 + $0x9b8] sm:$0xff]  ;;  %v1372_v50 = vld [vmem:[%s6929_s9 + $0x9b0] sm:$0xff]  ;;  %v1071_v60 = vld [vmem:[%s6929_s9 + $0x48] sm:$0xff] }
 0x10e   : > { %3779 = vmatprep.subr.bf16.mxu0 %v2317_v7  ;;  %v1717_v35 = vunpack.c.h.s8.bf16 %v1067_v23  ;;  %v2325_v36 = vunpack.c.h.s8.bf16 %v1371_v24  ;;  %v555_v38 = vunpack.c.l.s4 %v6577_v37  ;;  %v6967_v39 = vshrl.u32 %v557_v31, 7  ;;  %v6971_v46 = vld [vmem:[#allocation3] sm:$0xff]  ;;  %v1375_v61 = vld [vmem:[%s6929_s9 + $0x9c8] sm:$0xff]  ;;  %v1376_v17 = vld [vmem:[%s6929_s9 + $0x9d0] sm:$0xff] }
 0x10f   : > { %v706_v43 = vcombine.high %v520_v34, %v520_v34  ;;  %v1716_v44 = vunpack.c.h.s8.bf16 %v1066_v29  ;;  %v2324_v45 = vunpack.c.h.s8.bf16 %v1370_v30  ;;  %v1719_v47 = vunpack.c.l.s8.bf16 %v1069_v40  ;;  %v1070_v4 = vld [vmem:[%s6929_s9 + $0x40] sm:$0xff]  ;;  %v1073_v10 = vld [vmem:[%s6929_s9 + $0x58] sm:$0xff]  ;;  %v1379_v23 = vld [vmem:[%s6929_s9 + $0x9e8] sm:$0xff] }
 0x110   : > { %3001 = vmatpush1.bf16.msra.mxu1 %v1708_v13  ;;  %v556_v42 = vunpack.c.0.s8 %v555_v38  ;;  %v2327_v48 = vunpack.c.l.s8.bf16 %v1373_v41  ;;  %v1718_v54 = vunpack.c.l.s8.bf16 %v1068_v49  ;;  %v2326_v55 = vunpack.c.l.s8.bf16 %v1372_v50  ;;  %v1374_v5 = vld [vmem:[%s6929_s9 + $0x9c0] sm:$0xff]  ;;  %v1377_v11 = vld [vmem:[%s6929_s9 + $0x9d8] sm:$0xff] }
 0x111   : > { %3780 = vmatpush1.bf16.msra.mxu0 %v2316_v14  ;;  %3002 = vmatprep.subr.bf16.mxu1 %v1711_v15  ;;  %v1721_v56 = vunpack.c.h.s8.bf16 %v1069_v40  ;;  %v2329_v57 = vunpack.c.h.s8.bf16 %v1373_v41  ;;  %v1720_v0 = vunpack.c.h.s8.bf16 %v1068_v49  ;;  %v2328_v1 = vunpack.c.h.s8.bf16 %v1372_v50  ;;  %v1378_v29 = vld [vmem:[%s6929_s9 + $0x9e0] sm:$0xff]  ;;  %v1077_v34 = vld [vmem:[%s6929_s9 + $0x78] sm:$0xff]  ;;  %v1076_v41 = vld [vmem:[%s6929_s9 + $0x70] sm:$0xff] }
 0x112   : > { %3781 = vmatprep.subr.bf16.mxu0 %v2319_v16  ;;  %v6976_v51 = vsub.s32 %v556_v42, %v6967_v39  ;;  %v1723_v2 = vunpack.c.l.s8.bf16 %v1071_v60  ;;  %v2331_v3 = vunpack.c.l.s8.bf16 %v1375_v61  ;;  %v1722_v6 = vunpack.c.l.s8.bf16 %v1070_v4  ;;  %v1072_v16 = vld [vmem:[%s6929_s9 + $0x50] sm:$0xff]  ;;  %v1079_v50 = vld [vmem:[%s6929_s9 + $0x88] sm:$0xff] }
 0x113   : > { %v2330_v7 = vunpack.c.l.s8.bf16 %v1374_v5  ;;  %v1725_v8 = vunpack.c.h.s8.bf16 %v1071_v60  ;;  %v2333_v9 = vunpack.c.h.s8.bf16 %v1375_v61  ;;  %v1724_v12 = vunpack.c.h.s8.bf16 %v1070_v4  ;;  %v1380_v42 = vld [vmem:[%s6929_s9 + $0x9f0] sm:$0xff]  ;;  %v1078_v60 = vld [vmem:[%s6929_s9 + $0x80] sm:$0xff] }
 0x114   : > { %3003 = vmatpush1.bf16.msra.mxu1 %v1710_v19  ;;  %v6980_v52 = vrot.slane %v6971_v46, %v6976_v51  ;;  %v6983_v53 = vrot.slane %v706_v43, %v6976_v51  ;;  %v2332_v13 = vunpack.c.h.s8.bf16 %v1374_v5  ;;  %v1727_v14 = vunpack.c.l.s8.bf16 %v1073_v10  ;;  %v1382_v61 = vld [vmem:[%s6929_s9 + $0xa00] sm:$0xff] }
 0x115   : > { %3782 = vmatpush1.bf16.msra.mxu0 %v2318_v20  ;;  %3004 = vmatprep.subr.bf16.mxu1 %v1713_v21  ;;  %v2335_v15 = vunpack.c.l.s8.bf16 %v1377_v11  ;;  %v1726_v18 = vunpack.c.l.s8.bf16 %v1072_v16  ;;  %v2334_v19 = vunpack.c.l.s8.bf16 %v1376_v17  ;;  %v1729_v20 = vunpack.c.h.s8.bf16 %v1073_v10 }
 0x116   : > { %3783 = vmatprep.subr.bf16.mxu0 %v2321_v22  ;;  %v568_v58 = vcombine.high %v6980_v52, %v6980_v52  ;;  %v722_v59 = vcombine.high %v6983_v53, %v6983_v53  ;;  %v2337_v21 = vunpack.c.h.s8.bf16 %v1377_v11  ;;  %v1075_v22 = vld [vmem:[%s6929_s9 + $0x68] sm:$0xff]  ;;  %v1728_v24 = vunpack.c.h.s8.bf16 %v1072_v16 }
 0x117   : > { %v2338_v31 = vunpack.c.l.s8.bf16 %v1378_v29  ;;  %v2340_v37 = vunpack.c.h.s8.bf16 %v1378_v29  ;;  %v1735_v38 = vunpack.c.l.s8.bf16 %v1077_v34  ;;  %v553_v43 = vcombine.high %v6971_v46, %v6971_v46 }
 0x118   : > { %3005 = vmatpush1.bf16.msra.mxu1 %v1712_v25  ;;  %v982_v62 = vpack.c.bf16 %v568_v58, %v568_v58  ;;  %v1020_v63 = vpack.c.bf16 %v722_v59, %v722_v59  ;;  %v2336_v25 = vunpack.c.h.s8.bf16 %v1376_v17  ;;  %v1739_v58 = vunpack.c.l.s8.bf16 %v1079_v50 }
 0x119   : > { %3784 = vmatpush1.bf16.msra.mxu0 %v2320_v26  ;;  %3006 = vmatprep.subr.bf16.mxu1 %v1715_v27  ;;  %v1731_v26 = vunpack.c.l.s8.bf16 %v1075_v22  ;;  %v2339_v27 = vunpack.c.l.s8.bf16 %v1379_v23  ;;  %v1741_v4 = vunpack.c.h.s8.bf16 %v1079_v50  ;;  %vm5477_vm1 = vcmask (!%p5682_p9), 156672  }
 0x11a   : > { %3785 = vmatprep.subr.bf16.mxu0 %v2323_v28  ;;  %3030 = vmatprep.mubr.bf16.mxu1 %v982_v62  ;;  %v1074_v28 = vld [vmem:[%s6929_s9 + $0x60] sm:$0xff] }
 0x11b   : > { %3809 = vmatprep.mubr.bf16.mxu0 %v1020_v63  ;;  %v1730_v30 = vunpack.c.l.s8.bf16 %v1074_v28 }
 0x11c   : > { %3007 = vmatpush1.bf16.msra.mxu1 %v1714_v32  ;;  %v1733_v32 = vunpack.c.h.s8.bf16 %v1075_v22 }
 0x11d   : > { %3786 = vmatpush1.bf16.msra.mxu0 %v2322_v33  ;;  %3008 = vmatprep.subr.bf16.mxu1 %v1717_v35  ;;  %v2341_v33 = vunpack.c.h.s8.bf16 %v1379_v23  ;;  %v1381_v35 = vld [vmem:[%s6929_s9 + $0x9f8] sm:$0xff] }
 0x11e   : > { %3787 = vmatprep.subr.bf16.mxu0 %v2325_v36  ;;  %v1732_v36 = vunpack.c.h.s8.bf16 %v1074_v28  ;;  %v2343_v40 = vunpack.c.l.s8.bf16 %v1381_v35  ;;  %v2345_v49 = vunpack.c.h.s8.bf16 %v1381_v35 }
 0x120   : > { %3009 = vmatpush1.bf16.msra.mxu1 %v1716_v44  ;;  %v7007_v44 = vld [vmem:[#allocation3 + $0x50] sm:$0xff] }
 0x121   : > { %3788 = vmatpush1.bf16.msra.mxu0 %v2324_v45  ;;  %3010 = vmatprep.subr.bf16.mxu1 %v1719_v47  ;;  %v1734_v45 = vunpack.c.l.s8.bf16 %v1076_v41  ;;  %v2342_v47 = vunpack.c.l.s8.bf16 %v1380_v42  ;;  %v7016_v46 = vrot.slane %v7007_v44, %v6976_v51 }
 0x122   : > { %3789 = vmatprep.subr.bf16.mxu0 %v2327_v48  ;;  %v1737_v48 = vunpack.c.h.s8.bf16 %v1077_v34 }
 0x123   : > { %v738_v63 = vcombine.high %v7016_v46, %v7016_v46 }
 0x124   : > { %3011 = vmatpush1.bf16.msra.mxu1 %v1718_v54  ;;  %v1383_v54 = vld [vmem:[%s6929_s9 + $0xa08] sm:$0xff] }
 0x125   : > { %3790 = vmatpush1.bf16.msra.mxu0 %v2326_v55  ;;  %3012 = vmatprep.subr.bf16.mxu1 %v1721_v56  ;;  %v7012_v55 = vrot.slane %v553_v43, %v6976_v51  ;;  %v1736_v56 = vunpack.c.h.s8.bf16 %v1076_v41  ;;  %v2347_v59 = vunpack.c.l.s8.bf16 %v1383_v54  ;;  %v2349_v5 = vunpack.c.h.s8.bf16 %v1383_v54  ;;  %v1087_v43 = vld [vmem:[%s6929_s9 + $0xc8] sm:$0xff]  ;;  %v1086_v54 = vld [vmem:[%s6929_s9 + $0xc0] sm:$0xff] }
 0x126   : > { %3791 = vmatprep.subr.bf16.mxu0 %v2329_v57  ;;  %v2344_v57 = vunpack.c.h.s8.bf16 %v1380_v42 }
 0x127   : > { %v569_v62 = vcombine.high %v7012_v55, %v7012_v55 }
 0x128   : > { %3013 = vmatpush1.bf16.msra.mxu1 %v1720_v0  ;;  %v981_v0 = vpack.c.bf16 %v6980_v52, %v6980_v52  ;;  %v1740_v52 = vunpack.c.h.s8.bf16 %v1078_v60 }
 0x129   : > { %3792 = vmatpush1.bf16.msra.mxu0 %v2328_v1  ;;  %3014 = vmatprep.subr.bf16.mxu1 %v1723_v2  ;;  %v1019_v1 = vpack.c.bf16 %v6983_v53, %v6983_v53  ;;  %v1738_v2 = vunpack.c.l.s8.bf16 %v1078_v60  ;;  %v2348_v53 = vunpack.c.h.s8.bf16 %v1382_v61 }
 0x12a   : > { %3793 = vmatprep.subr.bf16.mxu0 %v2331_v3  ;;  %v2346_v3 = vunpack.c.l.s8.bf16 %v1382_v61  ;;  %v1089_v61 = vld [vmem:[%s6929_s9 + $0xd8] sm:$0xff] }
 0x12c   : > { %3015 = vmatpush1.bf16.msra.mxu1 %v1722_v6  ;;  %v1081_v6 = vld [vmem:[%s6929_s9 + $0x98] sm:$0xff] }
 0x12d   : > { %3794 = vmatpush1.bf16.msra.mxu0 %v2330_v7  ;;  %3016 = vmatprep.subr.bf16.mxu1 %v1725_v8  ;;  %v1385_v7 = vld [vmem:[%s6929_s9 + $0xa18] sm:$0xff]  ;;  %v984_v8 = vpack.c.bf16 %v569_v62, %v569_v62  ;;  %v1743_v10 = vunpack.c.l.s8.bf16 %v1081_v6  ;;  %v1745_v16 = vunpack.c.h.s8.bf16 %v1081_v6 }
 0x12e   : > { %3795 = vmatprep.subr.bf16.mxu0 %v2333_v9  ;;  %v1022_v9 = vpack.c.bf16 %v738_v63, %v738_v63  ;;  %v2351_v11 = vunpack.c.l.s8.bf16 %v1385_v7  ;;  %v2353_v17 = vunpack.c.h.s8.bf16 %v1385_v7  ;;  %v1393_v62 = vld [vmem:[%s6929_s9 + $0xa58] sm:$0xff]  ;;  %v1756_v63 = vunpack.c.h.s8.bf16 %v1086_v54 }
 0x12f   : > { %v1761_v7 = vunpack.c.h.s8.bf16 %v1089_v61 }
 0x130   : > { %3017 = vmatpush1.bf16.msra.mxu1 %v1724_v12  ;;  %v1080_v12 = vld [vmem:[%s6929_s9 + $0x90] sm:$0xff] }
 0x131   : > { %3796 = vmatpush1.bf16.msra.mxu0 %v2332_v13  ;;  %3018 = vmatprep.subr.bf16.mxu1 %v1727_v14  ;;  %v1384_v13 = vld [vmem:[%s6929_s9 + $0xa10] sm:$0xff]  ;;  %v1742_v14 = vunpack.c.l.s8.bf16 %v1080_v12 }
 0x132   : > { %3797 = vmatprep.subr.bf16.mxu0 %v2335_v15  ;;  %v2350_v15 = vunpack.c.l.s8.bf16 %v1384_v13 }
 0x134   : > { %3019 = vmatpush1.bf16.msra.mxu1 %v1726_v18  ;;  %v1083_v18 = vld [vmem:[%s6929_s9 + $0xa8] sm:$0xff] }
 0x135   : > { %3798 = vmatpush1.bf16.msra.mxu0 %v2334_v19  ;;  %3020 = vmatprep.subr.bf16.mxu1 %v1729_v20  ;;  %v1387_v19 = vld [vmem:[%s6929_s9 + $0xa28] sm:$0xff]  ;;  %v1744_v20 = vunpack.c.h.s8.bf16 %v1080_v12  ;;  %v1747_v22 = vunpack.c.l.s8.bf16 %v1083_v18  ;;  %v1749_v28 = vunpack.c.h.s8.bf16 %v1083_v18 }
 0x136   : > { %3799 = vmatprep.subr.bf16.mxu0 %v2337_v21  ;;  %v2352_v21 = vunpack.c.h.s8.bf16 %v1384_v13  ;;  %v2355_v23 = vunpack.c.l.s8.bf16 %v1387_v19  ;;  %v2357_v29 = vunpack.c.h.s8.bf16 %v1387_v19  ;;  %v1090_v13 = vld [vmem:[%s6929_s9 + $0xe0] sm:$0xff]  ;;  %v1093_v19 = vld [vmem:[%s6929_s9 + $0xf8] sm:$0xff] }
 0x138   : > { %3021 = vmatpush1.bf16.msra.mxu1 %v1728_v24  ;;  %v1082_v24 = vld [vmem:[%s6929_s9 + $0xa0] sm:$0xff] }
 0x139   : > { %3800 = vmatpush1.bf16.msra.mxu0 %v2336_v25  ;;  %3022 = vmatprep.subr.bf16.mxu1 %v1731_v26  ;;  %v1386_v25 = vld [vmem:[%s6929_s9 + $0xa20] sm:$0xff]  ;;  %v1746_v26 = vunpack.c.l.s8.bf16 %v1082_v24 }
 0x13a   : > { %3801 = vmatprep.subr.bf16.mxu0 %v2339_v27  ;;  %v2354_v27 = vunpack.c.l.s8.bf16 %v1386_v25 }
 0x13c   : > { %3023 = vmatpush1.bf16.msra.mxu1 %v1730_v30  ;;  %v1085_v30 = vld [vmem:[%s6929_s9 + $0xb8] sm:$0xff] }
 0x13d   : > { %3802 = vmatpush1.bf16.msra.mxu0 %v2338_v31  ;;  %3024 = vmatprep.subr.bf16.mxu1 %v1733_v32  ;;  %v1389_v31 = vld [vmem:[%s6929_s9 + $0xa38] sm:$0xff]  ;;  %v1748_v32 = vunpack.c.h.s8.bf16 %v1082_v24  ;;  %v1751_v34 = vunpack.c.l.s8.bf16 %v1085_v30  ;;  %v1753_v41 = vunpack.c.h.s8.bf16 %v1085_v30 }
 0x13e   : > { %3803 = vmatprep.subr.bf16.mxu0 %v2341_v33  ;;  %v2356_v33 = vunpack.c.h.s8.bf16 %v1386_v25  ;;  %v2359_v35 = vunpack.c.l.s8.bf16 %v1389_v31  ;;  %v2361_v42 = vunpack.c.h.s8.bf16 %v1389_v31  ;;  %v1092_v25 = vld [vmem:[%s6929_s9 + $0xf0] sm:$0xff]  ;;  %v1769_v31 = vunpack.c.h.s8.bf16 %v1093_v19 }
 0x140   : > { %3025 = vmatpush1.bf16.msra.mxu1 %v1732_v36  ;;  %v1084_v36 = vld [vmem:[%s6929_s9 + $0xb0] sm:$0xff] }
 0x141   : > { %3804 = vmatpush1.bf16.msra.mxu0 %v2340_v37  ;;  %3026 = vmatprep.subr.bf16.mxu1 %v1735_v38  ;;  %v1388_v37 = vld [vmem:[%s6929_s9 + $0xa30] sm:$0xff]  ;;  %v1750_v38 = vunpack.c.l.s8.bf16 %v1084_v36 }
 0x142   : > { %3805 = vmatprep.subr.bf16.mxu0 %v2343_v40  ;;  %v2358_v40 = vunpack.c.l.s8.bf16 %v1388_v37 }
 0x144   : > { %3027 = vmatpush1.bf16.msra.mxu1 %v1734_v45  ;;  %v1391_v45 = vld [vmem:[%s6929_s9 + $0xa48] sm:$0xff] }
 0x145   : > { %3806 = vmatpush1.bf16.msra.mxu0 %v2342_v47  ;;  %3028 = vmatprep.subr.bf16.mxu1 %v1737_v48  ;;  %v1752_v47 = vunpack.c.h.s8.bf16 %v1084_v36  ;;  %v2360_v48 = vunpack.c.h.s8.bf16 %v1388_v37  ;;  %v2363_v50 = vunpack.c.l.s8.bf16 %v1391_v45  ;;  %v2365_v60 = vunpack.c.h.s8.bf16 %v1391_v45 }
 0x146   : > { %3807 = vmatprep.subr.bf16.mxu0 %v2345_v49  ;;  %v1755_v49 = vunpack.c.l.s8.bf16 %v1087_v43  ;;  %v1768_v36 = vunpack.c.h.s8.bf16 %v1092_v25 }
 0x148   : > { %3029 = vmatpush1.bf16.msra.mxu1 %v1736_v56  ;;  %v1390_v56 = vld [vmem:[%s6929_s9 + $0xa40] sm:$0xff] }
 0x149   : > { %3808 = vmatpush1.bf16.msra.mxu0 %v2344_v57  ;;  %3039 = vmatprep.subr.bf16.mxu1 %v1739_v58  ;;  %v1754_v57 = vunpack.c.l.s8.bf16 %v1086_v54  ;;  %v2362_v58 = vunpack.c.l.s8.bf16 %v1390_v56 }
 0x14a   : > { %3818 = vmatprep.subr.bf16.mxu0 %v2347_v59  ;;  %v1757_v59 = vunpack.c.h.s8.bf16 %v1087_v43 }
 0x14b   : > { %3031 = vmatmul.mubr.bf16.vlgmr.msra.gmra.mrb[0].mxu1 %v981_v0  ;;  %v2364_v0 = vunpack.c.h.s8.bf16 %v1390_v56 }
 0x14c   : > { %3810 = vmatmul.mubr.bf16.vlgmr.msra.gmra.mrb[0].mxu0 %v1019_v1  ;;  %3040 = vmatpush1.bf16.msra.mxu1 %v1738_v2  ;;  %v1759_v1 = vunpack.c.l.s8.bf16 %v1089_v61  ;;  %v2367_v2 = vunpack.c.l.s8.bf16 %v1393_v62 }
 0x14d   : > { %3819 = vmatpush1.bf16.msra.mxu0 %v2346_v3  ;;  %3041 = vmatprep.subr.bf16.mxu1 %v1741_v4  ;;  %v1088_v3 = vld [vmem:[%s6929_s9 + $0xd0] sm:$0xff] }
 0x14e   : > { %3820 = vmatprep.subr.bf16.mxu0 %v2349_v5  ;;  %3071 = vmatprep.mubr.bf16.mxu1 %v984_v8  ;;  %v1392_v4 = vld [vmem:[%s6929_s9 + $0xa50] sm:$0xff]  ;;  %v1758_v5 = vunpack.c.l.s8.bf16 %v1088_v3  ;;  %v2369_v8 = vunpack.c.h.s8.bf16 %v1393_v62 }
 0x14f   : > { %3850 = vmatprep.mubr.bf16.mxu0 %v1022_v9  ;;  %v2366_v6 = vunpack.c.l.s8.bf16 %v1392_v4  ;;  %v1091_v9 = vld [vmem:[%s6929_s9 + $0xe8] sm:$0xff] }
 0x150   : > { %3042 = vmatpush1.bf16.msra.mxu1 %v1740_v52  ;;  %v1395_v52 = vld [vmem:[%s6929_s9 + $0xa68] sm:$0xff] }
 0x151   : > { %3821 = vmatpush1.bf16.msra.mxu0 %v2348_v53  ;;  %3043 = vmatprep.subr.bf16.mxu1 %v1743_v10  ;;  %v1760_v53 = vunpack.c.h.s8.bf16 %v1088_v3  ;;  %v2368_v10 = vunpack.c.h.s8.bf16 %v1392_v4  ;;  %v2371_v12 = vunpack.c.l.s8.bf16 %v1395_v52  ;;  %v2373_v18 = vunpack.c.h.s8.bf16 %v1395_v52 }
 0x152   : > { %3822 = vmatprep.subr.bf16.mxu0 %v2351_v11  ;;  %v1763_v11 = vunpack.c.l.s8.bf16 %v1091_v9 }
 0x154   : > { %3044 = vmatpush1.bf16.msra.mxu1 %v1742_v14  ;;  %v1394_v14 = vld [vmem:[%s6929_s9 + $0xa60] sm:$0xff] }
 0x155   : > { %3823 = vmatpush1.bf16.msra.mxu0 %v2350_v15  ;;  %3045 = vmatprep.subr.bf16.mxu1 %v1745_v16  ;;  %v1762_v15 = vunpack.c.l.s8.bf16 %v1090_v13  ;;  %v2370_v16 = vunpack.c.l.s8.bf16 %v1394_v14 }
 0x156   : > { %3824 = vmatprep.subr.bf16.mxu0 %v2353_v17  ;;  %v1765_v17 = vunpack.c.h.s8.bf16 %v1091_v9 }
 0x158   : > { %3046 = vmatpush1.bf16.msra.mxu1 %v1744_v20  ;;  %v1397_v20 = vld [vmem:[%s6929_s9 + $0xa78] sm:$0xff] }
 0x159   : > { %3825 = vmatpush1.bf16.msra.mxu0 %v2352_v21  ;;  %3047 = vmatprep.subr.bf16.mxu1 %v1747_v22  ;;  %v1764_v21 = vunpack.c.h.s8.bf16 %v1090_v13  ;;  %v2372_v22 = vunpack.c.h.s8.bf16 %v1394_v14  ;;  %v2375_v24 = vunpack.c.l.s8.bf16 %v1397_v20 }
 0x15a   : > { %3826 = vmatprep.subr.bf16.mxu0 %v2355_v23  ;;  %v1767_v23 = vunpack.c.l.s8.bf16 %v1093_v19 }
 0x15c   : > { %3048 = vmatpush1.bf16.msra.mxu1 %v1746_v26  ;;  %v1396_v26 = vld [vmem:[%s6929_s9 + $0xa70] sm:$0xff] }
 0x15d   : > { %3827 = vmatpush1.bf16.msra.mxu0 %v2354_v27  ;;  %3049 = vmatprep.subr.bf16.mxu1 %v1749_v28  ;;  %v723_v27 = vcombine.high %v7007_v44, %v7007_v44  ;;  %v7058_v28 = vld [vmem:[#allocation3 + $0x8] sm:$0xff]  ;;  %v2374_v30 = vunpack.c.l.s8.bf16 %v1396_v26  ;;  %v2376_v37 = vunpack.c.h.s8.bf16 %v1396_v26 }
 0x15e   : > { %3828 = vmatprep.subr.bf16.mxu0 %v2357_v29  ;;  %v1766_v29 = vunpack.c.l.s8.bf16 %v1092_v25 }
 0x15f   : > { %v7067_v44 = vrot.slane %v723_v27, %v6976_v51  ;;  %v1103_v27 = vld [vmem:[%s6929_s9 + $0x148] sm:$0xff] }
 0x160   : > { %3050 = vmatpush1.bf16.msra.mxu1 %v1748_v32  ;;  %v2377_v32 = vunpack.c.h.s8.bf16 %v1397_v20 }
 0x161   : > { %3829 = vmatpush1.bf16.msra.mxu0 %v2356_v33  ;;  %3051 = vmatprep.subr.bf16.mxu1 %v1751_v34  ;;  %v1095_v33 = vld [vmem:[%s6929_s9 + $0x108] sm:$0xff]  ;;  %v739_v45 = vcombine.high %v7067_v44, %v7067_v44 }
 0x162   : > { %3830 = vmatprep.subr.bf16.mxu0 %v2359_v35  ;;  %v1399_v34 = vld [vmem:[%s6929_s9 + $0xa88] sm:$0xff]  ;;  %v7064_v35 = vrot.slane %v7058_v28, %v6976_v51  ;;  %v1773_v54 = vunpack.c.h.s8.bf16 %v1095_v33 }
 0x163   : > { %v2381_v56 = vunpack.c.h.s8.bf16 %v1399_v34 }
 0x164   : > { %3052 = vmatpush1.bf16.msra.mxu1 %v1750_v38  ;;  %v1771_v38 = vunpack.c.l.s8.bf16 %v1095_v33  ;;  %v585_v43 = vcombine.high %v7064_v35, %v7064_v35 }
 0x165   : > { %3831 = vmatpush1.bf16.msra.mxu0 %v2358_v40  ;;  %3053 = vmatprep.subr.bf16.mxu1 %v1753_v41  ;;  %v2379_v40 = vunpack.c.l.s8.bf16 %v1399_v34  ;;  %v1094_v41 = vld [vmem:[%s6929_s9 + $0x100] sm:$0xff] }
 0x166   : > { %3832 = vmatprep.subr.bf16.mxu0 %v2361_v42  ;;  %v1398_v42 = vld [vmem:[%s6929_s9 + $0xa80] sm:$0xff] }
 0x167   : > { %v1102_v34 = vld [vmem:[%s6929_s9 + $0x140] sm:$0xff] }
 0x168   : > { %3054 = vmatpush1.bf16.msra.mxu1 %v1752_v47  ;;  %v983_v47 = vpack.c.bf16 %v7012_v55, %v7012_v55  ;;  %v1772_v55 = vunpack.c.h.s8.bf16 %v1094_v41 }
 0x169   : > { %3833 = vmatpush1.bf16.msra.mxu0 %v2360_v48  ;;  %3055 = vmatprep.subr.bf16.mxu1 %v1755_v49  ;;  %v1021_v48 = vpack.c.bf16 %v7016_v46, %v7016_v46  ;;  %v1770_v49 = vunpack.c.l.s8.bf16 %v1094_v41  ;;  %v2380_v46 = vunpack.c.h.s8.bf16 %v1398_v42 }
 0x16a   : > { %3834 = vmatprep.subr.bf16.mxu0 %v2363_v50  ;;  %v2378_v50 = vunpack.c.l.s8.bf16 %v1398_v42  ;;  %v1105_v42 = vld [vmem:[%s6929_s9 + $0x158] sm:$0xff] }
 0x16c   : > { %3056 = vmatpush1.bf16.msra.mxu1 %v1754_v57  ;;  %v1097_v57 = vld [vmem:[%s6929_s9 + $0x118] sm:$0xff] }
 0x16d   : > { %3835 = vmatpush1.bf16.msra.mxu0 %v2362_v58  ;;  %3057 = vmatprep.subr.bf16.mxu1 %v1757_v59  ;;  %v1401_v58 = vld [vmem:[%s6929_s9 + $0xa98] sm:$0xff]  ;;  %v986_v59 = vpack.c.bf16 %v585_v43, %v585_v43  ;;  %v1775_v61 = vunpack.c.l.s8.bf16 %v1097_v57  ;;  %v1777_v3 = vunpack.c.h.s8.bf16 %v1097_v57 }
 0x16e   : > { %3836 = vmatprep.subr.bf16.mxu0 %v2365_v60  ;;  %v1024_v60 = vpack.c.bf16 %v739_v45, %v739_v45  ;;  %v2383_v62 = vunpack.c.l.s8.bf16 %v1401_v58  ;;  %v2385_v4 = vunpack.c.h.s8.bf16 %v1401_v58  ;;  %v1409_v43 = vld [vmem:[%s6929_s9 + $0xad8] sm:$0xff]  ;;  %v1788_v45 = vunpack.c.h.s8.bf16 %v1102_v34 }
 0x16f   : > { %v1793_v58 = vunpack.c.h.s8.bf16 %v1105_v42 }
 0x170   : > { %3058 = vmatpush1.bf16.msra.mxu1 %v1756_v63  ;;  %v1096_v63 = vld [vmem:[%s6929_s9 + $0x110] sm:$0xff] }
 0x171   : > { %3837 = vmatpush1.bf16.msra.mxu0 %v2364_v0  ;;  %3059 = vmatprep.subr.bf16.mxu1 %v1759_v1  ;;  %v1400_v0 = vld [vmem:[%s6929_s9 + $0xa90] sm:$0xff]  ;;  %v1774_v1 = vunpack.c.l.s8.bf16 %v1096_v63 }
 0x172   : > { %3838 = vmatprep.subr.bf16.mxu0 %v2367_v2  ;;  %v2382_v2 = vunpack.c.l.s8.bf16 %v1400_v0 }
 0x174   : > { %3060 = vmatpush1.bf16.msra.mxu1 %v1758_v5  ;;  %v1099_v5 = vld [vmem:[%s6929_s9 + $0x128] sm:$0xff] }
 0x175   : > { %3839 = vmatpush1.bf16.msra.mxu0 %v2366_v6  ;;  %3061 = vmatprep.subr.bf16.mxu1 %v1761_v7  ;;  %v1403_v6 = vld [vmem:[%s6929_s9 + $0xaa8] sm:$0xff]  ;;  %v1776_v7 = vunpack.c.h.s8.bf16 %v1096_v63  ;;  %v1779_v9 = vunpack.c.l.s8.bf16 %v1099_v5  ;;  %v1781_v13 = vunpack.c.h.s8.bf16 %v1099_v5 }
 0x176   : > { %3840 = vmatprep.subr.bf16.mxu0 %v2369_v8  ;;  %v2384_v8 = vunpack.c.h.s8.bf16 %v1400_v0  ;;  %v2387_v52 = vunpack.c.l.s8.bf16 %v1403_v6  ;;  %v2389_v14 = vunpack.c.h.s8.bf16 %v1403_v6  ;;  %v1106_v0 = vld [vmem:[%s6929_s9 + $0x160] sm:$0xff]  ;;  %v1109_v6 = vld [vmem:[%s6929_s9 + $0x178] sm:$0xff] }
 0x178   : > { %3062 = vmatpush1.bf16.msra.mxu1 %v1760_v53  ;;  %v1098_v53 = vld [vmem:[%s6929_s9 + $0x120] sm:$0xff] }
 0x179   : > { %3841 = vmatpush1.bf16.msra.mxu0 %v2368_v10  ;;  %3063 = vmatprep.subr.bf16.mxu1 %v1763_v11  ;;  %v1402_v10 = vld [vmem:[%s6929_s9 + $0xaa0] sm:$0xff]  ;;  %v1778_v11 = vunpack.c.l.s8.bf16 %v1098_v53 }
 0x17a   : > { %3842 = vmatprep.subr.bf16.mxu0 %v2371_v12  ;;  %v2386_v12 = vunpack.c.l.s8.bf16 %v1402_v10 }
 0x17c   : > { %3064 = vmatpush1.bf16.msra.mxu1 %v1762_v15  ;;  %v1101_v15 = vld [vmem:[%s6929_s9 + $0x138] sm:$0xff] }
 0x17d   : > { %3843 = vmatpush1.bf16.msra.mxu0 %v2370_v16  ;;  %3065 = vmatprep.subr.bf16.mxu1 %v1765_v17  ;;  %v1405_v16 = vld [vmem:[%s6929_s9 + $0xab8] sm:$0xff]  ;;  %v1780_v17 = vunpack.c.h.s8.bf16 %v1098_v53  ;;  %v1783_v19 = vunpack.c.l.s8.bf16 %v1101_v15  ;;  %v1785_v25 = vunpack.c.h.s8.bf16 %v1101_v15 }
 0x17e   : > { %3844 = vmatprep.subr.bf16.mxu0 %v2373_v18  ;;  %v2388_v18 = vunpack.c.h.s8.bf16 %v1402_v10  ;;  %v2391_v20 = vunpack.c.l.s8.bf16 %v1405_v16  ;;  %v2393_v26 = vunpack.c.h.s8.bf16 %v1405_v16  ;;  %v1108_v10 = vld [vmem:[%s6929_s9 + $0x170] sm:$0xff]  ;;  %v1801_v16 = vunpack.c.h.s8.bf16 %v1109_v6 }
 0x180   : > { %3066 = vmatpush1.bf16.msra.mxu1 %v1764_v21  ;;  %v1100_v21 = vld [vmem:[%s6929_s9 + $0x130] sm:$0xff] }
 0x181   : > { %3845 = vmatpush1.bf16.msra.mxu0 %v2372_v22  ;;  %3067 = vmatprep.subr.bf16.mxu1 %v1767_v23  ;;  %v1404_v22 = vld [vmem:[%s6929_s9 + $0xab0] sm:$0xff]  ;;  %v1782_v23 = vunpack.c.l.s8.bf16 %v1100_v21 }
 0x182   : > { %3846 = vmatprep.subr.bf16.mxu0 %v2375_v24  ;;  %v2390_v24 = vunpack.c.l.s8.bf16 %v1404_v22 }
 0x184   : > { %3068 = vmatpush1.bf16.msra.mxu1 %v1766_v29  ;;  %v1407_v29 = vld [vmem:[%s6929_s9 + $0xac8] sm:$0xff] }
 0x185   : > { %3847 = vmatpush1.bf16.msra.mxu0 %v2374_v30  ;;  %3069 = vmatprep.subr.bf16.mxu1 %v1769_v31  ;;  %v1784_v30 = vunpack.c.h.s8.bf16 %v1100_v21  ;;  %v2392_v31 = vunpack.c.h.s8.bf16 %v1404_v22  ;;  %v2395_v33 = vunpack.c.l.s8.bf16 %v1407_v29  ;;  %v2397_v41 = vunpack.c.h.s8.bf16 %v1407_v29 }
 0x186   : > { %3848 = vmatprep.subr.bf16.mxu0 %v2377_v32  ;;  %v1787_v32 = vunpack.c.l.s8.bf16 %v1103_v27  ;;  %v1800_v21 = vunpack.c.h.s8.bf16 %v1108_v10 }
 0x188   : > { %3070 = vmatpush1.bf16.msra.mxu1 %v1768_v36  ;;  %v1406_v36 = vld [vmem:[%s6929_s9 + $0xac0] sm:$0xff] }
 0x189   : > { %3849 = vmatpush1.bf16.msra.mxu0 %v2376_v37  ;;  %3080 = vmatprep.subr.bf16.mxu1 %v1771_v38  ;;  %v1786_v37 = vunpack.c.l.s8.bf16 %v1102_v34  ;;  %v2394_v38 = vunpack.c.l.s8.bf16 %v1406_v36 }
 0x18a   : > { %3859 = vmatprep.subr.bf16.mxu0 %v2379_v40  ;;  %v1789_v40 = vunpack.c.h.s8.bf16 %v1103_v27 }
 0x18b   : > { %3072 = vmatmul.mubr.bf16.vlgmr.msra.gmra.mrb[0].mxu1 %v983_v47  ;;  %v2396_v47 = vunpack.c.h.s8.bf16 %v1406_v36 }
 0x18c   : > { %3851 = vmatmul.mubr.bf16.vlgmr.msra.gmra.mrb[0].mxu0 %v1021_v48  ;;  %3081 = vmatpush1.bf16.msra.mxu1 %v1770_v49  ;;  %v1791_v48 = vunpack.c.l.s8.bf16 %v1105_v42  ;;  %v2399_v49 = vunpack.c.l.s8.bf16 %v1409_v43 }
 0x18d   : > { %3860 = vmatpush1.bf16.msra.mxu0 %v2378_v50  ;;  %3082 = vmatprep.subr.bf16.mxu1 %v1773_v54  ;;  %v1104_v50 = vld [vmem:[%s6929_s9 + $0x150] sm:$0xff] }
 0x18e   : > { %3861 = vmatprep.subr.bf16.mxu0 %v2381_v56  ;;  %3112 = vmatprep.mubr.bf16.mxu1 %v986_v59  ;;  %v1408_v54 = vld [vmem:[%s6929_s9 + $0xad0] sm:$0xff]  ;;  %v1790_v56 = vunpack.c.l.s8.bf16 %v1104_v50  ;;  %v2401_v59 = vunpack.c.h.s8.bf16 %v1409_v43 }
 0x18f   : > { %3891 = vmatprep.mubr.bf16.mxu0 %v1024_v60  ;;  %v2398_v57 = vunpack.c.l.s8.bf16 %v1408_v54  ;;  %v1107_v60 = vld [vmem:[%s6929_s9 + $0x168] sm:$0xff] }
 0x190   : > { %3083 = vmatpush1.bf16.msra.mxu1 %v1772_v55  ;;  %v1411_v55 = vld [vmem:[%s6929_s9 + $0xae8] sm:$0xff] }
 0x191   : > { %3862 = vmatpush1.bf16.msra.mxu0 %v2380_v46  ;;  %3084 = vmatprep.subr.bf16.mxu1 %v1775_v61  ;;  %v1792_v46 = vunpack.c.h.s8.bf16 %v1104_v50  ;;  %v2400_v61 = vunpack.c.h.s8.bf16 %v1408_v54  ;;  %v2403_v63 = vunpack.c.l.s8.bf16 %v1411_v55  ;;  %v2405_v5 = vunpack.c.h.s8.bf16 %v1411_v55 }
 0x192   : > { %3863 = vmatprep.subr.bf16.mxu0 %v2383_v62  ;;  %v1795_v62 = vunpack.c.l.s8.bf16 %v1107_v60 }
 0x194   : > { %3085 = vmatpush1.bf16.msra.mxu1 %v1774_v1  ;;  %v1410_v1 = vld [vmem:[%s6929_s9 + $0xae0] sm:$0xff] }
 0x195   : > { %3864 = vmatpush1.bf16.msra.mxu0 %v2382_v2  ;;  %3086 = vmatprep.subr.bf16.mxu1 %v1777_v3  ;;  %v1794_v2 = vunpack.c.l.s8.bf16 %v1106_v0  ;;  %v2402_v3 = vunpack.c.l.s8.bf16 %v1410_v1 }
 0x196   : > { %3865 = vmatprep.subr.bf16.mxu0 %v2385_v4  ;;  %v1797_v4 = vunpack.c.h.s8.bf16 %v1107_v60 }
 0x198   : > { %3087 = vmatpush1.bf16.msra.mxu1 %v1776_v7  ;;  %v1413_v7 = vld [vmem:[%s6929_s9 + $0xaf8] sm:$0xff] }
 0x199   : > { %3866 = vmatpush1.bf16.msra.mxu0 %v2384_v8  ;;  %3088 = vmatprep.subr.bf16.mxu1 %v1779_v9  ;;  %v1796_v8 = vunpack.c.h.s8.bf16 %v1106_v0  ;;  %v2404_v9 = vunpack.c.h.s8.bf16 %v1410_v1  ;;  %v2407_v53 = vunpack.c.l.s8.bf16 %v1413_v7 }
 0x19a   : > { %3867 = vmatprep.subr.bf16.mxu0 %v2387_v52  ;;  %v1799_v52 = vunpack.c.l.s8.bf16 %v1109_v6 }
 0x19c   : > { %3089 = vmatpush1.bf16.msra.mxu1 %v1778_v11  ;;  %v1412_v11 = vld [vmem:[%s6929_s9 + $0xaf0] sm:$0xff] }
 0x19d   : > { %3868 = vmatpush1.bf16.msra.mxu0 %v2386_v12  ;;  %3090 = vmatprep.subr.bf16.mxu1 %v1781_v13  ;;  %v570_v12 = vcombine.high %v7058_v28, %v7058_v28  ;;  %v7109_v13 = vld [vmem:[#allocation3 + $0x58] sm:$0xff]  ;;  %v2406_v15 = vunpack.c.l.s8.bf16 %v1412_v11  ;;  %v2408_v22 = vunpack.c.h.s8.bf16 %v1412_v11 }
 0x19e   : > { %3869 = vmatprep.subr.bf16.mxu0 %v2389_v14  ;;  %v1798_v14 = vunpack.c.l.s8.bf16 %v1108_v10  ;;  %v7118_v28 = vrot.slane %v7109_v13, %v6976_v51 }
 0x1a0   : > { %3091 = vmatpush1.bf16.msra.mxu1 %v1780_v17  ;;  %v2409_v17 = vunpack.c.h.s8.bf16 %v1413_v7  ;;  %v755_v29 = vcombine.high %v7118_v28, %v7118_v28 }
 0x1a1   : > { %3870 = vmatpush1.bf16.msra.mxu0 %v2388_v18  ;;  %3092 = vmatprep.subr.bf16.mxu1 %v1783_v19  ;;  %v1111_v18 = vld [vmem:[%s6929_s9 + $0x188] sm:$0xff] }
 0x1a2   : > { %3871 = vmatprep.subr.bf16.mxu0 %v2391_v20  ;;  %v1415_v19 = vld [vmem:[%s6929_s9 + $0xb08] sm:$0xff]  ;;  %v7114_v20 = vrot.slane %v570_v12, %v6976_v51  ;;  %v1805_v34 = vunpack.c.h.s8.bf16 %v1111_v18 }
 0x1a3   : > { %v2413_v36 = vunpack.c.h.s8.bf16 %v1415_v19  ;;  %v1119_v12 = vld [vmem:[%s6929_s9 + $0x1c8] sm:$0xff] }
 0x1a4   : > { %3093 = vmatpush1.bf16.msra.mxu1 %v1782_v23  ;;  %v1803_v23 = vunpack.c.l.s8.bf16 %v1111_v18  ;;  %v586_v27 = vcombine.high %v7114_v20, %v7114_v20 }
 0x1a5   : > { %3872 = vmatpush1.bf16.msra.mxu0 %v2390_v24  ;;  %3094 = vmatprep.subr.bf16.mxu1 %v1785_v25  ;;  %v2411_v24 = vunpack.c.l.s8.bf16 %v1415_v19  ;;  %v1110_v25 = vld [vmem:[%s6929_s9 + $0x180] sm:$0xff] }
 0x1a6   : > { %3873 = vmatprep.subr.bf16.mxu0 %v2393_v26  ;;  %v1414_v26 = vld [vmem:[%s6929_s9 + $0xb00] sm:$0xff] }
 0x1a7   : > { %v1118_v19 = vld [vmem:[%s6929_s9 + $0x1c0] sm:$0xff] }
 0x1a8   : > { %3095 = vmatpush1.bf16.msra.mxu1 %v1784_v30  ;;  %v985_v30 = vpack.c.bf16 %v7064_v35, %v7064_v35  ;;  %v1804_v35 = vunpack.c.h.s8.bf16 %v1110_v25 }
 0x1a9   : > { %3874 = vmatpush1.bf16.msra.mxu0 %v2392_v31  ;;  %3096 = vmatprep.subr.bf16.mxu1 %v1787_v32  ;;  %v1023_v31 = vpack.c.bf16 %v7067_v44, %v7067_v44  ;;  %v1802_v32 = vunpack.c.l.s8.bf16 %v1110_v25  ;;  %v2412_v44 = vunpack.c.h.s8.bf16 %v1414_v26 }
 0x1aa   : > { %3875 = vmatprep.subr.bf16.mxu0 %v2395_v33  ;;  %v2410_v33 = vunpack.c.l.s8.bf16 %v1414_v26  ;;  %v1121_v26 = vld [vmem:[%s6929_s9 + $0x1d8] sm:$0xff] }
 0x1ac   : > { %3097 = vmatpush1.bf16.msra.mxu1 %v1786_v37  ;;  %v1113_v37 = vld [vmem:[%s6929_s9 + $0x198] sm:$0xff] }
 0x1ad   : > { %3876 = vmatpush1.bf16.msra.mxu0 %v2394_v38  ;;  %3098 = vmatprep.subr.bf16.mxu1 %v1789_v40  ;;  %v1417_v38 = vld [vmem:[%s6929_s9 + $0xb18] sm:$0xff]  ;;  %v988_v40 = vpack.c.bf16 %v586_v27, %v586_v27  ;;  %v1807_v42 = vunpack.c.l.s8.bf16 %v1113_v37  ;;  %v1809_v50 = vunpack.c.h.s8.bf16 %v1113_v37 }
 0x1ae   : > { %3877 = vmatprep.subr.bf16.mxu0 %v2397_v41  ;;  %v1026_v41 = vpack.c.bf16 %v755_v29, %v755_v29  ;;  %v2415_v43 = vunpack.c.l.s8.bf16 %v1417_v38  ;;  %v2417_v54 = vunpack.c.h.s8.bf16 %v1417_v38  ;;  %v1425_v27 = vld [vmem:[%s6929_s9 + $0xb58] sm:$0xff]  ;;  %v1820_v29 = vunpack.c.h.s8.bf16 %v1118_v19 }
 0x1af   : > { %v1825_v38 = vunpack.c.h.s8.bf16 %v1121_v26 }
 0x1b0   : > { %3099 = vmatpush1.bf16.msra.mxu1 %v1788_v45  ;;  %v1112_v45 = vld [vmem:[%s6929_s9 + $0x190] sm:$0xff] }
 0x1b1   : > { %3878 = vmatpush1.bf16.msra.mxu0 %v2396_v47  ;;  %3100 = vmatprep.subr.bf16.mxu1 %v1791_v48  ;;  %v1416_v47 = vld [vmem:[%s6929_s9 + $0xb10] sm:$0xff]  ;;  %v1806_v48 = vunpack.c.l.s8.bf16 %v1112_v45 }
 0x1b2   : > { %3879 = vmatprep.subr.bf16.mxu0 %v2399_v49  ;;  %v2414_v49 = vunpack.c.l.s8.bf16 %v1416_v47 }
 0x1b4   : > { %3101 = vmatpush1.bf16.msra.mxu1 %v1790_v56  ;;  %v1115_v56 = vld [vmem:[%s6929_s9 + $0x1a8] sm:$0xff] }
 0x1b5   : > { %3880 = vmatpush1.bf16.msra.mxu0 %v2398_v57  ;;  %3102 = vmatprep.subr.bf16.mxu1 %v1793_v58  ;;  %v1419_v57 = vld [vmem:[%s6929_s9 + $0xb28] sm:$0xff]  ;;  %v1808_v58 = vunpack.c.h.s8.bf16 %v1112_v45  ;;  %v1811_v60 = vunpack.c.l.s8.bf16 %v1115_v56  ;;  %v1813_v0 = vunpack.c.h.s8.bf16 %v1115_v56 }
 0x1b6   : > { %3881 = vmatprep.subr.bf16.mxu0 %v2401_v59  ;;  %v2416_v59 = vunpack.c.h.s8.bf16 %v1416_v47  ;;  %v2419_v55 = vunpack.c.l.s8.bf16 %v1419_v57  ;;  %v2421_v1 = vunpack.c.h.s8.bf16 %v1419_v57  ;;  %v1122_v47 = vld [vmem:[%s6929_s9 + $0x1e0] sm:$0xff]  ;;  %v1125_v57 = vld [vmem:[%s6929_s9 + $0x1f8] sm:$0xff] }
 0x1b8   : > { %3103 = vmatpush1.bf16.msra.mxu1 %v1792_v46  ;;  %v1114_v46 = vld [vmem:[%s6929_s9 + $0x1a0] sm:$0xff] }
 0x1b9   : > { %3882 = vmatpush1.bf16.msra.mxu0 %v2400_v61  ;;  %3104 = vmatprep.subr.bf16.mxu1 %v1795_v62  ;;  %v1418_v61 = vld [vmem:[%s6929_s9 + $0xb20] sm:$0xff]  ;;  %v1810_v62 = vunpack.c.l.s8.bf16 %v1114_v46 }
 0x1ba   : > { %3883 = vmatprep.subr.bf16.mxu0 %v2403_v63  ;;  %v2418_v63 = vunpack.c.l.s8.bf16 %v1418_v61 }
 0x1bc   : > { %3105 = vmatpush1.bf16.msra.mxu1 %v1794_v2  ;;  %v1117_v2 = vld [vmem:[%s6929_s9 + $0x1b8] sm:$0xff] }
 0x1bd   : > { %3884 = vmatpush1.bf16.msra.mxu0 %v2402_v3  ;;  %3106 = vmatprep.subr.bf16.mxu1 %v1797_v4  ;;  %v1421_v3 = vld [vmem:[%s6929_s9 + $0xb38] sm:$0xff]  ;;  %v1812_v4 = vunpack.c.h.s8.bf16 %v1114_v46  ;;  %v1815_v6 = vunpack.c.l.s8.bf16 %v1117_v2  ;;  %v1817_v10 = vunpack.c.h.s8.bf16 %v1117_v2 }
 0x1be   : > { %3885 = vmatprep.subr.bf16.mxu0 %v2405_v5  ;;  %v2420_v5 = vunpack.c.h.s8.bf16 %v1418_v61  ;;  %v2423_v7 = vunpack.c.l.s8.bf16 %v1421_v3  ;;  %v2425_v11 = vunpack.c.h.s8.bf16 %v1421_v3  ;;  %v1124_v61 = vld [vmem:[%s6929_s9 + $0x1f0] sm:$0xff]  ;;  %v1833_v3 = vunpack.c.h.s8.bf16 %v1125_v57 }
 0x1c0   : > { %3107 = vmatpush1.bf16.msra.mxu1 %v1796_v8  ;;  %v1116_v8 = vld [vmem:[%s6929_s9 + $0x1b0] sm:$0xff] }
 0x1c1   : > { %3886 = vmatpush1.bf16.msra.mxu0 %v2404_v9  ;;  %3108 = vmatprep.subr.bf16.mxu1 %v1799_v52  ;;  %v1420_v9 = vld [vmem:[%s6929_s9 + $0xb30] sm:$0xff]  ;;  %v1814_v52 = vunpack.c.l.s8.bf16 %v1116_v8 }
 0x1c2   : > { %3887 = vmatprep.subr.bf16.mxu0 %v2407_v53  ;;  %v2422_v53 = vunpack.c.l.s8.bf16 %v1420_v9 }
 0x1c4   : > { %3109 = vmatpush1.bf16.msra.mxu1 %v1798_v14  ;;  %v1423_v14 = vld [vmem:[%s6929_s9 + $0xb48] sm:$0xff] }
 0x1c5   : > { %3888 = vmatpush1.bf16.msra.mxu0 %v2406_v15  ;;  %3110 = vmatprep.subr.bf16.mxu1 %v1801_v16  ;;  %v1816_v15 = vunpack.c.h.s8.bf16 %v1116_v8  ;;  %v2424_v16 = vunpack.c.h.s8.bf16 %v1420_v9  ;;  %v2427_v18 = vunpack.c.l.s8.bf16 %v1423_v14  ;;  %v2429_v25 = vunpack.c.h.s8.bf16 %v1423_v14 }
 0x1c6   : > { %3889 = vmatprep.subr.bf16.mxu0 %v2409_v17  ;;  %v1819_v17 = vunpack.c.l.s8.bf16 %v1119_v12  ;;  %v1832_v8 = vunpack.c.h.s8.bf16 %v1124_v61 }
 0x1c8   : > { %3111 = vmatpush1.bf16.msra.mxu1 %v1800_v21  ;;  %v1422_v21 = vld [vmem:[%s6929_s9 + $0xb40] sm:$0xff] }
 0x1c9   : > { %3890 = vmatpush1.bf16.msra.mxu0 %v2408_v22  ;;  %3121 = vmatprep.subr.bf16.mxu1 %v1803_v23  ;;  %v1818_v22 = vunpack.c.l.s8.bf16 %v1118_v19  ;;  %v2426_v23 = vunpack.c.l.s8.bf16 %v1422_v21 }
 0x1ca   : > { %3900 = vmatprep.subr.bf16.mxu0 %v2411_v24  ;;  %v1821_v24 = vunpack.c.h.s8.bf16 %v1119_v12 }
 0x1cb   : > { %3113 = vmatmul.mubr.bf16.vlgmr.msra.gmra.mrb[0].mxu1 %v985_v30  ;;  %v2428_v30 = vunpack.c.h.s8.bf16 %v1422_v21 }
 0x1cc   : > { %3892 = vmatmul.mubr.bf16.vlgmr.msra.gmra.mrb[0].mxu0 %v1023_v31  ;;  %3122 = vmatpush1.bf16.msra.mxu1 %v1802_v32  ;;  %v1823_v31 = vunpack.c.l.s8.bf16 %v1121_v26  ;;  %v2431_v32 = vunpack.c.l.s8.bf16 %v1425_v27 }
 0x1cd   : > { %3901 = vmatpush1.bf16.msra.mxu0 %v2410_v33  ;;  %3123 = vmatprep.subr.bf16.mxu1 %v1805_v34  ;;  %v1120_v33 = vld [vmem:[%s6929_s9 + $0x1d0] sm:$0xff] }
 0x1ce   : > { %3902 = vmatprep.subr.bf16.mxu0 %v2413_v36  ;;  %3153 = vmatprep.mubr.bf16.mxu1 %v988_v40  ;;  %v1424_v34 = vld [vmem:[%s6929_s9 + $0xb50] sm:$0xff]  ;;  %v1822_v36 = vunpack.c.l.s8.bf16 %v1120_v33  ;;  %v2433_v40 = vunpack.c.h.s8.bf16 %v1425_v27 }
 0x1cf   : > { %3932 = vmatprep.mubr.bf16.mxu0 %v1026_v41  ;;  %v2430_v37 = vunpack.c.l.s8.bf16 %v1424_v34  ;;  %v1123_v41 = vld [vmem:[%s6929_s9 + $0x1e8] sm:$0xff] }
 0x1d0   : > { %3124 = vmatpush1.bf16.msra.mxu1 %v1804_v35  ;;  %v1427_v35 = vld [vmem:[%s6929_s9 + $0xb68] sm:$0xff] }
 0x1d1   : > { %3903 = vmatpush1.bf16.msra.mxu0 %v2412_v44  ;;  %3125 = vmatprep.subr.bf16.mxu1 %v1807_v42  ;;  %v1824_v44 = vunpack.c.h.s8.bf16 %v1120_v33  ;;  %v2432_v42 = vunpack.c.h.s8.bf16 %v1424_v34  ;;  %v2435_v45 = vunpack.c.l.s8.bf16 %v1427_v35  ;;  %v2437_v56 = vunpack.c.h.s8.bf16 %v1427_v35 }
 0x1d2   : > { %3904 = vmatprep.subr.bf16.mxu0 %v2415_v43  ;;  %v1827_v43 = vunpack.c.l.s8.bf16 %v1123_v41 }
 0x1d4   : > { %3126 = vmatpush1.bf16.msra.mxu1 %v1806_v48  ;;  %v1426_v48 = vld [vmem:[%s6929_s9 + $0xb60] sm:$0xff] }
 0x1d5   : > { %3905 = vmatpush1.bf16.msra.mxu0 %v2414_v49  ;;  %3127 = vmatprep.subr.bf16.mxu1 %v1809_v50  ;;  %v1826_v49 = vunpack.c.l.s8.bf16 %v1122_v47  ;;  %v2434_v50 = vunpack.c.l.s8.bf16 %v1426_v48 }
 0x1d6   : > { %3906 = vmatprep.subr.bf16.mxu0 %v2417_v54  ;;  %v1829_v54 = vunpack.c.h.s8.bf16 %v1123_v41 }
 0x1d8   : > { %3128 = vmatpush1.bf16.msra.mxu1 %v1808_v58  ;;  %v1429_v58 = vld [vmem:[%s6929_s9 + $0xb78] sm:$0xff] }
 0x1d9   : > { %3907 = vmatpush1.bf16.msra.mxu0 %v2416_v59  ;;  %3129 = vmatprep.subr.bf16.mxu1 %v1811_v60  ;;  %v1828_v59 = vunpack.c.h.s8.bf16 %v1122_v47  ;;  %v2436_v60 = vunpack.c.h.s8.bf16 %v1426_v48  ;;  %v2439_v46 = vunpack.c.l.s8.bf16 %v1429_v58 }
 0x1da   : > { %3908 = vmatprep.subr.bf16.mxu0 %v2419_v55  ;;  %v1831_v55 = vunpack.c.l.s8.bf16 %v1125_v57 }
 0x1dc   : > { %3130 = vmatpush1.bf16.msra.mxu1 %v1810_v62  ;;  %v1428_v62 = vld [vmem:[%s6929_s9 + $0xb70] sm:$0xff] }
 0x1dd   : > { %3909 = vmatpush1.bf16.msra.mxu0 %v2418_v63  ;;  %3131 = vmatprep.subr.bf16.mxu1 %v1813_v0  ;;  %v740_v63 = vcombine.high %v7109_v13, %v7109_v13  ;;  %v7160_v0 = vld [vmem:[#allocation3 + $0x10] sm:$0xff]  ;;  %v2438_v2 = vunpack.c.l.s8.bf16 %v1428_v62  ;;  %v2440_v9 = vunpack.c.h.s8.bf16 %v1428_v62 }
 0x1de   : > { %3910 = vmatprep.subr.bf16.mxu0 %v2421_v1  ;;  %v1830_v1 = vunpack.c.l.s8.bf16 %v1124_v61 }
 0x1df   : > { %v7169_v13 = vrot.slane %v740_v63, %v6976_v51  ;;  %v1135_v63 = vld [vmem:[%s6929_s9 + $0x248] sm:$0xff] }
 0x1e0   : > { %3132 = vmatpush1.bf16.msra.mxu1 %v1812_v4  ;;  %v2441_v4 = vunpack.c.h.s8.bf16 %v1429_v58 }
 0x1e1   : > { %3911 = vmatpush1.bf16.msra.mxu0 %v2420_v5  ;;  %3133 = vmatprep.subr.bf16.mxu1 %v1815_v6  ;;  %v1127_v5 = vld [vmem:[%s6929_s9 + $0x208] sm:$0xff]  ;;  %v756_v14 = vcombine.high %v7169_v13, %v7169_v13 }
 0x1e2   : > { %3912 = vmatprep.subr.bf16.mxu0 %v2423_v7  ;;  %v1431_v6 = vld [vmem:[%s6929_s9 + $0xb88] sm:$0xff]  ;;  %v7166_v7 = vrot.slane %v7160_v0, %v6976_v51  ;;  %v1837_v19 = vunpack.c.h.s8.bf16 %v1127_v5 }
 0x1e3   : > { %v2445_v21 = vunpack.c.h.s8.bf16 %v1431_v6 }
 0x1e4   : > { %3134 = vmatpush1.bf16.msra.mxu1 %v1814_v52  ;;  %v1835_v52 = vunpack.c.l.s8.bf16 %v1127_v5  ;;  %v602_v12 = vcombine.high %v7166_v7, %v7166_v7 }
 0x1e5   : > { %3913 = vmatpush1.bf16.msra.mxu0 %v2422_v53  ;;  %3135 = vmatprep.subr.bf16.mxu1 %v1817_v10  ;;  %v2443_v53 = vunpack.c.l.s8.bf16 %v1431_v6  ;;  %v1126_v10 = vld [vmem:[%s6929_s9 + $0x200] sm:$0xff] }
 0x1e6   : > { %3914 = vmatprep.subr.bf16.mxu0 %v2425_v11  ;;  %v1430_v11 = vld [vmem:[%s6929_s9 + $0xb80] sm:$0xff] }
 0x1e7   : > { %v1134_v6 = vld [vmem:[%s6929_s9 + $0x240] sm:$0xff] }
 0x1e8   : > { %3136 = vmatpush1.bf16.msra.mxu1 %v1816_v15  ;;  %v987_v15 = vpack.c.bf16 %v7114_v20, %v7114_v20  ;;  %v1836_v20 = vunpack.c.h.s8.bf16 %v1126_v10 }
 0x1e9   : > { %3915 = vmatpush1.bf16.msra.mxu0 %v2424_v16  ;;  %3137 = vmatprep.subr.bf16.mxu1 %v1819_v17  ;;  %v1025_v16 = vpack.c.bf16 %v7118_v28, %v7118_v28  ;;  %v1834_v17 = vunpack.c.l.s8.bf16 %v1126_v10  ;;  %v2444_v28 = vunpack.c.h.s8.bf16 %v1430_v11 }
 0x1ea   : > { %3916 = vmatprep.subr.bf16.mxu0 %v2427_v18  ;;  %v2442_v18 = vunpack.c.l.s8.bf16 %v1430_v11  ;;  %v1137_v11 = vld [vmem:[%s6929_s9 + $0x258] sm:$0xff] }
 0x1ec   : > { %3138 = vmatpush1.bf16.msra.mxu1 %v1818_v22  ;;  %v1129_v22 = vld [vmem:[%s6929_s9 + $0x218] sm:$0xff] }
 0x1ed   : > { %3917 = vmatpush1.bf16.msra.mxu0 %v2426_v23  ;;  %3139 = vmatprep.subr.bf16.mxu1 %v1821_v24  ;;  %v1433_v23 = vld [vmem:[%s6929_s9 + $0xb98] sm:$0xff]  ;;  %v990_v24 = vpack.c.bf16 %v602_v12, %v602_v12  ;;  %v1839_v26 = vunpack.c.l.s8.bf16 %v1129_v22  ;;  %v1841_v33 = vunpack.c.h.s8.bf16 %v1129_v22 }
 0x1ee   : > { %3918 = vmatprep.subr.bf16.mxu0 %v2429_v25  ;;  %v1028_v25 = vpack.c.bf16 %v756_v14, %v756_v14  ;;  %v2447_v27 = vunpack.c.l.s8.bf16 %v1433_v23  ;;  %v2449_v34 = vunpack.c.h.s8.bf16 %v1433_v23  ;;  %v1441_v12 = vld [vmem:[%s6929_s9 + $0xbd8] sm:$0xff]  ;;  %v1852_v14 = vunpack.c.h.s8.bf16 %v1134_v6 }
 0x1ef   : > { %v1857_v23 = vunpack.c.h.s8.bf16 %v1137_v11 }
 0x1f0   : > { %3140 = vmatpush1.bf16.msra.mxu1 %v1820_v29  ;;  %v1128_v29 = vld [vmem:[%s6929_s9 + $0x210] sm:$0xff] }
 0x1f1   : > { %3919 = vmatpush1.bf16.msra.mxu0 %v2428_v30  ;;  %3141 = vmatprep.subr.bf16.mxu1 %v1823_v31  ;;  %v1432_v30 = vld [vmem:[%s6929_s9 + $0xb90] sm:$0xff]  ;;  %v1838_v31 = vunpack.c.l.s8.bf16 %v1128_v29 }
 0x1f2   : > { %3920 = vmatprep.subr.bf16.mxu0 %v2431_v32  ;;  %v2446_v32 = vunpack.c.l.s8.bf16 %v1432_v30 }
 0x1f4   : > { %3142 = vmatpush1.bf16.msra.mxu1 %v1822_v36  ;;  %v1131_v36 = vld [vmem:[%s6929_s9 + $0x228] sm:$0xff] }
 0x1f5   : > { %3921 = vmatpush1.bf16.msra.mxu0 %v2430_v37  ;;  %3143 = vmatprep.subr.bf16.mxu1 %v1825_v38  ;;  %v1435_v37 = vld [vmem:[%s6929_s9 + $0xba8] sm:$0xff]  ;;  %v1840_v38 = vunpack.c.h.s8.bf16 %v1128_v29  ;;  %v1843_v41 = vunpack.c.l.s8.bf16 %v1131_v36  ;;  %v1845_v47 = vunpack.c.h.s8.bf16 %v1131_v36 }
 0x1f6   : > { %3922 = vmatprep.subr.bf16.mxu0 %v2433_v40  ;;  %v2448_v40 = vunpack.c.h.s8.bf16 %v1432_v30  ;;  %v2451_v35 = vunpack.c.l.s8.bf16 %v1435_v37  ;;  %v2453_v48 = vunpack.c.h.s8.bf16 %v1435_v37  ;;  %v1138_v30 = vld [vmem:[%s6929_s9 + $0x260] sm:$0xff]  ;;  %v1141_v37 = vld [vmem:[%s6929_s9 + $0x278] sm:$0xff] }
 0x1f8   : > { %3144 = vmatpush1.bf16.msra.mxu1 %v1824_v44  ;;  %v1130_v44 = vld [vmem:[%s6929_s9 + $0x220] sm:$0xff] }
 0x1f9   : > { %3923 = vmatpush1.bf16.msra.mxu0 %v2432_v42  ;;  %3145 = vmatprep.subr.bf16.mxu1 %v1827_v43  ;;  %v1434_v42 = vld [vmem:[%s6929_s9 + $0xba0] sm:$0xff]  ;;  %v1842_v43 = vunpack.c.l.s8.bf16 %v1130_v44 }
 0x1fa   : > { %3924 = vmatprep.subr.bf16.mxu0 %v2435_v45  ;;  %v2450_v45 = vunpack.c.l.s8.bf16 %v1434_v42 }
 0x1fc   : > { %3146 = vmatpush1.bf16.msra.mxu1 %v1826_v49  ;;  %v1133_v49 = vld [vmem:[%s6929_s9 + $0x238] sm:$0xff] }
 0x1fd   : > { %3925 = vmatpush1.bf16.msra.mxu0 %v2434_v50  ;;  %3147 = vmatprep.subr.bf16.mxu1 %v1829_v54  ;;  %v1437_v50 = vld [vmem:[%s6929_s9 + $0xbb8] sm:$0xff]  ;;  %v1844_v54 = vunpack.c.h.s8.bf16 %v1130_v44  ;;  %v1847_v57 = vunpack.c.l.s8.bf16 %v1133_v49  ;;  %v1849_v61 = vunpack.c.h.s8.bf16 %v1133_v49 }
 0x1fe   : > { %3926 = vmatprep.subr.bf16.mxu0 %v2437_v56  ;;  %v2452_v56 = vunpack.c.h.s8.bf16 %v1434_v42  ;;  %v2455_v58 = vunpack.c.l.s8.bf16 %v1437_v50  ;;  %v2457_v62 = vunpack.c.h.s8.bf16 %v1437_v50  ;;  %v1140_v42 = vld [vmem:[%s6929_s9 + $0x270] sm:$0xff]  ;;  %v1865_v50 = vunpack.c.h.s8.bf16 %v1141_v37 }
 0x200   : > { %3148 = vmatpush1.bf16.msra.mxu1 %v1828_v59  ;;  %v1132_v59 = vld [vmem:[%s6929_s9 + $0x230] sm:$0xff] }
 0x201   : > { %3927 = vmatpush1.bf16.msra.mxu0 %v2436_v60  ;;  %3149 = vmatprep.subr.bf16.mxu1 %v1831_v55  ;;  %v1436_v60 = vld [vmem:[%s6929_s9 + $0xbb0] sm:$0xff]  ;;  %v1846_v55 = vunpack.c.l.s8.bf16 %v1132_v59 }
 0x202   : > { %3928 = vmatprep.subr.bf16.mxu0 %v2439_v46  ;;  %v2454_v46 = vunpack.c.l.s8.bf16 %v1436_v60 }
 0x204   : > { %3150 = vmatpush1.bf16.msra.mxu1 %v1830_v1  ;;  %v1439_v1 = vld [vmem:[%s6929_s9 + $0xbc8] sm:$0xff] }
 0x205   : > { %3929 = vmatpush1.bf16.msra.mxu0 %v2438_v2  ;;  %3151 = vmatprep.subr.bf16.mxu1 %v1833_v3  ;;  %v1848_v2 = vunpack.c.h.s8.bf16 %v1132_v59  ;;  %v2456_v3 = vunpack.c.h.s8.bf16 %v1436_v60  ;;  %v2459_v5 = vunpack.c.l.s8.bf16 %v1439_v1  ;;  %v2461_v10 = vunpack.c.h.s8.bf16 %v1439_v1 }
 0x206   : > { %3930 = vmatprep.subr.bf16.mxu0 %v2441_v4  ;;  %v1851_v4 = vunpack.c.l.s8.bf16 %v1135_v63  ;;  %v1864_v59 = vunpack.c.h.s8.bf16 %v1140_v42 }
 0x208   : > { %3152 = vmatpush1.bf16.msra.mxu1 %v1832_v8  ;;  %v1438_v8 = vld [vmem:[%s6929_s9 + $0xbc0] sm:$0xff] }
 0x209   : > { %3931 = vmatpush1.bf16.msra.mxu0 %v2440_v9  ;;  %3162 = vmatprep.subr.bf16.mxu1 %v1835_v52  ;;  %v1850_v9 = vunpack.c.l.s8.bf16 %v1134_v6  ;;  %v2458_v52 = vunpack.c.l.s8.bf16 %v1438_v8 }
 0x20a   : > { %3941 = vmatprep.subr.bf16.mxu0 %v2443_v53  ;;  %v1853_v53 = vunpack.c.h.s8.bf16 %v1135_v63 }
 0x20b   : > { %3154 = vmatmul.mubr.bf16.vlgmr.msra.gmra.mrb[0].mxu1 %v987_v15  ;;  %v2460_v15 = vunpack.c.h.s8.bf16 %v1438_v8 }
 0x20c   : > { %3933 = vmatmul.mubr.bf16.vlgmr.msra.gmra.mrb[0].mxu0 %v1025_v16  ;;  %3163 = vmatpush1.bf16.msra.mxu1 %v1834_v17  ;;  %v1855_v16 = vunpack.c.l.s8.bf16 %v1137_v11  ;;  %v2463_v17 = vunpack.c.l.s8.bf16 %v1441_v12 }
 0x20d   : > { %3942 = vmatpush1.bf16.msra.mxu0 %v2442_v18  ;;  %3164 = vmatprep.subr.bf16.mxu1 %v1837_v19  ;;  %v1136_v18 = vld [vmem:[%s6929_s9 + $0x250] sm:$0xff] }
 0x20e   : > { %3943 = vmatprep.subr.bf16.mxu0 %v2445_v21  ;;  %3194 = vmatprep.mubr.bf16.mxu1 %v990_v24  ;;  %v1440_v19 = vld [vmem:[%s6929_s9 + $0xbd0] sm:$0xff]  ;;  %v1854_v21 = vunpack.c.l.s8.bf16 %v1136_v18  ;;  %v2465_v24 = vunpack.c.h.s8.bf16 %v1441_v12 }
 0x20f   : > { %3973 = vmatprep.mubr.bf16.mxu0 %v1028_v25  ;;  %v2462_v22 = vunpack.c.l.s8.bf16 %v1440_v19  ;;  %v1139_v25 = vld [vmem:[%s6929_s9 + $0x268] sm:$0xff] }
 0x210   : > { %3165 = vmatpush1.bf16.msra.mxu1 %v1836_v20  ;;  %v1443_v20 = vld [vmem:[%s6929_s9 + $0xbe8] sm:$0xff] }
 0x211   : > { %3944 = vmatpush1.bf16.msra.mxu0 %v2444_v28  ;;  %3166 = vmatprep.subr.bf16.mxu1 %v1839_v26  ;;  %v1856_v28 = vunpack.c.h.s8.bf16 %v1136_v18  ;;  %v2464_v26 = vunpack.c.h.s8.bf16 %v1440_v19  ;;  %v2467_v29 = vunpack.c.l.s8.bf16 %v1443_v20  ;;  %v2469_v36 = vunpack.c.h.s8.bf16 %v1443_v20 }
 0x212   : > { %3945 = vmatprep.subr.bf16.mxu0 %v2447_v27  ;;  %v1859_v27 = vunpack.c.l.s8.bf16 %v1139_v25 }
 0x214   : > { %3167 = vmatpush1.bf16.msra.mxu1 %v1838_v31  ;;  %v1442_v31 = vld [vmem:[%s6929_s9 + $0xbe0] sm:$0xff] }
 0x215   : > { %3946 = vmatpush1.bf16.msra.mxu0 %v2446_v32  ;;  %3168 = vmatprep.subr.bf16.mxu1 %v1841_v33  ;;  %v1858_v32 = vunpack.c.l.s8.bf16 %v1138_v30  ;;  %v2466_v33 = vunpack.c.l.s8.bf16 %v1442_v31 }
 0x216   : > { %3947 = vmatprep.subr.bf16.mxu0 %v2449_v34  ;;  %v1861_v34 = vunpack.c.h.s8.bf16 %v1139_v25 }
 0x218   : > { %3169 = vmatpush1.bf16.msra.mxu1 %v1840_v38  ;;  %v1445_v38 = vld [vmem:[%s6929_s9 + $0xbf8] sm:$0xff] }
 0x219   : > { %3948 = vmatpush1.bf16.msra.mxu0 %v2448_v40  ;;  %3170 = vmatprep.subr.bf16.mxu1 %v1843_v41  ;;  %v1860_v40 = vunpack.c.h.s8.bf16 %v1138_v30  ;;  %v2468_v41 = vunpack.c.h.s8.bf16 %v1442_v31  ;;  %v2471_v44 = vunpack.c.l.s8.bf16 %v1445_v38 }
 0x21a   : > { %3949 = vmatprep.subr.bf16.mxu0 %v2451_v35  ;;  %v1863_v35 = vunpack.c.l.s8.bf16 %v1141_v37 }
 0x21c   : > { %3171 = vmatpush1.bf16.msra.mxu1 %v1842_v43  ;;  %v1444_v43 = vld [vmem:[%s6929_s9 + $0xbf0] sm:$0xff] }
 0x21d   : > { %3950 = vmatpush1.bf16.msra.mxu0 %v2450_v45  ;;  %3172 = vmatprep.subr.bf16.mxu1 %v1845_v47  ;;  %v587_v45 = vcombine.high %v7160_v0, %v7160_v0  ;;  %v7211_v47 = vld [vmem:[#allocation3 + $0x60] sm:$0xff]  ;;  %v2470_v49 = vunpack.c.l.s8.bf16 %v1444_v43  ;;  %v2472_v60 = vunpack.c.h.s8.bf16 %v1444_v43 }
 0x21e   : > { %3951 = vmatprep.subr.bf16.mxu0 %v2453_v48  ;;  %v1862_v48 = vunpack.c.l.s8.bf16 %v1140_v42  ;;  %v7220_v0 = vrot.slane %v7211_v47, %v6976_v51 }
 0x220   : > { %3173 = vmatpush1.bf16.msra.mxu1 %v1844_v54  ;;  %v2473_v54 = vunpack.c.h.s8.bf16 %v1445_v38  ;;  %v772_v1 = vcombine.high %v7220_v0, %v7220_v0 }
 0x221   : > { %3952 = vmatpush1.bf16.msra.mxu0 %v2452_v56  ;;  %3174 = vmatprep.subr.bf16.mxu1 %v1847_v57  ;;  %v1143_v56 = vld [vmem:[%s6929_s9 + $0x288] sm:$0xff] }
 0x222   : > { %3953 = vmatprep.subr.bf16.mxu0 %v2455_v58  ;;  %v1447_v57 = vld [vmem:[%s6929_s9 + $0xc08] sm:$0xff]  ;;  %v7216_v58 = vrot.slane %v587_v45, %v6976_v51  ;;  %v1869_v6 = vunpack.c.h.s8.bf16 %v1143_v56 }
 0x223   : > { %v2477_v8 = vunpack.c.h.s8.bf16 %v1447_v57  ;;  %v1151_v45 = vld [vmem:[%s6929_s9 + $0x2c8] sm:$0xff] }
 0x224   : > { %3175 = vmatpush1.bf16.msra.mxu1 %v1846_v55  ;;  %v1867_v55 = vunpack.c.l.s8.bf16 %v1143_v56  ;;  %v603_v63 = vcombine.high %v7216_v58, %v7216_v58 }
 0x225   : > { %3954 = vmatpush1.bf16.msra.mxu0 %v2454_v46  ;;  %3176 = vmatprep.subr.bf16.mxu1 %v1849_v61  ;;  %v2475_v46 = vunpack.c.l.s8.bf16 %v1447_v57  ;;  %v1142_v61 = vld [vmem:[%s6929_s9 + $0x280] sm:$0xff] }
 0x226   : > { %3955 = vmatprep.subr.bf16.mxu0 %v2457_v62  ;;  %v1446_v62 = vld [vmem:[%s6929_s9 + $0xc00] sm:$0xff] }
 0x227   : > { %v1150_v57 = vld [vmem:[%s6929_s9 + $0x2c0] sm:$0xff] }
 0x228   : > { %3177 = vmatpush1.bf16.msra.mxu1 %v1848_v2  ;;  %v989_v2 = vpack.c.bf16 %v7166_v7, %v7166_v7  ;;  %v1868_v7 = vunpack.c.h.s8.bf16 %v1142_v61 }
 0x229   : > { %3956 = vmatpush1.bf16.msra.mxu0 %v2456_v3  ;;  %3178 = vmatprep.subr.bf16.mxu1 %v1851_v4  ;;  %v1027_v3 = vpack.c.bf16 %v7169_v13, %v7169_v13  ;;  %v1866_v4 = vunpack.c.l.s8.bf16 %v1142_v61  ;;  %v2476_v13 = vunpack.c.h.s8.bf16 %v1446_v62 }
 0x22a   : > { %3957 = vmatprep.subr.bf16.mxu0 %v2459_v5  ;;  %v2474_v5 = vunpack.c.l.s8.bf16 %v1446_v62  ;;  %v1153_v62 = vld [vmem:[%s6929_s9 + $0x2d8] sm:$0xff] }
 0x22c   : > { %3179 = vmatpush1.bf16.msra.mxu1 %v1850_v9  ;;  %v1145_v9 = vld [vmem:[%s6929_s9 + $0x298] sm:$0xff] }
 0x22d   : > { %3958 = vmatpush1.bf16.msra.mxu0 %v2458_v52  ;;  %3180 = vmatprep.subr.bf16.mxu1 %v1853_v53  ;;  %v1449_v52 = vld [vmem:[%s6929_s9 + $0xc18] sm:$0xff]  ;;  %v992_v53 = vpack.c.bf16 %v603_v63, %v603_v63  ;;  %v1871_v11 = vunpack.c.l.s8.bf16 %v1145_v9  ;;  %v1873_v18 = vunpack.c.h.s8.bf16 %v1145_v9 }
 0x22e   : > { %3959 = vmatprep.subr.bf16.mxu0 %v2461_v10  ;;  %v1030_v10 = vpack.c.bf16 %v772_v1, %v772_v1  ;;  %v2479_v12 = vunpack.c.l.s8.bf16 %v1449_v52  ;;  %v2481_v19 = vunpack.c.h.s8.bf16 %v1449_v52  ;;  %v1457_v63 = vld [vmem:[%s6929_s9 + $0xc58] sm:$0xff]  ;;  %v1884_v1 = vunpack.c.h.s8.bf16 %v1150_v57 }
 0x22f   : > { %v1889_v52 = vunpack.c.h.s8.bf16 %v1153_v62 }
 0x230   : > { %3181 = vmatpush1.bf16.msra.mxu1 %v1852_v14  ;;  %v1144_v14 = vld [vmem:[%s6929_s9 + $0x290] sm:$0xff] }
 0x231   : > { %3960 = vmatpush1.bf16.msra.mxu0 %v2460_v15  ;;  %3182 = vmatprep.subr.bf16.mxu1 %v1855_v16  ;;  %v1448_v15 = vld [vmem:[%s6929_s9 + $0xc10] sm:$0xff]  ;;  %v1870_v16 = vunpack.c.l.s8.bf16 %v1144_v14 }
 0x232   : > { %3961 = vmatprep.subr.bf16.mxu0 %v2463_v17  ;;  %v2478_v17 = vunpack.c.l.s8.bf16 %v1448_v15 }
 0x234   : > { %3183 = vmatpush1.bf16.msra.mxu1 %v1854_v21  ;;  %v1147_v21 = vld [vmem:[%s6929_s9 + $0x2a8] sm:$0xff] }
 0x235   : > { %3962 = vmatpush1.bf16.msra.mxu0 %v2462_v22  ;;  %3184 = vmatprep.subr.bf16.mxu1 %v1857_v23  ;;  %v1451_v22 = vld [vmem:[%s6929_s9 + $0xc28] sm:$0xff]  ;;  %v1872_v23 = vunpack.c.h.s8.bf16 %v1144_v14  ;;  %v1875_v25 = vunpack.c.l.s8.bf16 %v1147_v21  ;;  %v1877_v30 = vunpack.c.h.s8.bf16 %v1147_v21 }
 0x236   : > { %3963 = vmatprep.subr.bf16.mxu0 %v2465_v24  ;;  %v2480_v24 = vunpack.c.h.s8.bf16 %v1448_v15  ;;  %v2483_v20 = vunpack.c.l.s8.bf16 %v1451_v22  ;;  %v2485_v31 = vunpack.c.h.s8.bf16 %v1451_v22  ;;  %v1154_v15 = vld [vmem:[%s6929_s9 + $0x2e0] sm:$0xff]  ;;  %v1157_v22 = vld [vmem:[%s6929_s9 + $0x2f8] sm:$0xff] }
 0x238   : > { %3185 = vmatpush1.bf16.msra.mxu1 %v1856_v28  ;;  %v1146_v28 = vld [vmem:[%s6929_s9 + $0x2a0] sm:$0xff] }
 0x239   : > { %3964 = vmatpush1.bf16.msra.mxu0 %v2464_v26  ;;  %3186 = vmatprep.subr.bf16.mxu1 %v1859_v27  ;;  %v1450_v26 = vld [vmem:[%s6929_s9 + $0xc20] sm:$0xff]  ;;  %v1874_v27 = vunpack.c.l.s8.bf16 %v1146_v28 }
 0x23a   : > { %3965 = vmatprep.subr.bf16.mxu0 %v2467_v29  ;;  %v2482_v29 = vunpack.c.l.s8.bf16 %v1450_v26 }
 0x23c   : > { %3187 = vmatpush1.bf16.msra.mxu1 %v1858_v32  ;;  %v1149_v32 = vld [vmem:[%s6929_s9 + $0x2b8] sm:$0xff] }
 0x23d   : > { %3966 = vmatpush1.bf16.msra.mxu0 %v2466_v33  ;;  %3188 = vmatprep.subr.bf16.mxu1 %v1861_v34  ;;  %v1453_v33 = vld [vmem:[%s6929_s9 + $0xc38] sm:$0xff]  ;;  %v1876_v34 = vunpack.c.h.s8.bf16 %v1146_v28  ;;  %v1879_v37 = vunpack.c.l.s8.bf16 %v1149_v32  ;;  %v1881_v42 = vunpack.c.h.s8.bf16 %v1149_v32 }
 0x23e   : > { %3967 = vmatprep.subr.bf16.mxu0 %v2469_v36  ;;  %v2484_v36 = vunpack.c.h.s8.bf16 %v1450_v26  ;;  %v2487_v38 = vunpack.c.l.s8.bf16 %v1453_v33  ;;  %v2489_v43 = vunpack.c.h.s8.bf16 %v1453_v33  ;;  %v1156_v26 = vld [vmem:[%s6929_s9 + $0x2f0] sm:$0xff]  ;;  %v1897_v33 = vunpack.c.h.s8.bf16 %v1157_v22 }
 0x240   : > { %3189 = vmatpush1.bf16.msra.mxu1 %v1860_v40  ;;  %v1148_v40 = vld [vmem:[%s6929_s9 + $0x2b0] sm:$0xff] }
 0x241   : > { %3968 = vmatpush1.bf16.msra.mxu0 %v2468_v41  ;;  %3190 = vmatprep.subr.bf16.mxu1 %v1863_v35  ;;  %v1452_v41 = vld [vmem:[%s6929_s9 + $0xc30] sm:$0xff]  ;;  %v1878_v35 = vunpack.c.l.s8.bf16 %v1148_v40 }
 0x242   : > { %3969 = vmatprep.subr.bf16.mxu0 %v2471_v44  ;;  %v2486_v44 = vunpack.c.l.s8.bf16 %v1452_v41 }
 0x244   : > { %3191 = vmatpush1.bf16.msra.mxu1 %v1862_v48  ;;  %v1455_v48 = vld [vmem:[%s6929_s9 + $0xc48] sm:$0xff] }
 0x245   : > { %3970 = vmatpush1.bf16.msra.mxu0 %v2470_v49  ;;  %3192 = vmatprep.subr.bf16.mxu1 %v1865_v50  ;;  %v1880_v49 = vunpack.c.h.s8.bf16 %v1148_v40  ;;  %v2488_v50 = vunpack.c.h.s8.bf16 %v1452_v41  ;;  %v2491_v56 = vunpack.c.l.s8.bf16 %v1455_v48  ;;  %v2493_v61 = vunpack.c.h.s8.bf16 %v1455_v48 }
 0x246   : > { %3971 = vmatprep.subr.bf16.mxu0 %v2473_v54  ;;  %v1883_v54 = vunpack.c.l.s8.bf16 %v1151_v45  ;;  %v1896_v40 = vunpack.c.h.s8.bf16 %v1156_v26 }
 0x248   : > { %3193 = vmatpush1.bf16.msra.mxu1 %v1864_v59  ;;  %v1454_v59 = vld [vmem:[%s6929_s9 + $0xc40] sm:$0xff] }
 0x249   : > { %3972 = vmatpush1.bf16.msra.mxu0 %v2472_v60  ;;  %3203 = vmatprep.subr.bf16.mxu1 %v1867_v55  ;;  %v1882_v60 = vunpack.c.l.s8.bf16 %v1150_v57  ;;  %v2490_v55 = vunpack.c.l.s8.bf16 %v1454_v59 }
 0x24a   : > { %3982 = vmatprep.subr.bf16.mxu0 %v2475_v46  ;;  %v1885_v46 = vunpack.c.h.s8.bf16 %v1151_v45 }
 0x24b   : > { %3195 = vmatmul.mubr.bf16.vlgmr.msra.gmra.mrb[0].mxu1 %v989_v2  ;;  %v2492_v2 = vunpack.c.h.s8.bf16 %v1454_v59 }
 0x24c   : > { %3974 = vmatmul.mubr.bf16.vlgmr.msra.gmra.mrb[0].mxu0 %v1027_v3  ;;  %3204 = vmatpush1.bf16.msra.mxu1 %v1866_v4  ;;  %v1887_v3 = vunpack.c.l.s8.bf16 %v1153_v62  ;;  %v2495_v4 = vunpack.c.l.s8.bf16 %v1457_v63 }
 0x24d   : > { %3983 = vmatpush1.bf16.msra.mxu0 %v2474_v5  ;;  %3205 = vmatprep.subr.bf16.mxu1 %v1869_v6  ;;  %v1152_v5 = vld [vmem:[%s6929_s9 + $0x2d0] sm:$0xff] }
 0x24e   : > { %3984 = vmatprep.subr.bf16.mxu0 %v2477_v8  ;;  %3235 = vmatprep.mubr.bf16.mxu1 %v992_v53  ;;  %v1456_v6 = vld [vmem:[%s6929_s9 + $0xc50] sm:$0xff]  ;;  %v1886_v8 = vunpack.c.l.s8.bf16 %v1152_v5  ;;  %v2497_v53 = vunpack.c.h.s8.bf16 %v1457_v63 }
 0x24f   : > { %4014 = vmatprep.mubr.bf16.mxu0 %v1030_v10  ;;  %v2494_v9 = vunpack.c.l.s8.bf16 %v1456_v6  ;;  %v1155_v10 = vld [vmem:[%s6929_s9 + $0x2e8] sm:$0xff] }
 0x250   : > { %3206 = vmatpush1.bf16.msra.mxu1 %v1868_v7  ;;  %v1459_v7 = vld [vmem:[%s6929_s9 + $0xc68] sm:$0xff] }
 0x251   : > { %3985 = vmatpush1.bf16.msra.mxu0 %v2476_v13  ;;  %3207 = vmatprep.subr.bf16.mxu1 %v1871_v11  ;;  %v1888_v13 = vunpack.c.h.s8.bf16 %v1152_v5  ;;  %v2496_v11 = vunpack.c.h.s8.bf16 %v1456_v6  ;;  %v2499_v14 = vunpack.c.l.s8.bf16 %v1459_v7  ;;  %v2501_v21 = vunpack.c.h.s8.bf16 %v1459_v7 }
 0x252   : > { %3986 = vmatprep.subr.bf16.mxu0 %v2479_v12  ;;  %v1891_v12 = vunpack.c.l.s8.bf16 %v1155_v10 }
 0x254   : > { %3208 = vmatpush1.bf16.msra.mxu1 %v1870_v16  ;;  %v1458_v16 = vld [vmem:[%s6929_s9 + $0xc60] sm:$0xff] }
 0x255   : > { %3987 = vmatpush1.bf16.msra.mxu0 %v2478_v17  ;;  %3209 = vmatprep.subr.bf16.mxu1 %v1873_v18  ;;  %v1890_v17 = vunpack.c.l.s8.bf16 %v1154_v15  ;;  %v2498_v18 = vunpack.c.l.s8.bf16 %v1458_v16 }
 0x256   : > { %3988 = vmatprep.subr.bf16.mxu0 %v2481_v19  ;;  %v1893_v19 = vunpack.c.h.s8.bf16 %v1155_v10 }
 0x258   : > { %3210 = vmatpush1.bf16.msra.mxu1 %v1872_v23  ;;  %v1461_v23 = vld [vmem:[%s6929_s9 + $0xc78] sm:$0xff] }
 0x259   : > { %3989 = vmatpush1.bf16.msra.mxu0 %v2480_v24  ;;  %3211 = vmatprep.subr.bf16.mxu1 %v1875_v25  ;;  %v1892_v24 = vunpack.c.h.s8.bf16 %v1154_v15  ;;  %v2500_v25 = vunpack.c.h.s8.bf16 %v1458_v16  ;;  %v2503_v28 = vunpack.c.l.s8.bf16 %v1461_v23 }
 0x25a   : > { %3990 = vmatprep.subr.bf16.mxu0 %v2483_v20  ;;  %v1895_v20 = vunpack.c.l.s8.bf16 %v1157_v22 }
 0x25c   : > { %3212 = vmatpush1.bf16.msra.mxu1 %v1874_v27  ;;  %v1460_v27 = vld [vmem:[%s6929_s9 + $0xc70] sm:$0xff] }
 0x25d   : > { %3991 = vmatpush1.bf16.msra.mxu0 %v2482_v29  ;;  %3213 = vmatprep.subr.bf16.mxu1 %v1877_v30  ;;  %v757_v29 = vcombine.high %v7211_v47, %v7211_v47  ;;  %v7262_v30 = vld [vmem:[#allocation3 + $0x18] sm:$0xff]  ;;  %v2502_v32 = vunpack.c.l.s8.bf16 %v1460_v27  ;;  %v2504_v41 = vunpack.c.h.s8.bf16 %v1460_v27 }
 0x25e   : > { %3992 = vmatprep.subr.bf16.mxu0 %v2485_v31  ;;  %v1894_v31 = vunpack.c.l.s8.bf16 %v1156_v26 }
 0x25f   : > { %v7271_v47 = vrot.slane %v757_v29, %v6976_v51  ;;  %v1167_v29 = vld [vmem:[%s6929_s9 + $0x348] sm:$0xff] }
 0x260   : > { %3214 = vmatpush1.bf16.msra.mxu1 %v1876_v34  ;;  %v2505_v34 = vunpack.c.h.s8.bf16 %v1461_v23 }
 0x261   : > { %3993 = vmatpush1.bf16.msra.mxu0 %v2484_v36  ;;  %3215 = vmatprep.subr.bf16.mxu1 %v1879_v37  ;;  %v1159_v36 = vld [vmem:[%s6929_s9 + $0x308] sm:$0xff]  ;;  %v773_v48 = vcombine.high %v7271_v47, %v7271_v47 }
 0x262   : > { %3994 = vmatprep.subr.bf16.mxu0 %v2487_v38  ;;  %v1463_v37 = vld [vmem:[%s6929_s9 + $0xc88] sm:$0xff]  ;;  %v7268_v38 = vrot.slane %v7262_v30, %v6976_v51  ;;  %v1901_v57 = vunpack.c.h.s8.bf16 %v1159_v36 }
 0x263   : > { %v2509_v59 = vunpack.c.h.s8.bf16 %v1463_v37 }
 0x264   : > { %3216 = vmatpush1.bf16.msra.mxu1 %v1878_v35  ;;  %v1899_v35 = vunpack.c.l.s8.bf16 %v1159_v36  ;;  %v619_v45 = vcombine.high %v7268_v38, %v7268_v38 }
 0x265   : > { %3995 = vmatpush1.bf16.msra.mxu0 %v2486_v44  ;;  %3217 = vmatprep.subr.bf16.mxu1 %v1881_v42  ;;  %v2507_v44 = vunpack.c.l.s8.bf16 %v1463_v37  ;;  %v1158_v42 = vld [vmem:[%s6929_s9 + $0x300] sm:$0xff] }
 0x266   : > { %3996 = vmatprep.subr.bf16.mxu0 %v2489_v43  ;;  %v1462_v43 = vld [vmem:[%s6929_s9 + $0xc80] sm:$0xff] }
 0x267   : > { %v1166_v37 = vld [vmem:[%s6929_s9 + $0x340] sm:$0xff] }
 0x268   : > { %3218 = vmatpush1.bf16.msra.mxu1 %v1880_v49  ;;  %v991_v49 = vpack.c.bf16 %v7216_v58, %v7216_v58  ;;  %v1900_v58 = vunpack.c.h.s8.bf16 %v1158_v42 }
 0x269   : > { %3997 = vmatpush1.bf16.msra.mxu0 %v2488_v50  ;;  %3219 = vmatprep.subr.bf16.mxu1 %v1883_v54  ;;  %v1029_v50 = vpack.c.bf16 %v7220_v0, %v7220_v0  ;;  %v1898_v54 = vunpack.c.l.s8.bf16 %v1158_v42  ;;  %v2508_v0 = vunpack.c.h.s8.bf16 %v1462_v43 }
 0x26a   : > { %3998 = vmatprep.subr.bf16.mxu0 %v2491_v56  ;;  %v2506_v56 = vunpack.c.l.s8.bf16 %v1462_v43  ;;  %v1169_v43 = vld [vmem:[%s6929_s9 + $0x358] sm:$0xff] }
 0x26c   : > { %3220 = vmatpush1.bf16.msra.mxu1 %v1882_v60  ;;  %v1161_v60 = vld [vmem:[%s6929_s9 + $0x318] sm:$0xff] }
 0x26d   : > { %3999 = vmatpush1.bf16.msra.mxu0 %v2490_v55  ;;  %3221 = vmatprep.subr.bf16.mxu1 %v1885_v46  ;;  %v1465_v55 = vld [vmem:[%s6929_s9 + $0xc98] sm:$0xff]  ;;  %v994_v46 = vpack.c.bf16 %v619_v45, %v619_v45  ;;  %v1903_v62 = vunpack.c.l.s8.bf16 %v1161_v60  ;;  %v1905_v5 = vunpack.c.h.s8.bf16 %v1161_v60 }
 0x26e   : > { %4000 = vmatprep.subr.bf16.mxu0 %v2493_v61  ;;  %v1032_v61 = vpack.c.bf16 %v773_v48, %v773_v48  ;;  %v2511_v63 = vunpack.c.l.s8.bf16 %v1465_v55  ;;  %v2513_v6 = vunpack.c.h.s8.bf16 %v1465_v55  ;;  %v1473_v45 = vld [vmem:[%s6929_s9 + $0xcd8] sm:$0xff]  ;;  %v1916_v48 = vunpack.c.h.s8.bf16 %v1166_v37 }
 0x26f   : > { %v1921_v55 = vunpack.c.h.s8.bf16 %v1169_v43 }
 0x270   : > { %3222 = vmatpush1.bf16.msra.mxu1 %v1884_v1  ;;  %v1160_v1 = vld [vmem:[%s6929_s9 + $0x310] sm:$0xff] }
 0x271   : > { %4001 = vmatpush1.bf16.msra.mxu0 %v2492_v2  ;;  %3223 = vmatprep.subr.bf16.mxu1 %v1887_v3  ;;  %v1464_v2 = vld [vmem:[%s6929_s9 + $0xc90] sm:$0xff]  ;;  %v1902_v3 = vunpack.c.l.s8.bf16 %v1160_v1 }
 0x272   : > { %4002 = vmatprep.subr.bf16.mxu0 %v2495_v4  ;;  %v2510_v4 = vunpack.c.l.s8.bf16 %v1464_v2 }
 0x274   : > { %3224 = vmatpush1.bf16.msra.mxu1 %v1886_v8  ;;  %v1163_v8 = vld [vmem:[%s6929_s9 + $0x328] sm:$0xff] }
 0x275   : > { %4003 = vmatpush1.bf16.msra.mxu0 %v2494_v9  ;;  %3225 = vmatprep.subr.bf16.mxu1 %v1889_v52  ;;  %v1467_v9 = vld [vmem:[%s6929_s9 + $0xca8] sm:$0xff]  ;;  %v1904_v52 = vunpack.c.h.s8.bf16 %v1160_v1  ;;  %v1907_v10 = vunpack.c.l.s8.bf16 %v1163_v8  ;;  %v1909_v15 = vunpack.c.h.s8.bf16 %v1163_v8 }
 0x276   : > { %4004 = vmatprep.subr.bf16.mxu0 %v2497_v53  ;;  %v2512_v53 = vunpack.c.h.s8.bf16 %v1464_v2  ;;  %v2515_v7 = vunpack.c.l.s8.bf16 %v1467_v9  ;;  %v2517_v16 = vunpack.c.h.s8.bf16 %v1467_v9  ;;  %v1170_v2 = vld [vmem:[%s6929_s9 + $0x360] sm:$0xff]  ;;  %v1173_v9 = vld [vmem:[%s6929_s9 + $0x378] sm:$0xff] }
 0x278   : > { %3226 = vmatpush1.bf16.msra.mxu1 %v1888_v13  ;;  %v1162_v13 = vld [vmem:[%s6929_s9 + $0x320] sm:$0xff] }
 0x279   : > { %4005 = vmatpush1.bf16.msra.mxu0 %v2496_v11  ;;  %3227 = vmatprep.subr.bf16.mxu1 %v1891_v12  ;;  %v1466_v11 = vld [vmem:[%s6929_s9 + $0xca0] sm:$0xff]  ;;  %v1906_v12 = vunpack.c.l.s8.bf16 %v1162_v13 }
 0x27a   : > { %4006 = vmatprep.subr.bf16.mxu0 %v2499_v14  ;;  %v2514_v14 = vunpack.c.l.s8.bf16 %v1466_v11 }
 0x27c   : > { %3228 = vmatpush1.bf16.msra.mxu1 %v1890_v17  ;;  %v1165_v17 = vld [vmem:[%s6929_s9 + $0x338] sm:$0xff] }
 0x27d   : > { %4007 = vmatpush1.bf16.msra.mxu0 %v2498_v18  ;;  %3229 = vmatprep.subr.bf16.mxu1 %v1893_v19  ;;  %v1469_v18 = vld [vmem:[%s6929_s9 + $0xcb8] sm:$0xff]  ;;  %v1908_v19 = vunpack.c.h.s8.bf16 %v1162_v13  ;;  %v1911_v22 = vunpack.c.l.s8.bf16 %v1165_v17  ;;  %v1913_v26 = vunpack.c.h.s8.bf16 %v1165_v17 }
 0x27e   : > { %4008 = vmatprep.subr.bf16.mxu0 %v2501_v21  ;;  %v2516_v21 = vunpack.c.h.s8.bf16 %v1466_v11  ;;  %v2519_v23 = vunpack.c.l.s8.bf16 %v1469_v18  ;;  %v2521_v27 = vunpack.c.h.s8.bf16 %v1469_v18  ;;  %v1172_v11 = vld [vmem:[%s6929_s9 + $0x370] sm:$0xff]  ;;  %v1929_v18 = vunpack.c.h.s8.bf16 %v1173_v9 }
 0x280   : > { %3230 = vmatpush1.bf16.msra.mxu1 %v1892_v24  ;;  %v1164_v24 = vld [vmem:[%s6929_s9 + $0x330] sm:$0xff] }
 0x281   : > { %4009 = vmatpush1.bf16.msra.mxu0 %v2500_v25  ;;  %3231 = vmatprep.subr.bf16.mxu1 %v1895_v20  ;;  %v1468_v25 = vld [vmem:[%s6929_s9 + $0xcb0] sm:$0xff]  ;;  %v1910_v20 = vunpack.c.l.s8.bf16 %v1164_v24 }
 0x282   : > { %4010 = vmatprep.subr.bf16.mxu0 %v2503_v28  ;;  %v2518_v28 = vunpack.c.l.s8.bf16 %v1468_v25 }
 0x284   : > { %3232 = vmatpush1.bf16.msra.mxu1 %v1894_v31  ;;  %v1471_v31 = vld [vmem:[%s6929_s9 + $0xcc8] sm:$0xff] }
 0x285   : > { %4011 = vmatpush1.bf16.msra.mxu0 %v2502_v32  ;;  %3233 = vmatprep.subr.bf16.mxu1 %v1897_v33  ;;  %v1912_v32 = vunpack.c.h.s8.bf16 %v1164_v24  ;;  %v2520_v33 = vunpack.c.h.s8.bf16 %v1468_v25  ;;  %v2523_v36 = vunpack.c.l.s8.bf16 %v1471_v31  ;;  %v2525_v42 = vunpack.c.h.s8.bf16 %v1471_v31 }
 0x286   : > { %4012 = vmatprep.subr.bf16.mxu0 %v2505_v34  ;;  %v1915_v34 = vunpack.c.l.s8.bf16 %v1167_v29  ;;  %v1928_v24 = vunpack.c.h.s8.bf16 %v1172_v11 }
 0x288   : > { %3234 = vmatpush1.bf16.msra.mxu1 %v1896_v40  ;;  %v1470_v40 = vld [vmem:[%s6929_s9 + $0xcc0] sm:$0xff] }
 0x289   : > { %4013 = vmatpush1.bf16.msra.mxu0 %v2504_v41  ;;  %3244 = vmatprep.subr.bf16.mxu1 %v1899_v35  ;;  %v1914_v41 = vunpack.c.l.s8.bf16 %v1166_v37  ;;  %v2522_v35 = vunpack.c.l.s8.bf16 %v1470_v40 }
 0x28a   : > { %4023 = vmatprep.subr.bf16.mxu0 %v2507_v44  ;;  %v1917_v44 = vunpack.c.h.s8.bf16 %v1167_v29 }
 0x28b   : > { %3236 = vmatmul.mubr.bf16.vlgmr.msra.gmra.mrb[0].mxu1 %v991_v49  ;;  %v2524_v49 = vunpack.c.h.s8.bf16 %v1470_v40 }
 0x28c   : > { %4015 = vmatmul.mubr.bf16.vlgmr.msra.gmra.mrb[0].mxu0 %v1029_v50  ;;  %3245 = vmatpush1.bf16.msra.mxu1 %v1898_v54  ;;  %v1919_v50 = vunpack.c.l.s8.bf16 %v1169_v43  ;;  %v2527_v54 = vunpack.c.l.s8.bf16 %v1473_v45 }
 0x28d   : > { %4024 = vmatpush1.bf16.msra.mxu0 %v2506_v56  ;;  %3246 = vmatprep.subr.bf16.mxu1 %v1901_v57  ;;  %v1168_v56 = vld [vmem:[%s6929_s9 + $0x350] sm:$0xff] }
 0x28e   : > { %4025 = vmatprep.subr.bf16.mxu0 %v2509_v59  ;;  %3276 = vmatprep.mubr.bf16.mxu1 %v994_v46  ;;  %v1472_v57 = vld [vmem:[%s6929_s9 + $0xcd0] sm:$0xff]  ;;  %v1918_v59 = vunpack.c.l.s8.bf16 %v1168_v56  ;;  %v2529_v46 = vunpack.c.h.s8.bf16 %v1473_v45 }
 0x28f   : > { %4055 = vmatprep.mubr.bf16.mxu0 %v1032_v61  ;;  %v2526_v60 = vunpack.c.l.s8.bf16 %v1472_v57  ;;  %v1171_v61 = vld [vmem:[%s6929_s9 + $0x368] sm:$0xff] }
 0x290   : > { %3247 = vmatpush1.bf16.msra.mxu1 %v1900_v58  ;;  %v1475_v58 = vld [vmem:[%s6929_s9 + $0xce8] sm:$0xff] }
 0x291   : > { %4026 = vmatpush1.bf16.msra.mxu0 %v2508_v0  ;;  %3248 = vmatprep.subr.bf16.mxu1 %v1903_v62  ;;  %v1920_v0 = vunpack.c.h.s8.bf16 %v1168_v56  ;;  %v2528_v62 = vunpack.c.h.s8.bf16 %v1472_v57  ;;  %v2531_v1 = vunpack.c.l.s8.bf16 %v1475_v58  ;;  %v2533_v8 = vunpack.c.h.s8.bf16 %v1475_v58 }
 0x292   : > { %4027 = vmatprep.subr.bf16.mxu0 %v2511_v63  ;;  %v1923_v63 = vunpack.c.l.s8.bf16 %v1171_v61 }
 0x294   : > { %3249 = vmatpush1.bf16.msra.mxu1 %v1902_v3  ;;  %v1474_v3 = vld [vmem:[%s6929_s9 + $0xce0] sm:$0xff] }
 0x295   : > { %4028 = vmatpush1.bf16.msra.mxu0 %v2510_v4  ;;  %3250 = vmatprep.subr.bf16.mxu1 %v1905_v5  ;;  %v1922_v4 = vunpack.c.l.s8.bf16 %v1170_v2  ;;  %v2530_v5 = vunpack.c.l.s8.bf16 %v1474_v3 }
 0x296   : > { %4029 = vmatprep.subr.bf16.mxu0 %v2513_v6  ;;  %v1925_v6 = vunpack.c.h.s8.bf16 %v1171_v61 }
 0x298   : > { %3251 = vmatpush1.bf16.msra.mxu1 %v1904_v52  ;;  %v1477_v52 = vld [vmem:[%s6929_s9 + $0xcf8] sm:$0xff] }
 0x299   : > { %4030 = vmatpush1.bf16.msra.mxu0 %v2512_v53  ;;  %3252 = vmatprep.subr.bf16.mxu1 %v1907_v10  ;;  %v1924_v53 = vunpack.c.h.s8.bf16 %v1170_v2  ;;  %v2532_v10 = vunpack.c.h.s8.bf16 %v1474_v3  ;;  %v2535_v13 = vunpack.c.l.s8.bf16 %v1477_v52 }
 0x29a   : > { %4031 = vmatprep.subr.bf16.mxu0 %v2515_v7  ;;  %v1927_v7 = vunpack.c.l.s8.bf16 %v1173_v9 }
 0x29c   : > { %3253 = vmatpush1.bf16.msra.mxu1 %v1906_v12  ;;  %v1476_v12 = vld [vmem:[%s6929_s9 + $0xcf0] sm:$0xff] }
 0x29d   : > { %4032 = vmatpush1.bf16.msra.mxu0 %v2514_v14  ;;  %3254 = vmatprep.subr.bf16.mxu1 %v1909_v15  ;;  %v604_v14 = vcombine.high %v7262_v30, %v7262_v30  ;;  %v7313_v15 = vld [vmem:[#allocation3 + $0x68] sm:$0xff]  ;;  %v2534_v17 = vunpack.c.l.s8.bf16 %v1476_v12  ;;  %v2536_v25 = vunpack.c.h.s8.bf16 %v1476_v12 }
 0x29e   : > { %4033 = vmatprep.subr.bf16.mxu0 %v2517_v16  ;;  %v1926_v16 = vunpack.c.l.s8.bf16 %v1172_v11  ;;  %v7322_v30 = vrot.slane %v7313_v15, %v6976_v51 }
 0x2a0   : > { %3255 = vmatpush1.bf16.msra.mxu1 %v1908_v19  ;;  %v2537_v19 = vunpack.c.h.s8.bf16 %v1477_v52  ;;  %v789_v31 = vcombine.high %v7322_v30, %v7322_v30 }
 0x2a1   : > { %4034 = vmatpush1.bf16.msra.mxu0 %v2516_v21  ;;  %3256 = vmatprep.subr.bf16.mxu1 %v1911_v22  ;;  %v1175_v21 = vld [vmem:[%s6929_s9 + $0x388] sm:$0xff] }
 0x2a2   : > { %4035 = vmatprep.subr.bf16.mxu0 %v2519_v23  ;;  %v1479_v22 = vld [vmem:[%s6929_s9 + $0xd08] sm:$0xff]  ;;  %v7318_v23 = vrot.slane %v604_v14, %v6976_v51  ;;  %v1933_v37 = vunpack.c.h.s8.bf16 %v1175_v21 }
 0x2a3   : > { %v2541_v40 = vunpack.c.h.s8.bf16 %v1479_v22  ;;  %v1183_v14 = vld [vmem:[%s6929_s9 + $0x3c8] sm:$0xff] }
 0x2a4   : > { %3257 = vmatpush1.bf16.msra.mxu1 %v1910_v20  ;;  %v1931_v20 = vunpack.c.l.s8.bf16 %v1175_v21  ;;  %v620_v29 = vcombine.high %v7318_v23, %v7318_v23 }
 0x2a5   : > { %4036 = vmatpush1.bf16.msra.mxu0 %v2518_v28  ;;  %3258 = vmatprep.subr.bf16.mxu1 %v1913_v26  ;;  %v2539_v28 = vunpack.c.l.s8.bf16 %v1479_v22  ;;  %v1174_v26 = vld [vmem:[%s6929_s9 + $0x380] sm:$0xff] }
 0x2a6   : > { %4037 = vmatprep.subr.bf16.mxu0 %v2521_v27  ;;  %v1478_v27 = vld [vmem:[%s6929_s9 + $0xd00] sm:$0xff] }
 0x2a7   : > { %v1182_v22 = vld [vmem:[%s6929_s9 + $0x3c0] sm:$0xff] }
 0x2a8   : > { %3259 = vmatpush1.bf16.msra.mxu1 %v1912_v32  ;;  %v993_v32 = vpack.c.bf16 %v7268_v38, %v7268_v38  ;;  %v1932_v38 = vunpack.c.h.s8.bf16 %v1174_v26 }
 0x2a9   : > { %4038 = vmatpush1.bf16.msra.mxu0 %v2520_v33  ;;  %3260 = vmatprep.subr.bf16.mxu1 %v1915_v34  ;;  %v1031_v33 = vpack.c.bf16 %v7271_v47, %v7271_v47  ;;  %v1930_v34 = vunpack.c.l.s8.bf16 %v1174_v26  ;;  %v2540_v47 = vunpack.c.h.s8.bf16 %v1478_v27 }
 0x2aa   : > { %4039 = vmatprep.subr.bf16.mxu0 %v2523_v36  ;;  %v2538_v36 = vunpack.c.l.s8.bf16 %v1478_v27  ;;  %v1185_v27 = vld [vmem:[%s6929_s9 + $0x3d8] sm:$0xff] }
 0x2ac   : > { %3261 = vmatpush1.bf16.msra.mxu1 %v1914_v41  ;;  %v1177_v41 = vld [vmem:[%s6929_s9 + $0x398] sm:$0xff] }
 0x2ad   : > { %4040 = vmatpush1.bf16.msra.mxu0 %v2522_v35  ;;  %3262 = vmatprep.subr.bf16.mxu1 %v1917_v44  ;;  %v1481_v35 = vld [vmem:[%s6929_s9 + $0xd18] sm:$0xff]  ;;  %v996_v44 = vpack.c.bf16 %v620_v29, %v620_v29  ;;  %v1935_v43 = vunpack.c.l.s8.bf16 %v1177_v41  ;;  %v1937_v56 = vunpack.c.h.s8.bf16 %v1177_v41 }
 0x2ae   : > { %4041 = vmatprep.subr.bf16.mxu0 %v2525_v42  ;;  %v1034_v42 = vpack.c.bf16 %v789_v31, %v789_v31  ;;  %v2543_v45 = vunpack.c.l.s8.bf16 %v1481_v35  ;;  %v2545_v57 = vunpack.c.h.s8.bf16 %v1481_v35  ;;  %v1489_v29 = vld [vmem:[%s6929_s9 + $0xd58] sm:$0xff]  ;;  %v1948_v31 = vunpack.c.h.s8.bf16 %v1182_v22 }
 0x2af   : > { %v1953_v35 = vunpack.c.h.s8.bf16 %v1185_v27 }
 0x2b0   : > { %3263 = vmatpush1.bf16.msra.mxu1 %v1916_v48  ;;  %v1176_v48 = vld [vmem:[%s6929_s9 + $0x390] sm:$0xff] }
 0x2b1   : > { %4042 = vmatpush1.bf16.msra.mxu0 %v2524_v49  ;;  %3264 = vmatprep.subr.bf16.mxu1 %v1919_v50  ;;  %v1480_v49 = vld [vmem:[%s6929_s9 + $0xd10] sm:$0xff]  ;;  %v1934_v50 = vunpack.c.l.s8.bf16 %v1176_v48 }
 0x2b2   : > { %4043 = vmatprep.subr.bf16.mxu0 %v2527_v54  ;;  %v2542_v54 = vunpack.c.l.s8.bf16 %v1480_v49 }
 0x2b4   : > { %3265 = vmatpush1.bf16.msra.mxu1 %v1918_v59  ;;  %v1179_v59 = vld [vmem:[%s6929_s9 + $0x3a8] sm:$0xff] }
 0x2b5   : > { %4044 = vmatpush1.bf16.msra.mxu0 %v2526_v60  ;;  %3266 = vmatprep.subr.bf16.mxu1 %v1921_v55  ;;  %v1483_v60 = vld [vmem:[%s6929_s9 + $0xd28] sm:$0xff]  ;;  %v1936_v55 = vunpack.c.h.s8.bf16 %v1176_v48  ;;  %v1939_v61 = vunpack.c.l.s8.bf16 %v1179_v59  ;;  %v1941_v2 = vunpack.c.h.s8.bf16 %v1179_v59 }
 0x2b6   : > { %4045 = vmatprep.subr.bf16.mxu0 %v2529_v46  ;;  %v2544_v46 = vunpack.c.h.s8.bf16 %v1480_v49  ;;  %v2547_v58 = vunpack.c.l.s8.bf16 %v1483_v60  ;;  %v2549_v3 = vunpack.c.h.s8.bf16 %v1483_v60  ;;  %v1186_v49 = vld [vmem:[%s6929_s9 + $0x3e0] sm:$0xff]  ;;  %v1189_v60 = vld [vmem:[%s6929_s9 + $0x3f8] sm:$0xff] }
 0x2b8   : > { %3267 = vmatpush1.bf16.msra.mxu1 %v1920_v0  ;;  %v1178_v0 = vld [vmem:[%s6929_s9 + $0x3a0] sm:$0xff] }
 0x2b9   : > { %4046 = vmatpush1.bf16.msra.mxu0 %v2528_v62  ;;  %3268 = vmatprep.subr.bf16.mxu1 %v1923_v63  ;;  %v1482_v62 = vld [vmem:[%s6929_s9 + $0xd20] sm:$0xff]  ;;  %v1938_v63 = vunpack.c.l.s8.bf16 %v1178_v0 }
 0x2ba   : > { %4047 = vmatprep.subr.bf16.mxu0 %v2531_v1  ;;  %v2546_v1 = vunpack.c.l.s8.bf16 %v1482_v62 }
 0x2bc   : > { %3269 = vmatpush1.bf16.msra.mxu1 %v1922_v4  ;;  %v1181_v4 = vld [vmem:[%s6929_s9 + $0x3b8] sm:$0xff] }
 0x2bd   : > { %4048 = vmatpush1.bf16.msra.mxu0 %v2530_v5  ;;  %3270 = vmatprep.subr.bf16.mxu1 %v1925_v6  ;;  %v1485_v5 = vld [vmem:[%s6929_s9 + $0xd38] sm:$0xff]  ;;  %v1940_v6 = vunpack.c.h.s8.bf16 %v1178_v0  ;;  %v1943_v9 = vunpack.c.l.s8.bf16 %v1181_v4  ;;  %v1945_v11 = vunpack.c.h.s8.bf16 %v1181_v4 }
 0x2be   : > { %4049 = vmatprep.subr.bf16.mxu0 %v2533_v8  ;;  %v2548_v8 = vunpack.c.h.s8.bf16 %v1482_v62  ;;  %v2551_v52 = vunpack.c.l.s8.bf16 %v1485_v5  ;;  %v2553_v12 = vunpack.c.h.s8.bf16 %v1485_v5  ;;  %v1188_v62 = vld [vmem:[%s6929_s9 + $0x3f0] sm:$0xff]  ;;  %v1961_v5 = vunpack.c.h.s8.bf16 %v1189_v60 }
 0x2c0   : > { %3271 = vmatpush1.bf16.msra.mxu1 %v1924_v53  ;;  %v1180_v53 = vld [vmem:[%s6929_s9 + $0x3b0] sm:$0xff] }
 0x2c1   : > { %4050 = vmatpush1.bf16.msra.mxu0 %v2532_v10  ;;  %3272 = vmatprep.subr.bf16.mxu1 %v1927_v7  ;;  %v1484_v10 = vld [vmem:[%s6929_s9 + $0xd30] sm:$0xff]  ;;  %v1942_v7 = vunpack.c.l.s8.bf16 %v1180_v53 }
 0x2c2   : > { %4051 = vmatprep.subr.bf16.mxu0 %v2535_v13  ;;  %v2550_v13 = vunpack.c.l.s8.bf16 %v1484_v10 }
 0x2c4   : > { %3273 = vmatpush1.bf16.msra.mxu1 %v1926_v16  ;;  %v1487_v16 = vld [vmem:[%s6929_s9 + $0xd48] sm:$0xff] }
 0x2c5   : > { %4052 = vmatpush1.bf16.msra.mxu0 %v2534_v17  ;;  %3274 = vmatprep.subr.bf16.mxu1 %v1929_v18  ;;  %v1944_v17 = vunpack.c.h.s8.bf16 %v1180_v53  ;;  %v2552_v18 = vunpack.c.h.s8.bf16 %v1484_v10  ;;  %v2555_v21 = vunpack.c.l.s8.bf16 %v1487_v16  ;;  %v2557_v26 = vunpack.c.h.s8.bf16 %v1487_v16 }
 0x2c6   : > { %4053 = vmatprep.subr.bf16.mxu0 %v2537_v19  ;;  %v1947_v19 = vunpack.c.l.s8.bf16 %v1183_v14  ;;  %v1960_v53 = vunpack.c.h.s8.bf16 %v1188_v62 }
 0x2c8   : > { %3275 = vmatpush1.bf16.msra.mxu1 %v1928_v24  ;;  %v1486_v24 = vld [vmem:[%s6929_s9 + $0xd40] sm:$0xff] }
 0x2c9   : > { %4054 = vmatpush1.bf16.msra.mxu0 %v2536_v25  ;;  %3285 = vmatprep.subr.bf16.mxu1 %v1931_v20  ;;  %v1946_v25 = vunpack.c.l.s8.bf16 %v1182_v22  ;;  %v2554_v20 = vunpack.c.l.s8.bf16 %v1486_v24 }
 0x2ca   : > { %4064 = vmatprep.subr.bf16.mxu0 %v2539_v28  ;;  %v1949_v28 = vunpack.c.h.s8.bf16 %v1183_v14 }
 0x2cb   : > { %3277 = vmatmul.mubr.bf16.vlgmr.msra.gmra.mrb[0].mxu1 %v993_v32  ;;  %v2556_v32 = vunpack.c.h.s8.bf16 %v1486_v24 }
 0x2cc   : > { %4056 = vmatmul.mubr.bf16.vlgmr.msra.gmra.mrb[0].mxu0 %v1031_v33  ;;  %3286 = vmatpush1.bf16.msra.mxu1 %v1930_v34  ;;  %v1951_v33 = vunpack.c.l.s8.bf16 %v1185_v27  ;;  %v2559_v34 = vunpack.c.l.s8.bf16 %v1489_v29 }
 0x2cd   : > { %4065 = vmatpush1.bf16.msra.mxu0 %v2538_v36  ;;  %3287 = vmatprep.subr.bf16.mxu1 %v1933_v37  ;;  %v1184_v36 = vld [vmem:[%s6929_s9 + $0x3d0] sm:$0xff] }
 0x2ce   : > { %4066 = vmatprep.subr.bf16.mxu0 %v2541_v40  ;;  %3317 = vmatprep.mubr.bf16.mxu1 %v996_v44  ;;  %v1488_v37 = vld [vmem:[%s6929_s9 + $0xd50] sm:$0xff]  ;;  %v1950_v40 = vunpack.c.l.s8.bf16 %v1184_v36  ;;  %v2561_v44 = vunpack.c.h.s8.bf16 %v1489_v29 }
 0x2cf   : > { %4096 = vmatprep.mubr.bf16.mxu0 %v1034_v42  ;;  %v2558_v41 = vunpack.c.l.s8.bf16 %v1488_v37  ;;  %v1187_v42 = vld [vmem:[%s6929_s9 + $0x3e8] sm:$0xff] }
 0x2d0   : > { %3288 = vmatpush1.bf16.msra.mxu1 %v1932_v38  ;;  %v1491_v38 = vld [vmem:[%s6929_s9 + $0xd68] sm:$0xff] }
 0x2d1   : > { %4067 = vmatpush1.bf16.msra.mxu0 %v2540_v47  ;;  %3289 = vmatprep.subr.bf16.mxu1 %v1935_v43  ;;  %v1952_v47 = vunpack.c.h.s8.bf16 %v1184_v36  ;;  %v2560_v43 = vunpack.c.h.s8.bf16 %v1488_v37  ;;  %v2563_v48 = vunpack.c.l.s8.bf16 %v1491_v38  ;;  %v2565_v59 = vunpack.c.h.s8.bf16 %v1491_v38 }
 0x2d2   : > { %4068 = vmatprep.subr.bf16.mxu0 %v2543_v45  ;;  %v1955_v45 = vunpack.c.l.s8.bf16 %v1187_v42 }
 0x2d4   : > { %3290 = vmatpush1.bf16.msra.mxu1 %v1934_v50  ;;  %v1490_v50 = vld [vmem:[%s6929_s9 + $0xd60] sm:$0xff] }
 0x2d5   : > { %4069 = vmatpush1.bf16.msra.mxu0 %v2542_v54  ;;  %3291 = vmatprep.subr.bf16.mxu1 %v1937_v56  ;;  %v1954_v54 = vunpack.c.l.s8.bf16 %v1186_v49  ;;  %v2562_v56 = vunpack.c.l.s8.bf16 %v1490_v50 }
 0x2d6   : > { %4070 = vmatprep.subr.bf16.mxu0 %v2545_v57  ;;  %v1957_v57 = vunpack.c.h.s8.bf16 %v1187_v42 }
 0x2d8   : > { %3292 = vmatpush1.bf16.msra.mxu1 %v1936_v55  ;;  %v1493_v55 = vld [vmem:[%s6929_s9 + $0xd78] sm:$0xff] }
 0x2d9   : > { %4071 = vmatpush1.bf16.msra.mxu0 %v2544_v46  ;;  %3293 = vmatprep.subr.bf16.mxu1 %v1939_v61  ;;  %v1956_v46 = vunpack.c.h.s8.bf16 %v1186_v49  ;;  %v2564_v61 = vunpack.c.h.s8.bf16 %v1490_v50  ;;  %v2567_v0 = vunpack.c.l.s8.bf16 %v1493_v55 }
 0x2da   : > { %4072 = vmatprep.subr.bf16.mxu0 %v2547_v58  ;;  %v1959_v58 = vunpack.c.l.s8.bf16 %v1189_v60 }
 0x2dc   : > { %3294 = vmatpush1.bf16.msra.mxu1 %v1938_v63  ;;  %v1492_v63 = vld [vmem:[%s6929_s9 + $0xd70] sm:$0xff] }
 0x2dd   : > { %4073 = vmatpush1.bf16.msra.mxu0 %v2546_v1  ;;  %3295 = vmatprep.subr.bf16.mxu1 %v1941_v2  ;;  %v774_v1 = vcombine.high %v7313_v15, %v7313_v15  ;;  %v7364_v2 = vld [vmem:[#allocation3 + $0x20] sm:$0xff]  ;;  %v2566_v4 = vunpack.c.l.s8.bf16 %v1492_v63  ;;  %v2568_v10 = vunpack.c.h.s8.bf16 %v1492_v63 }
 0x2de   : > { %4074 = vmatprep.subr.bf16.mxu0 %v2549_v3  ;;  %v1958_v3 = vunpack.c.l.s8.bf16 %v1188_v62 }
 0x2df   : > { %v7373_v15 = vrot.slane %v774_v1, %v6976_v51  ;;  %v1199_v1 = vld [vmem:[%s6929_s9 + $0x448] sm:$0xff] }
 0x2e0   : > { %3296 = vmatpush1.bf16.msra.mxu1 %v1940_v6  ;;  %v2569_v6 = vunpack.c.h.s8.bf16 %v1493_v55 }
 0x2e1   : > { %4075 = vmatpush1.bf16.msra.mxu0 %v2548_v8  ;;  %3297 = vmatprep.subr.bf16.mxu1 %v1943_v9  ;;  %v1191_v8 = vld [vmem:[%s6929_s9 + $0x408] sm:$0xff]  ;;  %v790_v16 = vcombine.high %v7373_v15, %v7373_v15 }
 0x2e2   : > { %4076 = vmatprep.subr.bf16.mxu0 %v2551_v52  ;;  %v1495_v9 = vld [vmem:[%s6929_s9 + $0xd88] sm:$0xff]  ;;  %v7370_v52 = vrot.slane %v7364_v2, %v6976_v51  ;;  %v1965_v22 = vunpack.c.h.s8.bf16 %v1191_v8 }
 0x2e3   : > { %v2573_v24 = vunpack.c.h.s8.bf16 %v1495_v9 }
 0x2e4   : > { %3298 = vmatpush1.bf16.msra.mxu1 %v1942_v7  ;;  %v1963_v7 = vunpack.c.l.s8.bf16 %v1191_v8  ;;  %v636_v14 = vcombine.high %v7370_v52, %v7370_v52 }
 0x2e5   : > { %4077 = vmatpush1.bf16.msra.mxu0 %v2550_v13  ;;  %3299 = vmatprep.subr.bf16.mxu1 %v1945_v11  ;;  %v2571_v13 = vunpack.c.l.s8.bf16 %v1495_v9  ;;  %v1190_v11 = vld [vmem:[%s6929_s9 + $0x400] sm:$0xff] }
 0x2e6   : > { %4078 = vmatprep.subr.bf16.mxu0 %v2553_v12  ;;  %v1494_v12 = vld [vmem:[%s6929_s9 + $0xd80] sm:$0xff] }
 0x2e7   : > { %v1198_v9 = vld [vmem:[%s6929_s9 + $0x440] sm:$0xff] }
 0x2e8   : > { %3300 = vmatpush1.bf16.msra.mxu1 %v1944_v17  ;;  %v995_v17 = vpack.c.bf16 %v7318_v23, %v7318_v23  ;;  %v1964_v23 = vunpack.c.h.s8.bf16 %v1190_v11 }
 0x2e9   : > { %4079 = vmatpush1.bf16.msra.mxu0 %v2552_v18  ;;  %3301 = vmatprep.subr.bf16.mxu1 %v1947_v19  ;;  %v1033_v18 = vpack.c.bf16 %v7322_v30, %v7322_v30  ;;  %v1962_v19 = vunpack.c.l.s8.bf16 %v1190_v11  ;;  %v2572_v30 = vunpack.c.h.s8.bf16 %v1494_v12 }
 0x2ea   : > { %4080 = vmatprep.subr.bf16.mxu0 %v2555_v21  ;;  %v2570_v21 = vunpack.c.l.s8.bf16 %v1494_v12  ;;  %v1201_v12 = vld [vmem:[%s6929_s9 + $0x458] sm:$0xff] }
 0x2ec   : > { %3302 = vmatpush1.bf16.msra.mxu1 %v1946_v25  ;;  %v1193_v25 = vld [vmem:[%s6929_s9 + $0x418] sm:$0xff] }
 0x2ed   : > { %4081 = vmatpush1.bf16.msra.mxu0 %v2554_v20  ;;  %3303 = vmatprep.subr.bf16.mxu1 %v1949_v28  ;;  %v1497_v20 = vld [vmem:[%s6929_s9 + $0xd98] sm:$0xff]  ;;  %v998_v28 = vpack.c.bf16 %v636_v14, %v636_v14  ;;  %v1967_v27 = vunpack.c.l.s8.bf16 %v1193_v25  ;;  %v1969_v36 = vunpack.c.h.s8.bf16 %v1193_v25 }
 0x2ee   : > { %4082 = vmatprep.subr.bf16.mxu0 %v2557_v26  ;;  %v1036_v26 = vpack.c.bf16 %v790_v16, %v790_v16  ;;  %v2575_v29 = vunpack.c.l.s8.bf16 %v1497_v20  ;;  %v2577_v37 = vunpack.c.h.s8.bf16 %v1497_v20  ;;  %v1505_v14 = vld [vmem:[%s6929_s9 + $0xdd8] sm:$0xff]  ;;  %v1980_v16 = vunpack.c.h.s8.bf16 %v1198_v9 }
 0x2ef   : > { %v1985_v20 = vunpack.c.h.s8.bf16 %v1201_v12 }
 0x2f0   : > { %3304 = vmatpush1.bf16.msra.mxu1 %v1948_v31  ;;  %v1192_v31 = vld [vmem:[%s6929_s9 + $0x410] sm:$0xff] }
 0x2f1   : > { %4083 = vmatpush1.bf16.msra.mxu0 %v2556_v32  ;;  %3305 = vmatprep.subr.bf16.mxu1 %v1951_v33  ;;  %v1496_v32 = vld [vmem:[%s6929_s9 + $0xd90] sm:$0xff]  ;;  %v1966_v33 = vunpack.c.l.s8.bf16 %v1192_v31 }
 0x2f2   : > { %4084 = vmatprep.subr.bf16.mxu0 %v2559_v34  ;;  %v2574_v34 = vunpack.c.l.s8.bf16 %v1496_v32 }
 0x2f4   : > { %3306 = vmatpush1.bf16.msra.mxu1 %v1950_v40  ;;  %v1195_v40 = vld [vmem:[%s6929_s9 + $0x428] sm:$0xff] }
 0x2f5   : > { %4085 = vmatpush1.bf16.msra.mxu0 %v2558_v41  ;;  %3307 = vmatprep.subr.bf16.mxu1 %v1953_v35  ;;  %v1499_v41 = vld [vmem:[%s6929_s9 + $0xda8] sm:$0xff]  ;;  %v1968_v35 = vunpack.c.h.s8.bf16 %v1192_v31  ;;  %v1971_v42 = vunpack.c.l.s8.bf16 %v1195_v40  ;;  %v1973_v49 = vunpack.c.h.s8.bf16 %v1195_v40 }
 0x2f6   : > { %4086 = vmatprep.subr.bf16.mxu0 %v2561_v44  ;;  %v2576_v44 = vunpack.c.h.s8.bf16 %v1496_v32  ;;  %v2579_v38 = vunpack.c.l.s8.bf16 %v1499_v41  ;;  %v2581_v50 = vunpack.c.h.s8.bf16 %v1499_v41  ;;  %v1202_v32 = vld [vmem:[%s6929_s9 + $0x460] sm:$0xff]  ;;  %v1205_v41 = vld [vmem:[%s6929_s9 + $0x478] sm:$0xff] }
 0x2f8   : > { %3308 = vmatpush1.bf16.msra.mxu1 %v1952_v47  ;;  %v1194_v47 = vld [vmem:[%s6929_s9 + $0x420] sm:$0xff] }
 0x2f9   : > { %4087 = vmatpush1.bf16.msra.mxu0 %v2560_v43  ;;  %3309 = vmatprep.subr.bf16.mxu1 %v1955_v45  ;;  %v1498_v43 = vld [vmem:[%s6929_s9 + $0xda0] sm:$0xff]  ;;  %v1970_v45 = vunpack.c.l.s8.bf16 %v1194_v47 }
 0x2fa   : > { %4088 = vmatprep.subr.bf16.mxu0 %v2563_v48  ;;  %v2578_v48 = vunpack.c.l.s8.bf16 %v1498_v43 }
 0x2fc   : > { %3310 = vmatpush1.bf16.msra.mxu1 %v1954_v54  ;;  %v1197_v54 = vld [vmem:[%s6929_s9 + $0x438] sm:$0xff] }
 0x2fd   : > { %4089 = vmatpush1.bf16.msra.mxu0 %v2562_v56  ;;  %3311 = vmatprep.subr.bf16.mxu1 %v1957_v57  ;;  %v1501_v56 = vld [vmem:[%s6929_s9 + $0xdb8] sm:$0xff]  ;;  %v1972_v57 = vunpack.c.h.s8.bf16 %v1194_v47  ;;  %v1975_v60 = vunpack.c.l.s8.bf16 %v1197_v54  ;;  %v1977_v62 = vunpack.c.h.s8.bf16 %v1197_v54 }
 0x2fe   : > { %4090 = vmatprep.subr.bf16.mxu0 %v2565_v59  ;;  %v2580_v59 = vunpack.c.h.s8.bf16 %v1498_v43  ;;  %v2583_v55 = vunpack.c.l.s8.bf16 %v1501_v56  ;;  %v2585_v63 = vunpack.c.h.s8.bf16 %v1501_v56  ;;  %v1204_v43 = vld [vmem:[%s6929_s9 + $0x470] sm:$0xff]  ;;  %v1993_v56 = vunpack.c.h.s8.bf16 %v1205_v41 }
 0x300   : > { %3312 = vmatpush1.bf16.msra.mxu1 %v1956_v46  ;;  %v1196_v46 = vld [vmem:[%s6929_s9 + $0x430] sm:$0xff] }
 0x301   : > { %4091 = vmatpush1.bf16.msra.mxu0 %v2564_v61  ;;  %3313 = vmatprep.subr.bf16.mxu1 %v1959_v58  ;;  %v1500_v61 = vld [vmem:[%s6929_s9 + $0xdb0] sm:$0xff]  ;;  %v1974_v58 = vunpack.c.l.s8.bf16 %v1196_v46 }
 0x302   : > { %4092 = vmatprep.subr.bf16.mxu0 %v2567_v0  ;;  %v2582_v0 = vunpack.c.l.s8.bf16 %v1500_v61 }
 0x304   : > { %3314 = vmatpush1.bf16.msra.mxu1 %v1958_v3  ;;  %v1503_v3 = vld [vmem:[%s6929_s9 + $0xdc8] sm:$0xff] }
 0x305   : > { %4093 = vmatpush1.bf16.msra.mxu0 %v2566_v4  ;;  %3315 = vmatprep.subr.bf16.mxu1 %v1961_v5  ;;  %v1976_v4 = vunpack.c.h.s8.bf16 %v1196_v46  ;;  %v2584_v5 = vunpack.c.h.s8.bf16 %v1500_v61  ;;  %v2587_v8 = vunpack.c.l.s8.bf16 %v1503_v3  ;;  %v2589_v11 = vunpack.c.h.s8.bf16 %v1503_v3 }
 0x306   : > { %4094 = vmatprep.subr.bf16.mxu0 %v2569_v6  ;;  %v1979_v6 = vunpack.c.l.s8.bf16 %v1199_v1  ;;  %v1992_v46 = vunpack.c.h.s8.bf16 %v1204_v43 }
 0x308   : > { %3316 = vmatpush1.bf16.msra.mxu1 %v1960_v53  ;;  %v1502_v53 = vld [vmem:[%s6929_s9 + $0xdc0] sm:$0xff] }
 0x309   : > { %4095 = vmatpush1.bf16.msra.mxu0 %v2568_v10  ;;  %3326 = vmatprep.subr.bf16.mxu1 %v1963_v7  ;;  %v1978_v10 = vunpack.c.l.s8.bf16 %v1198_v9  ;;  %v2586_v7 = vunpack.c.l.s8.bf16 %v1502_v53 }
 0x30a   : > { %4105 = vmatprep.subr.bf16.mxu0 %v2571_v13  ;;  %v1981_v13 = vunpack.c.h.s8.bf16 %v1199_v1 }
 0x30b   : > { %3318 = vmatmul.mubr.bf16.vlgmr.msra.gmra.mrb[0].mxu1 %v995_v17  ;;  %v2588_v17 = vunpack.c.h.s8.bf16 %v1502_v53 }
 0x30c   : > { %4097 = vmatmul.mubr.bf16.vlgmr.msra.gmra.mrb[0].mxu0 %v1033_v18  ;;  %3327 = vmatpush1.bf16.msra.mxu1 %v1962_v19  ;;  %v1983_v18 = vunpack.c.l.s8.bf16 %v1201_v12  ;;  %v2591_v19 = vunpack.c.l.s8.bf16 %v1505_v14 }
 0x30d   : > { %4106 = vmatpush1.bf16.msra.mxu0 %v2570_v21  ;;  %3328 = vmatprep.subr.bf16.mxu1 %v1965_v22  ;;  %v1200_v21 = vld [vmem:[%s6929_s9 + $0x450] sm:$0xff] }
 0x30e   : > { %4107 = vmatprep.subr.bf16.mxu0 %v2573_v24  ;;  %3358 = vmatprep.mubr.bf16.mxu1 %v998_v28  ;;  %v1504_v22 = vld [vmem:[%s6929_s9 + $0xdd0] sm:$0xff]  ;;  %v1982_v24 = vunpack.c.l.s8.bf16 %v1200_v21  ;;  %v2593_v28 = vunpack.c.h.s8.bf16 %v1505_v14 }
 0x30f   : > { %4137 = vmatprep.mubr.bf16.mxu0 %v1036_v26  ;;  %v2590_v25 = vunpack.c.l.s8.bf16 %v1504_v22  ;;  %v1203_v26 = vld [vmem:[%s6929_s9 + $0x468] sm:$0xff] }
 0x310   : > { %3329 = vmatpush1.bf16.msra.mxu1 %v1964_v23  ;;  %v1507_v23 = vld [vmem:[%s6929_s9 + $0xde8] sm:$0xff] }
 0x311   : > { %4108 = vmatpush1.bf16.msra.mxu0 %v2572_v30  ;;  %3330 = vmatprep.subr.bf16.mxu1 %v1967_v27  ;;  %v1984_v30 = vunpack.c.h.s8.bf16 %v1200_v21  ;;  %v2592_v27 = vunpack.c.h.s8.bf16 %v1504_v22  ;;  %v2595_v31 = vunpack.c.l.s8.bf16 %v1507_v23  ;;  %v2597_v40 = vunpack.c.h.s8.bf16 %v1507_v23 }
 0x312   : > { %4109 = vmatprep.subr.bf16.mxu0 %v2575_v29  ;;  %v1987_v29 = vunpack.c.l.s8.bf16 %v1203_v26 }
 0x314   : > { %3331 = vmatpush1.bf16.msra.mxu1 %v1966_v33  ;;  %v1506_v33 = vld [vmem:[%s6929_s9 + $0xde0] sm:$0xff] }
 0x315   : > { %4110 = vmatpush1.bf16.msra.mxu0 %v2574_v34  ;;  %3332 = vmatprep.subr.bf16.mxu1 %v1969_v36  ;;  %v1986_v34 = vunpack.c.l.s8.bf16 %v1202_v32  ;;  %v2594_v36 = vunpack.c.l.s8.bf16 %v1506_v33 }
 0x316   : > { %4111 = vmatprep.subr.bf16.mxu0 %v2577_v37  ;;  %v1989_v37 = vunpack.c.h.s8.bf16 %v1203_v26 }
 0x318   : > { %3333 = vmatpush1.bf16.msra.mxu1 %v1968_v35  ;;  %v1509_v35 = vld [vmem:[%s6929_s9 + $0xdf8] sm:$0xff] }
 0x319   : > { %4112 = vmatpush1.bf16.msra.mxu0 %v2576_v44  ;;  %3334 = vmatprep.subr.bf16.mxu1 %v1971_v42  ;;  %v1988_v44 = vunpack.c.h.s8.bf16 %v1202_v32  ;;  %v2596_v42 = vunpack.c.h.s8.bf16 %v1506_v33  ;;  %v2599_v47 = vunpack.c.l.s8.bf16 %v1509_v35 }
 0x31a   : > { %4113 = vmatprep.subr.bf16.mxu0 %v2579_v38  ;;  %v1991_v38 = vunpack.c.l.s8.bf16 %v1205_v41 }
 0x31c   : > { %3335 = vmatpush1.bf16.msra.mxu1 %v1970_v45  ;;  %v1508_v45 = vld [vmem:[%s6929_s9 + $0xdf0] sm:$0xff] }
 0x31d   : > { %4114 = vmatpush1.bf16.msra.mxu0 %v2578_v48  ;;  %3336 = vmatprep.subr.bf16.mxu1 %v1973_v49  ;;  %v621_v48 = vcombine.high %v7364_v2, %v7364_v2  ;;  %v7415_v49 = vld [vmem:[#allocation3 + $0x70] sm:$0xff]  ;;  %v2598_v54 = vunpack.c.l.s8.bf16 %v1508_v45  ;;  %v2600_v61 = vunpack.c.h.s8.bf16 %v1508_v45 }
 0x31e   : > { %4115 = vmatprep.subr.bf16.mxu0 %v2581_v50  ;;  %v1990_v50 = vunpack.c.l.s8.bf16 %v1204_v43  ;;  %v7424_v2 = vrot.slane %v7415_v49, %v6976_v51 }
 0x320   : > { %3337 = vmatpush1.bf16.msra.mxu1 %v1972_v57  ;;  %v2601_v57 = vunpack.c.h.s8.bf16 %v1509_v35  ;;  %v806_v3 = vcombine.high %v7424_v2, %v7424_v2 }
 0x321   : > { %4116 = vmatpush1.bf16.msra.mxu0 %v2580_v59  ;;  %3338 = vmatprep.subr.bf16.mxu1 %v1975_v60  ;;  %v1207_v59 = vld [vmem:[%s6929_s9 + $0x488] sm:$0xff] }
 0x322   : > { %4117 = vmatprep.subr.bf16.mxu0 %v2583_v55  ;;  %v1511_v60 = vld [vmem:[%s6929_s9 + $0xe08] sm:$0xff]  ;;  %v7420_v55 = vrot.slane %v621_v48, %v6976_v51  ;;  %v1997_v9 = vunpack.c.h.s8.bf16 %v1207_v59 }
 0x323   : > { %v2605_v53 = vunpack.c.h.s8.bf16 %v1511_v60  ;;  %v1215_v48 = vld [vmem:[%s6929_s9 + $0x4c8] sm:$0xff] }
 0x324   : > { %3339 = vmatpush1.bf16.msra.mxu1 %v1974_v58  ;;  %v1995_v58 = vunpack.c.l.s8.bf16 %v1207_v59  ;;  %v637_v1 = vcombine.high %v7420_v55, %v7420_v55 }
 0x325   : > { %4118 = vmatpush1.bf16.msra.mxu0 %v2582_v0  ;;  %3340 = vmatprep.subr.bf16.mxu1 %v1977_v62  ;;  %v2603_v0 = vunpack.c.l.s8.bf16 %v1511_v60  ;;  %v1206_v62 = vld [vmem:[%s6929_s9 + $0x480] sm:$0xff] }
 0x326   : > { %4119 = vmatprep.subr.bf16.mxu0 %v2585_v63  ;;  %v1510_v63 = vld [vmem:[%s6929_s9 + $0xe00] sm:$0xff] }
 0x327   : > { %v1214_v60 = vld [vmem:[%s6929_s9 + $0x4c0] sm:$0xff] }
 0x328   : > { %3341 = vmatpush1.bf16.msra.mxu1 %v1976_v4  ;;  %v997_v4 = vpack.c.bf16 %v7370_v52, %v7370_v52  ;;  %v1996_v52 = vunpack.c.h.s8.bf16 %v1206_v62 }
 0x329   : > { %4120 = vmatpush1.bf16.msra.mxu0 %v2584_v5  ;;  %3342 = vmatprep.subr.bf16.mxu1 %v1979_v6  ;;  %v1035_v5 = vpack.c.bf16 %v7373_v15, %v7373_v15  ;;  %v1994_v6 = vunpack.c.l.s8.bf16 %v1206_v62  ;;  %v2604_v15 = vunpack.c.h.s8.bf16 %v1510_v63 }
 0x32a   : > { %4121 = vmatprep.subr.bf16.mxu0 %v2587_v8  ;;  %v2602_v8 = vunpack.c.l.s8.bf16 %v1510_v63  ;;  %v1217_v63 = vld [vmem:[%s6929_s9 + $0x4d8] sm:$0xff] }
 0x32c   : > { %3343 = vmatpush1.bf16.msra.mxu1 %v1978_v10  ;;  %v1209_v10 = vld [vmem:[%s6929_s9 + $0x498] sm:$0xff] }
 0x32d   : > { %4122 = vmatpush1.bf16.msra.mxu0 %v2586_v7  ;;  %3344 = vmatprep.subr.bf16.mxu1 %v1981_v13  ;;  %v1513_v7 = vld [vmem:[%s6929_s9 + $0xe18] sm:$0xff]  ;;  %v1000_v13 = vpack.c.bf16 %v637_v1, %v637_v1  ;;  %v1999_v12 = vunpack.c.l.s8.bf16 %v1209_v10  ;;  %v2001_v21 = vunpack.c.h.s8.bf16 %v1209_v10 }
 0x32e   : > { %4123 = vmatprep.subr.bf16.mxu0 %v2589_v11  ;;  %v1038_v11 = vpack.c.bf16 %v806_v3, %v806_v3  ;;  %v2607_v14 = vunpack.c.l.s8.bf16 %v1513_v7  ;;  %v2609_v22 = vunpack.c.h.s8.bf16 %v1513_v7  ;;  %v1521_v1 = vld [vmem:[%s6929_s9 + $0xe58] sm:$0xff]  ;;  %v2012_v3 = vunpack.c.h.s8.bf16 %v1214_v60 }
 0x32f   : > { %v2017_v7 = vunpack.c.h.s8.bf16 %v1217_v63 }
 0x330   : > { %3345 = vmatpush1.bf16.msra.mxu1 %v1980_v16  ;;  %v1208_v16 = vld [vmem:[%s6929_s9 + $0x490] sm:$0xff] }
 0x331   : > { %4124 = vmatpush1.bf16.msra.mxu0 %v2588_v17  ;;  %3346 = vmatprep.subr.bf16.mxu1 %v1983_v18  ;;  %v1512_v17 = vld [vmem:[%s6929_s9 + $0xe10] sm:$0xff]  ;;  %v1998_v18 = vunpack.c.l.s8.bf16 %v1208_v16 }
 0x332   : > { %4125 = vmatprep.subr.bf16.mxu0 %v2591_v19  ;;  %v2606_v19 = vunpack.c.l.s8.bf16 %v1512_v17 }
 0x334   : > { %3347 = vmatpush1.bf16.msra.mxu1 %v1982_v24  ;;  %v1211_v24 = vld [vmem:[%s6929_s9 + $0x4a8] sm:$0xff] }
 0x335   : > { %4126 = vmatpush1.bf16.msra.mxu0 %v2590_v25  ;;  %3348 = vmatprep.subr.bf16.mxu1 %v1985_v20  ;;  %v1515_v25 = vld [vmem:[%s6929_s9 + $0xe28] sm:$0xff]  ;;  %v2000_v20 = vunpack.c.h.s8.bf16 %v1208_v16  ;;  %v2003_v26 = vunpack.c.l.s8.bf16 %v1211_v24  ;;  %v2005_v32 = vunpack.c.h.s8.bf16 %v1211_v24 }
 0x336   : > { %4127 = vmatprep.subr.bf16.mxu0 %v2593_v28  ;;  %v2608_v28 = vunpack.c.h.s8.bf16 %v1512_v17  ;;  %v2611_v23 = vunpack.c.l.s8.bf16 %v1515_v25  ;;  %v2613_v33 = vunpack.c.h.s8.bf16 %v1515_v25  ;;  %v1218_v17 = vld [vmem:[%s6929_s9 + $0x4e0] sm:$0xff]  ;;  %v1221_v25 = vld [vmem:[%s6929_s9 + $0x4f8] sm:$0xff] }
 0x338   : > { %3349 = vmatpush1.bf16.msra.mxu1 %v1984_v30  ;;  %v1210_v30 = vld [vmem:[%s6929_s9 + $0x4a0] sm:$0xff] }
 0x339   : > { %4128 = vmatpush1.bf16.msra.mxu0 %v2592_v27  ;;  %3350 = vmatprep.subr.bf16.mxu1 %v1987_v29  ;;  %v1514_v27 = vld [vmem:[%s6929_s9 + $0xe20] sm:$0xff]  ;;  %v2002_v29 = vunpack.c.l.s8.bf16 %v1210_v30 }
 0x33a   : > { %4129 = vmatprep.subr.bf16.mxu0 %v2595_v31  ;;  %v2610_v31 = vunpack.c.l.s8.bf16 %v1514_v27 }
 0x33c   : > { %3351 = vmatpush1.bf16.msra.mxu1 %v1986_v34  ;;  %v1213_v34 = vld [vmem:[%s6929_s9 + $0x4b8] sm:$0xff] }
 0x33d   : > { %4130 = vmatpush1.bf16.msra.mxu0 %v2594_v36  ;;  %3352 = vmatprep.subr.bf16.mxu1 %v1989_v37  ;;  %v1517_v36 = vld [vmem:[%s6929_s9 + $0xe38] sm:$0xff]  ;;  %v2004_v37 = vunpack.c.h.s8.bf16 %v1210_v30  ;;  %v2007_v41 = vunpack.c.l.s8.bf16 %v1213_v34  ;;  %v2009_v43 = vunpack.c.h.s8.bf16 %v1213_v34 }
 0x33e   : > { %4131 = vmatprep.subr.bf16.mxu0 %v2597_v40  ;;  %v2612_v40 = vunpack.c.h.s8.bf16 %v1514_v27  ;;  %v2615_v35 = vunpack.c.l.s8.bf16 %v1517_v36  ;;  %v2617_v45 = vunpack.c.h.s8.bf16 %v1517_v36  ;;  %v1220_v27 = vld [vmem:[%s6929_s9 + $0x4f0] sm:$0xff]  ;;  %v2025_v36 = vunpack.c.h.s8.bf16 %v1221_v25 }
 0x340   : > { %3353 = vmatpush1.bf16.msra.mxu1 %v1988_v44  ;;  %v1212_v44 = vld [vmem:[%s6929_s9 + $0x4b0] sm:$0xff] }
 0x341   : > { %4132 = vmatpush1.bf16.msra.mxu0 %v2596_v42  ;;  %3354 = vmatprep.subr.bf16.mxu1 %v1991_v38  ;;  %v1516_v42 = vld [vmem:[%s6929_s9 + $0xe30] sm:$0xff]  ;;  %v2006_v38 = vunpack.c.l.s8.bf16 %v1212_v44 }
 0x342   : > { %4133 = vmatprep.subr.bf16.mxu0 %v2599_v47  ;;  %v2614_v47 = vunpack.c.l.s8.bf16 %v1516_v42 }
 0x344   : > { %3355 = vmatpush1.bf16.msra.mxu1 %v1990_v50  ;;  %v1519_v50 = vld [vmem:[%s6929_s9 + $0xe48] sm:$0xff] }
 0x345   : > { %4134 = vmatpush1.bf16.msra.mxu0 %v2598_v54  ;;  %3356 = vmatprep.subr.bf16.mxu1 %v1993_v56  ;;  %v2008_v54 = vunpack.c.h.s8.bf16 %v1212_v44  ;;  %v2616_v56 = vunpack.c.h.s8.bf16 %v1516_v42  ;;  %v2619_v59 = vunpack.c.l.s8.bf16 %v1519_v50  ;;  %v2621_v62 = vunpack.c.h.s8.bf16 %v1519_v50 }
 0x346   : > { %4135 = vmatprep.subr.bf16.mxu0 %v2601_v57  ;;  %v2011_v57 = vunpack.c.l.s8.bf16 %v1215_v48  ;;  %v2024_v44 = vunpack.c.h.s8.bf16 %v1220_v27 }
 0x348   : > { %3357 = vmatpush1.bf16.msra.mxu1 %v1992_v46  ;;  %v1518_v46 = vld [vmem:[%s6929_s9 + $0xe40] sm:$0xff] }
 0x349   : > { %4136 = vmatpush1.bf16.msra.mxu0 %v2600_v61  ;;  %3367 = vmatprep.subr.bf16.mxu1 %v1995_v58  ;;  %v2010_v61 = vunpack.c.l.s8.bf16 %v1214_v60  ;;  %v2618_v58 = vunpack.c.l.s8.bf16 %v1518_v46 }
 0x34a   : > { %4146 = vmatprep.subr.bf16.mxu0 %v2603_v0  ;;  %v2013_v0 = vunpack.c.h.s8.bf16 %v1215_v48 }
 0x34b   : > { %3359 = vmatmul.mubr.bf16.vlgmr.msra.gmra.mrb[0].mxu1 %v997_v4  ;;  %v2620_v4 = vunpack.c.h.s8.bf16 %v1518_v46 }
 0x34c   : > { %4138 = vmatmul.mubr.bf16.vlgmr.msra.gmra.mrb[0].mxu0 %v1035_v5  ;;  %3368 = vmatpush1.bf16.msra.mxu1 %v1994_v6  ;;  %v2015_v5 = vunpack.c.l.s8.bf16 %v1217_v63  ;;  %v2623_v6 = vunpack.c.l.s8.bf16 %v1521_v1 }
 0x34d   : > { %4147 = vmatpush1.bf16.msra.mxu0 %v2602_v8  ;;  %3369 = vmatprep.subr.bf16.mxu1 %v1997_v9  ;;  %v1216_v8 = vld [vmem:[%s6929_s9 + $0x4d0] sm:$0xff] }
 0x34e   : > { %4148 = vmatprep.subr.bf16.mxu0 %v2605_v53  ;;  %3399 = vmatprep.mubr.bf16.mxu1 %v1000_v13  ;;  %v1520_v9 = vld [vmem:[%s6929_s9 + $0xe50] sm:$0xff]  ;;  %v2014_v53 = vunpack.c.l.s8.bf16 %v1216_v8  ;;  %v2625_v13 = vunpack.c.h.s8.bf16 %v1521_v1 }
 0x34f   : > { %4178 = vmatprep.mubr.bf16.mxu0 %v1038_v11  ;;  %v2622_v10 = vunpack.c.l.s8.bf16 %v1520_v9  ;;  %v1219_v11 = vld [vmem:[%s6929_s9 + $0x4e8] sm:$0xff] }
 0x350   : > { %3370 = vmatpush1.bf16.msra.mxu1 %v1996_v52  ;;  %v1523_v52 = vld [vmem:[%s6929_s9 + $0xe68] sm:$0xff] }
 0x351   : > { %4149 = vmatpush1.bf16.msra.mxu0 %v2604_v15  ;;  %3371 = vmatprep.subr.bf16.mxu1 %v1999_v12  ;;  %v2016_v15 = vunpack.c.h.s8.bf16 %v1216_v8  ;;  %v2624_v12 = vunpack.c.h.s8.bf16 %v1520_v9  ;;  %v2627_v16 = vunpack.c.l.s8.bf16 %v1523_v52  ;;  %v2629_v24 = vunpack.c.h.s8.bf16 %v1523_v52 }
 0x352   : > { %4150 = vmatprep.subr.bf16.mxu0 %v2607_v14  ;;  %v2019_v14 = vunpack.c.l.s8.bf16 %v1219_v11 }
 0x354   : > { %3372 = vmatpush1.bf16.msra.mxu1 %v1998_v18  ;;  %v1522_v18 = vld [vmem:[%s6929_s9 + $0xe60] sm:$0xff] }
 0x355   : > { %4151 = vmatpush1.bf16.msra.mxu0 %v2606_v19  ;;  %3373 = vmatprep.subr.bf16.mxu1 %v2001_v21  ;;  %v2018_v19 = vunpack.c.l.s8.bf16 %v1218_v17  ;;  %v2626_v21 = vunpack.c.l.s8.bf16 %v1522_v18 }
 0x356   : > { %4152 = vmatprep.subr.bf16.mxu0 %v2609_v22  ;;  %v2021_v22 = vunpack.c.h.s8.bf16 %v1219_v11 }
 0x358   : > { %3374 = vmatpush1.bf16.msra.mxu1 %v2000_v20  ;;  %v1525_v20 = vld [vmem:[%s6929_s9 + $0xe78] sm:$0xff] }
 0x359   : > { %4153 = vmatpush1.bf16.msra.mxu0 %v2608_v28  ;;  %3375 = vmatprep.subr.bf16.mxu1 %v2003_v26  ;;  %v2020_v28 = vunpack.c.h.s8.bf16 %v1218_v17  ;;  %v2628_v26 = vunpack.c.h.s8.bf16 %v1522_v18  ;;  %v2631_v30 = vunpack.c.l.s8.bf16 %v1525_v20 }
 0x35a   : > { %4154 = vmatprep.subr.bf16.mxu0 %v2611_v23  ;;  %v2023_v23 = vunpack.c.l.s8.bf16 %v1221_v25 }
 0x35c   : > { %3376 = vmatpush1.bf16.msra.mxu1 %v2002_v29  ;;  %v1524_v29 = vld [vmem:[%s6929_s9 + $0xe70] sm:$0xff] }
 0x35d   : > { %4155 = vmatpush1.bf16.msra.mxu0 %v2610_v31  ;;  %3377 = vmatprep.subr.bf16.mxu1 %v2005_v32  ;;  %v791_v31 = vcombine.high %v7415_v49, %v7415_v49  ;;  %v7466_v32 = vld [vmem:[#allocation3 + $0x28] sm:$0xff]  ;;  %v2630_v34 = vunpack.c.l.s8.bf16 %v1524_v29  ;;  %v2632_v42 = vunpack.c.h.s8.bf16 %v1524_v29 }
 0x35e   : > { %4156 = vmatprep.subr.bf16.mxu0 %v2613_v33  ;;  %v2022_v33 = vunpack.c.l.s8.bf16 %v1220_v27 }
 0x35f   : > { %v7475_v49 = vrot.slane %v791_v31, %v6976_v51  ;;  %v1231_v31 = vld [vmem:[%s6929_s9 + $0x548] sm:$0xff] }
 0x360   : > { %3378 = vmatpush1.bf16.msra.mxu1 %v2004_v37  ;;  %v2633_v37 = vunpack.c.h.s8.bf16 %v1525_v20 }
 0x361   : > { %4157 = vmatpush1.bf16.msra.mxu0 %v2612_v40  ;;  %3379 = vmatprep.subr.bf16.mxu1 %v2007_v41  ;;  %v1223_v40 = vld [vmem:[%s6929_s9 + $0x508] sm:$0xff]  ;;  %v807_v50 = vcombine.high %v7475_v49, %v7475_v49 }
 0x362   : > { %4158 = vmatprep.subr.bf16.mxu0 %v2615_v35  ;;  %v1527_v41 = vld [vmem:[%s6929_s9 + $0xe88] sm:$0xff]  ;;  %v7472_v35 = vrot.slane %v7466_v32, %v6976_v51  ;;  %v2029_v60 = vunpack.c.h.s8.bf16 %v1223_v40 }
 0x363   : > { %v2637_v46 = vunpack.c.h.s8.bf16 %v1527_v41 }
 0x364   : > { %3380 = vmatpush1.bf16.msra.mxu1 %v2006_v38  ;;  %v2027_v38 = vunpack.c.l.s8.bf16 %v1223_v40  ;;  %v653_v48 = vcombine.high %v7472_v35, %v7472_v35 }
 0x365   : > { %4159 = vmatpush1.bf16.msra.mxu0 %v2614_v47  ;;  %3381 = vmatprep.subr.bf16.mxu1 %v2009_v43  ;;  %v2635_v47 = vunpack.c.l.s8.bf16 %v1527_v41  ;;  %v1222_v43 = vld [vmem:[%s6929_s9 + $0x500] sm:$0xff] }
 0x366   : > { %4160 = vmatprep.subr.bf16.mxu0 %v2617_v45  ;;  %v1526_v45 = vld [vmem:[%s6929_s9 + $0xe80] sm:$0xff] }
 0x367   : > { %v1230_v41 = vld [vmem:[%s6929_s9 + $0x540] sm:$0xff] }
 0x368   : > { %3382 = vmatpush1.bf16.msra.mxu1 %v2008_v54  ;;  %v999_v54 = vpack.c.bf16 %v7420_v55, %v7420_v55  ;;  %v2028_v55 = vunpack.c.h.s8.bf16 %v1222_v43 }
 0x369   : > { %4161 = vmatpush1.bf16.msra.mxu0 %v2616_v56  ;;  %3383 = vmatprep.subr.bf16.mxu1 %v2011_v57  ;;  %v1037_v56 = vpack.c.bf16 %v7424_v2, %v7424_v2  ;;  %v2026_v57 = vunpack.c.l.s8.bf16 %v1222_v43  ;;  %v2636_v2 = vunpack.c.h.s8.bf16 %v1526_v45 }
 0x36a   : > { %4162 = vmatprep.subr.bf16.mxu0 %v2619_v59  ;;  %v2634_v59 = vunpack.c.l.s8.bf16 %v1526_v45  ;;  %v1233_v45 = vld [vmem:[%s6929_s9 + $0x558] sm:$0xff] }
 0x36c   : > { %3384 = vmatpush1.bf16.msra.mxu1 %v2010_v61  ;;  %v1225_v61 = vld [vmem:[%s6929_s9 + $0x518] sm:$0xff] }
 0x36d   : > { %4163 = vmatpush1.bf16.msra.mxu0 %v2618_v58  ;;  %3385 = vmatprep.subr.bf16.mxu1 %v2013_v0  ;;  %v1529_v58 = vld [vmem:[%s6929_s9 + $0xe98] sm:$0xff]  ;;  %v1002_v0 = vpack.c.bf16 %v653_v48, %v653_v48  ;;  %v2031_v63 = vunpack.c.l.s8.bf16 %v1225_v61  ;;  %v2033_v8 = vunpack.c.h.s8.bf16 %v1225_v61 }
 0x36e   : > { %4164 = vmatprep.subr.bf16.mxu0 %v2621_v62  ;;  %v1040_v62 = vpack.c.bf16 %v807_v50, %v807_v50  ;;  %v2639_v1 = vunpack.c.l.s8.bf16 %v1529_v58  ;;  %v2641_v9 = vunpack.c.h.s8.bf16 %v1529_v58  ;;  %v1537_v48 = vld [vmem:[%s6929_s9 + $0xed8] sm:$0xff]  ;;  %v2044_v50 = vunpack.c.h.s8.bf16 %v1230_v41 }
 0x36f   : > { %v2049_v58 = vunpack.c.h.s8.bf16 %v1233_v45 }
 0x370   : > { %3386 = vmatpush1.bf16.msra.mxu1 %v2012_v3  ;;  %v1224_v3 = vld [vmem:[%s6929_s9 + $0x510] sm:$0xff] }
 0x371   : > { %4165 = vmatpush1.bf16.msra.mxu0 %v2620_v4  ;;  %3387 = vmatprep.subr.bf16.mxu1 %v2015_v5  ;;  %v1528_v4 = vld [vmem:[%s6929_s9 + $0xe90] sm:$0xff]  ;;  %v2030_v5 = vunpack.c.l.s8.bf16 %v1224_v3 }
 0x372   : > { %4166 = vmatprep.subr.bf16.mxu0 %v2623_v6  ;;  %v2638_v6 = vunpack.c.l.s8.bf16 %v1528_v4 }
 0x374   : > { %3388 = vmatpush1.bf16.msra.mxu1 %v2014_v53  ;;  %v1227_v53 = vld [vmem:[%s6929_s9 + $0x528] sm:$0xff] }
 0x375   : > { %4167 = vmatpush1.bf16.msra.mxu0 %v2622_v10  ;;  %3389 = vmatprep.subr.bf16.mxu1 %v2017_v7  ;;  %v1531_v10 = vld [vmem:[%s6929_s9 + $0xea8] sm:$0xff]  ;;  %v2032_v7 = vunpack.c.h.s8.bf16 %v1224_v3  ;;  %v2035_v11 = vunpack.c.l.s8.bf16 %v1227_v53  ;;  %v2037_v17 = vunpack.c.h.s8.bf16 %v1227_v53 }
 0x376   : > { %4168 = vmatprep.subr.bf16.mxu0 %v2625_v13  ;;  %v2640_v13 = vunpack.c.h.s8.bf16 %v1528_v4  ;;  %v2643_v52 = vunpack.c.l.s8.bf16 %v1531_v10  ;;  %v2645_v18 = vunpack.c.h.s8.bf16 %v1531_v10  ;;  %v1234_v4 = vld [vmem:[%s6929_s9 + $0x560] sm:$0xff]  ;;  %v1237_v10 = vld [vmem:[%s6929_s9 + $0x578] sm:$0xff] }
 0x378   : > { %3390 = vmatpush1.bf16.msra.mxu1 %v2016_v15  ;;  %v1226_v15 = vld [vmem:[%s6929_s9 + $0x520] sm:$0xff] }
 0x379   : > { %4169 = vmatpush1.bf16.msra.mxu0 %v2624_v12  ;;  %3391 = vmatprep.subr.bf16.mxu1 %v2019_v14  ;;  %v1530_v12 = vld [vmem:[%s6929_s9 + $0xea0] sm:$0xff]  ;;  %v2034_v14 = vunpack.c.l.s8.bf16 %v1226_v15 }
 0x37a   : > { %4170 = vmatprep.subr.bf16.mxu0 %v2627_v16  ;;  %v2642_v16 = vunpack.c.l.s8.bf16 %v1530_v12 }
 0x37c   : > { %3392 = vmatpush1.bf16.msra.mxu1 %v2018_v19  ;;  %v1229_v19 = vld [vmem:[%s6929_s9 + $0x538] sm:$0xff] }
 0x37d   : > { %4171 = vmatpush1.bf16.msra.mxu0 %v2626_v21  ;;  %3393 = vmatprep.subr.bf16.mxu1 %v2021_v22  ;;  %v1533_v21 = vld [vmem:[%s6929_s9 + $0xeb8] sm:$0xff]  ;;  %v2036_v22 = vunpack.c.h.s8.bf16 %v1226_v15  ;;  %v2039_v25 = vunpack.c.l.s8.bf16 %v1229_v19  ;;  %v2041_v27 = vunpack.c.h.s8.bf16 %v1229_v19 }
 0x37e   : > { %4172 = vmatprep.subr.bf16.mxu0 %v2629_v24  ;;  %v2644_v24 = vunpack.c.h.s8.bf16 %v1530_v12  ;;  %v2647_v20 = vunpack.c.l.s8.bf16 %v1533_v21  ;;  %v2649_v29 = vunpack.c.h.s8.bf16 %v1533_v21  ;;  %v1236_v12 = vld [vmem:[%s6929_s9 + $0x570] sm:$0xff]  ;;  %v2057_v21 = vunpack.c.h.s8.bf16 %v1237_v10 }
 0x380   : > { %3394 = vmatpush1.bf16.msra.mxu1 %v2020_v28  ;;  %v1228_v28 = vld [vmem:[%s6929_s9 + $0x530] sm:$0xff] }
 0x381   : > { %4173 = vmatpush1.bf16.msra.mxu0 %v2628_v26  ;;  %3395 = vmatprep.subr.bf16.mxu1 %v2023_v23  ;;  %v1532_v26 = vld [vmem:[%s6929_s9 + $0xeb0] sm:$0xff]  ;;  %v2038_v23 = vunpack.c.l.s8.bf16 %v1228_v28 }
 0x382   : > { %4174 = vmatprep.subr.bf16.mxu0 %v2631_v30  ;;  %v2646_v30 = vunpack.c.l.s8.bf16 %v1532_v26 }
 0x384   : > { %3396 = vmatpush1.bf16.msra.mxu1 %v2022_v33  ;;  %v1535_v33 = vld [vmem:[%s6929_s9 + $0xec8] sm:$0xff] }
 0x385   : > { %4175 = vmatpush1.bf16.msra.mxu0 %v2630_v34  ;;  %3397 = vmatprep.subr.bf16.mxu1 %v2025_v36  ;;  %v2040_v34 = vunpack.c.h.s8.bf16 %v1228_v28  ;;  %v2648_v36 = vunpack.c.h.s8.bf16 %v1532_v26  ;;  %v2651_v40 = vunpack.c.l.s8.bf16 %v1535_v33  ;;  %v2653_v43 = vunpack.c.h.s8.bf16 %v1535_v33 }
 0x386   : > { %4176 = vmatprep.subr.bf16.mxu0 %v2633_v37  ;;  %v2043_v37 = vunpack.c.l.s8.bf16 %v1231_v31  ;;  %v2056_v28 = vunpack.c.h.s8.bf16 %v1236_v12 }
 0x388   : > { %3398 = vmatpush1.bf16.msra.mxu1 %v2024_v44  ;;  %v1534_v44 = vld [vmem:[%s6929_s9 + $0xec0] sm:$0xff] }
 0x389   : > { %4177 = vmatpush1.bf16.msra.mxu0 %v2632_v42  ;;  %3408 = vmatprep.subr.bf16.mxu1 %v2027_v38  ;;  %v2042_v42 = vunpack.c.l.s8.bf16 %v1230_v41  ;;  %v2650_v38 = vunpack.c.l.s8.bf16 %v1534_v44 }
 0x38a   : > { %4187 = vmatprep.subr.bf16.mxu0 %v2635_v47  ;;  %v2045_v47 = vunpack.c.h.s8.bf16 %v1231_v31 }
 0x38b   : > { %3400 = vmatmul.mubr.bf16.vlgmr.msra.gmra.mrb[0].mxu1 %v999_v54  ;;  %v2652_v54 = vunpack.c.h.s8.bf16 %v1534_v44 }
 0x38c   : > { %4179 = vmatmul.mubr.bf16.vlgmr.msra.gmra.mrb[0].mxu0 %v1037_v56  ;;  %3409 = vmatpush1.bf16.msra.mxu1 %v2026_v57  ;;  %v2047_v56 = vunpack.c.l.s8.bf16 %v1233_v45  ;;  %v2655_v57 = vunpack.c.l.s8.bf16 %v1537_v48 }
 0x38d   : > { %4188 = vmatpush1.bf16.msra.mxu0 %v2634_v59  ;;  %3410 = vmatprep.subr.bf16.mxu1 %v2029_v60  ;;  %v1232_v59 = vld [vmem:[%s6929_s9 + $0x550] sm:$0xff] }
 0x38e   : > { %4189 = vmatprep.subr.bf16.mxu0 %v2637_v46  ;;  %3440 = vmatprep.mubr.bf16.mxu1 %v1002_v0  ;;  %v1536_v60 = vld [vmem:[%s6929_s9 + $0xed0] sm:$0xff]  ;;  %v2046_v46 = vunpack.c.l.s8.bf16 %v1232_v59  ;;  %v2657_v0 = vunpack.c.h.s8.bf16 %v1537_v48 }
 0x38f   : > { %4219 = vmatprep.mubr.bf16.mxu0 %v1040_v62  ;;  %v2654_v61 = vunpack.c.l.s8.bf16 %v1536_v60  ;;  %v1235_v62 = vld [vmem:[%s6929_s9 + $0x568] sm:$0xff] }
 0x390   : > { %3411 = vmatpush1.bf16.msra.mxu1 %v2028_v55  ;;  %v1539_v55 = vld [vmem:[%s6929_s9 + $0xee8] sm:$0xff] }
 0x391   : > { %4190 = vmatpush1.bf16.msra.mxu0 %v2636_v2  ;;  %3412 = vmatprep.subr.bf16.mxu1 %v2031_v63  ;;  %v2048_v2 = vunpack.c.h.s8.bf16 %v1232_v59  ;;  %v2656_v63 = vunpack.c.h.s8.bf16 %v1536_v60  ;;  %v2659_v3 = vunpack.c.l.s8.bf16 %v1539_v55  ;;  %v2661_v53 = vunpack.c.h.s8.bf16 %v1539_v55 }
 0x392   : > { %4191 = vmatprep.subr.bf16.mxu0 %v2639_v1  ;;  %v2051_v1 = vunpack.c.l.s8.bf16 %v1235_v62 }
 0x394   : > { %3413 = vmatpush1.bf16.msra.mxu1 %v2030_v5  ;;  %v1538_v5 = vld [vmem:[%s6929_s9 + $0xee0] sm:$0xff] }
 0x395   : > { %4192 = vmatpush1.bf16.msra.mxu0 %v2638_v6  ;;  %3414 = vmatprep.subr.bf16.mxu1 %v2033_v8  ;;  %v2050_v6 = vunpack.c.l.s8.bf16 %v1234_v4  ;;  %v2658_v8 = vunpack.c.l.s8.bf16 %v1538_v5 }
 0x396   : > { %4193 = vmatprep.subr.bf16.mxu0 %v2641_v9  ;;  %v2053_v9 = vunpack.c.h.s8.bf16 %v1235_v62 }
 0x398   : > { %3415 = vmatpush1.bf16.msra.mxu1 %v2032_v7  ;;  %v1541_v7 = vld [vmem:[%s6929_s9 + $0xef8] sm:$0xff] }
 0x399   : > { %4194 = vmatpush1.bf16.msra.mxu0 %v2640_v13  ;;  %3416 = vmatprep.subr.bf16.mxu1 %v2035_v11  ;;  %v2052_v13 = vunpack.c.h.s8.bf16 %v1234_v4  ;;  %v2660_v11 = vunpack.c.h.s8.bf16 %v1538_v5  ;;  %v2663_v15 = vunpack.c.l.s8.bf16 %v1541_v7 }
 0x39a   : > { %4195 = vmatprep.subr.bf16.mxu0 %v2643_v52  ;;  %v2055_v52 = vunpack.c.l.s8.bf16 %v1237_v10 }
 0x39c   : > { %3417 = vmatpush1.bf16.msra.mxu1 %v2034_v14  ;;  %v1540_v14 = vld [vmem:[%s6929_s9 + $0xef0] sm:$0xff] }
 0x39d   : > { %4196 = vmatpush1.bf16.msra.mxu0 %v2642_v16  ;;  %3418 = vmatprep.subr.bf16.mxu1 %v2037_v17  ;;  %v638_v16 = vcombine.high %v7466_v32, %v7466_v32  ;;  %v7517_v17 = vld [vmem:[#allocation3 + $0x78] sm:$0xff]  ;;  %v2662_v19 = vunpack.c.l.s8.bf16 %v1540_v14  ;;  %v2664_v26 = vunpack.c.h.s8.bf16 %v1540_v14 }
 0x39e   : > { %4197 = vmatprep.subr.bf16.mxu0 %v2645_v18  ;;  %v2054_v18 = vunpack.c.l.s8.bf16 %v1236_v12  ;;  %v7526_v32 = vrot.slane %v7517_v17, %v6976_v51 }
 0x3a0   : > { %3419 = vmatpush1.bf16.msra.mxu1 %v2036_v22  ;;  %v2665_v22 = vunpack.c.h.s8.bf16 %v1541_v7  ;;  %v823_v33 = vcombine.high %v7526_v32, %v7526_v32 }
 0x3a1   : > { %4198 = vmatpush1.bf16.msra.mxu0 %v2644_v24  ;;  %3420 = vmatprep.subr.bf16.mxu1 %v2039_v25  ;;  %v1239_v24 = vld [vmem:[%s6929_s9 + $0x588] sm:$0xff] }
 0x3a2   : > { %4199 = vmatprep.subr.bf16.mxu0 %v2647_v20  ;;  %v1543_v25 = vld [vmem:[%s6929_s9 + $0xf08] sm:$0xff]  ;;  %v7522_v20 = vrot.slane %v638_v16, %v6976_v51  ;;  %v2061_v41 = vunpack.c.h.s8.bf16 %v1239_v24 }
 0x3a3   : > { %v2669_v44 = vunpack.c.h.s8.bf16 %v1543_v25  ;;  %v1247_v16 = vld [vmem:[%s6929_s9 + $0x5c8] sm:$0xff] }
 0x3a4   : > { %3421 = vmatpush1.bf16.msra.mxu1 %v2038_v23  ;;  %v2059_v23 = vunpack.c.l.s8.bf16 %v1239_v24  ;;  %v654_v31 = vcombine.high %v7522_v20, %v7522_v20 }
 0x3a5   : > { %4200 = vmatpush1.bf16.msra.mxu0 %v2646_v30  ;;  %3422 = vmatprep.subr.bf16.mxu1 %v2041_v27  ;;  %v2667_v30 = vunpack.c.l.s8.bf16 %v1543_v25  ;;  %v1238_v27 = vld [vmem:[%s6929_s9 + $0x580] sm:$0xff] }
 0x3a6   : > { %4201 = vmatprep.subr.bf16.mxu0 %v2649_v29  ;;  %v1542_v29 = vld [vmem:[%s6929_s9 + $0xf00] sm:$0xff] }
 0x3a7   : > { %v1246_v25 = vld [vmem:[%s6929_s9 + $0x5c0] sm:$0xff] }
 0x3a8   : > { %3423 = vmatpush1.bf16.msra.mxu1 %v2040_v34  ;;  %v1001_v34 = vpack.c.bf16 %v7472_v35, %v7472_v35  ;;  %v2060_v35 = vunpack.c.h.s8.bf16 %v1238_v27 }
 0x3a9   : > { %4202 = vmatpush1.bf16.msra.mxu0 %v2648_v36  ;;  %3424 = vmatprep.subr.bf16.mxu1 %v2043_v37  ;;  %v1039_v36 = vpack.c.bf16 %v7475_v49, %v7475_v49  ;;  %v2058_v37 = vunpack.c.l.s8.bf16 %v1238_v27  ;;  %v2668_v49 = vunpack.c.h.s8.bf16 %v1542_v29 }
 0x3aa   : > { %4203 = vmatprep.subr.bf16.mxu0 %v2651_v40  ;;  %v2666_v40 = vunpack.c.l.s8.bf16 %v1542_v29  ;;  %v1249_v29 = vld [vmem:[%s6929_s9 + $0x5d8] sm:$0xff] }
 0x3ac   : > { %3425 = vmatpush1.bf16.msra.mxu1 %v2042_v42  ;;  %v1241_v42 = vld [vmem:[%s6929_s9 + $0x598] sm:$0xff] }
 0x3ad   : > { %4204 = vmatpush1.bf16.msra.mxu0 %v2650_v38  ;;  %3426 = vmatprep.subr.bf16.mxu1 %v2045_v47  ;;  %v1545_v38 = vld [vmem:[%s6929_s9 + $0xf18] sm:$0xff]  ;;  %v1004_v47 = vpack.c.bf16 %v654_v31, %v654_v31  ;;  %v2063_v45 = vunpack.c.l.s8.bf16 %v1241_v42  ;;  %v2065_v59 = vunpack.c.h.s8.bf16 %v1241_v42 }
 0x3ae   : > { %4205 = vmatprep.subr.bf16.mxu0 %v2653_v43  ;;  %v1042_v43 = vpack.c.bf16 %v823_v33, %v823_v33  ;;  %v2671_v48 = vunpack.c.l.s8.bf16 %v1545_v38  ;;  %v2673_v60 = vunpack.c.h.s8.bf16 %v1545_v38  ;;  %v1553_v31 = vld [vmem:[%s6929_s9 + $0xf58] sm:$0xff]  ;;  %v2076_v33 = vunpack.c.h.s8.bf16 %v1246_v25 }
 0x3af   : > { %v2081_v38 = vunpack.c.h.s8.bf16 %v1249_v29 }
 0x3b0   : > { %3427 = vmatpush1.bf16.msra.mxu1 %v2044_v50  ;;  %v1240_v50 = vld [vmem:[%s6929_s9 + $0x590] sm:$0xff] }
 0x3b1   : > { %4206 = vmatpush1.bf16.msra.mxu0 %v2652_v54  ;;  %3428 = vmatprep.subr.bf16.mxu1 %v2047_v56  ;;  %v1544_v54 = vld [vmem:[%s6929_s9 + $0xf10] sm:$0xff]  ;;  %v2062_v56 = vunpack.c.l.s8.bf16 %v1240_v50 }
 0x3b2   : > { %4207 = vmatprep.subr.bf16.mxu0 %v2655_v57  ;;  %v2670_v57 = vunpack.c.l.s8.bf16 %v1544_v54 }
 0x3b4   : > { %3429 = vmatpush1.bf16.msra.mxu1 %v2046_v46  ;;  %v1243_v46 = vld [vmem:[%s6929_s9 + $0x5a8] sm:$0xff] }
 0x3b5   : > { %4208 = vmatpush1.bf16.msra.mxu0 %v2654_v61  ;;  %3430 = vmatprep.subr.bf16.mxu1 %v2049_v58  ;;  %v1547_v61 = vld [vmem:[%s6929_s9 + $0xf28] sm:$0xff]  ;;  %v2064_v58 = vunpack.c.h.s8.bf16 %v1240_v50  ;;  %v2067_v62 = vunpack.c.l.s8.bf16 %v1243_v46  ;;  %v2069_v4 = vunpack.c.h.s8.bf16 %v1243_v46 }
 0x3b6   : > { %4209 = vmatprep.subr.bf16.mxu0 %v2657_v0  ;;  %v2672_v0 = vunpack.c.h.s8.bf16 %v1544_v54  ;;  %v2675_v55 = vunpack.c.l.s8.bf16 %v1547_v61  ;;  %v2677_v5 = vunpack.c.h.s8.bf16 %v1547_v61  ;;  %v1250_v54 = vld [vmem:[%s6929_s9 + $0x5e0] sm:$0xff]  ;;  %v1253_v61 = vld [vmem:[%s6929_s9 + $0x5f8] sm:$0xff] }
 0x3b8   : > { %3431 = vmatpush1.bf16.msra.mxu1 %v2048_v2  ;;  %v1242_v2 = vld [vmem:[%s6929_s9 + $0x5a0] sm:$0xff] }
 0x3b9   : > { %4210 = vmatpush1.bf16.msra.mxu0 %v2656_v63  ;;  %3432 = vmatprep.subr.bf16.mxu1 %v2051_v1  ;;  %v1546_v63 = vld [vmem:[%s6929_s9 + $0xf20] sm:$0xff]  ;;  %v2066_v1 = vunpack.c.l.s8.bf16 %v1242_v2 }
 0x3ba   : > { %4211 = vmatprep.subr.bf16.mxu0 %v2659_v3  ;;  %v2674_v3 = vunpack.c.l.s8.bf16 %v1546_v63 }
 0x3bc   : > { %3433 = vmatpush1.bf16.msra.mxu1 %v2050_v6  ;;  %v1245_v6 = vld [vmem:[%s6929_s9 + $0x5b8] sm:$0xff] }
 0x3bd   : > { %4212 = vmatpush1.bf16.msra.mxu0 %v2658_v8  ;;  %3434 = vmatprep.subr.bf16.mxu1 %v2053_v9  ;;  %v1549_v8 = vld [vmem:[%s6929_s9 + $0xf38] sm:$0xff]  ;;  %v2068_v9 = vunpack.c.h.s8.bf16 %v1242_v2  ;;  %v2071_v10 = vunpack.c.l.s8.bf16 %v1245_v6  ;;  %v2073_v12 = vunpack.c.h.s8.bf16 %v1245_v6 }
 0x3be   : > { %4213 = vmatprep.subr.bf16.mxu0 %v2661_v53  ;;  %v2676_v53 = vunpack.c.h.s8.bf16 %v1546_v63  ;;  %v2679_v7 = vunpack.c.l.s8.bf16 %v1549_v8  ;;  %v2681_v14 = vunpack.c.h.s8.bf16 %v1549_v8  ;;  %v1252_v63 = vld [vmem:[%s6929_s9 + $0x5f0] sm:$0xff]  ;;  %v2089_v8 = vunpack.c.h.s8.bf16 %v1253_v61 }
 0x3c0   : > { %3435 = vmatpush1.bf16.msra.mxu1 %v2052_v13  ;;  %v1244_v13 = vld [vmem:[%s6929_s9 + $0x5b0] sm:$0xff] }
 0x3c1   : > { %4214 = vmatpush1.bf16.msra.mxu0 %v2660_v11  ;;  %3436 = vmatprep.subr.bf16.mxu1 %v2055_v52  ;;  %v1548_v11 = vld [vmem:[%s6929_s9 + $0xf30] sm:$0xff]  ;;  %v2070_v52 = vunpack.c.l.s8.bf16 %v1244_v13 }
 0x3c2   : > { %4215 = vmatprep.subr.bf16.mxu0 %v2663_v15  ;;  %v2678_v15 = vunpack.c.l.s8.bf16 %v1548_v11 }
 0x3c4   : > { %3437 = vmatpush1.bf16.msra.mxu1 %v2054_v18  ;;  %v1551_v18 = vld [vmem:[%s6929_s9 + $0xf48] sm:$0xff] }
 0x3c5   : > { %4216 = vmatpush1.bf16.msra.mxu0 %v2662_v19  ;;  %3438 = vmatprep.subr.bf16.mxu1 %v2057_v21  ;;  %v2072_v19 = vunpack.c.h.s8.bf16 %v1244_v13  ;;  %v2680_v21 = vunpack.c.h.s8.bf16 %v1548_v11  ;;  %v2683_v24 = vunpack.c.l.s8.bf16 %v1551_v18  ;;  %v2685_v27 = vunpack.c.h.s8.bf16 %v1551_v18 }
 0x3c6   : > { %4217 = vmatprep.subr.bf16.mxu0 %v2665_v22  ;;  %v2075_v22 = vunpack.c.l.s8.bf16 %v1247_v16  ;;  %v2088_v13 = vunpack.c.h.s8.bf16 %v1252_v63 }
 0x3c8   : > { %3439 = vmatpush1.bf16.msra.mxu1 %v2056_v28  ;;  %v1550_v28 = vld [vmem:[%s6929_s9 + $0xf40] sm:$0xff] }
 0x3c9   : > { %4218 = vmatpush1.bf16.msra.mxu0 %v2664_v26  ;;  %3449 = vmatprep.subr.bf16.mxu1 %v2059_v23  ;;  %v2074_v26 = vunpack.c.l.s8.bf16 %v1246_v25  ;;  %v2682_v23 = vunpack.c.l.s8.bf16 %v1550_v28 }
 0x3ca   : > { %4228 = vmatprep.subr.bf16.mxu0 %v2667_v30  ;;  %v2077_v30 = vunpack.c.h.s8.bf16 %v1247_v16 }
 0x3cb   : > { %3441 = vmatmul.mubr.bf16.vlgmr.msra.gmra.mrb[0].mxu1 %v1001_v34  ;;  %v2684_v34 = vunpack.c.h.s8.bf16 %v1550_v28 }
 0x3cc   : > { %4220 = vmatmul.mubr.bf16.vlgmr.msra.gmra.mrb[0].mxu0 %v1039_v36  ;;  %3450 = vmatpush1.bf16.msra.mxu1 %v2058_v37  ;;  %v2079_v36 = vunpack.c.l.s8.bf16 %v1249_v29  ;;  %v2687_v37 = vunpack.c.l.s8.bf16 %v1553_v31 }
 0x3cd   : > { %4229 = vmatpush1.bf16.msra.mxu0 %v2666_v40  ;;  %3451 = vmatprep.subr.bf16.mxu1 %v2061_v41  ;;  %v1248_v40 = vld [vmem:[%s6929_s9 + $0x5d0] sm:$0xff] }
 0x3ce   : > { %4230 = vmatprep.subr.bf16.mxu0 %v2669_v44  ;;  %3481 = vmatprep.mubr.bf16.mxu1 %v1004_v47  ;;  %v1552_v41 = vld [vmem:[%s6929_s9 + $0xf50] sm:$0xff]  ;;  %v2078_v44 = vunpack.c.l.s8.bf16 %v1248_v40  ;;  %v2689_v47 = vunpack.c.h.s8.bf16 %v1553_v31 }
 0x3cf   : > { %4260 = vmatprep.mubr.bf16.mxu0 %v1042_v43  ;;  %v2686_v42 = vunpack.c.l.s8.bf16 %v1552_v41  ;;  %v1251_v43 = vld [vmem:[%s6929_s9 + $0x5e8] sm:$0xff] }
 0x3d0   : > { %3452 = vmatpush1.bf16.msra.mxu1 %v2060_v35  ;;  %v1555_v35 = vld [vmem:[%s6929_s9 + $0xf68] sm:$0xff] }
 0x3d1   : > { %4231 = vmatpush1.bf16.msra.mxu0 %v2668_v49  ;;  %3453 = vmatprep.subr.bf16.mxu1 %v2063_v45  ;;  %v2080_v49 = vunpack.c.h.s8.bf16 %v1248_v40  ;;  %v2688_v45 = vunpack.c.h.s8.bf16 %v1552_v41  ;;  %v2691_v50 = vunpack.c.l.s8.bf16 %v1555_v35  ;;  %v2693_v46 = vunpack.c.h.s8.bf16 %v1555_v35 }
 0x3d2   : > { %4232 = vmatprep.subr.bf16.mxu0 %v2671_v48  ;;  %v2083_v48 = vunpack.c.l.s8.bf16 %v1251_v43 }
 0x3d4   : > { %3454 = vmatpush1.bf16.msra.mxu1 %v2062_v56  ;;  %v1554_v56 = vld [vmem:[%s6929_s9 + $0xf60] sm:$0xff] }
 0x3d5   : > { %4233 = vmatpush1.bf16.msra.mxu0 %v2670_v57  ;;  %3455 = vmatprep.subr.bf16.mxu1 %v2065_v59  ;;  %v2082_v57 = vunpack.c.l.s8.bf16 %v1250_v54  ;;  %v2690_v59 = vunpack.c.l.s8.bf16 %v1554_v56 }
 0x3d6   : > { %4234 = vmatprep.subr.bf16.mxu0 %v2673_v60  ;;  %v2085_v60 = vunpack.c.h.s8.bf16 %v1251_v43 }
 0x3d8   : > { %3456 = vmatpush1.bf16.msra.mxu1 %v2064_v58  ;;  %v1557_v58 = vld [vmem:[%s6929_s9 + $0xf78] sm:$0xff] }
 0x3d9   : > { %4235 = vmatpush1.bf16.msra.mxu0 %v2672_v0  ;;  %3457 = vmatprep.subr.bf16.mxu1 %v2067_v62  ;;  %v2084_v0 = vunpack.c.h.s8.bf16 %v1250_v54  ;;  %v2692_v62 = vunpack.c.h.s8.bf16 %v1554_v56  ;;  %v2695_v2 = vunpack.c.l.s8.bf16 %v1557_v58 }
 0x3da   : > { %4236 = vmatprep.subr.bf16.mxu0 %v2675_v55  ;;  %v2087_v55 = vunpack.c.l.s8.bf16 %v1253_v61 }
 0x3dc   : > { %3458 = vmatpush1.bf16.msra.mxu1 %v2066_v1  ;;  %v1556_v1 = vld [vmem:[%s6929_s9 + $0xf70] sm:$0xff] }
 0x3dd   : > { %4237 = vmatpush1.bf16.msra.mxu0 %v2674_v3  ;;  %3459 = vmatprep.subr.bf16.mxu1 %v2069_v4  ;;  %v808_v3 = vcombine.high %v7517_v17, %v7517_v17  ;;  %v7568_v4 = vld [vmem:[#allocation3 + $0x30] sm:$0xff]  ;;  %v2694_v6 = vunpack.c.l.s8.bf16 %v1556_v1  ;;  %v2696_v11 = vunpack.c.h.s8.bf16 %v1556_v1 }
 0x3de   : > { %4238 = vmatprep.subr.bf16.mxu0 %v2677_v5  ;;  %v2086_v5 = vunpack.c.l.s8.bf16 %v1252_v63 }
 0x3df   : > { %v7577_v17 = vrot.slane %v808_v3, %v6976_v51  ;;  %v1263_v3 = vld [vmem:[%s6929_s9 + $0x648] sm:$0xff] }
 0x3e0   : > { %3460 = vmatpush1.bf16.msra.mxu1 %v2068_v9  ;;  %v2697_v9 = vunpack.c.h.s8.bf16 %v1557_v58 }
 0x3e1   : > { %4239 = vmatpush1.bf16.msra.mxu0 %v2676_v53  ;;  %3461 = vmatprep.subr.bf16.mxu1 %v2071_v10  ;;  %v1255_v53 = vld [vmem:[%s6929_s9 + $0x608] sm:$0xff]  ;;  %v824_v18 = vcombine.high %v7577_v17, %v7577_v17 }
 0x3e2   : > { %4240 = vmatprep.subr.bf16.mxu0 %v2679_v7  ;;  %v1559_v10 = vld [vmem:[%s6929_s9 + $0xf88] sm:$0xff]  ;;  %v7574_v7 = vrot.slane %v7568_v4, %v6976_v51  ;;  %v2093_v25 = vunpack.c.h.s8.bf16 %v1255_v53 }
 0x3e3   : > { %v2701_v28 = vunpack.c.h.s8.bf16 %v1559_v10 }
 0x3e4   : > { %3462 = vmatpush1.bf16.msra.mxu1 %v2070_v52  ;;  %v2091_v52 = vunpack.c.l.s8.bf16 %v1255_v53  ;;  %v670_v16 = vcombine.high %v7574_v7, %v7574_v7 }
 0x3e5   : > { %4241 = vmatpush1.bf16.msra.mxu0 %v2678_v15  ;;  %3463 = vmatprep.subr.bf16.mxu1 %v2073_v12  ;;  %v2699_v15 = vunpack.c.l.s8.bf16 %v1559_v10  ;;  %v1254_v12 = vld [vmem:[%s6929_s9 + $0x600] sm:$0xff] }
 0x3e6   : > { %4242 = vmatprep.subr.bf16.mxu0 %v2681_v14  ;;  %v1558_v14 = vld [vmem:[%s6929_s9 + $0xf80] sm:$0xff] }
 0x3e7   : > { %v1262_v10 = vld [vmem:[%s6929_s9 + $0x640] sm:$0xff] }
 0x3e8   : > { %3464 = vmatpush1.bf16.msra.mxu1 %v2072_v19  ;;  %v1003_v19 = vpack.c.bf16 %v7522_v20, %v7522_v20  ;;  %v2092_v20 = vunpack.c.h.s8.bf16 %v1254_v12 }
 0x3e9   : > { %4243 = vmatpush1.bf16.msra.mxu0 %v2680_v21  ;;  %3465 = vmatprep.subr.bf16.mxu1 %v2075_v22  ;;  %v1041_v21 = vpack.c.bf16 %v7526_v32, %v7526_v32  ;;  %v2090_v22 = vunpack.c.l.s8.bf16 %v1254_v12  ;;  %v2700_v32 = vunpack.c.h.s8.bf16 %v1558_v14 }
 0x3ea   : > { %4244 = vmatprep.subr.bf16.mxu0 %v2683_v24  ;;  %v2698_v24 = vunpack.c.l.s8.bf16 %v1558_v14  ;;  %v1265_v14 = vld [vmem:[%s6929_s9 + $0x658] sm:$0xff] }
 0x3ec   : > { %3466 = vmatpush1.bf16.msra.mxu1 %v2074_v26  ;;  %v1257_v26 = vld [vmem:[%s6929_s9 + $0x618] sm:$0xff] }
 0x3ed   : > { %4245 = vmatpush1.bf16.msra.mxu0 %v2682_v23  ;;  %3467 = vmatprep.subr.bf16.mxu1 %v2077_v30  ;;  %v1561_v23 = vld [vmem:[%s6929_s9 + $0xf98] sm:$0xff]  ;;  %v1006_v30 = vpack.c.bf16 %v670_v16, %v670_v16  ;;  %v2095_v29 = vunpack.c.l.s8.bf16 %v1257_v26  ;;  %v2097_v40 = vunpack.c.h.s8.bf16 %v1257_v26 }
 0x3ee   : > { %4246 = vmatprep.subr.bf16.mxu0 %v2685_v27  ;;  %v1044_v27 = vpack.c.bf16 %v824_v18, %v824_v18  ;;  %v2703_v31 = vunpack.c.l.s8.bf16 %v1561_v23  ;;  %v2705_v41 = vunpack.c.h.s8.bf16 %v1561_v23  ;;  %v1569_v16 = vld [vmem:[%s6929_s9 + $0xfd8] sm:$0xff]  ;;  %v2108_v18 = vunpack.c.h.s8.bf16 %v1262_v10 }
 0x3ef   : > { %v2113_v23 = vunpack.c.h.s8.bf16 %v1265_v14 }
 0x3f0   : > { %3468 = vmatpush1.bf16.msra.mxu1 %v2076_v33  ;;  %v1256_v33 = vld [vmem:[%s6929_s9 + $0x610] sm:$0xff] }
 0x3f1   : > { %4247 = vmatpush1.bf16.msra.mxu0 %v2684_v34  ;;  %3469 = vmatprep.subr.bf16.mxu1 %v2079_v36  ;;  %v1560_v34 = vld [vmem:[%s6929_s9 + $0xf90] sm:$0xff]  ;;  %v2094_v36 = vunpack.c.l.s8.bf16 %v1256_v33 }
 0x3f2   : > { %4248 = vmatprep.subr.bf16.mxu0 %v2687_v37  ;;  %v2702_v37 = vunpack.c.l.s8.bf16 %v1560_v34 }
 0x3f4   : > { %3470 = vmatpush1.bf16.msra.mxu1 %v2078_v44  ;;  %v1259_v44 = vld [vmem:[%s6929_s9 + $0x628] sm:$0xff] }
 0x3f5   : > { %4249 = vmatpush1.bf16.msra.mxu0 %v2686_v42  ;;  %3471 = vmatprep.subr.bf16.mxu1 %v2081_v38  ;;  %v1563_v42 = vld [vmem:[%s6929_s9 + $0xfa8] sm:$0xff]  ;;  %v2096_v38 = vunpack.c.h.s8.bf16 %v1256_v33  ;;  %v2099_v43 = vunpack.c.l.s8.bf16 %v1259_v44  ;;  %v2101_v54 = vunpack.c.h.s8.bf16 %v1259_v44 }
 0x3f6   : > { %4250 = vmatprep.subr.bf16.mxu0 %v2689_v47  ;;  %v2704_v47 = vunpack.c.h.s8.bf16 %v1560_v34  ;;  %v2707_v35 = vunpack.c.l.s8.bf16 %v1563_v42  ;;  %v2709_v56 = vunpack.c.h.s8.bf16 %v1563_v42  ;;  %v1266_v34 = vld [vmem:[%s6929_s9 + $0x660] sm:$0xff]  ;;  %v1269_v42 = vld [vmem:[%s6929_s9 + $0x678] sm:$0xff] }
 0x3f8   : > { %3472 = vmatpush1.bf16.msra.mxu1 %v2080_v49  ;;  %v1258_v49 = vld [vmem:[%s6929_s9 + $0x620] sm:$0xff] }
 0x3f9   : > { %4251 = vmatpush1.bf16.msra.mxu0 %v2688_v45  ;;  %3473 = vmatprep.subr.bf16.mxu1 %v2083_v48  ;;  %v1562_v45 = vld [vmem:[%s6929_s9 + $0xfa0] sm:$0xff]  ;;  %v2098_v48 = vunpack.c.l.s8.bf16 %v1258_v49 }
 0x3fa   : > { %4252 = vmatprep.subr.bf16.mxu0 %v2691_v50  ;;  %v2706_v50 = vunpack.c.l.s8.bf16 %v1562_v45 }
 0x3fc   : > { %3474 = vmatpush1.bf16.msra.mxu1 %v2082_v57  ;;  %v1261_v57 = vld [vmem:[%s6929_s9 + $0x638] sm:$0xff] }
 0x3fd   : > { %4253 = vmatpush1.bf16.msra.mxu0 %v2690_v59  ;;  %3475 = vmatprep.subr.bf16.mxu1 %v2085_v60  ;;  %v1565_v59 = vld [vmem:[%s6929_s9 + $0xfb8] sm:$0xff]  ;;  %v2100_v60 = vunpack.c.h.s8.bf16 %v1258_v49  ;;  %v2103_v61 = vunpack.c.l.s8.bf16 %v1261_v57  ;;  %v2105_v63 = vunpack.c.h.s8.bf16 %v1261_v57 }
 0x3fe   : > { %4254 = vmatprep.subr.bf16.mxu0 %v2693_v46  ;;  %v2708_v46 = vunpack.c.h.s8.bf16 %v1562_v45  ;;  %v2711_v58 = vunpack.c.l.s8.bf16 %v1565_v59  ;;  %v2713_v1 = vunpack.c.h.s8.bf16 %v1565_v59  ;;  %v1268_v45 = vld [vmem:[%s6929_s9 + $0x670] sm:$0xff]  ;;  %v2121_v59 = vunpack.c.h.s8.bf16 %v1269_v42 }
 0x400   : > { %3476 = vmatpush1.bf16.msra.mxu1 %v2084_v0  ;;  %v1260_v0 = vld [vmem:[%s6929_s9 + $0x630] sm:$0xff] }
 0x401   : > { %4255 = vmatpush1.bf16.msra.mxu0 %v2692_v62  ;;  %3477 = vmatprep.subr.bf16.mxu1 %v2087_v55  ;;  %v1564_v62 = vld [vmem:[%s6929_s9 + $0xfb0] sm:$0xff]  ;;  %v2102_v55 = vunpack.c.l.s8.bf16 %v1260_v0 }
 0x402   : > { %4256 = vmatprep.subr.bf16.mxu0 %v2695_v2  ;;  %v2710_v2 = vunpack.c.l.s8.bf16 %v1564_v62 }
 0x404   : > { %3478 = vmatpush1.bf16.msra.mxu1 %v2086_v5  ;;  %v1567_v5 = vld [vmem:[%s6929_s9 + $0xfc8] sm:$0xff] }
 0x405   : > { %4257 = vmatpush1.bf16.msra.mxu0 %v2694_v6  ;;  %3479 = vmatprep.subr.bf16.mxu1 %v2089_v8  ;;  %v2104_v6 = vunpack.c.h.s8.bf16 %v1260_v0  ;;  %v2712_v8 = vunpack.c.h.s8.bf16 %v1564_v62  ;;  %v2715_v53 = vunpack.c.l.s8.bf16 %v1567_v5  ;;  %v2717_v12 = vunpack.c.h.s8.bf16 %v1567_v5 }
 0x406   : > { %4258 = vmatprep.subr.bf16.mxu0 %v2697_v9  ;;  %v2107_v9 = vunpack.c.l.s8.bf16 %v1263_v3  ;;  %v2120_v0 = vunpack.c.h.s8.bf16 %v1268_v45 }
 0x408   : > { %3480 = vmatpush1.bf16.msra.mxu1 %v2088_v13  ;;  %v1566_v13 = vld [vmem:[%s6929_s9 + $0xfc0] sm:$0xff] }
 0x409   : > { %4259 = vmatpush1.bf16.msra.mxu0 %v2696_v11  ;;  %3490 = vmatprep.subr.bf16.mxu1 %v2091_v52  ;;  %v2106_v11 = vunpack.c.l.s8.bf16 %v1262_v10  ;;  %v2714_v52 = vunpack.c.l.s8.bf16 %v1566_v13 }
 0x40a   : > { %4269 = vmatprep.subr.bf16.mxu0 %v2699_v15  ;;  %v2109_v15 = vunpack.c.h.s8.bf16 %v1263_v3 }
 0x40b   : > { %3482 = vmatmul.mubr.bf16.vlgmr.msra.gmra.mrb[0].mxu1 %v1003_v19  ;;  %v2716_v19 = vunpack.c.h.s8.bf16 %v1566_v13 }
 0x40c   : > { %4261 = vmatmul.mubr.bf16.vlgmr.msra.gmra.mrb[0].mxu0 %v1041_v21  ;;  %3491 = vmatpush1.bf16.msra.mxu1 %v2090_v22  ;;  %v2111_v21 = vunpack.c.l.s8.bf16 %v1265_v14  ;;  %v2719_v22 = vunpack.c.l.s8.bf16 %v1569_v16 }
 0x40d   : > { %4270 = vmatpush1.bf16.msra.mxu0 %v2698_v24  ;;  %3492 = vmatprep.subr.bf16.mxu1 %v2093_v25  ;;  %v1264_v24 = vld [vmem:[%s6929_s9 + $0x650] sm:$0xff] }
 0x40e   : > { %4271 = vmatprep.subr.bf16.mxu0 %v2701_v28  ;;  %3522 = vmatprep.mubr.bf16.mxu1 %v1006_v30  ;;  %v1568_v25 = vld [vmem:[%s6929_s9 + $0xfd0] sm:$0xff]  ;;  %v2110_v28 = vunpack.c.l.s8.bf16 %v1264_v24  ;;  %v2721_v30 = vunpack.c.h.s8.bf16 %v1569_v16 }
 0x40f   : > { %4301 = vmatprep.mubr.bf16.mxu0 %v1044_v27  ;;  %v2718_v26 = vunpack.c.l.s8.bf16 %v1568_v25  ;;  %v1267_v27 = vld [vmem:[%s6929_s9 + $0x668] sm:$0xff] }
 0x410   : > { %3493 = vmatpush1.bf16.msra.mxu1 %v2092_v20  ;;  %v1571_v20 = vld [vmem:[%s6929_s9 + $0xfe8] sm:$0xff] }
 0x411   : > { %4272 = vmatpush1.bf16.msra.mxu0 %v2700_v32  ;;  %3494 = vmatprep.subr.bf16.mxu1 %v2095_v29  ;;  %v2112_v32 = vunpack.c.h.s8.bf16 %v1264_v24  ;;  %v2720_v29 = vunpack.c.h.s8.bf16 %v1568_v25  ;;  %v2723_v33 = vunpack.c.l.s8.bf16 %v1571_v20  ;;  %v2725_v44 = vunpack.c.h.s8.bf16 %v1571_v20 }
 0x412   : > { %4273 = vmatprep.subr.bf16.mxu0 %v2703_v31  ;;  %v2115_v31 = vunpack.c.l.s8.bf16 %v1267_v27 }
 0x414   : > { %3495 = vmatpush1.bf16.msra.mxu1 %v2094_v36  ;;  %v1570_v36 = vld [vmem:[%s6929_s9 + $0xfe0] sm:$0xff] }
 0x415   : > { %4274 = vmatpush1.bf16.msra.mxu0 %v2702_v37  ;;  %3496 = vmatprep.subr.bf16.mxu1 %v2097_v40  ;;  %v2114_v37 = vunpack.c.l.s8.bf16 %v1266_v34  ;;  %v2722_v40 = vunpack.c.l.s8.bf16 %v1570_v36 }
 0x416   : > { %4275 = vmatprep.subr.bf16.mxu0 %v2705_v41  ;;  %v2117_v41 = vunpack.c.h.s8.bf16 %v1267_v27 }
 0x418   : > { %3497 = vmatpush1.bf16.msra.mxu1 %v2096_v38  ;;  %v1573_v38 = vld [vmem:[%s6929_s9 + $0xff8] sm:$0xff] }
 0x419   : > { %4276 = vmatpush1.bf16.msra.mxu0 %v2704_v47  ;;  %3498 = vmatprep.subr.bf16.mxu1 %v2099_v43  ;;  %v2116_v47 = vunpack.c.h.s8.bf16 %v1266_v34  ;;  %v2724_v43 = vunpack.c.h.s8.bf16 %v1570_v36  ;;  %v2727_v49 = vunpack.c.l.s8.bf16 %v1573_v38 }
 0x41a   : > { %4277 = vmatprep.subr.bf16.mxu0 %v2707_v35  ;;  %v2119_v35 = vunpack.c.l.s8.bf16 %v1269_v42 }
 0x41c   : > { %3499 = vmatpush1.bf16.msra.mxu1 %v2098_v48  ;;  %v1572_v48 = vld [vmem:[%s6929_s9 + $0xff0] sm:$0xff] }
 0x41d   : > { %4278 = vmatpush1.bf16.msra.mxu0 %v2706_v50  ;;  %3500 = vmatprep.subr.bf16.mxu1 %v2101_v54  ;;  %v655_v50 = vcombine.high %v7568_v4, %v7568_v4  ;;  %v7619_v54 = vld [vmem:[#allocation3 + $0x80] sm:$0xff]  ;;  %v2726_v57 = vunpack.c.l.s8.bf16 %v1572_v48  ;;  %v2728_v62 = vunpack.c.h.s8.bf16 %v1572_v48 }
 0x41e   : > { %4279 = vmatprep.subr.bf16.mxu0 %v2709_v56  ;;  %v2118_v56 = vunpack.c.l.s8.bf16 %v1268_v45  ;;  %v7628_v4 = vrot.slane %v7619_v54, %v6976_v51 }
 0x420   : > { %3501 = vmatpush1.bf16.msra.mxu1 %v2100_v60  ;;  %v2729_v60 = vunpack.c.h.s8.bf16 %v1573_v38  ;;  %v840_v5 = vcombine.high %v7628_v4, %v7628_v4 }
 0x421   : > { %4280 = vmatpush1.bf16.msra.mxu0 %v2708_v46  ;;  %3502 = vmatprep.subr.bf16.mxu1 %v2103_v61  ;;  %v1271_v46 = vld [vmem:[%s6929_s9 + $0x688] sm:$0xff] }
 0x422   : > { %4281 = vmatprep.subr.bf16.mxu0 %v2711_v58  ;;  %v1575_v61 = vld [vmem:[%s6929_s9 + $0x1008] sm:$0xff]  ;;  %v7624_v58 = vrot.slane %v655_v50, %v6976_v51  ;;  %v2125_v10 = vunpack.c.h.s8.bf16 %v1271_v46 }
 0x423   : > { %v2733_v13 = vunpack.c.h.s8.bf16 %v1575_v61  ;;  %v1279_v50 = vld [vmem:[%s6929_s9 + $0x6c8] sm:$0xff] }
 0x424   : > { %3503 = vmatpush1.bf16.msra.mxu1 %v2102_v55  ;;  %v2123_v55 = vunpack.c.l.s8.bf16 %v1271_v46  ;;  %v671_v3 = vcombine.high %v7624_v58, %v7624_v58 }
 0x425   : > { %4282 = vmatpush1.bf16.msra.mxu0 %v2710_v2  ;;  %3504 = vmatprep.subr.bf16.mxu1 %v2105_v63  ;;  %v2731_v2 = vunpack.c.l.s8.bf16 %v1575_v61  ;;  %v1270_v63 = vld [vmem:[%s6929_s9 + $0x680] sm:$0xff] }
 0x426   : > { %4283 = vmatprep.subr.bf16.mxu0 %v2713_v1  ;;  %v1574_v1 = vld [vmem:[%s6929_s9 + $0x1000] sm:$0xff] }
 0x427   : > { %v1278_v61 = vld [vmem:[%s6929_s9 + $0x6c0] sm:$0xff] }
 0x428   : > { %3505 = vmatpush1.bf16.msra.mxu1 %v2104_v6  ;;  %v1005_v6 = vpack.c.bf16 %v7574_v7, %v7574_v7  ;;  %v2124_v7 = vunpack.c.h.s8.bf16 %v1270_v63 }
 0x429   : > { %4284 = vmatpush1.bf16.msra.mxu0 %v2712_v8  ;;  %3506 = vmatprep.subr.bf16.mxu1 %v2107_v9  ;;  %v1043_v8 = vpack.c.bf16 %v7577_v17, %v7577_v17  ;;  %v2122_v9 = vunpack.c.l.s8.bf16 %v1270_v63  ;;  %v2732_v17 = vunpack.c.h.s8.bf16 %v1574_v1 }
 0x42a   : > { %4285 = vmatprep.subr.bf16.mxu0 %v2715_v53  ;;  %v2730_v53 = vunpack.c.l.s8.bf16 %v1574_v1  ;;  %v1281_v1 = vld [vmem:[%s6929_s9 + $0x6d8] sm:$0xff] }
 0x42c   : > { %3507 = vmatpush1.bf16.msra.mxu1 %v2106_v11  ;;  %v1273_v11 = vld [vmem:[%s6929_s9 + $0x698] sm:$0xff] }
 0x42d   : > { %4286 = vmatpush1.bf16.msra.mxu0 %v2714_v52  ;;  %3508 = vmatprep.subr.bf16.mxu1 %v2109_v15  ;;  %v1577_v52 = vld [vmem:[%s6929_s9 + $0x1018] sm:$0xff]  ;;  %v1008_v15 = vpack.c.bf16 %v671_v3, %v671_v3  ;;  %v2127_v14 = vunpack.c.l.s8.bf16 %v1273_v11  ;;  %v2129_v24 = vunpack.c.h.s8.bf16 %v1273_v11 }
 0x42e   : > { %4287 = vmatprep.subr.bf16.mxu0 %v2717_v12  ;;  %v1046_v12 = vpack.c.bf16 %v840_v5, %v840_v5  ;;  %v2735_v16 = vunpack.c.l.s8.bf16 %v1577_v52  ;;  %v2737_v25 = vunpack.c.h.s8.bf16 %v1577_v52  ;;  %v1585_v3 = vld [vmem:[%s6929_s9 + $0x1058] sm:$0xff]  ;;  %v2140_v5 = vunpack.c.h.s8.bf16 %v1278_v61 }
 0x42f   : > { %v2145_v52 = vunpack.c.h.s8.bf16 %v1281_v1 }
 0x430   : > { %3509 = vmatpush1.bf16.msra.mxu1 %v2108_v18  ;;  %v1272_v18 = vld [vmem:[%s6929_s9 + $0x690] sm:$0xff] }
 0x431   : > { %4288 = vmatpush1.bf16.msra.mxu0 %v2716_v19  ;;  %3510 = vmatprep.subr.bf16.mxu1 %v2111_v21  ;;  %v1576_v19 = vld [vmem:[%s6929_s9 + $0x1010] sm:$0xff]  ;;  %v2126_v21 = vunpack.c.l.s8.bf16 %v1272_v18 }
 0x432   : > { %4289 = vmatprep.subr.bf16.mxu0 %v2719_v22  ;;  %v2734_v22 = vunpack.c.l.s8.bf16 %v1576_v19 }
 0x434   : > { %3511 = vmatpush1.bf16.msra.mxu1 %v2110_v28  ;;  %v1275_v28 = vld [vmem:[%s6929_s9 + $0x6a8] sm:$0xff] }
 0x435   : > { %4290 = vmatpush1.bf16.msra.mxu0 %v2718_v26  ;;  %3512 = vmatprep.subr.bf16.mxu1 %v2113_v23  ;;  %v1579_v26 = vld [vmem:[%s6929_s9 + $0x1028] sm:$0xff]  ;;  %v2128_v23 = vunpack.c.h.s8.bf16 %v1272_v18  ;;  %v2131_v27 = vunpack.c.l.s8.bf16 %v1275_v28  ;;  %v2133_v34 = vunpack.c.h.s8.bf16 %v1275_v28 }
 0x436   : > { %4291 = vmatprep.subr.bf16.mxu0 %v2721_v30  ;;  %v2736_v30 = vunpack.c.h.s8.bf16 %v1576_v19  ;;  %v2739_v20 = vunpack.c.l.s8.bf16 %v1579_v26  ;;  %v2741_v36 = vunpack.c.h.s8.bf16 %v1579_v26  ;;  %v1282_v19 = vld [vmem:[%s6929_s9 + $0x6e0] sm:$0xff]  ;;  %v1285_v26 = vld [vmem:[%s6929_s9 + $0x6f8] sm:$0xff] }
 0x438   : > { %3513 = vmatpush1.bf16.msra.mxu1 %v2112_v32  ;;  %v1274_v32 = vld [vmem:[%s6929_s9 + $0x6a0] sm:$0xff] }
 0x439   : > { %4292 = vmatpush1.bf16.msra.mxu0 %v2720_v29  ;;  %3514 = vmatprep.subr.bf16.mxu1 %v2115_v31  ;;  %v1578_v29 = vld [vmem:[%s6929_s9 + $0x1020] sm:$0xff]  ;;  %v2130_v31 = vunpack.c.l.s8.bf16 %v1274_v32 }
 0x43a   : > { %4293 = vmatprep.subr.bf16.mxu0 %v2723_v33  ;;  %v2738_v33 = vunpack.c.l.s8.bf16 %v1578_v29 }
 0x43c   : > { %3515 = vmatpush1.bf16.msra.mxu1 %v2114_v37  ;;  %v1277_v37 = vld [vmem:[%s6929_s9 + $0x6b8] sm:$0xff] }
 0x43d   : > { %4294 = vmatpush1.bf16.msra.mxu0 %v2722_v40  ;;  %3516 = vmatprep.subr.bf16.mxu1 %v2117_v41  ;;  %v1581_v40 = vld [vmem:[%s6929_s9 + $0x1038] sm:$0xff]  ;;  %v2132_v41 = vunpack.c.h.s8.bf16 %v1274_v32  ;;  %v2135_v42 = vunpack.c.l.s8.bf16 %v1277_v37  ;;  %v2137_v45 = vunpack.c.h.s8.bf16 %v1277_v37 }
 0x43e   : > { %4295 = vmatprep.subr.bf16.mxu0 %v2725_v44  ;;  %v2740_v44 = vunpack.c.h.s8.bf16 %v1578_v29  ;;  %v2743_v38 = vunpack.c.l.s8.bf16 %v1581_v40  ;;  %v2745_v48 = vunpack.c.h.s8.bf16 %v1581_v40  ;;  %v1284_v29 = vld [vmem:[%s6929_s9 + $0x6f0] sm:$0xff]  ;;  %v2153_v40 = vunpack.c.h.s8.bf16 %v1285_v26 }
 0x440   : > { %3517 = vmatpush1.bf16.msra.mxu1 %v2116_v47  ;;  %v1276_v47 = vld [vmem:[%s6929_s9 + $0x6b0] sm:$0xff] }
 0x441   : > { %4296 = vmatpush1.bf16.msra.mxu0 %v2724_v43  ;;  %3518 = vmatprep.subr.bf16.mxu1 %v2119_v35  ;;  %v1580_v43 = vld [vmem:[%s6929_s9 + $0x1030] sm:$0xff]  ;;  %v2134_v35 = vunpack.c.l.s8.bf16 %v1276_v47 }
 0x442   : > { %4297 = vmatprep.subr.bf16.mxu0 %v2727_v49  ;;  %v2742_v49 = vunpack.c.l.s8.bf16 %v1580_v43 }
 0x444   : > { %3519 = vmatpush1.bf16.msra.mxu1 %v2118_v56  ;;  %v1583_v56 = vld [vmem:[%s6929_s9 + $0x1048] sm:$0xff] }
 0x445   : > { %4298 = vmatpush1.bf16.msra.mxu0 %v2726_v57  ;;  %3520 = vmatprep.subr.bf16.mxu1 %v2121_v59  ;;  %v2136_v57 = vunpack.c.h.s8.bf16 %v1276_v47  ;;  %v2744_v59 = vunpack.c.h.s8.bf16 %v1580_v43  ;;  %v2747_v46 = vunpack.c.l.s8.bf16 %v1583_v56  ;;  %v2749_v63 = vunpack.c.h.s8.bf16 %v1583_v56 }
 0x446   : > { %4299 = vmatprep.subr.bf16.mxu0 %v2729_v60  ;;  %v2139_v60 = vunpack.c.l.s8.bf16 %v1279_v50  ;;  %v2152_v47 = vunpack.c.h.s8.bf16 %v1284_v29 }
 0x448   : > { %3521 = vmatpush1.bf16.msra.mxu1 %v2120_v0  ;;  %v1582_v0 = vld [vmem:[%s6929_s9 + $0x1040] sm:$0xff] }
 0x449   : > { %4300 = vmatpush1.bf16.msra.mxu0 %v2728_v62  ;;  %3531 = vmatprep.subr.bf16.mxu1 %v2123_v55  ;;  %v2138_v62 = vunpack.c.l.s8.bf16 %v1278_v61  ;;  %v2746_v55 = vunpack.c.l.s8.bf16 %v1582_v0 }
 0x44a   : > { %4310 = vmatprep.subr.bf16.mxu0 %v2731_v2  ;;  %v2141_v2 = vunpack.c.h.s8.bf16 %v1279_v50 }
 0x44b   : > { %3523 = vmatmul.mubr.bf16.vlgmr.msra.gmra.mrb[0].mxu1 %v1005_v6  ;;  %v2748_v6 = vunpack.c.h.s8.bf16 %v1582_v0 }
 0x44c   : > { %4302 = vmatmul.mubr.bf16.vlgmr.msra.gmra.mrb[0].mxu0 %v1043_v8  ;;  %3532 = vmatpush1.bf16.msra.mxu1 %v2122_v9  ;;  %v2143_v8 = vunpack.c.l.s8.bf16 %v1281_v1  ;;  %v2751_v9 = vunpack.c.l.s8.bf16 %v1585_v3 }
 0x44d   : > { %4311 = vmatpush1.bf16.msra.mxu0 %v2730_v53  ;;  %3533 = vmatprep.subr.bf16.mxu1 %v2125_v10  ;;  %v1280_v53 = vld [vmem:[%s6929_s9 + $0x6d0] sm:$0xff] }
 0x44e   : > { %4312 = vmatprep.subr.bf16.mxu0 %v2733_v13  ;;  %3563 = vmatprep.mubr.bf16.mxu1 %v1008_v15  ;;  %v1584_v10 = vld [vmem:[%s6929_s9 + $0x1050] sm:$0xff]  ;;  %v2142_v13 = vunpack.c.l.s8.bf16 %v1280_v53  ;;  %v2753_v15 = vunpack.c.h.s8.bf16 %v1585_v3 }
 0x44f   : > { %4342 = vmatprep.mubr.bf16.mxu0 %v1046_v12  ;;  %v2750_v11 = vunpack.c.l.s8.bf16 %v1584_v10  ;;  %v1283_v12 = vld [vmem:[%s6929_s9 + $0x6e8] sm:$0xff] }
 0x450   : > { %3534 = vmatpush1.bf16.msra.mxu1 %v2124_v7  ;;  %v1587_v7 = vld [vmem:[%s6929_s9 + $0x1068] sm:$0xff] }
 0x451   : > { %4313 = vmatpush1.bf16.msra.mxu0 %v2732_v17  ;;  %3535 = vmatprep.subr.bf16.mxu1 %v2127_v14  ;;  %v2144_v17 = vunpack.c.h.s8.bf16 %v1280_v53  ;;  %v2752_v14 = vunpack.c.h.s8.bf16 %v1584_v10  ;;  %v2755_v18 = vunpack.c.l.s8.bf16 %v1587_v7  ;;  %v2757_v28 = vunpack.c.h.s8.bf16 %v1587_v7 }
 0x452   : > { %4314 = vmatprep.subr.bf16.mxu0 %v2735_v16  ;;  %v2147_v16 = vunpack.c.l.s8.bf16 %v1283_v12 }
 0x454   : > { %3536 = vmatpush1.bf16.msra.mxu1 %v2126_v21  ;;  %v1586_v21 = vld [vmem:[%s6929_s9 + $0x1060] sm:$0xff] }
 0x455   : > { %4315 = vmatpush1.bf16.msra.mxu0 %v2734_v22  ;;  %3537 = vmatprep.subr.bf16.mxu1 %v2129_v24  ;;  %v2146_v22 = vunpack.c.l.s8.bf16 %v1282_v19  ;;  %v2754_v24 = vunpack.c.l.s8.bf16 %v1586_v21 }
 0x456   : > { %4316 = vmatprep.subr.bf16.mxu0 %v2737_v25  ;;  %v2149_v25 = vunpack.c.h.s8.bf16 %v1283_v12 }
 0x458   : > { %3538 = vmatpush1.bf16.msra.mxu1 %v2128_v23  ;;  %v1589_v23 = vld [vmem:[%s6929_s9 + $0x1078] sm:$0xff] }
 0x459   : > { %4317 = vmatpush1.bf16.msra.mxu0 %v2736_v30  ;;  %3539 = vmatprep.subr.bf16.mxu1 %v2131_v27  ;;  %v2148_v30 = vunpack.c.h.s8.bf16 %v1282_v19  ;;  %v2756_v27 = vunpack.c.h.s8.bf16 %v1586_v21  ;;  %v2759_v32 = vunpack.c.l.s8.bf16 %v1589_v23 }
 0x45a   : > { %4318 = vmatprep.subr.bf16.mxu0 %v2739_v20  ;;  %v2151_v20 = vunpack.c.l.s8.bf16 %v1285_v26 }
 0x45c   : > { %3540 = vmatpush1.bf16.msra.mxu1 %v2130_v31  ;;  %v1588_v31 = vld [vmem:[%s6929_s9 + $0x1070] sm:$0xff] }
 0x45d   : > { %4319 = vmatpush1.bf16.msra.mxu0 %v2738_v33  ;;  %3541 = vmatprep.subr.bf16.mxu1 %v2133_v34  ;;  %v825_v33 = vcombine.high %v7619_v54, %v7619_v54  ;;  %v7670_v34 = vld [vmem:[#allocation3 + $0x38] sm:$0xff]  ;;  %v2758_v37 = vunpack.c.l.s8.bf16 %v1588_v31  ;;  %v2760_v43 = vunpack.c.h.s8.bf16 %v1588_v31 }
 0x45e   : > { %4320 = vmatprep.subr.bf16.mxu0 %v2741_v36  ;;  %v2150_v36 = vunpack.c.l.s8.bf16 %v1284_v29 }
 0x45f   : > { %v7679_v54 = vrot.slane %v825_v33, %v6976_v51  ;;  %v1295_v33 = vld [vmem:[%s6929_s9 + $0x748] sm:$0xff] }
 0x460   : > { %3542 = vmatpush1.bf16.msra.mxu1 %v2132_v41  ;;  %v2761_v41 = vunpack.c.h.s8.bf16 %v1589_v23 }
 0x461   : > { %4321 = vmatpush1.bf16.msra.mxu0 %v2740_v44  ;;  %3543 = vmatprep.subr.bf16.mxu1 %v2135_v42  ;;  %v1287_v44 = vld [vmem:[%s6929_s9 + $0x708] sm:$0xff]  ;;  %v841_v56 = vcombine.high %v7679_v54, %v7679_v54 }
 0x462   : > { %4322 = vmatprep.subr.bf16.mxu0 %v2743_v38  ;;  %v1591_v42 = vld [vmem:[%s6929_s9 + $0x1088] sm:$0xff]  ;;  %v7676_v38 = vrot.slane %v7670_v34, %v6976_v51  ;;  %v2157_v61 = vunpack.c.h.s8.bf16 %v1287_v44 }
 0x463   : > { %v2765_v0 = vunpack.c.h.s8.bf16 %v1591_v42 }
 0x464   : > { %3544 = vmatpush1.bf16.msra.mxu1 %v2134_v35  ;;  %v2155_v35 = vunpack.c.l.s8.bf16 %v1287_v44  ;;  %v687_v50 = vcombine.high %v7676_v38, %v7676_v38 }
 0x465   : > { %4323 = vmatpush1.bf16.msra.mxu0 %v2742_v49  ;;  %3545 = vmatprep.subr.bf16.mxu1 %v2137_v45  ;;  %v2763_v49 = vunpack.c.l.s8.bf16 %v1591_v42  ;;  %v1286_v45 = vld [vmem:[%s6929_s9 + $0x700] sm:$0xff] }
 0x466   : > { %4324 = vmatprep.subr.bf16.mxu0 %v2745_v48  ;;  %v1590_v48 = vld [vmem:[%s6929_s9 + $0x1080] sm:$0xff] }
 0x467   : > { %v1294_v42 = vld [vmem:[%s6929_s9 + $0x740] sm:$0xff] }
 0x468   : > { %3546 = vmatpush1.bf16.msra.mxu1 %v2136_v57  ;;  %v1007_v57 = vpack.c.bf16 %v7624_v58, %v7624_v58  ;;  %v2156_v58 = vunpack.c.h.s8.bf16 %v1286_v45 }
 0x469   : > { %4325 = vmatpush1.bf16.msra.mxu0 %v2744_v59  ;;  %3547 = vmatprep.subr.bf16.mxu1 %v2139_v60  ;;  %v1045_v59 = vpack.c.bf16 %v7628_v4, %v7628_v4  ;;  %v2154_v60 = vunpack.c.l.s8.bf16 %v1286_v45  ;;  %v2764_v4 = vunpack.c.h.s8.bf16 %v1590_v48 }
 0x46a   : > { %4326 = vmatprep.subr.bf16.mxu0 %v2747_v46  ;;  %v2762_v46 = vunpack.c.l.s8.bf16 %v1590_v48  ;;  %v1297_v48 = vld [vmem:[%s6929_s9 + $0x758] sm:$0xff] }
 0x46c   : > { %3548 = vmatpush1.bf16.msra.mxu1 %v2138_v62  ;;  %v1289_v62 = vld [vmem:[%s6929_s9 + $0x718] sm:$0xff] }
 0x46d   : > { %4327 = vmatpush1.bf16.msra.mxu0 %v2746_v55  ;;  %3549 = vmatprep.subr.bf16.mxu1 %v2141_v2  ;;  %v1593_v55 = vld [vmem:[%s6929_s9 + $0x1098] sm:$0xff]  ;;  %v1010_v2 = vpack.c.bf16 %v687_v50, %v687_v50  ;;  %v2159_v1 = vunpack.c.l.s8.bf16 %v1289_v62  ;;  %v2161_v53 = vunpack.c.h.s8.bf16 %v1289_v62 }
 0x46e   : > { %4328 = vmatprep.subr.bf16.mxu0 %v2749_v63  ;;  %v1048_v63 = vpack.c.bf16 %v841_v56, %v841_v56  ;;  %v2767_v3 = vunpack.c.l.s8.bf16 %v1593_v55  ;;  %v2769_v10 = vunpack.c.h.s8.bf16 %v1593_v55  ;;  %v1601_v50 = vld [vmem:[%s6929_s9 + $0x10d8] sm:$0xff]  ;;  %v2172_v56 = vunpack.c.h.s8.bf16 %v1294_v42 }
 0x46f   : > { %v2177_v55 = vunpack.c.h.s8.bf16 %v1297_v48 }
 0x470   : > { %3550 = vmatpush1.bf16.msra.mxu1 %v2140_v5  ;;  %v1288_v5 = vld [vmem:[%s6929_s9 + $0x710] sm:$0xff] }
 0x471   : > { %4329 = vmatpush1.bf16.msra.mxu0 %v2748_v6  ;;  %3551 = vmatprep.subr.bf16.mxu1 %v2143_v8  ;;  %v1592_v6 = vld [vmem:[%s6929_s9 + $0x1090] sm:$0xff]  ;;  %v2158_v8 = vunpack.c.l.s8.bf16 %v1288_v5 }
 0x472   : > { %4330 = vmatprep.subr.bf16.mxu0 %v2751_v9  ;;  %v2766_v9 = vunpack.c.l.s8.bf16 %v1592_v6 }
 0x474   : > { %3552 = vmatpush1.bf16.msra.mxu1 %v2142_v13  ;;  %v1291_v13 = vld [vmem:[%s6929_s9 + $0x728] sm:$0xff] }
 0x475   : > { %4331 = vmatpush1.bf16.msra.mxu0 %v2750_v11  ;;  %3553 = vmatprep.subr.bf16.mxu1 %v2145_v52  ;;  %v1595_v11 = vld [vmem:[%s6929_s9 + $0x10a8] sm:$0xff]  ;;  %v2160_v52 = vunpack.c.h.s8.bf16 %v1288_v5  ;;  %v2163_v12 = vunpack.c.l.s8.bf16 %v1291_v13  ;;  %v2165_v19 = vunpack.c.h.s8.bf16 %v1291_v13 }
 0x476   : > { %4332 = vmatprep.subr.bf16.mxu0 %v2753_v15  ;;  %v2768_v15 = vunpack.c.h.s8.bf16 %v1592_v6  ;;  %v2771_v7 = vunpack.c.l.s8.bf16 %v1595_v11  ;;  %v2773_v21 = vunpack.c.h.s8.bf16 %v1595_v11  ;;  %v1298_v6 = vld [vmem:[%s6929_s9 + $0x760] sm:$0xff]  ;;  %v1301_v11 = vld [vmem:[%s6929_s9 + $0x778] sm:$0xff] }
 0x478   : > { %3554 = vmatpush1.bf16.msra.mxu1 %v2144_v17  ;;  %v1290_v17 = vld [vmem:[%s6929_s9 + $0x720] sm:$0xff] }
 0x479   : > { %4333 = vmatpush1.bf16.msra.mxu0 %v2752_v14  ;;  %3555 = vmatprep.subr.bf16.mxu1 %v2147_v16  ;;  %v1594_v14 = vld [vmem:[%s6929_s9 + $0x10a0] sm:$0xff]  ;;  %v2162_v16 = vunpack.c.l.s8.bf16 %v1290_v17 }
 0x47a   : > { %4334 = vmatprep.subr.bf16.mxu0 %v2755_v18  ;;  %v2770_v18 = vunpack.c.l.s8.bf16 %v1594_v14 }
 0x47c   : > { %3556 = vmatpush1.bf16.msra.mxu1 %v2146_v22  ;;  %v1293_v22 = vld [vmem:[%s6929_s9 + $0x738] sm:$0xff] }
 0x47d   : > { %4335 = vmatpush1.bf16.msra.mxu0 %v2754_v24  ;;  %3557 = vmatprep.subr.bf16.mxu1 %v2149_v25  ;;  %v1597_v24 = vld [vmem:[%s6929_s9 + $0x10b8] sm:$0xff]  ;;  %v2164_v25 = vunpack.c.h.s8.bf16 %v1290_v17  ;;  %v2167_v26 = vunpack.c.l.s8.bf16 %v1293_v22  ;;  %v2169_v29 = vunpack.c.h.s8.bf16 %v1293_v22 }
 0x47e   : > { %4336 = vmatprep.subr.bf16.mxu0 %v2757_v28  ;;  %v2772_v28 = vunpack.c.h.s8.bf16 %v1594_v14  ;;  %v2775_v23 = vunpack.c.l.s8.bf16 %v1597_v24  ;;  %v2777_v31 = vunpack.c.h.s8.bf16 %v1597_v24  ;;  %v1300_v14 = vld [vmem:[%s6929_s9 + $0x770] sm:$0xff]  ;;  %v2185_v24 = vunpack.c.h.s8.bf16 %v1301_v11 }
 0x480   : > { %3558 = vmatpush1.bf16.msra.mxu1 %v2148_v30  ;;  %v1292_v30 = vld [vmem:[%s6929_s9 + $0x730] sm:$0xff] }
 0x481   : > { %4337 = vmatpush1.bf16.msra.mxu0 %v2756_v27  ;;  %3559 = vmatprep.subr.bf16.mxu1 %v2151_v20  ;;  %v1596_v27 = vld [vmem:[%s6929_s9 + $0x10b0] sm:$0xff]  ;;  %v2166_v20 = vunpack.c.l.s8.bf16 %v1292_v30 }
 0x482   : > { %4338 = vmatprep.subr.bf16.mxu0 %v2759_v32  ;;  %v2774_v32 = vunpack.c.l.s8.bf16 %v1596_v27 }
 0x484   : > { %3560 = vmatpush1.bf16.msra.mxu1 %v2150_v36  ;;  %v1599_v36 = vld [vmem:[%s6929_s9 + $0x10c8] sm:$0xff] }
 0x485   : > { %4339 = vmatpush1.bf16.msra.mxu0 %v2758_v37  ;;  %3561 = vmatprep.subr.bf16.mxu1 %v2153_v40  ;;  %v2168_v37 = vunpack.c.h.s8.bf16 %v1292_v30  ;;  %v2776_v40 = vunpack.c.h.s8.bf16 %v1596_v27  ;;  %v2779_v44 = vunpack.c.l.s8.bf16 %v1599_v36  ;;  %v2781_v45 = vunpack.c.h.s8.bf16 %v1599_v36 }
 0x486   : > { %4340 = vmatprep.subr.bf16.mxu0 %v2761_v41  ;;  %v2171_v41 = vunpack.c.l.s8.bf16 %v1295_v33  ;;  %v2184_v30 = vunpack.c.h.s8.bf16 %v1300_v14 }
 0x488   : > { %3562 = vmatpush1.bf16.msra.mxu1 %v2152_v47  ;;  %v1598_v47 = vld [vmem:[%s6929_s9 + $0x10c0] sm:$0xff] }
 0x489   : > { %4341 = vmatpush1.bf16.msra.mxu0 %v2760_v43  ;;  %3572 = vmatprep.subr.bf16.mxu1 %v2155_v35  ;;  %v2170_v43 = vunpack.c.l.s8.bf16 %v1294_v42  ;;  %v2778_v35 = vunpack.c.l.s8.bf16 %v1598_v47 }
 0x48a   : > { %4351 = vmatprep.subr.bf16.mxu0 %v2763_v49  ;;  %v2173_v49 = vunpack.c.h.s8.bf16 %v1295_v33 }
 0x48b   : > { %3564 = vmatmul.mubr.bf16.vlgmr.msra.gmra.mrb[0].mxu1 %v1007_v57  ;;  %v2780_v57 = vunpack.c.h.s8.bf16 %v1598_v47 }
 0x48c   : > { %4343 = vmatmul.mubr.bf16.vlgmr.msra.gmra.mrb[0].mxu0 %v1045_v59  ;;  %3573 = vmatpush1.bf16.msra.mxu1 %v2154_v60  ;;  %v2175_v59 = vunpack.c.l.s8.bf16 %v1297_v48  ;;  %v2783_v60 = vunpack.c.l.s8.bf16 %v1601_v50 }
 0x48d   : > { %4352 = vmatpush1.bf16.msra.mxu0 %v2762_v46  ;;  %3574 = vmatprep.subr.bf16.mxu1 %v2157_v61  ;;  %v1296_v46 = vld [vmem:[%s6929_s9 + $0x750] sm:$0xff] }
 0x48e   : > { %4353 = vmatprep.subr.bf16.mxu0 %v2765_v0  ;;  %3604 = vmatprep.mubr.bf16.mxu1 %v1010_v2  ;;  %v1600_v61 = vld [vmem:[%s6929_s9 + $0x10d0] sm:$0xff]  ;;  %v2174_v0 = vunpack.c.l.s8.bf16 %v1296_v46  ;;  %v2785_v2 = vunpack.c.h.s8.bf16 %v1601_v50 }
 0x48f   : > { %4383 = vmatprep.mubr.bf16.mxu0 %v1048_v63  ;;  %v2782_v62 = vunpack.c.l.s8.bf16 %v1600_v61  ;;  %v1299_v63 = vld [vmem:[%s6929_s9 + $0x768] sm:$0xff] }
 0x490   : > { %3575 = vmatpush1.bf16.msra.mxu1 %v2156_v58  ;;  %v1603_v58 = vld [vmem:[%s6929_s9 + $0x10e8] sm:$0xff] }
 0x491   : > { %4354 = vmatpush1.bf16.msra.mxu0 %v2764_v4  ;;  %3576 = vmatprep.subr.bf16.mxu1 %v2159_v1  ;;  %v2176_v4 = vunpack.c.h.s8.bf16 %v1296_v46  ;;  %v2784_v1 = vunpack.c.h.s8.bf16 %v1600_v61  ;;  %v2787_v5 = vunpack.c.l.s8.bf16 %v1603_v58  ;;  %v2789_v13 = vunpack.c.h.s8.bf16 %v1603_v58 }
 0x492   : > { %4355 = vmatprep.subr.bf16.mxu0 %v2767_v3  ;;  %v2179_v3 = vunpack.c.l.s8.bf16 %v1299_v63 }
 0x494   : > { %3577 = vmatpush1.bf16.msra.mxu1 %v2158_v8  ;;  %v1602_v8 = vld [vmem:[%s6929_s9 + $0x10e0] sm:$0xff] }
 0x495   : > { %4356 = vmatpush1.bf16.msra.mxu0 %v2766_v9  ;;  %3578 = vmatprep.subr.bf16.mxu1 %v2161_v53  ;;  %v2178_v9 = vunpack.c.l.s8.bf16 %v1298_v6  ;;  %v2786_v53 = vunpack.c.l.s8.bf16 %v1602_v8 }
 0x496   : > { %4357 = vmatprep.subr.bf16.mxu0 %v2769_v10  ;;  %v2181_v10 = vunpack.c.h.s8.bf16 %v1299_v63 }
 0x498   : > { %3579 = vmatpush1.bf16.msra.mxu1 %v2160_v52  ;;  %v1605_v52 = vld [vmem:[%s6929_s9 + $0x10f8] sm:$0xff] }
 0x499   : > { %4358 = vmatpush1.bf16.msra.mxu0 %v2768_v15  ;;  %3580 = vmatprep.subr.bf16.mxu1 %v2163_v12  ;;  %v2180_v15 = vunpack.c.h.s8.bf16 %v1298_v6  ;;  %v2788_v12 = vunpack.c.h.s8.bf16 %v1602_v8  ;;  %v2791_v17 = vunpack.c.l.s8.bf16 %v1605_v52 }
 0x49a   : > { %4359 = vmatprep.subr.bf16.mxu0 %v2771_v7  ;;  %v2183_v7 = vunpack.c.l.s8.bf16 %v1301_v11 }
 0x49c   : > { %3581 = vmatpush1.bf16.msra.mxu1 %v2162_v16  ;;  %v1604_v16 = vld [vmem:[%s6929_s9 + $0x10f0] sm:$0xff] }
 0x49d   : > { %4360 = vmatpush1.bf16.msra.mxu0 %v2770_v18  ;;  %3582 = vmatprep.subr.bf16.mxu1 %v2165_v19  ;;  %v672_v18 = vcombine.high %v7670_v34, %v7670_v34  ;;  %v7721_v19 = vld [vmem:[#allocation3 + $0x88] sm:$0xff]  ;;  %v2790_v22 = vunpack.c.l.s8.bf16 %v1604_v16  ;;  %v2792_v27 = vunpack.c.h.s8.bf16 %v1604_v16 }
 0x49e   : > { %4361 = vmatprep.subr.bf16.mxu0 %v2773_v21  ;;  %v2182_v21 = vunpack.c.l.s8.bf16 %v1300_v14  ;;  %v7730_v34 = vrot.slane %v7721_v19, %v6976_v51 }
 0x4a0   : > { %3583 = vmatpush1.bf16.msra.mxu1 %v2164_v25  ;;  %v2793_v25 = vunpack.c.h.s8.bf16 %v1605_v52  ;;  %v857_v36 = vcombine.high %v7730_v34, %v7730_v34 }
 0x4a1   : > { %4362 = vmatpush1.bf16.msra.mxu0 %v2772_v28  ;;  %3584 = vmatprep.subr.bf16.mxu1 %v2167_v26  ;;  %v1303_v28 = vld [vmem:[%s6929_s9 + $0x788] sm:$0xff] }
 0x4a2   : > { %4363 = vmatprep.subr.bf16.mxu0 %v2775_v23  ;;  %v1607_v26 = vld [vmem:[%s6929_s9 + $0x1108] sm:$0xff]  ;;  %v7726_v23 = vrot.slane %v672_v18, %v6976_v51  ;;  %v2189_v42 = vunpack.c.h.s8.bf16 %v1303_v28 }
 0x4a3   : > { %v2797_v47 = vunpack.c.h.s8.bf16 %v1607_v26  ;;  %v1311_v18 = vld [vmem:[%s6929_s9 + $0x7c8] sm:$0xff] }
 0x4a4   : > { %3585 = vmatpush1.bf16.msra.mxu1 %v2166_v20  ;;  %v2187_v20 = vunpack.c.l.s8.bf16 %v1303_v28  ;;  %v688_v33 = vcombine.high %v7726_v23, %v7726_v23 }
 0x4a5   : > { %4364 = vmatpush1.bf16.msra.mxu0 %v2774_v32  ;;  %3586 = vmatprep.subr.bf16.mxu1 %v2169_v29  ;;  %v2795_v32 = vunpack.c.l.s8.bf16 %v1607_v26  ;;  %v1302_v29 = vld [vmem:[%s6929_s9 + $0x780] sm:$0xff] }
 0x4a6   : > { %4365 = vmatprep.subr.bf16.mxu0 %v2777_v31  ;;  %v1606_v31 = vld [vmem:[%s6929_s9 + $0x1100] sm:$0xff] }
 0x4a7   : > { %v1310_v26 = vld [vmem:[%s6929_s9 + $0x7c0] sm:$0xff] }
 0x4a8   : > { %3587 = vmatpush1.bf16.msra.mxu1 %v2168_v37  ;;  %v1009_v37 = vpack.c.bf16 %v7676_v38, %v7676_v38  ;;  %v2188_v38 = vunpack.c.h.s8.bf16 %v1302_v29 }
 0x4a9   : > { %4366 = vmatpush1.bf16.msra.mxu0 %v2776_v40  ;;  %3588 = vmatprep.subr.bf16.mxu1 %v2171_v41  ;;  %v1047_v40 = vpack.c.bf16 %v7679_v54, %v7679_v54  ;;  %v2186_v41 = vunpack.c.l.s8.bf16 %v1302_v29  ;;  %v2796_v54 = vunpack.c.h.s8.bf16 %v1606_v31 }
 0x4aa   : > { %4367 = vmatprep.subr.bf16.mxu0 %v2779_v44  ;;  %v2794_v44 = vunpack.c.l.s8.bf16 %v1606_v31  ;;  %v1313_v31 = vld [vmem:[%s6929_s9 + $0x7d8] sm:$0xff] }
 0x4ac   : > { %3589 = vmatpush1.bf16.msra.mxu1 %v2170_v43  ;;  %v1305_v43 = vld [vmem:[%s6929_s9 + $0x798] sm:$0xff] }
 0x4ad   : > { %4368 = vmatpush1.bf16.msra.mxu0 %v2778_v35  ;;  %3590 = vmatprep.subr.bf16.mxu1 %v2173_v49  ;;  %v1609_v35 = vld [vmem:[%s6929_s9 + $0x1118] sm:$0xff]  ;;  %v1012_v49 = vpack.c.bf16 %v688_v33, %v688_v33  ;;  %v2191_v48 = vunpack.c.l.s8.bf16 %v1305_v43  ;;  %v2193_v46 = vunpack.c.h.s8.bf16 %v1305_v43 }
 0x4ae   : > { %4369 = vmatprep.subr.bf16.mxu0 %v2781_v45  ;;  %v1050_v45 = vpack.c.bf16 %v857_v36, %v857_v36  ;;  %v2799_v50 = vunpack.c.l.s8.bf16 %v1609_v35  ;;  %v2801_v61 = vunpack.c.h.s8.bf16 %v1609_v35  ;;  %v1617_v33 = vld [vmem:[%s6929_s9 + $0x1158] sm:$0xff]  ;;  %v2204_v36 = vunpack.c.h.s8.bf16 %v1310_v26 }
 0x4af   : > { %v2209_v35 = vunpack.c.h.s8.bf16 %v1313_v31 }
 0x4b0   : > { %3591 = vmatpush1.bf16.msra.mxu1 %v2172_v56  ;;  %v1304_v56 = vld [vmem:[%s6929_s9 + $0x790] sm:$0xff] }
 0x4b1   : > { %4370 = vmatpush1.bf16.msra.mxu0 %v2780_v57  ;;  %3592 = vmatprep.subr.bf16.mxu1 %v2175_v59  ;;  %v1608_v57 = vld [vmem:[%s6929_s9 + $0x1110] sm:$0xff]  ;;  %v2190_v59 = vunpack.c.l.s8.bf16 %v1304_v56 }
 0x4b2   : > { %4371 = vmatprep.subr.bf16.mxu0 %v2783_v60  ;;  %v2798_v60 = vunpack.c.l.s8.bf16 %v1608_v57 }
 0x4b4   : > { %3593 = vmatpush1.bf16.msra.mxu1 %v2174_v0  ;;  %v1307_v0 = vld [vmem:[%s6929_s9 + $0x7a8] sm:$0xff] }
 0x4b5   : > { %4372 = vmatpush1.bf16.msra.mxu0 %v2782_v62  ;;  %3594 = vmatprep.subr.bf16.mxu1 %v2177_v55  ;;  %v1611_v62 = vld [vmem:[%s6929_s9 + $0x1128] sm:$0xff]  ;;  %v2192_v55 = vunpack.c.h.s8.bf16 %v1304_v56  ;;  %v2195_v63 = vunpack.c.l.s8.bf16 %v1307_v0  ;;  %v2197_v6 = vunpack.c.h.s8.bf16 %v1307_v0 }
 0x4b6   : > { %4373 = vmatprep.subr.bf16.mxu0 %v2785_v2  ;;  %v2800_v2 = vunpack.c.h.s8.bf16 %v1608_v57  ;;  %v2803_v58 = vunpack.c.l.s8.bf16 %v1611_v62  ;;  %v2805_v8 = vunpack.c.h.s8.bf16 %v1611_v62  ;;  %v1314_v57 = vld [vmem:[%s6929_s9 + $0x7e0] sm:$0xff]  ;;  %v1317_v62 = vld [vmem:[%s6929_s9 + $0x7f8] sm:$0xff] }
 0x4b8   : > { %3595 = vmatpush1.bf16.msra.mxu1 %v2176_v4  ;;  %v1306_v4 = vld [vmem:[%s6929_s9 + $0x7a0] sm:$0xff] }
 0x4b9   : > { %4374 = vmatpush1.bf16.msra.mxu0 %v2784_v1  ;;  %3596 = vmatprep.subr.bf16.mxu1 %v2179_v3  ;;  %v1610_v1 = vld [vmem:[%s6929_s9 + $0x1120] sm:$0xff]  ;;  %v2194_v3 = vunpack.c.l.s8.bf16 %v1306_v4 }
 0x4ba   : > { %4375 = vmatprep.subr.bf16.mxu0 %v2787_v5  ;;  %v2802_v5 = vunpack.c.l.s8.bf16 %v1610_v1 }
 0x4bc   : > { %3597 = vmatpush1.bf16.msra.mxu1 %v2178_v9  ;;  %v1309_v9 = vld [vmem:[%s6929_s9 + $0x7b8] sm:$0xff] }
 0x4bd   : > { %4376 = vmatpush1.bf16.msra.mxu0 %v2786_v53  ;;  %3598 = vmatprep.subr.bf16.mxu1 %v2181_v10  ;;  %v1613_v53 = vld [vmem:[%s6929_s9 + $0x1138] sm:$0xff]  ;;  %v2196_v10 = vunpack.c.h.s8.bf16 %v1306_v4  ;;  %v2199_v11 = vunpack.c.l.s8.bf16 %v1309_v9  ;;  %v2201_v14 = vunpack.c.h.s8.bf16 %v1309_v9 }
 0x4be   : > { %4377 = vmatprep.subr.bf16.mxu0 %v2789_v13  ;;  %v2804_v13 = vunpack.c.h.s8.bf16 %v1610_v1  ;;  %v2807_v52 = vunpack.c.l.s8.bf16 %v1613_v53  ;;  %v2809_v16 = vunpack.c.h.s8.bf16 %v1613_v53  ;;  %v1316_v1 = vld [vmem:[%s6929_s9 + $0x7f0] sm:$0xff]  ;;  %v2217_v53 = vunpack.c.h.s8.bf16 %v1317_v62 }
 0x4c0   : > { %3599 = vmatpush1.bf16.msra.mxu1 %v2180_v15  ;;  %v1308_v15 = vld [vmem:[%s6929_s9 + $0x7b0] sm:$0xff] }
 0x4c1   : > { %4378 = vmatpush1.bf16.msra.mxu0 %v2788_v12  ;;  %3600 = vmatprep.subr.bf16.mxu1 %v2183_v7  ;;  %v1612_v12 = vld [vmem:[%s6929_s9 + $0x1130] sm:$0xff]  ;;  %v2198_v7 = vunpack.c.l.s8.bf16 %v1308_v15 }
 0x4c2   : > { %4379 = vmatprep.subr.bf16.mxu0 %v2791_v17  ;;  %v2806_v17 = vunpack.c.l.s8.bf16 %v1612_v12 }
 0x4c4   : > { %3601 = vmatpush1.bf16.msra.mxu1 %v2182_v21  ;;  %v1615_v21 = vld [vmem:[%s6929_s9 + $0x1148] sm:$0xff] }
 0x4c5   : > { %4380 = vmatpush1.bf16.msra.mxu0 %v2790_v22  ;;  %3602 = vmatprep.subr.bf16.mxu1 %v2185_v24  ;;  %v2200_v22 = vunpack.c.h.s8.bf16 %v1308_v15  ;;  %v2808_v24 = vunpack.c.h.s8.bf16 %v1612_v12  ;;  %v2811_v28 = vunpack.c.l.s8.bf16 %v1615_v21  ;;  %v2813_v29 = vunpack.c.h.s8.bf16 %v1615_v21 }
 0x4c6   : > { %4381 = vmatprep.subr.bf16.mxu0 %v2793_v25  ;;  %v2203_v25 = vunpack.c.l.s8.bf16 %v1311_v18  ;;  %v2216_v15 = vunpack.c.h.s8.bf16 %v1316_v1 }
 0x4c8   : > { %3603 = vmatpush1.bf16.msra.mxu1 %v2184_v30  ;;  %v1614_v30 = vld [vmem:[%s6929_s9 + $0x1140] sm:$0xff] }
 0x4c9   : > { %4382 = vmatpush1.bf16.msra.mxu0 %v2792_v27  ;;  %3613 = vmatprep.subr.bf16.mxu1 %v2187_v20  ;;  %v2202_v27 = vunpack.c.l.s8.bf16 %v1310_v26  ;;  %v2810_v20 = vunpack.c.l.s8.bf16 %v1614_v30 }
 0x4ca   : > { %4392 = vmatprep.subr.bf16.mxu0 %v2795_v32  ;;  %v2205_v32 = vunpack.c.h.s8.bf16 %v1311_v18 }
 0x4cb   : > { %3605 = vmatmul.mubr.bf16.vlgmr.msra.gmra.mrb[0].mxu1 %v1009_v37  ;;  %v2812_v37 = vunpack.c.h.s8.bf16 %v1614_v30 }
 0x4cc   : > { %4384 = vmatmul.mubr.bf16.vlgmr.msra.gmra.mrb[0].mxu0 %v1047_v40  ;;  %3614 = vmatpush1.bf16.msra.mxu1 %v2186_v41  ;;  %v2207_v40 = vunpack.c.l.s8.bf16 %v1313_v31  ;;  %v2815_v41 = vunpack.c.l.s8.bf16 %v1617_v33 }
 0x4cd   : > { %4393 = vmatpush1.bf16.msra.mxu0 %v2794_v44  ;;  %3615 = vmatprep.subr.bf16.mxu1 %v2189_v42  ;;  %v1312_v44 = vld [vmem:[%s6929_s9 + $0x7d0] sm:$0xff] }
 0x4ce   : > { %4394 = vmatprep.subr.bf16.mxu0 %v2797_v47  ;;  %3645 = vmatprep.mubr.bf16.mxu1 %v1012_v49  ;;  %v1616_v42 = vld [vmem:[%s6929_s9 + $0x1150] sm:$0xff]  ;;  %v2206_v47 = vunpack.c.l.s8.bf16 %v1312_v44  ;;  %v2817_v49 = vunpack.c.h.s8.bf16 %v1617_v33 }
 0x4cf   : > { %4424 = vmatprep.mubr.bf16.mxu0 %v1050_v45  ;;  %v2814_v43 = vunpack.c.l.s8.bf16 %v1616_v42  ;;  %v1315_v45 = vld [vmem:[%s6929_s9 + $0x7e8] sm:$0xff] }
 0x4d0   : > { %3616 = vmatpush1.bf16.msra.mxu1 %v2188_v38  ;;  %v1619_v38 = vld [vmem:[%s6929_s9 + $0x1168] sm:$0xff] }
 0x4d1   : > { %4395 = vmatpush1.bf16.msra.mxu0 %v2796_v54  ;;  %3617 = vmatprep.subr.bf16.mxu1 %v2191_v48  ;;  %v2208_v54 = vunpack.c.h.s8.bf16 %v1312_v44  ;;  %v2816_v48 = vunpack.c.h.s8.bf16 %v1616_v42  ;;  %v2819_v56 = vunpack.c.l.s8.bf16 %v1619_v38  ;;  %v2821_v0 = vunpack.c.h.s8.bf16 %v1619_v38 }
 0x4d2   : > { %4396 = vmatprep.subr.bf16.mxu0 %v2799_v50  ;;  %v2211_v50 = vunpack.c.l.s8.bf16 %v1315_v45 }
 0x4d4   : > { %3618 = vmatpush1.bf16.msra.mxu1 %v2190_v59  ;;  %v1618_v59 = vld [vmem:[%s6929_s9 + $0x1160] sm:$0xff] }
 0x4d5   : > { %4397 = vmatpush1.bf16.msra.mxu0 %v2798_v60  ;;  %3619 = vmatprep.subr.bf16.mxu1 %v2193_v46  ;;  %v2210_v60 = vunpack.c.l.s8.bf16 %v1314_v57  ;;  %v2818_v46 = vunpack.c.l.s8.bf16 %v1618_v59 }
 0x4d6   : > { %4398 = vmatprep.subr.bf16.mxu0 %v2801_v61  ;;  %v2213_v61 = vunpack.c.h.s8.bf16 %v1315_v45 }
 0x4d8   : > { %3620 = vmatpush1.bf16.msra.mxu1 %v2192_v55  ;;  %v1621_v55 = vld [vmem:[%s6929_s9 + $0x1178] sm:$0xff] }
 0x4d9   : > { %4399 = vmatpush1.bf16.msra.mxu0 %v2800_v2  ;;  %3621 = vmatprep.subr.bf16.mxu1 %v2195_v63  ;;  %v2212_v2 = vunpack.c.h.s8.bf16 %v1314_v57  ;;  %v2820_v63 = vunpack.c.h.s8.bf16 %v1618_v59  ;;  %v2823_v4 = vunpack.c.l.s8.bf16 %v1621_v55 }
 0x4da   : > { %4400 = vmatprep.subr.bf16.mxu0 %v2803_v58  ;;  %v2215_v58 = vunpack.c.l.s8.bf16 %v1317_v62 }
 0x4dc   : > { %3622 = vmatpush1.bf16.msra.mxu1 %v2194_v3  ;;  %v1620_v3 = vld [vmem:[%s6929_s9 + $0x1170] sm:$0xff] }
 0x4dd   : > { %4401 = vmatpush1.bf16.msra.mxu0 %v2802_v5  ;;  %3623 = vmatprep.subr.bf16.mxu1 %v2197_v6  ;;  %v842_v5 = vcombine.high %v7721_v19, %v7721_v19  ;;  %v7772_v6 = vld [vmem:[#allocation3 + $0x40] sm:$0xff]  ;;  %v2822_v9 = vunpack.c.l.s8.bf16 %v1620_v3  ;;  %v2824_v12 = vunpack.c.h.s8.bf16 %v1620_v3 }
 0x4de   : > { %4402 = vmatprep.subr.bf16.mxu0 %v2805_v8  ;;  %v2214_v8 = vunpack.c.l.s8.bf16 %v1316_v1 }
 0x4df   : > { %v7781_v19 = vrot.slane %v842_v5, %v6976_v51  ;;  %v1327_v5 = vld [vmem:[%s6929_s9 + $0x848] sm:$0xff] }
 0x4e0   : > { %3624 = vmatpush1.bf16.msra.mxu1 %v2196_v10  ;;  %v2825_v10 = vunpack.c.h.s8.bf16 %v1621_v55 }
 0x4e1   : > { %4403 = vmatpush1.bf16.msra.mxu0 %v2804_v13  ;;  %3625 = vmatprep.subr.bf16.mxu1 %v2199_v11  ;;  %v1319_v13 = vld [vmem:[%s6929_s9 + $0x808] sm:$0xff]  ;;  %v858_v21 = vcombine.high %v7781_v19, %v7781_v19 }
 0x4e2   : > { %4404 = vmatprep.subr.bf16.mxu0 %v2807_v52  ;;  %v1623_v11 = vld [vmem:[%s6929_s9 + $0x1188] sm:$0xff]  ;;  %v7778_v52 = vrot.slane %v7772_v6, %v6976_v51  ;;  %v2221_v26 = vunpack.c.h.s8.bf16 %v1319_v13 }
 0x4e3   : > { %v2829_v30 = vunpack.c.h.s8.bf16 %v1623_v11 }
 0x4e4   : > { %3626 = vmatpush1.bf16.msra.mxu1 %v2198_v7  ;;  %v2219_v7 = vunpack.c.l.s8.bf16 %v1319_v13  ;;  %v704_v18 = vcombine.high %v7778_v52, %v7778_v52 }
 0x4e5   : > { %4405 = vmatpush1.bf16.msra.mxu0 %v2806_v17  ;;  %3627 = vmatprep.subr.bf16.mxu1 %v2201_v14  ;;  %v2827_v17 = vunpack.c.l.s8.bf16 %v1623_v11  ;;  %v1318_v14 = vld [vmem:[%s6929_s9 + $0x800] sm:$0xff] }
 0x4e6   : > { %4406 = vmatprep.subr.bf16.mxu0 %v2809_v16  ;;  %v1622_v16 = vld [vmem:[%s6929_s9 + $0x1180] sm:$0xff] }
 0x4e7   : > { %v1326_v11 = vld [vmem:[%s6929_s9 + $0x840] sm:$0xff] }
 0x4e8   : > { %3628 = vmatpush1.bf16.msra.mxu1 %v2200_v22  ;;  %v1011_v22 = vpack.c.bf16 %v7726_v23, %v7726_v23  ;;  %v2220_v23 = vunpack.c.h.s8.bf16 %v1318_v14 }
 0x4e9   : > { %4407 = vmatpush1.bf16.msra.mxu0 %v2808_v24  ;;  %3629 = vmatprep.subr.bf16.mxu1 %v2203_v25  ;;  %v1049_v24 = vpack.c.bf16 %v7730_v34, %v7730_v34  ;;  %v2218_v25 = vunpack.c.l.s8.bf16 %v1318_v14  ;;  %v2828_v34 = vunpack.c.h.s8.bf16 %v1622_v16 }
 0x4ea   : > { %4408 = vmatprep.subr.bf16.mxu0 %v2811_v28  ;;  %v2826_v28 = vunpack.c.l.s8.bf16 %v1622_v16  ;;  %v1329_v16 = vld [vmem:[%s6929_s9 + $0x858] sm:$0xff] }
 0x4ec   : > { %3630 = vmatpush1.bf16.msra.mxu1 %v2202_v27  ;;  %v1321_v27 = vld [vmem:[%s6929_s9 + $0x818] sm:$0xff] }
 0x4ed   : > { %4409 = vmatpush1.bf16.msra.mxu0 %v2810_v20  ;;  %3631 = vmatprep.subr.bf16.mxu1 %v2205_v32  ;;  %v1625_v20 = vld [vmem:[%s6929_s9 + $0x1198] sm:$0xff]  ;;  %v1014_v32 = vpack.c.bf16 %v704_v18, %v704_v18  ;;  %v2223_v31 = vunpack.c.l.s8.bf16 %v1321_v27  ;;  %v2225_v44 = vunpack.c.h.s8.bf16 %v1321_v27 }
 0x4ee   : > { %4410 = vmatprep.subr.bf16.mxu0 %v2813_v29  ;;  %v1052_v29 = vpack.c.bf16 %v858_v21, %v858_v21  ;;  %v2831_v33 = vunpack.c.l.s8.bf16 %v1625_v20  ;;  %v2833_v42 = vunpack.c.h.s8.bf16 %v1625_v20  ;;  %v1633_v18 = vld [vmem:[%s6929_s9 + $0x11d8] sm:$0xff]  ;;  %v2236_v21 = vunpack.c.h.s8.bf16 %v1326_v11 }
 0x4ef   : > { %v2241_v20 = vunpack.c.h.s8.bf16 %v1329_v16 }
 0x4f0   : > { %3632 = vmatpush1.bf16.msra.mxu1 %v2204_v36  ;;  %v1320_v36 = vld [vmem:[%s6929_s9 + $0x810] sm:$0xff] }
 0x4f1   : > { %4411 = vmatpush1.bf16.msra.mxu0 %v2812_v37  ;;  %3633 = vmatprep.subr.bf16.mxu1 %v2207_v40  ;;  %v1624_v37 = vld [vmem:[%s6929_s9 + $0x1190] sm:$0xff]  ;;  %v2222_v40 = vunpack.c.l.s8.bf16 %v1320_v36 }
 0x4f2   : > { %4412 = vmatprep.subr.bf16.mxu0 %v2815_v41  ;;  %v2830_v41 = vunpack.c.l.s8.bf16 %v1624_v37 }
 0x4f4   : > { %3634 = vmatpush1.bf16.msra.mxu1 %v2206_v47  ;;  %v1323_v47 = vld [vmem:[%s6929_s9 + $0x828] sm:$0xff] }
 0x4f5   : > { %4413 = vmatpush1.bf16.msra.mxu0 %v2814_v43  ;;  %3635 = vmatprep.subr.bf16.mxu1 %v2209_v35  ;;  %v1627_v43 = vld [vmem:[%s6929_s9 + $0x11a8] sm:$0xff]  ;;  %v2224_v35 = vunpack.c.h.s8.bf16 %v1320_v36  ;;  %v2227_v45 = vunpack.c.l.s8.bf16 %v1323_v47  ;;  %v2229_v57 = vunpack.c.h.s8.bf16 %v1323_v47 }
 0x4f6   : > { %4414 = vmatprep.subr.bf16.mxu0 %v2817_v49  ;;  %v2832_v49 = vunpack.c.h.s8.bf16 %v1624_v37  ;;  %v2835_v38 = vunpack.c.l.s8.bf16 %v1627_v43  ;;  %v2837_v59 = vunpack.c.h.s8.bf16 %v1627_v43  ;;  %v1330_v37 = vld [vmem:[%s6929_s9 + $0x860] sm:$0xff]  ;;  %v1333_v43 = vld [vmem:[%s6929_s9 + $0x878] sm:$0xff] }
 0x4f8   : > { %3636 = vmatpush1.bf16.msra.mxu1 %v2208_v54  ;;  %v1322_v54 = vld [vmem:[%s6929_s9 + $0x820] sm:$0xff] }
 0x4f9   : > { %4415 = vmatpush1.bf16.msra.mxu0 %v2816_v48  ;;  %3637 = vmatprep.subr.bf16.mxu1 %v2211_v50  ;;  %v1626_v48 = vld [vmem:[%s6929_s9 + $0x11a0] sm:$0xff]  ;;  %v2226_v50 = vunpack.c.l.s8.bf16 %v1322_v54 }
 0x4fa   : > { %4416 = vmatprep.subr.bf16.mxu0 %v2819_v56  ;;  %v2834_v56 = vunpack.c.l.s8.bf16 %v1626_v48 }
 0x4fc   : > { %3638 = vmatpush1.bf16.msra.mxu1 %v2210_v60  ;;  %v1325_v60 = vld [vmem:[%s6929_s9 + $0x838] sm:$0xff] }
 0x4fd   : > { %4417 = vmatpush1.bf16.msra.mxu0 %v2818_v46  ;;  %3639 = vmatprep.subr.bf16.mxu1 %v2213_v61  ;;  %v1629_v46 = vld [vmem:[%s6929_s9 + $0x11b8] sm:$0xff]  ;;  %v2228_v61 = vunpack.c.h.s8.bf16 %v1322_v54  ;;  %v2231_v62 = vunpack.c.l.s8.bf16 %v1325_v60  ;;  %v2233_v1 = vunpack.c.h.s8.bf16 %v1325_v60 }
 0x4fe   : > { %4418 = vmatprep.subr.bf16.mxu0 %v2821_v0  ;;  %v2836_v0 = vunpack.c.h.s8.bf16 %v1626_v48  ;;  %v2839_v55 = vunpack.c.l.s8.bf16 %v1629_v46  ;;  %v2841_v3 = vunpack.c.h.s8.bf16 %v1629_v46  ;;  %v1332_v48 = vld [vmem:[%s6929_s9 + $0x870] sm:$0xff]  ;;  %v2249_v46 = vunpack.c.h.s8.bf16 %v1333_v43 }
 0x500   : > { %3640 = vmatpush1.bf16.msra.mxu1 %v2212_v2  ;;  %v1324_v2 = vld [vmem:[%s6929_s9 + $0x830] sm:$0xff] }
 0x501   : > { %4419 = vmatpush1.bf16.msra.mxu0 %v2820_v63  ;;  %3641 = vmatprep.subr.bf16.mxu1 %v2215_v58  ;;  %v1628_v63 = vld [vmem:[%s6929_s9 + $0x11b0] sm:$0xff]  ;;  %v2230_v58 = vunpack.c.l.s8.bf16 %v1324_v2 }
 0x502   : > { %4420 = vmatprep.subr.bf16.mxu0 %v2823_v4  ;;  %v2838_v4 = vunpack.c.l.s8.bf16 %v1628_v63 }
 0x504   : > { %3642 = vmatpush1.bf16.msra.mxu1 %v2214_v8  ;;  %v1631_v8 = vld [vmem:[%s6929_s9 + $0x11c8] sm:$0xff] }
 0x505   : > { %4421 = vmatpush1.bf16.msra.mxu0 %v2822_v9  ;;  %3643 = vmatprep.subr.bf16.mxu1 %v2217_v53  ;;  %v2232_v9 = vunpack.c.h.s8.bf16 %v1324_v2  ;;  %v2840_v53 = vunpack.c.h.s8.bf16 %v1628_v63  ;;  %v2843_v13 = vunpack.c.l.s8.bf16 %v1631_v8  ;;  %v2845_v14 = vunpack.c.h.s8.bf16 %v1631_v8 }
 0x506   : > { %4422 = vmatprep.subr.bf16.mxu0 %v2825_v10  ;;  %v2235_v10 = vunpack.c.l.s8.bf16 %v1327_v5  ;;  %v2248_v2 = vunpack.c.h.s8.bf16 %v1332_v48 }
 0x508   : > { %3644 = vmatpush1.bf16.msra.mxu1 %v2216_v15  ;;  %v1630_v15 = vld [vmem:[%s6929_s9 + $0x11c0] sm:$0xff] }
 0x509   : > { %4423 = vmatpush1.bf16.msra.mxu0 %v2824_v12  ;;  %3654 = vmatprep.subr.bf16.mxu1 %v2219_v7  ;;  %v2234_v12 = vunpack.c.l.s8.bf16 %v1326_v11  ;;  %v2842_v7 = vunpack.c.l.s8.bf16 %v1630_v15 }
 0x50a   : > { %4433 = vmatprep.subr.bf16.mxu0 %v2827_v17  ;;  %v2237_v17 = vunpack.c.h.s8.bf16 %v1327_v5 }
 0x50b   : > { %3646 = vmatmul.mubr.bf16.vlgmr.msra.gmra.mrb[0].mxu1 %v1011_v22  ;;  %v2844_v22 = vunpack.c.h.s8.bf16 %v1630_v15 }
 0x50c   : > { %4425 = vmatmul.mubr.bf16.vlgmr.msra.gmra.mrb[0].mxu0 %v1049_v24  ;;  %3655 = vmatpush1.bf16.msra.mxu1 %v2218_v25  ;;  %v2239_v24 = vunpack.c.l.s8.bf16 %v1329_v16  ;;  %v2847_v25 = vunpack.c.l.s8.bf16 %v1633_v18 }
 0x50d   : > { %4434 = vmatpush1.bf16.msra.mxu0 %v2826_v28  ;;  %3656 = vmatprep.subr.bf16.mxu1 %v2221_v26  ;;  %v1328_v28 = vld [vmem:[%s6929_s9 + $0x850] sm:$0xff] }
 0x50e   : > { %4435 = vmatprep.subr.bf16.mxu0 %v2829_v30  ;;  %3686 = vmatprep.mubr.bf16.mxu1 %v1014_v32  ;;  %v1632_v26 = vld [vmem:[%s6929_s9 + $0x11d0] sm:$0xff]  ;;  %v2238_v30 = vunpack.c.l.s8.bf16 %v1328_v28  ;;  %v2849_v32 = vunpack.c.h.s8.bf16 %v1633_v18 }
 0x50f   : > { %4465 = vmatprep.mubr.bf16.mxu0 %v1052_v29  ;;  %v2846_v27 = vunpack.c.l.s8.bf16 %v1632_v26  ;;  %v1331_v29 = vld [vmem:[%s6929_s9 + $0x868] sm:$0xff] }
 0x510   : > { %3657 = vmatpush1.bf16.msra.mxu1 %v2220_v23  ;;  %v1635_v23 = vld [vmem:[%s6929_s9 + $0x11e8] sm:$0xff] }
 0x511   : > { %4436 = vmatpush1.bf16.msra.mxu0 %v2828_v34  ;;  %3658 = vmatprep.subr.bf16.mxu1 %v2223_v31  ;;  %v2240_v34 = vunpack.c.h.s8.bf16 %v1328_v28  ;;  %v2848_v31 = vunpack.c.h.s8.bf16 %v1632_v26  ;;  %v2851_v36 = vunpack.c.l.s8.bf16 %v1635_v23  ;;  %v2853_v47 = vunpack.c.h.s8.bf16 %v1635_v23 }
 0x512   : > { %4437 = vmatprep.subr.bf16.mxu0 %v2831_v33  ;;  %v2243_v33 = vunpack.c.l.s8.bf16 %v1331_v29 }
 0x514   : > { %3659 = vmatpush1.bf16.msra.mxu1 %v2222_v40  ;;  %v1634_v40 = vld [vmem:[%s6929_s9 + $0x11e0] sm:$0xff] }
 0x515   : > { %4438 = vmatpush1.bf16.msra.mxu0 %v2830_v41  ;;  %3660 = vmatprep.subr.bf16.mxu1 %v2225_v44  ;;  %v2242_v41 = vunpack.c.l.s8.bf16 %v1330_v37  ;;  %v2850_v44 = vunpack.c.l.s8.bf16 %v1634_v40 }
 0x516   : > { %4439 = vmatprep.subr.bf16.mxu0 %v2833_v42  ;;  %v2245_v42 = vunpack.c.h.s8.bf16 %v1331_v29 }
 0x518   : > { %3661 = vmatpush1.bf16.msra.mxu1 %v2224_v35  ;;  %v1637_v35 = vld [vmem:[%s6929_s9 + $0x11f8] sm:$0xff] }
 0x519   : > { %4440 = vmatpush1.bf16.msra.mxu0 %v2832_v49  ;;  %3662 = vmatprep.subr.bf16.mxu1 %v2227_v45  ;;  %v2244_v49 = vunpack.c.h.s8.bf16 %v1330_v37  ;;  %v2852_v45 = vunpack.c.h.s8.bf16 %v1634_v40  ;;  %v2855_v54 = vunpack.c.l.s8.bf16 %v1637_v35 }
 0x51a   : > { %4441 = vmatprep.subr.bf16.mxu0 %v2835_v38  ;;  %v2247_v38 = vunpack.c.l.s8.bf16 %v1333_v43 }
 0x51c   : > { %3663 = vmatpush1.bf16.msra.mxu1 %v2226_v50  ;;  %v1636_v50 = vld [vmem:[%s6929_s9 + $0x11f0] sm:$0xff] }
 0x51d   : > { %4442 = vmatpush1.bf16.msra.mxu0 %v2834_v56  ;;  %3664 = vmatprep.subr.bf16.mxu1 %v2229_v57  ;;  %v689_v56 = vcombine.high %v7772_v6, %v7772_v6  ;;  %v7823_v57 = vld [vmem:[#allocation3 + $0x90] sm:$0xff]  ;;  %v2854_v60 = vunpack.c.l.s8.bf16 %v1636_v50  ;;  %v2856_v63 = vunpack.c.h.s8.bf16 %v1636_v50 }
 0x51e   : > { %4443 = vmatprep.subr.bf16.mxu0 %v2837_v59  ;;  %v2246_v59 = vunpack.c.l.s8.bf16 %v1332_v48  ;;  %v7832_v6 = vrot.slane %v7823_v57, %v6976_v51 }
 0x520   : > { %3665 = vmatpush1.bf16.msra.mxu1 %v2228_v61  ;;  %v2857_v61 = vunpack.c.h.s8.bf16 %v1637_v35  ;;  %v874_v8 = vcombine.high %v7832_v6, %v7832_v6 }
 0x521   : > { %4444 = vmatpush1.bf16.msra.mxu0 %v2836_v0  ;;  %3666 = vmatprep.subr.bf16.mxu1 %v2231_v62  ;;  %v1335_v0 = vld [vmem:[%s6929_s9 + $0x888] sm:$0xff] }
 0x522   : > { %4445 = vmatprep.subr.bf16.mxu0 %v2839_v55  ;;  %v1639_v62 = vld [vmem:[%s6929_s9 + $0x1208] sm:$0xff]  ;;  %v7828_v55 = vrot.slane %v689_v56, %v6976_v51  ;;  %v2253_v11 = vunpack.c.h.s8.bf16 %v1335_v0 }
 0x523   : > { %v2861_v15 = vunpack.c.h.s8.bf16 %v1639_v62  ;;  %v1343_v56 = vld [vmem:[%s6929_s9 + $0x8c8] sm:$0xff] }
 0x524   : > { %3667 = vmatpush1.bf16.msra.mxu1 %v2230_v58  ;;  %v2251_v58 = vunpack.c.l.s8.bf16 %v1335_v0  ;;  %v705_v5 = vcombine.high %v7828_v55, %v7828_v55 }
 0x525   : > { %4446 = vmatpush1.bf16.msra.mxu0 %v2838_v4  ;;  %3668 = vmatprep.subr.bf16.mxu1 %v2233_v1  ;;  %v2859_v4 = vunpack.c.l.s8.bf16 %v1639_v62  ;;  %v1334_v1 = vld [vmem:[%s6929_s9 + $0x880] sm:$0xff] }
 0x526   : > { %4447 = vmatprep.subr.bf16.mxu0 %v2841_v3  ;;  %v1638_v3 = vld [vmem:[%s6929_s9 + $0x1200] sm:$0xff] }
 0x527   : > { %v1342_v62 = vld [vmem:[%s6929_s9 + $0x8c0] sm:$0xff] }
 0x528   : > { %3669 = vmatpush1.bf16.msra.mxu1 %v2232_v9  ;;  %v1013_v9 = vpack.c.bf16 %v7778_v52, %v7778_v52  ;;  %v2252_v52 = vunpack.c.h.s8.bf16 %v1334_v1 }
 0x529   : > { %4448 = vmatpush1.bf16.msra.mxu0 %v2840_v53  ;;  %3670 = vmatprep.subr.bf16.mxu1 %v2235_v10  ;;  %v1051_v53 = vpack.c.bf16 %v7781_v19, %v7781_v19  ;;  %v2250_v10 = vunpack.c.l.s8.bf16 %v1334_v1  ;;  %v2860_v19 = vunpack.c.h.s8.bf16 %v1638_v3 }
 0x52a   : > { %4449 = vmatprep.subr.bf16.mxu0 %v2843_v13  ;;  %v2858_v13 = vunpack.c.l.s8.bf16 %v1638_v3  ;;  %v1345_v3 = vld [vmem:[%s6929_s9 + $0x8d8] sm:$0xff] }
 0x52c   : > { %3671 = vmatpush1.bf16.msra.mxu1 %v2234_v12  ;;  %v1337_v12 = vld [vmem:[%s6929_s9 + $0x898] sm:$0xff] }
 0x52d   : > { %4450 = vmatpush1.bf16.msra.mxu0 %v2842_v7  ;;  %3672 = vmatprep.subr.bf16.mxu1 %v2237_v17  ;;  %v1641_v7 = vld [vmem:[%s6929_s9 + $0x1218] sm:$0xff]  ;;  %v1016_v17 = vpack.c.bf16 %v705_v5, %v705_v5  ;;  %v2255_v16 = vunpack.c.l.s8.bf16 %v1337_v12  ;;  %v2257_v28 = vunpack.c.h.s8.bf16 %v1337_v12 }
 0x52e   : > { %4451 = vmatprep.subr.bf16.mxu0 %v2845_v14  ;;  %v1054_v14 = vpack.c.bf16 %v874_v8, %v874_v8  ;;  %v2863_v18 = vunpack.c.l.s8.bf16 %v1641_v7  ;;  %v2865_v26 = vunpack.c.h.s8.bf16 %v1641_v7  ;;  %v1649_v5 = vld [vmem:[%s6929_s9 + $0x1258] sm:$0xff]  ;;  %v2268_v8 = vunpack.c.h.s8.bf16 %v1342_v62 }
 0x52f   : > { %v2273_v7 = vunpack.c.h.s8.bf16 %v1345_v3 }
 0x530   : > { %3673 = vmatpush1.bf16.msra.mxu1 %v2236_v21  ;;  %v1336_v21 = vld [vmem:[%s6929_s9 + $0x890] sm:$0xff] }
 0x531   : > { %4452 = vmatpush1.bf16.msra.mxu0 %v2844_v22  ;;  %3674 = vmatprep.subr.bf16.mxu1 %v2239_v24  ;;  %v1640_v22 = vld [vmem:[%s6929_s9 + $0x1210] sm:$0xff]  ;;  %v2254_v24 = vunpack.c.l.s8.bf16 %v1336_v21 }
 0x532   : > { %4453 = vmatprep.subr.bf16.mxu0 %v2847_v25  ;;  %v2862_v25 = vunpack.c.l.s8.bf16 %v1640_v22 }
 0x534   : > { %3675 = vmatpush1.bf16.msra.mxu1 %v2238_v30  ;;  %v1339_v30 = vld [vmem:[%s6929_s9 + $0x8a8] sm:$0xff] }
 0x535   : > { %4454 = vmatpush1.bf16.msra.mxu0 %v2846_v27  ;;  %3676 = vmatprep.subr.bf16.mxu1 %v2241_v20  ;;  %v1643_v27 = vld [vmem:[%s6929_s9 + $0x1228] sm:$0xff]  ;;  %v2256_v20 = vunpack.c.h.s8.bf16 %v1336_v21  ;;  %v2259_v29 = vunpack.c.l.s8.bf16 %v1339_v30  ;;  %v2261_v37 = vunpack.c.h.s8.bf16 %v1339_v30 }
 0x536   : > { %4455 = vmatprep.subr.bf16.mxu0 %v2849_v32  ;;  %v2864_v32 = vunpack.c.h.s8.bf16 %v1640_v22  ;;  %v2867_v23 = vunpack.c.l.s8.bf16 %v1643_v27  ;;  %v2869_v40 = vunpack.c.h.s8.bf16 %v1643_v27  ;;  %v1346_v22 = vld [vmem:[%s6929_s9 + $0x8e0] sm:$0xff]  ;;  %v1349_v27 = vld [vmem:[%s6929_s9 + $0x8f8] sm:$0xff] }
 0x538   : > { %3677 = vmatpush1.bf16.msra.mxu1 %v2240_v34  ;;  %v1338_v34 = vld [vmem:[%s6929_s9 + $0x8a0] sm:$0xff] }
 0x539   : > { %4456 = vmatpush1.bf16.msra.mxu0 %v2848_v31  ;;  %3678 = vmatprep.subr.bf16.mxu1 %v2243_v33  ;;  %v1642_v31 = vld [vmem:[%s6929_s9 + $0x1220] sm:$0xff]  ;;  %v2258_v33 = vunpack.c.l.s8.bf16 %v1338_v34 }
 0x53a   : > { %4457 = vmatprep.subr.bf16.mxu0 %v2851_v36  ;;  %v2866_v36 = vunpack.c.l.s8.bf16 %v1642_v31 }
 0x53c   : > { %3679 = vmatpush1.bf16.msra.mxu1 %v2242_v41  ;;  %v1341_v41 = vld [vmem:[%s6929_s9 + $0x8b8] sm:$0xff] }
 0x53d   : > { %4458 = vmatpush1.bf16.msra.mxu0 %v2850_v44  ;;  %3680 = vmatprep.subr.bf16.mxu1 %v2245_v42  ;;  %v1645_v44 = vld [vmem:[%s6929_s9 + $0x1238] sm:$0xff]  ;;  %v2260_v42 = vunpack.c.h.s8.bf16 %v1338_v34  ;;  %v2263_v43 = vunpack.c.l.s8.bf16 %v1341_v41  ;;  %v2265_v48 = vunpack.c.h.s8.bf16 %v1341_v41  ;;  %v2281_v41 = vunpack.c.h.s8.bf16 %v1349_v27 }
 0x53e   : > { %4459 = vmatprep.subr.bf16.mxu0 %v2853_v47  ;;  %v2868_v47 = vunpack.c.h.s8.bf16 %v1642_v31  ;;  %v2871_v35 = vunpack.c.l.s8.bf16 %v1645_v44  ;;  %v2873_v50 = vunpack.c.h.s8.bf16 %v1645_v44  ;;  %v1348_v31 = vld [vmem:[%s6929_s9 + $0x8f0] sm:$0xff] }
 0x540   : > { %3681 = vmatpush1.bf16.msra.mxu1 %v2244_v49  ;;  %v1340_v49 = vld [vmem:[%s6929_s9 + $0x8b0] sm:$0xff] }
 0x541   : > { %4460 = vmatpush1.bf16.msra.mxu0 %v2852_v45  ;;  %3682 = vmatprep.subr.bf16.mxu1 %v2247_v38  ;;  %v1644_v45 = vld [vmem:[%s6929_s9 + $0x1230] sm:$0xff]  ;;  %v2262_v38 = vunpack.c.l.s8.bf16 %v1340_v49 }
 0x542   : > { %4461 = vmatprep.subr.bf16.mxu0 %v2855_v54  ;;  %v2870_v54 = vunpack.c.l.s8.bf16 %v1644_v45 }
 0x544   : > { %3683 = vmatpush1.bf16.msra.mxu1 %v2246_v59  ;;  %v1647_v59 = vld [vmem:[%s6929_s9 + $0x1248] sm:$0xff] }
 0x545   : > { %4462 = vmatpush1.bf16.msra.mxu0 %v2854_v60  ;;  %3684 = vmatprep.subr.bf16.mxu1 %v2249_v46  ;;  %v2264_v60 = vunpack.c.h.s8.bf16 %v1340_v49  ;;  %v2872_v46 = vunpack.c.h.s8.bf16 %v1644_v45  ;;  %v2875_v0 = vunpack.c.l.s8.bf16 %v1647_v59  ;;  %v2877_v1 = vunpack.c.h.s8.bf16 %v1647_v59 }
 0x546   : > { %4463 = vmatprep.subr.bf16.mxu0 %v2857_v61  ;;  %v2267_v61 = vunpack.c.l.s8.bf16 %v1343_v56  ;;  %v1015_v59 = vpack.c.bf16 %v7828_v55, %v7828_v55 }
 0x548   : > { %3685 = vmatpush1.bf16.msra.mxu1 %v2248_v2  ;;  %v1646_v2 = vld [vmem:[%s6929_s9 + $0x1240] sm:$0xff] }
 0x549   : > { %4464 = vmatpush1.bf16.msra.mxu0 %v2856_v63  ;;  %3695 = vmatprep.subr.bf16.mxu1 %v2251_v58  ;;  %v2266_v63 = vunpack.c.l.s8.bf16 %v1342_v62  ;;  %v2874_v58 = vunpack.c.l.s8.bf16 %v1646_v2 }
 0x54a   : > { %4474 = vmatprep.subr.bf16.mxu0 %v2859_v4  ;;  %v2269_v4 = vunpack.c.h.s8.bf16 %v1343_v56 }
 0x54b   : > { %3687 = vmatmul.mubr.bf16.vlgmr.msra.gmra.mrb[0].mxu1 %v1013_v9  ;;  %v2876_v9 = vunpack.c.h.s8.bf16 %v1646_v2  ;;  %v1353_v2 = vld [vmem:[%s6929_s9 + $0x918] sm:$0xff] }
 0x54c   : > { %4466 = vmatmul.mubr.bf16.vlgmr.msra.gmra.mrb[0].mxu0 %v1051_v53  ;;  %3696 = vmatpush1.bf16.msra.mxu1 %v2250_v10  ;;  %v2271_v53 = vunpack.c.l.s8.bf16 %v1345_v3  ;;  %v2879_v10 = vunpack.c.l.s8.bf16 %v1649_v5 }
 0x54d   : > { %4475 = vmatpush1.bf16.msra.mxu0 %v2858_v13  ;;  %3697 = vmatprep.subr.bf16.mxu1 %v2253_v11  ;;  %v1344_v13 = vld [vmem:[%s6929_s9 + $0x8d0] sm:$0xff] }
 0x54e   : > { %4476 = vmatprep.subr.bf16.mxu0 %v2861_v15  ;;  %3727 = vmatprep.mubr.bf16.mxu1 %v1016_v17  ;;  %v1648_v11 = vld [vmem:[%s6929_s9 + $0x1250] sm:$0xff]  ;;  %v2270_v15 = vunpack.c.l.s8.bf16 %v1344_v13  ;;  %v2881_v17 = vunpack.c.h.s8.bf16 %v1649_v5 }
 0x54f   : > { %4506 = vmatprep.mubr.bf16.mxu0 %v1054_v14  ;;  %v2878_v12 = vunpack.c.l.s8.bf16 %v1648_v11  ;;  %v1347_v14 = vld [vmem:[%s6929_s9 + $0x8e8] sm:$0xff]  ;;  %v1352_v5 = vld [vmem:[%s6929_s9 + $0x910] sm:$0xff] }
 0x550   : > { %3698 = vmatpush1.bf16.msra.mxu1 %v2252_v52  ;;  %v1651_v52 = vld [vmem:[%s6929_s9 + $0x1268] sm:$0xff] }
 0x551   : > { %4477 = vmatpush1.bf16.msra.mxu0 %v2860_v19  ;;  %3699 = vmatprep.subr.bf16.mxu1 %v2255_v16  ;;  %v2272_v19 = vunpack.c.h.s8.bf16 %v1344_v13  ;;  %v2880_v16 = vunpack.c.h.s8.bf16 %v1648_v11  ;;  %v2883_v21 = vunpack.c.l.s8.bf16 %v1651_v52  ;;  %v2885_v30 = vunpack.c.h.s8.bf16 %v1651_v52  ;;  %v1355_v11 = vld [vmem:[%s6929_s9 + $0x928] sm:$0xff]  ;;  %v1354_v52 = vld [vmem:[%s6929_s9 + $0x920] sm:$0xff] }
 0x552   : > { %4478 = vmatprep.subr.bf16.mxu0 %v2863_v18  ;;  %v2275_v18 = vunpack.c.l.s8.bf16 %v1347_v14 }
 0x554   : > { %3700 = vmatpush1.bf16.msra.mxu1 %v2254_v24  ;;  %v1650_v24 = vld [vmem:[%s6929_s9 + $0x1260] sm:$0xff] }
 0x555   : > { %4479 = vmatpush1.bf16.msra.mxu0 %v2862_v25  ;;  %3701 = vmatprep.subr.bf16.mxu1 %v2257_v28  ;;  %v2274_v25 = vunpack.c.l.s8.bf16 %v1346_v22  ;;  %v2882_v28 = vunpack.c.l.s8.bf16 %v1650_v24 }
 0x556   : > { %4480 = vmatprep.subr.bf16.mxu0 %v2865_v26  ;;  %v2277_v26 = vunpack.c.h.s8.bf16 %v1347_v14 }
 0x558   : > { %3702 = vmatpush1.bf16.msra.mxu1 %v2256_v20  ;;  %v1653_v20 = vld [vmem:[%s6929_s9 + $0x1278] sm:$0xff] }
 0x559   : > { %4481 = vmatpush1.bf16.msra.mxu0 %v2864_v32  ;;  %3703 = vmatprep.subr.bf16.mxu1 %v2259_v29  ;;  %v2276_v32 = vunpack.c.h.s8.bf16 %v1346_v22  ;;  %v2884_v29 = vunpack.c.h.s8.bf16 %v1650_v24  ;;  %v2887_v34 = vunpack.c.l.s8.bf16 %v1653_v20  ;;  %v2889_v44 = vunpack.c.h.s8.bf16 %v1653_v20  ;;  %v1357_v24 = vld [vmem:[%s6929_s9 + $0x938] sm:$0xff]  ;;  %v1356_v20 = vld [vmem:[%s6929_s9 + $0x930] sm:$0xff] }
 0x55a   : > { %4482 = vmatprep.subr.bf16.mxu0 %v2867_v23  ;;  %v2279_v23 = vunpack.c.l.s8.bf16 %v1349_v27 }
 0x55c   : > { %3704 = vmatpush1.bf16.msra.mxu1 %v2258_v33  ;;  %v1652_v33 = vld [vmem:[%s6929_s9 + $0x1270] sm:$0xff] }
 0x55d   : > { %4483 = vmatpush1.bf16.msra.mxu0 %v2866_v36  ;;  %3705 = vmatprep.subr.bf16.mxu1 %v2261_v37  ;;  %v859_v36 = vcombine.high %v7823_v57, %v7823_v57  ;;  %v2278_v37 = vunpack.c.l.s8.bf16 %v1348_v31  ;;  %v2280_v57 = vunpack.c.h.s8.bf16 %v1348_v31  ;;  %v2888_v49 = vunpack.c.h.s8.bf16 %v1652_v33 }
 0x55e   : > { %4484 = vmatprep.subr.bf16.mxu0 %v2869_v40  ;;  %v2886_v40 = vunpack.c.l.s8.bf16 %v1652_v33  ;;  %v1359_v33 = vld [vmem:[%s6929_s9 + $0x948] sm:$0xff] }
 0x560   : > { %3706 = vmatpush1.bf16.msra.mxu1 %v2260_v42  ;;  %v1351_v42 = vld [vmem:[%s6929_s9 + $0x908] sm:$0xff] }
 0x561   : > { %4485 = vmatpush1.bf16.msra.mxu0 %v2868_v47  ;;  %3707 = vmatprep.subr.bf16.mxu1 %v2263_v43  ;;  %v1655_v47 = vld [vmem:[%s6929_s9 + $0x1288] sm:$0xff]  ;;  %v2283_v45 = vunpack.c.l.s8.bf16 %v1351_v42 }
 0x562   : > { %4486 = vmatprep.subr.bf16.mxu0 %v2871_v35  ;;  %v7876_v43 = vld.sshfl [vmem:[#allocation3 + $0x48] sm:$0xff pattern:$0x76325410]  ;;  %v7879_v35 = vrot.slane %v859_v36, %v6976_v51  ;;  %v2893_v62 = vunpack.c.h.s8.bf16 %v1655_v47 }
 0x563   : > { %v1663_v36 = vld [vmem:[%s6929_s9 + $0x12c8] sm:$0xff] }
 0x564   : > { %3708 = vmatpush1.bf16.msra.mxu1 %v2262_v38  ;;  %v2891_v38 = vunpack.c.l.s8.bf16 %v1655_v47  ;;  %v875_v56 = vcombine.high %v7879_v35, %v7879_v35  ;;  %v1662_v47 = vld [vmem:[%s6929_s9 + $0x12c0] sm:$0xff] }
 0x565   : > { %4487 = vmatpush1.bf16.msra.mxu0 %v2870_v54  ;;  %3709 = vmatprep.subr.bf16.mxu1 %v2265_v48  ;;  %v1350_v54 = vld [vmem:[%s6929_s9 + $0x900] sm:$0xff] }
 0x566   : > { %4488 = vmatprep.subr.bf16.mxu0 %v2873_v50  ;;  %v1654_v48 = vld [vmem:[%s6929_s9 + $0x1280] sm:$0xff]  ;;  %v721_v50 = vcombine.high %v7876_v43, %v7876_v43  ;;  %v2284_v55 = vunpack.c.h.s8.bf16 %v1350_v54 }
 0x568   : > { %3710 = vmatpush1.bf16.msra.mxu1 %v2264_v60  ;;  %v1053_v60 = vpack.c.bf16 %v7832_v6, %v7832_v6  ;;  %v2892_v6 = vunpack.c.h.s8.bf16 %v1654_v48 }
 0x569   : > { %4489 = vmatpush1.bf16.msra.mxu0 %v2872_v46  ;;  %3711 = vmatprep.subr.bf16.mxu1 %v2267_v61  ;;  %v2282_v46 = vunpack.c.l.s8.bf16 %v1350_v54  ;;  %v2890_v61 = vunpack.c.l.s8.bf16 %v1654_v48  ;;  %v1361_v54 = vld [vmem:[%s6929_s9 + $0x958] sm:$0xff] }
 0x56a   : > { %4490 = vmatprep.subr.bf16.mxu0 %v2875_v0  ;;  %v2285_v0 = vunpack.c.h.s8.bf16 %v1351_v42  ;;  %v1358_v42 = vld [vmem:[%s6929_s9 + $0x940] sm:$0xff]  ;;  %v1665_v48 = vld [vmem:[%s6929_s9 + $0x12d8] sm:$0xff] }
 0x56c   : > { %3712 = vmatpush1.bf16.msra.mxu1 %v2266_v63  ;;  %v1657_v63 = vld [vmem:[%s6929_s9 + $0x1298] sm:$0xff] }
 0x56d   : > { %4491 = vmatpush1.bf16.msra.mxu0 %v2874_v58  ;;  %3713 = vmatprep.subr.bf16.mxu1 %v2269_v4  ;;  %v1018_v58 = vpack.c.bf16 %v721_v50, %v721_v50  ;;  %v1056_v4 = vpack.c.bf16 %v875_v56, %v875_v56  ;;  %v2895_v3 = vunpack.c.l.s8.bf16 %v1657_v63  ;;  %v2897_v13 = vunpack.c.h.s8.bf16 %v1657_v63 }
 0x56e   : > { %4492 = vmatprep.subr.bf16.mxu0 %v2877_v1  ;;  %v2287_v1 = vunpack.c.l.s8.bf16 %v1353_v2  ;;  %v2300_v50 = vunpack.c.h.s8.bf16 %v1358_v42  ;;  %v2908_v56 = vunpack.c.h.s8.bf16 %v1662_v47  ;;  %v2913_v63 = vunpack.c.h.s8.bf16 %v1665_v48 }
 0x570   : > { %3714 = vmatpush1.bf16.msra.mxu1 %v2268_v8  ;;  %v1656_v8 = vld [vmem:[%s6929_s9 + $0x1290] sm:$0xff] }
 0x571   : > { %4493 = vmatpush1.bf16.msra.mxu0 %v2876_v9  ;;  %3715 = vmatprep.subr.bf16.mxu1 %v2271_v53  ;;  %v2286_v9 = vunpack.c.l.s8.bf16 %v1352_v5  ;;  %v2894_v53 = vunpack.c.l.s8.bf16 %v1656_v8 }
 0x572   : > { %4494 = vmatprep.subr.bf16.mxu0 %v2879_v10  ;;  %v2289_v10 = vunpack.c.h.s8.bf16 %v1353_v2  ;;  %v2305_v2 = vunpack.c.h.s8.bf16 %v1361_v54 }
 0x574   : > { %3716 = vmatpush1.bf16.msra.mxu1 %v2270_v15  ;;  %v1659_v15 = vld [vmem:[%s6929_s9 + $0x12a8] sm:$0xff] }
 0x575   : > { %4495 = vmatpush1.bf16.msra.mxu0 %v2878_v12  ;;  %3717 = vmatprep.subr.bf16.mxu1 %v2273_v7  ;;  %v2288_v12 = vunpack.c.h.s8.bf16 %v1352_v5  ;;  %v2896_v7 = vunpack.c.h.s8.bf16 %v1656_v8  ;;  %v2899_v14 = vunpack.c.l.s8.bf16 %v1659_v15  ;;  %v2901_v22 = vunpack.c.h.s8.bf16 %v1659_v15  ;;  %v1362_v5 = vld [vmem:[%s6929_s9 + $0x960] sm:$0xff]  ;;  %v1669_v15 = vld [vmem:[%s6929_s9 + $0x12f8] sm:$0xff] }
 0x576   : > { %4496 = vmatprep.subr.bf16.mxu0 %v2881_v17  ;;  %v2291_v17 = vunpack.c.l.s8.bf16 %v1355_v11  ;;  %v1666_v8 = vld [vmem:[%s6929_s9 + $0x12e0] sm:$0xff] }
 0x578   : > { %3718 = vmatpush1.bf16.msra.mxu1 %v2272_v19  ;;  %v1658_v19 = vld [vmem:[%s6929_s9 + $0x12a0] sm:$0xff] }
 0x579   : > { %4497 = vmatpush1.bf16.msra.mxu0 %v2880_v16  ;;  %3719 = vmatprep.subr.bf16.mxu1 %v2275_v18  ;;  %v2290_v16 = vunpack.c.l.s8.bf16 %v1354_v52  ;;  %v2898_v18 = vunpack.c.l.s8.bf16 %v1658_v19 }
 0x57a   : > { %4498 = vmatprep.subr.bf16.mxu0 %v2883_v21  ;;  %v2293_v21 = vunpack.c.h.s8.bf16 %v1355_v11  ;;  %v1365_v11 = vld [vmem:[%s6929_s9 + $0x978] sm:$0xff] }
 0x57c   : > { %3720 = vmatpush1.bf16.msra.mxu1 %v2274_v25  ;;  %v1661_v25 = vld [vmem:[%s6929_s9 + $0x12b8] sm:$0xff] }
 0x57d   : > { %4499 = vmatpush1.bf16.msra.mxu0 %v2882_v28  ;;  %3721 = vmatprep.subr.bf16.mxu1 %v2277_v26  ;;  %v2292_v28 = vunpack.c.h.s8.bf16 %v1354_v52  ;;  %v2900_v26 = vunpack.c.h.s8.bf16 %v1658_v19  ;;  %v2903_v27 = vunpack.c.l.s8.bf16 %v1661_v25  ;;  %v2905_v31 = vunpack.c.h.s8.bf16 %v1661_v25  ;;  %v1364_v52 = vld [vmem:[%s6929_s9 + $0x970] sm:$0xff] }
 0x57e   : > { %4500 = vmatprep.subr.bf16.mxu0 %v2885_v30  ;;  %v2295_v30 = vunpack.c.l.s8.bf16 %v1357_v24  ;;  %v1668_v19 = vld [vmem:[%s6929_s9 + $0x12f0] sm:$0xff]  ;;  %v2921_v25 = vunpack.c.h.s8.bf16 %v1669_v15 }
 0x580   : > { %3722 = vmatpush1.bf16.msra.mxu1 %v2276_v32  ;;  %v1660_v32 = vld [vmem:[%s6929_s9 + $0x12b0] sm:$0xff] }
 0x581   : > { %4501 = vmatpush1.bf16.msra.mxu0 %v2884_v29  ;;  %3723 = vmatprep.subr.bf16.mxu1 %v2279_v23  ;;  %v2294_v29 = vunpack.c.l.s8.bf16 %v1356_v20  ;;  %v2902_v23 = vunpack.c.l.s8.bf16 %v1660_v32 }
 0x582   : > { %4502 = vmatprep.subr.bf16.mxu0 %v2887_v34  ;;  %v2297_v34 = vunpack.c.h.s8.bf16 %v1357_v24  ;;  %v2313_v24 = vunpack.c.h.s8.bf16 %v1365_v11 }
 0x584   : > { %3724 = vmatpush1.bf16.msra.mxu1 %v2278_v37  ;;  %v2296_v37 = vunpack.c.h.s8.bf16 %v1356_v20 }
 0x585   : > { %4503 = vmatpush1.bf16.msra.mxu0 %v2886_v40  ;;  %3725 = vmatprep.subr.bf16.mxu1 %v2281_v41  ;;  %v2904_v40 = vunpack.c.h.s8.bf16 %v1660_v32  ;;  %v2299_v41 = vunpack.c.l.s8.bf16 %v1359_v33 }
 0x586   : > { %4504 = vmatprep.subr.bf16.mxu0 %v2889_v44  ;;  %v2907_v44 = vunpack.c.l.s8.bf16 %v1663_v36 }
 0x588   : > { %3726 = vmatpush1.bf16.msra.mxu1 %v2280_v57  ;;  %v2298_v57 = vunpack.c.l.s8.bf16 %v1358_v42 }
 0x589   : > { %4505 = vmatpush1.bf16.msra.mxu0 %v2888_v49  ;;  %3736 = vmatprep.subr.bf16.mxu1 %v2283_v45  ;;  %v2906_v49 = vunpack.c.l.s8.bf16 %v1662_v47  ;;  %v2301_v45 = vunpack.c.h.s8.bf16 %v1359_v33  ;;  %v1055_v33 = vpack.c.bf16 %v7879_v35, %v7879_v35  ;;  %v1705_v47 = vld [vmem:[%s6929_s9 + $0x1418] sm:$0xff] }
 0x58a   : > { %4515 = vmatprep.subr.bf16.mxu0 %v2891_v38  ;;  %v2909_v38 = vunpack.c.h.s8.bf16 %v1663_v36 }
 0x58b   : > { %3728 = vmatmul.mubr.bf16.vlgmr.msra.gmra.mrb[0].mxu1 %v1015_v59  ;;  %v2303_v59 = vunpack.c.l.s8.bf16 %v1361_v54  ;;  %v6578_v54 = vmov 0  }
 0x58c   : > { %4507 = vmatmul.mubr.bf16.vlgmr.msra.gmra.mrb[0].mxu0 %v1053_v60  ;;  %3737 = vmatpush1.bf16.msra.mxu1 %v2282_v46  ;;  %v2911_v60 = vunpack.c.l.s8.bf16 %v1665_v48  ;;  %v1360_v46 = vld [vmem:[%s6929_s9 + $0x950] sm:$0xff] }
 0x58d   : > { %4516 = vmatpush1.bf16.msra.mxu0 %v2890_v61  ;;  %3738 = vmatprep.subr.bf16.mxu1 %v2285_v0  ;;  %v1664_v61 = vld [vmem:[%s6929_s9 + $0x12d0] sm:$0xff]  ;;  %v2302_v0 = vunpack.c.l.s8.bf16 %v1360_v46 }
 0x58e   : > { %4517 = vmatprep.subr.bf16.mxu0 %v2893_v62  ;;  %3768 = vmatprep.mubr.bf16.mxu1 %v1018_v58  ;;  %v2910_v62 = vunpack.c.l.s8.bf16 %v1664_v61  ;;  %v1363_v58 = vld [vmem:[%s6929_s9 + $0x968] sm:$0xff] }
 0x58f   : > { %4547 = vmatprep.mubr.bf16.mxu0 %v1056_v4  ;;  %v1667_v4 = vld [vmem:[%s6929_s9 + $0x12e8] sm:$0xff] }
 0x590   : > { %3739 = vmatpush1.bf16.msra.mxu1 %v2284_v55  ;;  %v2304_v55 = vunpack.c.h.s8.bf16 %v1360_v46 }
 0x591   : > { %4518 = vmatpush1.bf16.msra.mxu0 %v2892_v6  ;;  %3740 = vmatprep.subr.bf16.mxu1 %v2287_v1  ;;  %v2912_v6 = vunpack.c.h.s8.bf16 %v1664_v61  ;;  %v2307_v1 = vunpack.c.l.s8.bf16 %v1363_v58 }
 0x592   : > { %4519 = vmatprep.subr.bf16.mxu0 %v2895_v3  ;;  %v2915_v3 = vunpack.c.l.s8.bf16 %v1667_v4 }
 0x594   : > { %3741 = vmatpush1.bf16.msra.mxu1 %v2286_v9  ;;  %v2306_v9 = vunpack.c.l.s8.bf16 %v1362_v5 }
 0x595   : > { %4520 = vmatpush1.bf16.msra.mxu0 %v2894_v53  ;;  %3742 = vmatprep.subr.bf16.mxu1 %v2289_v10  ;;  %v2914_v53 = vunpack.c.l.s8.bf16 %v1666_v8  ;;  %v2309_v10 = vunpack.c.h.s8.bf16 %v1363_v58 }
 0x596   : > { %4521 = vmatprep.subr.bf16.mxu0 %v2897_v13  ;;  %v2917_v13 = vunpack.c.h.s8.bf16 %v1667_v4 }
 0x598   : > { %3743 = vmatpush1.bf16.msra.mxu1 %v2288_v12  ;;  %v2308_v12 = vunpack.c.h.s8.bf16 %v1362_v5 }
 0x599   : > { %4522 = vmatpush1.bf16.msra.mxu0 %v2896_v7  ;;  %3744 = vmatprep.subr.bf16.mxu1 %v2291_v17  ;;  %v2916_v7 = vunpack.c.h.s8.bf16 %v1666_v8  ;;  %v2311_v17 = vunpack.c.l.s8.bf16 %v1365_v11 }
 0x59a   : > { %4523 = vmatprep.subr.bf16.mxu0 %v2899_v14  ;;  %v2919_v14 = vunpack.c.l.s8.bf16 %v1669_v15 }
 0x59c   : > { %3745 = vmatpush1.bf16.msra.mxu1 %v2290_v16  ;;  %v7919_v16 = vld [vmem:[#allocation3 + $0x98] sm:$0xff] }
 0x59d   : > { %4524 = vmatpush1.bf16.msra.mxu0 %v2898_v18  ;;  %3746 = vmatprep.subr.bf16.mxu1 %v2293_v21  ;;  %v2310_v18 = vunpack.c.l.s8.bf16 %v1364_v52  ;;  %v2918_v21 = vunpack.c.l.s8.bf16 %v1668_v19 }
 0x59e   : > { %4525 = vmatprep.subr.bf16.mxu0 %v2901_v22  ;;  %v7923_v22 = vrot.slane %v7919_v16, %v6976_v51 }
 0x5a0   : > { %3747 = vmatpush1.bf16.msra.mxu1 %v2292_v28  ;;  %v1671_v28 = vld [vmem:[%s6929_s9 + $0x1308] sm:$0xff]  ;;  %v891_v20 = vcombine.high %v7923_v22, %v7923_v22 }
 0x5a1   : > { %4526 = vmatpush1.bf16.msra.mxu0 %v2900_v26  ;;  %3748 = vmatprep.subr.bf16.mxu1 %v2295_v30  ;;  %v1703_v26 = vld [vmem:[%s6929_s9 + $0x1408] sm:$0xff]  ;;  %v2312_v30 = vunpack.c.h.s8.bf16 %v1364_v52  ;;  %v2923_v32 = vunpack.c.l.s8.bf16 %v1671_v28 }
 0x5a2   : > { %4527 = vmatprep.subr.bf16.mxu0 %v2903_v27  ;;  %v2920_v27 = vunpack.c.h.s8.bf16 %v1668_v19  ;;  %v2989_v42 = vunpack.c.h.s8.bf16 %v1703_v26 }
 0x5a4   : > { %3749 = vmatpush1.bf16.msra.mxu1 %v2294_v29  ;;  %v1670_v29 = vld [vmem:[%s6929_s9 + $0x1300] sm:$0xff] }
 0x5a5   : > { %4528 = vmatpush1.bf16.msra.mxu0 %v2902_v23  ;;  %3750 = vmatprep.subr.bf16.mxu1 %v2297_v34  ;;  %v2987_v23 = vunpack.c.l.s8.bf16 %v1703_v26  ;;  %v1702_v34 = vld [vmem:[%s6929_s9 + $0x1400] sm:$0xff]  ;;  %v2922_v36 = vunpack.c.l.s8.bf16 %v1670_v29 }
 0x5a6   : > { %4529 = vmatprep.subr.bf16.mxu0 %v2905_v31  ;;  %v1017_v31 = vpack.c.bf16 %v7876_v43, %v7876_v43  ;;  %v2924_v43 = vunpack.c.h.s8.bf16 %v1670_v29  ;;  %v1684_v29 = vld [vmem:[%s6929_s9 + $0x1370] sm:$0xff] }
 0x5a8   : > { %3751 = vmatpush1.bf16.msra.mxu1 %v2296_v37  ;;  %v1058_v37 = vpack.c.bf16 %v891_v20, %v891_v20  ;;  %v876_v20 = vcombine.high %v7919_v16, %v7919_v16 }
 0x5a9   : > { %4530 = vmatpush1.bf16.msra.mxu0 %v2904_v40  ;;  %3752 = vmatprep.subr.bf16.mxu1 %v2299_v41  ;;  %v2925_v40 = vunpack.c.h.s8.bf16 %v1671_v28  ;;  %v2986_v41 = vunpack.c.l.s8.bf16 %v1702_v34 }
 0x5aa   : > { %4531 = vmatprep.subr.bf16.mxu0 %v2907_v44  ;;  %v1673_v44 = vld [vmem:[%s6929_s9 + $0x1318] sm:$0xff] }
 0x5ab   : > { %v2927_v35 = vunpack.c.l.s8.bf16 %v1673_v44 }
 0x5ac   : > { %3753 = vmatpush1.bf16.msra.mxu1 %v2298_v57  ;;  %v1672_v57 = vld [vmem:[%s6929_s9 + $0x1310] sm:$0xff] }
 0x5ad   : > { %4532 = vmatpush1.bf16.msra.mxu0 %v2906_v49  ;;  %3754 = vmatprep.subr.bf16.mxu1 %v2301_v45  ;;  %v2988_v49 = vunpack.c.h.s8.bf16 %v1702_v34  ;;  %v2991_v45 = vunpack.c.l.s8.bf16 %v1705_v47  ;;  %v2926_v48 = vunpack.c.l.s8.bf16 %v1672_v57  ;;  %v2928_v46 = vunpack.c.h.s8.bf16 %v1672_v57 }
 0x5ae   : > { %4533 = vmatprep.subr.bf16.mxu0 %v2909_v38  ;;  %v1704_v38 = vld [vmem:[%s6929_s9 + $0x1410] sm:$0xff]  ;;  %v7954_v34 = vrot.slane %v876_v20, %v6976_v51 }
 0x5b0   : > { %3755 = vmatpush1.bf16.msra.mxu1 %v2300_v50  ;;  %v2929_v50 = vunpack.c.h.s8.bf16 %v1673_v44 }
 0x5b1   : > { %4534 = vmatpush1.bf16.msra.mxu0 %v2908_v56  ;;  %3756 = vmatprep.subr.bf16.mxu1 %v2303_v59  ;;  %v2990_v56 = vunpack.c.l.s8.bf16 %v1704_v38  ;;  %v1675_v59 = vld [vmem:[%s6929_s9 + $0x1328] sm:$0xff] }
 0x5b2   : > { %4535 = vmatprep.subr.bf16.mxu0 %v2911_v60  ;;  %v2993_v60 = vunpack.c.h.s8.bf16 %v1705_v47  ;;  %v2931_v61 = vunpack.c.l.s8.bf16 %v1675_v59  ;;  %v2933_v4 = vunpack.c.h.s8.bf16 %v1675_v59 }
 0x5b4   : > { %3757 = vmatpush1.bf16.msra.mxu1 %v2302_v0  ;;  %v1674_v0 = vld [vmem:[%s6929_s9 + $0x1320] sm:$0xff] }
 0x5b5   : > { %4536 = vmatpush1.bf16.msra.mxu0 %v2910_v62  ;;  %3758 = vmatprep.subr.bf16.mxu1 %v2305_v2  ;;  %v2992_v62 = vunpack.c.h.s8.bf16 %v1704_v38  ;;  %v5680_v2 = vld.sshfl [vmem:[#allocation3 + $0xa0] sm:$0x3 pattern:$0x76325410]  ;;  %v1691_v38 = vld [vmem:[%s6929_s9 + $0x13a8] sm:$0xff] }
 0x5b6   : > { %4537 = vmatprep.subr.bf16.mxu0 %v2913_v63  ;;  %v2930_v63 = vunpack.c.l.s8.bf16 %v1674_v0  ;;  %v1061_v58 = vpack.c.bf16 %v5680_v2, %v5680_v2  ;;  %v2965_v59 = vunpack.c.h.s8.bf16 %v1691_v38 }
 0x5b8   : > { %3759 = vmatpush1.bf16.msra.mxu1 %v2304_v55  ;;  %v1677_v55 = vld [vmem:[%s6929_s9 + $0x1338] sm:$0xff] }
 0x5b9   : > { %4538 = vmatpush1.bf16.msra.mxu0 %v2912_v6  ;;  %3760 = vmatprep.subr.bf16.mxu1 %v2307_v1  ;;  %v2932_v6 = vunpack.c.h.s8.bf16 %v1674_v0  ;;  %v2935_v1 = vunpack.c.l.s8.bf16 %v1677_v55  ;;  %v2937_v8 = vunpack.c.h.s8.bf16 %v1677_v55  ;;  %v1692_v0 = vld [vmem:[%s6929_s9 + $0x13b0] sm:$0xff] }
 0x5ba   : > { %4539 = vmatprep.subr.bf16.mxu0 %v2915_v3  ;;  %v1676_v3 = vld [vmem:[%s6929_s9 + $0x1330] sm:$0xff] }
 0x5bb   : > { %v2934_v5 = vunpack.c.l.s8.bf16 %v1676_v3 }
 0x5bc   : > { %3761 = vmatpush1.bf16.msra.mxu1 %v2306_v9  ;;  %v1679_v9 = vld [vmem:[%s6929_s9 + $0x1348] sm:$0xff] }
 0x5bd   : > { %4540 = vmatpush1.bf16.msra.mxu0 %v2914_v53  ;;  %3762 = vmatprep.subr.bf16.mxu1 %v2309_v10  ;;  %v2936_v53 = vunpack.c.h.s8.bf16 %v1676_v3  ;;  %v2939_v10 = vunpack.c.l.s8.bf16 %v1679_v9  ;;  %v2941_v15 = vunpack.c.h.s8.bf16 %v1679_v9  ;;  %v4714_v3 = vld [vmem:[%s6943_s19 + $0x28] sm:$0xff]  ;;  %v1694_v9 = vld [vmem:[%s6929_s9 + $0x13c0] sm:$0xff] }
 0x5be   : > { %4541 = vmatprep.subr.bf16.mxu0 %v2917_v13  ;;  %v1678_v13 = vld [vmem:[%s6929_s9 + $0x1340] sm:$0xff] }
 0x5bf   : > { %v2938_v11 = vunpack.c.l.s8.bf16 %v1678_v13 }
 0x5c0   : > { %3763 = vmatpush1.bf16.msra.mxu1 %v2308_v12  ;;  %v1681_v12 = vld [vmem:[%s6929_s9 + $0x1358] sm:$0xff] }
 0x5c1   : > { %4542 = vmatpush1.bf16.msra.mxu0 %v2916_v7  ;;  %3764 = vmatprep.subr.bf16.mxu1 %v2311_v17  ;;  %v2940_v7 = vunpack.c.h.s8.bf16 %v1678_v13  ;;  %v2943_v17 = vunpack.c.l.s8.bf16 %v1681_v12  ;;  %v2945_v19 = vunpack.c.h.s8.bf16 %v1681_v12  ;;  %v4713_v13 = vld [vmem:[%s6943_s19 + $0x20] sm:$0xff] }
 0x5c2   : > { %4543 = vmatprep.subr.bf16.mxu0 %v2919_v14  ;;  %v1680_v14 = vld [vmem:[%s6929_s9 + $0x1350] sm:$0xff]  ;;  %v5773_v12 = vunpack.c.l.s8.bf16 %v4713_v13 }
 0x5c3   : > { %v2942_v52 = vunpack.c.l.s8.bf16 %v1680_v14 }
 0x5c4   : > { %3765 = vmatpush1.bf16.msra.mxu1 %v2310_v18  ;;  %v1683_v18 = vld [vmem:[%s6929_s9 + $0x1368] sm:$0xff] }
 0x5c5   : > { %4544 = vmatpush1.bf16.msra.mxu0 %v2918_v21  ;;  %3766 = vmatprep.subr.bf16.mxu1 %v2313_v24  ;;  %v2944_v21 = vunpack.c.h.s8.bf16 %v1680_v14  ;;  %v2947_v24 = vunpack.c.l.s8.bf16 %v1683_v18  ;;  %v2949_v26 = vunpack.c.h.s8.bf16 %v1683_v18  ;;  %v4718_v14 = vld [vmem:[%s6943_s19 + $0x48] sm:$0xff] }
 0x5c6   : > { %4545 = vmatprep.subr.bf16.mxu0 %v2921_v25  ;;  %v1682_v25 = vld [vmem:[%s6929_s9 + $0x1360] sm:$0xff]  ;;  %v1696_v18 = vld [vmem:[%s6929_s9 + $0x13d0] sm:$0xff]  ;;  %v5783_v20 = vunpack.c.h.s8.bf16 %v4718_v14 }
 0x5c7   : > { %v2946_v28 = vunpack.c.l.s8.bf16 %v1682_v25 }
 0x5c8   : > { %3767 = vmatpush1.bf16.msra.mxu1 %v2312_v30  ;;  %v1685_v30 = vld [vmem:[%s6929_s9 + $0x1378] sm:$0xff] }
 0x5c9   : > { %4546 = vmatpush1.bf16.msra.mxu0 %v2920_v27  ;;  %4638 = vmatprep.subr.bf16.mxu1 %v2987_v23  ;;  %v2948_v27 = vunpack.c.h.s8.bf16 %v1682_v25  ;;  %v2950_v23 = vunpack.c.l.s8.bf16 %v1684_v29  ;;  %v4717_v25 = vld [vmem:[%s6943_s19 + $0x40] sm:$0xff] }
 0x5ca   : > { %4556 = vmatprep.subr.bf16.mxu0 %v2923_v32  ;;  %v2951_v32 = vunpack.c.l.s8.bf16 %v1685_v30 }
 0x5cb   : > { %3769 = vmatmul.mubr.bf16.vlgmr.msra.gmra.mrb[0].mxu1 %v1017_v31  ;;  %v2953_v31 = vunpack.c.h.s8.bf16 %v1685_v30  ;;  %v5781_v30 = vunpack.c.l.s8.bf16 %v4717_v25 }
 0x5cc   : > { %4548 = vmatmul.mubr.bf16.vlgmr.msra.gmra.mrb[0].mxu0 %v1055_v33  ;;  %4639 = vmatpush1.bf16.msra.mxu1 %v2986_v41  ;;  %v1687_v33 = vld [vmem:[%s6929_s9 + $0x1388] sm:$0xff]  ;;  %v1057_v41 = vpack.c.bf16 %v7923_v22, %v7923_v22 }
 0x5cd   : > { %4557 = vmatpush1.bf16.msra.mxu0 %v2922_v36  ;;  %4588 = vmatprep.mubr.bf16.mxu0 %v1058_v37  ;;  %v2952_v36 = vunpack.c.h.s8.bf16 %v1684_v29  ;;  %v892_v37 = vcombine.high %v7954_v34, %v7954_v34  ;;  %v2955_v16 = vunpack.c.l.s8.bf16 %v1687_v33  ;;  %v2957_v47 = vunpack.c.h.s8.bf16 %v1687_v33 }
 0x5ce   : > { %4558 = vmatprep.subr.bf16.mxu0 %v2925_v40  ;;  %4640 = vmatprep.subr.bf16.mxu1 %v2989_v42  ;;  %v1686_v40 = vld [vmem:[%s6929_s9 + $0x1380] sm:$0xff]  ;;  %v2976_v29 = vunpack.c.h.s8.bf16 %v1696_v18  ;;  %v5785_v33 = vunpack.c.h.s8.bf16 %v4717_v25  ;;  %v8000_v25 = vsub.s32 1, %v6967_v39 }
 0x5cf   : > { %4670 = vmatprep.mubr.bf16.mxu1 %v6578_v54  ;;  %v2954_v44 = vunpack.c.l.s8.bf16 %v1686_v40  ;;  %v1060_v42 = vpack.c.bf16 %v892_v37, %v892_v37  ;;  %v4721_v37 = vld [vmem:[%s6943_s19 + $0x60] sm:$0xff] }
 0x5d0   : > { %4641 = vmatpush1.bf16.msra.mxu1 %v2988_v49  ;;  %v1688_v49 = vld [vmem:[%s6929_s9 + $0x1390] sm:$0xff] }
 0x5d1   : > { %4559 = vmatpush1.bf16.msra.mxu0 %v2924_v43  ;;  %4642 = vmatprep.subr.bf16.mxu1 %v2991_v45  ;;  %v1689_v43 = vld [vmem:[%s6929_s9 + $0x1398] sm:$0xff]  ;;  %v2958_v45 = vunpack.c.l.s8.bf16 %v1688_v49  ;;  %v2960_v54 = vunpack.c.h.s8.bf16 %v1688_v49  ;;  %v5793_v49 = vunpack.c.h.s8.bf16 %v4721_v37 }
 0x5d2   : > { %4560 = vmatprep.subr.bf16.mxu0 %v2927_v35  ;;  %v2956_v35 = vunpack.c.h.s8.bf16 %v1686_v40  ;;  %v2959_v57 = vunpack.c.l.s8.bf16 %v1689_v43  ;;  %v2961_v22 = vunpack.c.h.s8.bf16 %v1689_v43 }
 0x5d4   : > { %4643 = vmatpush1.bf16.msra.mxu1 %v2990_v56 }
 0x5d5   : > { %4561 = vmatpush1.bf16.msra.mxu0 %v2926_v48  ;;  %4644 = vmatprep.subr.bf16.mxu1 %v2993_v60  ;;  %v2963_v48 = vunpack.c.l.s8.bf16 %v1691_v38  ;;  %v1693_v60 = vld [vmem:[%s6929_s9 + $0x13b8] sm:$0xff] }
 0x5d6   : > { %4562 = vmatprep.subr.bf16.mxu0 %v2929_v50  ;;  %v1690_v50 = vld [vmem:[%s6929_s9 + $0x13a0] sm:$0xff]  ;;  %v2969_v2 = vunpack.c.h.s8.bf16 %v1693_v60 }
 0x5d7   : > { %v2962_v56 = vunpack.c.l.s8.bf16 %v1690_v50 }
 0x5d8   : > { %4645 = vmatpush1.bf16.msra.mxu1 %v2992_v62  ;;  %v2966_v62 = vunpack.c.l.s8.bf16 %v1692_v0 }
 0x5d9   : > { %4563 = vmatpush1.bf16.msra.mxu0 %v2928_v46  ;;  %v2964_v46 = vunpack.c.h.s8.bf16 %v1690_v50 }
 0x5da   : > { %4564 = vmatprep.subr.bf16.mxu0 %v2931_v61  ;;  %v2967_v61 = vunpack.c.l.s8.bf16 %v1693_v60 }
 0x5db   : > { %5681 = vmatmul.mubr.msk.bf16.vlgmr.msra.gmra.mrb[4].mxu1 %vm2994_vm0, %v1061_v58  ;;  %v4709_v58 = vld [vmem:[%s6943_s19] sm:$0xff] }
 0x5dd   : > { %4565 = vmatpush1.bf16.msra.mxu0 %v2930_v63  ;;  %v4710_v63 = vld [vmem:[%s6943_s19 + $0x8] sm:$0xff] }
 0x5de   : > { %4566 = vmatprep.subr.bf16.mxu0 %v2933_v4  ;;  %v1695_v4 = vld [vmem:[%s6929_s9 + $0x13c8] sm:$0xff]  ;;  %v5763_v55 = vunpack.c.l.s8.bf16 %v4710_v63 }
 0x5e0   : > { %5764 = vmatprep.subr.bf16.mxu1 %v5763_v55  ;;  %v4733_v55 = vld [vmem:[%s6943_s19 + $0xc0] sm:$0xff] }
 0x5e1   : > { %4567 = vmatpush1.bf16.msra.mxu0 %v2932_v6  ;;  %v5765_v6 = vunpack.c.l.s8.bf16 %v4709_v58 }
 0x5e2   : > { %4568 = vmatprep.subr.bf16.mxu0 %v2935_v1  ;;  %v5767_v1 = vunpack.c.h.s8.bf16 %v4710_v63  ;;  %v4734_v63 = vld [vmem:[%s6943_s19 + $0xc8] sm:$0xff] }
 0x5e3   : > { %5766 = vmatpush1.bf16.msra.mxu1 %v5765_v6  ;;  %v5813_v6 = vunpack.c.l.s8.bf16 %v4733_v55 }
 0x5e4   : > { %5768 = vmatprep.subr.bf16.mxu1 %v5767_v1  ;;  %v5815_v1 = vunpack.c.h.s8.bf16 %v4734_v63 }
 0x5e5   : > { %4569 = vmatpush1.bf16.msra.mxu0 %v2934_v5  ;;  %v2968_v5 = vunpack.c.h.s8.bf16 %v1692_v0  ;;  %v1059_v0 = vpack.c.bf16 %v7954_v34, %v7954_v34  ;;  %v5817_v34 = vunpack.c.h.s8.bf16 %v4733_v55 }
 0x5e6   : > { %4570 = vmatprep.subr.bf16.mxu0 %v2937_v8  ;;  %v2971_v8 = vunpack.c.l.s8.bf16 %v1695_v4 }
 0x5e9   : > { %4571 = vmatpush1.bf16.msra.mxu0 %v2936_v53  ;;  %v5769_v53 = vunpack.c.h.s8.bf16 %v4709_v58 }
 0x5ea   : > { %4572 = vmatprep.subr.bf16.mxu0 %v2939_v10  ;;  %v5771_v10 = vunpack.c.l.s8.bf16 %v4714_v3 }
 0x5eb   : > { %5770 = vmatpush1.bf16.msra.mxu1 %v5769_v53 }
 0x5ec   : > { %5772 = vmatprep.subr.bf16.mxu1 %v5771_v10  ;;  %v4737_v10 = vld [vmem:[%s6943_s19 + $0xe0] sm:$0xff] }
 0x5ed   : > { %4573 = vmatpush1.bf16.msra.mxu0 %v2938_v11  ;;  %v2970_v11 = vunpack.c.l.s8.bf16 %v1694_v9 }
 0x5ee   : > { %4574 = vmatprep.subr.bf16.mxu0 %v2941_v15  ;;  %v2973_v15 = vunpack.c.h.s8.bf16 %v1695_v4  ;;  %v5811_v4 = vunpack.c.l.s8.bf16 %v4734_v63 }
 0x5ef   : > { %5774 = vmatpush1.bf16.msra.mxu1 %v5773_v12  ;;  %v5825_v12 = vunpack.c.h.s8.bf16 %v4737_v10 }
 0x5f1   : > { %4575 = vmatpush1.bf16.msra.mxu0 %v2940_v7  ;;  %v1697_v7 = vld [vmem:[%s6929_s9 + $0x13d8] sm:$0xff] }
 0x5f2   : > { %4576 = vmatprep.subr.bf16.mxu0 %v2943_v17  ;;  %v5775_v17 = vunpack.c.h.s8.bf16 %v4714_v3 }
 0x5f4   : > { %5776 = vmatprep.subr.bf16.mxu1 %v5775_v17 }
 0x5f5   : > { %4577 = vmatpush1.bf16.msra.mxu0 %v2942_v52  ;;  %v2972_v52 = vunpack.c.h.s8.bf16 %v1694_v9 }
 0x5f6   : > { %4578 = vmatprep.subr.bf16.mxu0 %v2945_v19  ;;  %v2975_v19 = vunpack.c.l.s8.bf16 %v1697_v7 }
 0x5f9   : > { %4579 = vmatpush1.bf16.msra.mxu0 %v2944_v21  ;;  %v5777_v21 = vunpack.c.h.s8.bf16 %v4713_v13 }
 0x5fa   : > { %4580 = vmatprep.subr.bf16.mxu0 %v2947_v24  ;;  %v5779_v24 = vunpack.c.l.s8.bf16 %v4718_v14 }
 0x5fb   : > { %5778 = vmatpush1.bf16.msra.mxu1 %v5777_v21  ;;  %v7996_v21 = vsub.s32 0, %v6967_v39 }
 0x5fc   : > { %5780 = vmatprep.subr.bf16.mxu1 %v5779_v24  ;;  %v4679_v24 = vld [vmem:[%s6935_s17] sm:$0x3] }
 0x5fd   : > { %4581 = vmatpush1.bf16.msra.mxu0 %v2946_v28  ;;  %v2974_v28 = vunpack.c.l.s8.bf16 %v1696_v18 }
 0x5fe   : > { %4582 = vmatprep.subr.bf16.mxu0 %v2949_v26  ;;  %v2977_v26 = vunpack.c.h.s8.bf16 %v1697_v7  ;;  %v4712_v7 = vld [vmem:[%s6943_s19 + $0x18] sm:$0xff] }
 0x5ff   : > { %5782 = vmatpush1.bf16.msra.mxu1 %v5781_v30  ;;  %v5827_v17 = vunpack.c.l.s8.bf16 %v4712_v7 }
 0x600   : > { %5784 = vmatprep.subr.bf16.mxu1 %v5783_v20 }
 0x601   : > { %4583 = vmatpush1.bf16.msra.mxu0 %v2948_v27  ;;  %v1699_v27 = vld [vmem:[%s6929_s9 + $0x13e8] sm:$0xff] }
 0x602   : > { %4584 = vmatprep.subr.bf16.mxu0 %v2951_v32  ;;  %v4722_v32 = vld [vmem:[%s6943_s19 + $0x68] sm:$0xff]  ;;  %v2981_v40 = vunpack.c.h.s8.bf16 %v1699_v27 }
 0x603   : > { %5786 = vmatpush1.bf16.msra.mxu1 %v5785_v33 }
 0x605   : > { %4585 = vmatpush1.bf16.msra.mxu0 %v2950_v23  ;;  %v2979_v23 = vunpack.c.l.s8.bf16 %v1699_v27  ;;  %v4684_v27 = vrot.slane %v4679_v24, %v7996_v21 }
 0x606   : > { %4586 = vmatprep.subr.bf16.mxu0 %v2953_v31  ;;  %v1698_v31 = vld [vmem:[%s6929_s9 + $0x13e0] sm:$0xff] }
 0x607   : > { %v2980_v43 = vunpack.c.h.s8.bf16 %v1698_v31 }
 0x609   : > { %4587 = vmatpush1.bf16.msra.mxu0 %v2952_v36  ;;  %v5787_v36 = vunpack.c.l.s8.bf16 %v4722_v32 }
 0x60a   : > { %4597 = vmatprep.subr.bf16.mxu0 %v2955_v16  ;;  %v2978_v16 = vunpack.c.l.s8.bf16 %v1698_v31 }
 0x60b   : > { %5788 = vmatprep.subr.bf16.mxu1 %v5787_v36 }
 0x60c   : > { %4589 = vmatmul.mubr.bf16.vlgmr.msra.gmra.mrb[0].mxu0 %v1057_v41  ;;  %v5789_v41 = vunpack.c.l.s8.bf16 %v4721_v37 }
 0x60d   : > { %4598 = vmatpush1.bf16.msra.mxu0 %v2954_v44  ;;  %4629 = vmatprep.mubr.bf16.mxu0 %v1060_v42  ;;  %v1701_v44 = vld [vmem:[%s6929_s9 + $0x13f8] sm:$0xff]  ;;  %v5791_v42 = vunpack.c.h.s8.bf16 %v4722_v32 }
 0x60e   : > { %4599 = vmatprep.subr.bf16.mxu0 %v2957_v47  ;;  %v4726_v47 = vld [vmem:[%s6943_s19 + $0x88] sm:$0xff]  ;;  %5790 = vmatpush1.bf16.msra.mxu1 %v5789_v41 }
 0x60f   : > { %5792 = vmatprep.subr.bf16.mxu1 %v5791_v42  ;;  %v5799_v50 = vunpack.c.h.s8.bf16 %v4726_v47  ;;  %v4711_v42 = vld [vmem:[%s6943_s19 + $0x10] sm:$0xff] }
 0x611   : > { %4600 = vmatpush1.bf16.msra.mxu0 %v2956_v35  ;;  %v2983_v35 = vunpack.c.l.s8.bf16 %v1701_v44 }
 0x612   : > { %4601 = vmatprep.subr.bf16.mxu0 %v2959_v57  ;;  %v1700_v57 = vld [vmem:[%s6929_s9 + $0x13f0] sm:$0xff]  ;;  %5794 = vmatpush1.bf16.msra.mxu1 %v5793_v49  ;;  %v5831_v49 = vunpack.c.h.s8.bf16 %v4712_v7 }
 0x613   : > { %v2982_v38 = vunpack.c.l.s8.bf16 %v1700_v57 }
 0x615   : > { %4602 = vmatpush1.bf16.msra.mxu0 %v2958_v45  ;;  %v5795_v45 = vunpack.c.l.s8.bf16 %v4726_v47 }
 0x616   : > { %4603 = vmatprep.subr.bf16.mxu0 %v2961_v22  ;;  %v4725_v22 = vld [vmem:[%s6943_s19 + $0x80] sm:$0xff] }
 0x617   : > { %5796 = vmatprep.subr.bf16.mxu1 %v5795_v45  ;;  %v5801_v60 = vunpack.c.h.s8.bf16 %v4725_v22  ;;  %v4716_v45 = vld [vmem:[%s6943_s19 + $0x38] sm:$0xff] }
 0x619   : > { %4604 = vmatpush1.bf16.msra.mxu0 %v2960_v54  ;;  %v2985_v54 = vunpack.c.h.s8.bf16 %v1701_v44 }
 0x61a   : > { %4605 = vmatprep.subr.bf16.mxu0 %v2963_v48  ;;  %v5797_v48 = vunpack.c.l.s8.bf16 %v4725_v22  ;;  %v5833_v22 = vunpack.c.h.s8.bf16 %v4711_v42 }
 0x61c   : > { %5798 = vmatpush1.bf16.msra.mxu1 %v5797_v48 }
 0x61d   : > { %4606 = vmatpush1.bf16.msra.mxu0 %v2962_v56  ;;  %v4730_v56 = vld [vmem:[%s6943_s19 + $0xa8] sm:$0xff]  ;;  %5800 = vmatprep.subr.bf16.mxu1 %v5799_v50  ;;  %v5839_v50 = vunpack.c.h.s8.bf16 %v4716_v45 }
 0x61e   : > { %4607 = vmatprep.subr.bf16.mxu0 %v2965_v59  ;;  %v2984_v59 = vunpack.c.h.s8.bf16 %v1700_v57 }
 0x620   : > { %5802 = vmatpush1.bf16.msra.mxu1 %v5801_v60 }
 0x621   : > { %4608 = vmatpush1.bf16.msra.mxu0 %v2964_v46  ;;  %v5803_v46 = vunpack.c.l.s8.bf16 %v4730_v56 }
 0x622   : > { %4609 = vmatprep.subr.bf16.mxu0 %v2967_v61  ;;  %v4729_v61 = vld [vmem:[%s6943_s19 + $0xa0] sm:$0xff] }
 0x623   : > { %5804 = vmatprep.subr.bf16.mxu1 %v5803_v46  ;;  %v5809_v58 = vunpack.c.h.s8.bf16 %v4729_v61  ;;  %v4719_v46 = vld [vmem:[%s6943_s19 + $0x50] sm:$0xff] }
 0x625   : > { %4610 = vmatpush1.bf16.msra.mxu0 %v2966_v62  ;;  %v5805_v62 = vunpack.c.l.s8.bf16 %v4729_v61  ;;  %v5845_v61 = vunpack.c.l.s8.bf16 %v4719_v46 }
 0x626   : > { %4611 = vmatprep.subr.bf16.mxu0 %v2969_v2  ;;  %v5807_v2 = vunpack.c.h.s8.bf16 %v4730_v56  ;;  %v4720_v56 = vld [vmem:[%s6943_s19 + $0x58] sm:$0xff] }
 0x627   : > { %5806 = vmatpush1.bf16.msra.mxu1 %v5805_v62  ;;  %v5843_v60 = vunpack.c.l.s8.bf16 %v4720_v56  ;;  %v4724_v62 = vld [vmem:[%s6943_s19 + $0x78] sm:$0xff] }
 0x628   : > { %5808 = vmatprep.subr.bf16.mxu1 %v5807_v2  ;;  %v5849_v2 = vunpack.c.h.s8.bf16 %v4719_v46  ;;  %v5851_v63 = vunpack.c.l.s8.bf16 %v4724_v62  ;;  %v5855_v55 = vunpack.c.h.s8.bf16 %v4724_v62  ;;  %v5247_v46 = vld [vmem:[%s8340_s25 + $0x18] sm:$0xff] (!%p5682_p9)  ;;  %v5294_v62 = vld [vmem:[%s8340_s25 + $0x190] sm:$0xff] (!%p5682_p9) }
 0x629   : > { %4612 = vmatpush1.bf16.msra.mxu0 %v2968_v5 }
 0x62a   : > { %4613 = vmatprep.subr.bf16.mxu0 %v2971_v8  ;;  %v4738_v8 = vld [vmem:[%s6943_s19 + $0xe8] sm:$0xff] }
 0x62b   : > { %5810 = vmatpush1.bf16.msra.mxu1 %v5809_v58  ;;  %v5819_v53 = vunpack.c.l.s8.bf16 %v4738_v8  ;;  %v4723_v58 = vld [vmem:[%s6943_s19 + $0x70] sm:$0xff] }
 0x62c   : > { %5812 = vmatprep.subr.bf16.mxu1 %v5811_v4  ;;  %v5853_v4 = vunpack.c.l.s8.bf16 %v4723_v58 }
 0x62d   : > { %4614 = vmatpush1.bf16.msra.mxu0 %v2970_v11  ;;  %v5821_v11 = vunpack.c.l.s8.bf16 %v4737_v10 }
 0x62e   : > { %4615 = vmatprep.subr.bf16.mxu0 %v2973_v15  ;;  %v5823_v15 = vunpack.c.h.s8.bf16 %v4738_v8 }
 0x62f   : > { %5814 = vmatpush1.bf16.msra.mxu1 %v5813_v6  ;;  %v4728_v6 = vld [vmem:[%s6943_s19 + $0x98] sm:$0xff] }
 0x630   : > { %5816 = vmatprep.subr.bf16.mxu1 %v5815_v1  ;;  %v5857_v1 = vunpack.c.h.s8.bf16 %v4723_v58  ;;  %v5863_v8 = vunpack.c.h.s8.bf16 %v4728_v6 }
 0x631   : > { %4616 = vmatpush1.bf16.msra.mxu0 %v2972_v52 }
 0x632   : > { %4617 = vmatprep.subr.bf16.mxu0 %v2975_v19 }
 0x633   : > { %5818 = vmatpush1.bf16.msra.mxu1 %v5817_v34  ;;  %v5859_v34 = vunpack.c.l.s8.bf16 %v4728_v6  ;;  %v5265_v6 = vld [vmem:[%s8340_s25 + $0xa8] sm:$0xff] (!%p5682_p9) }
 0x634   : > { %5820 = vmatprep.subr.bf16.mxu1 %v5819_v53 }
 0x635   : > { %4618 = vmatpush1.bf16.msra.mxu0 %v2974_v28 }
 0x636   : > { %4619 = vmatprep.subr.bf16.mxu0 %v2977_v26  ;;  %v4693_v26 = vld [vmem:[%s6937_s27] sm:$0x3] }
 0x637   : > { %5822 = vmatpush1.bf16.msra.mxu1 %v5821_v11  ;;  %v4698_v33 = vrot.slane %v4693_v26, %v7996_v21 }
 0x638   : > { %5824 = vmatprep.subr.bf16.mxu1 %v5823_v15 }
 0x639   : > { %4620 = vmatpush1.bf16.msra.mxu0 %v2976_v29  ;;  %v4688_v29 = vrot.slane %v4679_v24, %v8000_v25 }
 0x63a   : > { %4621 = vmatprep.subr.bf16.mxu0 %v2979_v23 }
 0x63b   : > { %5826 = vmatpush1.bf16.msra.mxu1 %v5825_v12  ;;  %v4736_v12 = vld [vmem:[%s6943_s19 + $0xd8] sm:$0xff] }
 0x63c   : > { %5828 = vmatprep.subr.bf16.mxu1 %v5827_v17  ;;  %v5875_v17 = vunpack.c.l.s8.bf16 %v4736_v12 }
 0x63d   : > { %4622 = vmatpush1.bf16.msra.mxu0 %v2978_v16  ;;  %v4702_v16 = vrot.slane %v4693_v26, %v8000_v25  ;;  %v4739_v26 = vld [vmem:[%s6943_s19 + $0xf0] sm:$0xff] }
 0x63e   : > { %4623 = vmatprep.subr.bf16.mxu0 %v2981_v40 }
 0x641   : > { %4624 = vmatpush1.bf16.msra.mxu0 %v2980_v43 }
 0x642   : > { %4625 = vmatprep.subr.bf16.mxu0 %v2983_v35  ;;  %v5829_v35 = vunpack.c.l.s8.bf16 %v4711_v42 }
 0x645   : > { %4626 = vmatpush1.bf16.msra.mxu0 %v2982_v38  ;;  %v5835_v38 = vunpack.c.l.s8.bf16 %v4716_v45  ;;  %v5293_v45 = vld [vmem:[%s8340_s25 + $0x188] sm:$0xff] (!%p5682_p9) }
 0x646   : > { %4627 = vmatprep.subr.bf16.mxu0 %v2985_v54  ;;  %v4715_v54 = vld [vmem:[%s6943_s19 + $0x30] sm:$0xff] }
 0x647   : > { %v5837_v48 = vunpack.c.l.s8.bf16 %v4715_v54 }
 0x649   : > { %4628 = vmatpush1.bf16.msra.mxu0 %v2984_v59  ;;  %v5841_v59 = vunpack.c.h.s8.bf16 %v4715_v54  ;;  %v5276_v54 = vld [vmem:[%s8340_s25 + $0x100] sm:$0xff] (!%p5682_p9) }
 0x64c   : > { %4630 = vmatmul.mubr.bf16.vlgmr.msra.gmra.mrb[0].mxu0 %v1059_v0  ;;  %v5847_v0 = vunpack.c.h.s8.bf16 %v4720_v56 }
 0x69e   : > { %v3770_v3 = vpop.f32.mrb[0].mxu1 }
 0x69f   : > { %v3772_v5 = vpop.f32.mrb[1].mxu1 }
 0x6a0   : > { %v3774_v9 = vpop.f32.mrb[2].mxu1 }
 0x6a1   : > { %v3775_v13 = vpop.f32.mrb[3].mxu1  ;;  %v4732_v9 = vld [vmem:[%s6943_s19 + $0xb8] sm:$0xff] }
 0x6a2   : > { %v5867_v10 = vunpack.c.l.s8.bf16 %v4732_v9  ;;  %v4731_v13 = vld [vmem:[%s6943_s19 + $0xb0] sm:$0xff]  ;;  %v5871_v15 = vunpack.c.h.s8.bf16 %v4732_v9 }
 0x6a3   : > { %v5869_v11 = vunpack.c.l.s8.bf16 %v4731_v13  ;;  %v5873_v7 = vunpack.c.h.s8.bf16 %v4731_v13  ;;  %v5297_v9 = vld [vmem:[%s8340_s25 + $0x1a8] sm:$0xff] (!%p5682_p9) }
 0x6ae   : > { %v4672_v14 = vpop.f32.mrb[4].mxu1 }
 0x6af   : > { %v4674_v52 = vpop.f32.mrb[5].mxu1 }
 0x6b0   : > { %v4676_v19 = vpop.f32.mrb[6].mxu1 }
 0x6b1   : > { %v4677_v18 = vpop.f32.mrb[7].mxu1  ;;  %v5879_v19 = vunpack.c.h.s8.bf16 %v4736_v12  ;;  %v5267_v12 = vld [vmem:[%s8340_s25 + $0xb8] sm:$0xff] (!%p5682_p9) }
 0x6b2   : > { %v4740_v18 = vld [vmem:[%s6943_s19 + $0xf8] sm:$0xff] }
 0x71f   : > { %v4631_v28 = vpop.f32.mrb[0].mxu0 }
 0x720   : > { %v5955_v30 = vadd.f32 %v4631_v28, %v3770_v3  ;;  %v4633_v20 = vpop.f32.mrb[1].mxu0  ;;  %v4727_v3 = vld [vmem:[%s6943_s19 + $0x90] sm:$0xff]  ;;  %v5883_v28 = vunpack.c.l.s8.bf16 %v4740_v18 }
 0x721   : > { %v5957_v32 = vadd.f32 %v4633_v20, %v3772_v5  ;;  %v4635_v23 = vpop.f32.mrb[2].mxu0  ;;  %v5861_v5 = vunpack.c.l.s8.bf16 %v4727_v3  ;;  %v5865_v53 = vunpack.c.h.s8.bf16 %v4727_v3  ;;  %v5889_v20 = vunpack.c.h.s8.bf16 %v4739_v26  ;;  %v5248_v3 = vld [vmem:[%s8340_s25 + $0x20] sm:$0xff] (!%p5682_p9) }
 0x722   : > { %v5956_v31 = vadd.f32 %v5955_v30, %v4672_v14  ;;  %v4636_v36 = vpop.f32.mrb[3].mxu0  ;;  %v4735_v14 = vld [vmem:[%s6943_s19 + $0xd0] sm:$0xff]  ;;  %v5885_v30 = vunpack.c.l.s8.bf16 %v4739_v26  ;;  %v5283_v26 = vld [vmem:[%s8340_s25 + $0x138] sm:$0xff] (!%p5682_p9) }
 0x723   : > { %v5958_v37 = vadd.f32 %v5957_v32, %v4674_v52  ;;  %v5877_v52 = vunpack.c.l.s8.bf16 %v4735_v14  ;;  %v5881_v24 = vunpack.c.h.s8.bf16 %v4735_v14 }
 0x724   : > { %v4691_v40 = vmul.f32 %v5956_v31, %v4684_v27  ;;  %v5887_v27 = vunpack.c.h.s8.bf16 %v4740_v18  ;;  %v5299_v18 = vld [vmem:[%s8340_s25 + $0x1b8] sm:$0xff] (!%p5682_p9) }
 0x725   : > { %v4692_v41 = vmul.f32 %v5958_v37, %v4688_v29 }
 0x726   : > { %v8007_v44 = vadd.f32 %v4698_v33, %v4691_v40  ;;  %v4997_v40 = vld [vmem:[#allocation2] sm:$0xff] }
 0x727   : > { %v4706_v47 = vadd.f32 %v4702_v16, %v4692_v41 }
 0x728   : > { %v4707_v57 = vmax.f32 %v8007_v44, 0.0  ;;  %v5260_v44 = vld [vmem:[%s8340_s25 + $0x80] sm:$0xff] (!%p5682_p9) }
 0x729   : > { %v4708_v43 = vmax.f32 %v4706_v47, 0.0  ;;  %v5261_v47 = vld [vmem:[%s8340_s25 + $0x88] sm:$0xff] (!%p5682_p9) }
 0x72b   : > { %5062 = vmatprep.mubr.f32.mxu1 %v4708_v43 }
 0x72c   : > { %5063 = vmatmul.mubr.f32.vlgmr.msra.gmra.mrb[8].mxu1 %v4707_v57 }
 0x72d   : > { %5830 = vmatpush1.bf16.msra.mxu1 %v5829_v35  ;;  %5133 = vmatprep.mubr.f32.mxu1 %v4708_v43  ;;  %v5244_v43 = vld [vmem:[%s8340_s25] sm:$0xff] (!%p5682_p9)  ;;  %v5891_v35 = vpack.c.bf16 (!%p5682_p9), %v5261_v47, %v5260_v44  ;;  %v5302_v44 = vld [vmem:[%s8340_s25 + $0x1d0] sm:$0xff] (!%p5682_p9)  ;;  %v5303_v47 = vld [vmem:[%s8340_s25 + $0x1d8] sm:$0xff] (!%p5682_p9) }
 0x72e   : > { %5832 = vmatprep.subr.bf16.mxu1 %v5831_v49  ;;  %v5292_v49 = vld [vmem:[%s8340_s25 + $0x180] sm:$0xff] (!%p5682_p9) }
 0x72f   : > { %5892 = vmatprep.subr.bf16.mxu0 (!%p5682_p9), %v5891_v35 }
 0x731   : > { %5834 = vmatpush1.bf16.msra.mxu1 %v5833_v22 }
 0x732   : > { %5836 = vmatprep.subr.bf16.mxu1 %v5835_v38  ;;  %v5923_v38 = vpack.c.bf16 (!%p5682_p9), %v5293_v45, %v5292_v49  ;;  %v5254_v49 = vld [vmem:[%s8340_s25 + $0x50] sm:$0xff] (!%p5682_p9)  ;;  %v5255_v45 = vld [vmem:[%s8340_s25 + $0x58] sm:$0xff] (!%p5682_p9) }
 0x735   : > { %5838 = vmatpush1.bf16.msra.mxu1 %v5837_v48  ;;  %v5277_v48 = vld [vmem:[%s8340_s25 + $0x108] sm:$0xff] (!%p5682_p9) }
 0x736   : > { %5840 = vmatprep.subr.bf16.mxu1 %v5839_v50  ;;  %v5262_v50 = vld [vmem:[%s8340_s25 + $0x90] sm:$0xff] (!%p5682_p9)  ;;  %v5925_v56 = vpack.c.bf16 (!%p5682_p9), %v5277_v48, %v5276_v54  ;;  %v5287_v54 = vld [vmem:[%s8340_s25 + $0x158] sm:$0xff] (!%p5682_p9)  ;;  %v5272_v48 = vld [vmem:[%s8340_s25 + $0xe0] sm:$0xff] (!%p5682_p9) }
 0x739   : > { %5842 = vmatpush1.bf16.msra.mxu1 %v5841_v59  ;;  %v5263_v59 = vld [vmem:[%s8340_s25 + $0x98] sm:$0xff] (!%p5682_p9) }
 0x73a   : > { %5844 = vmatprep.subr.bf16.mxu1 %v5843_v60  ;;  %v5246_v60 = vld [vmem:[%s8340_s25 + $0x10] sm:$0xff] (!%p5682_p9) }
 0x73d   : > { %5846 = vmatpush1.bf16.msra.mxu1 %v5845_v61  ;;  %v5895_v61 = vpack.c.bf16 (!%p5682_p9), %v5263_v59, %v5262_v50  ;;  %v5273_v50 = vld [vmem:[%s8340_s25 + $0xe8] sm:$0xff] (!%p5682_p9)  ;;  %v5304_v59 = vld [vmem:[%s8340_s25 + $0x1e0] sm:$0xff] (!%p5682_p9) }
 0x73e   : > { %5848 = vmatprep.subr.bf16.mxu1 %v5847_v0  ;;  %v5897_v0 = vpack.c.bf16 (!%p5682_p9), %v5247_v46, %v5246_v60  ;;  %v5305_v60 = vld [vmem:[%s8340_s25 + $0x1e8] sm:$0xff] (!%p5682_p9)  ;;  %v5185_v46 = vsub.s32 (!%p5682_p9), 3, %v6967_v39 }
 0x741   : > { %5850 = vmatpush1.bf16.msra.mxu1 %v5849_v2  ;;  %v5295_v2 = vld [vmem:[%s8340_s25 + $0x198] sm:$0xff] (!%p5682_p9) }
 0x742   : > { %5852 = vmatprep.subr.bf16.mxu1 %v5851_v63  ;;  %v5278_v63 = vld [vmem:[%s8340_s25 + $0x110] sm:$0xff] (!%p5682_p9)  ;;  %v5927_v58 = vpack.c.bf16 (!%p5682_p9), %v5295_v2, %v5294_v62  ;;  %v5257_v62 = vld [vmem:[%s8340_s25 + $0x68] sm:$0xff] (!%p5682_p9) }
 0x745   : > { %5854 = vmatpush1.bf16.msra.mxu1 %v5853_v4  ;;  %v5279_v4 = vld [vmem:[%s8340_s25 + $0x118] sm:$0xff] (!%p5682_p9) }
 0x746   : > { %5856 = vmatprep.subr.bf16.mxu1 %v5855_v55  ;;  %v5264_v55 = vld [vmem:[%s8340_s25 + $0xa0] sm:$0xff] (!%p5682_p9) }
 0x749   : > { %5858 = vmatpush1.bf16.msra.mxu1 %v5857_v1  ;;  %v5929_v1 = vpack.c.bf16 (!%p5682_p9), %v5279_v4, %v5278_v63  ;;  %v5915_v63 = vpack.c.bf16 (!%p5682_p9), %v5273_v50, %v5272_v48  ;;  %v5169_v4 = vld [vmem:[#allocation12] sm:$0xf] (!%p5682_p9) }
 0x74a   : > { %5860 = vmatprep.subr.bf16.mxu1 %v5859_v34  ;;  %v5899_v34 = vpack.c.bf16 (!%p5682_p9), %v5265_v6, %v5264_v55  ;;  %v5947_v55 = vpack.c.bf16 (!%p5682_p9), %v5305_v60, %v5304_v59  ;;  %v5274_v6 = vld [vmem:[%s8340_s25 + $0xf0] sm:$0xff] (!%p5682_p9) }
 0x74d   : > { %5862 = vmatpush1.bf16.msra.mxu1 %v5861_v5  ;;  %v5249_v5 = vld [vmem:[%s8340_s25 + $0x28] sm:$0xff] (!%p5682_p9) }
 0x74e   : > { %5864 = vmatprep.subr.bf16.mxu1 %v5863_v8  ;;  %v5296_v8 = vld [vmem:[%s8340_s25 + $0x1a0] sm:$0xff] (!%p5682_p9)  ;;  %v5901_v13 = vpack.c.bf16 (!%p5682_p9), %v5249_v5, %v5248_v3  ;;  %v5178_v3 = vrot.slane (!%p5682_p9), %v5169_v4, %v8000_v25 }
 0x751   : > { %5866 = vmatpush1.bf16.msra.mxu1 %v5865_v53  ;;  %v5280_v53 = vld [vmem:[%s8340_s25 + $0x120] sm:$0xff] (!%p5682_p9) }
 0x752   : > { %5868 = vmatprep.subr.bf16.mxu1 %v5867_v10  ;;  %v5281_v10 = vld [vmem:[%s8340_s25 + $0x128] sm:$0xff] (!%p5682_p9) }
 0x755   : > { %5870 = vmatpush1.bf16.msra.mxu1 %v5869_v11  ;;  %v5931_v11 = vpack.c.bf16 (!%p5682_p9), %v5297_v9, %v5296_v8  ;;  %v5206_v8 = vld [vmem:[#allocation14] sm:$0xf] (!%p5682_p9) }
 0x756   : > { %5872 = vmatprep.subr.bf16.mxu1 %v5871_v15  ;;  %v5266_v15 = vld [vmem:[%s8340_s25 + $0xb0] sm:$0xff] (!%p5682_p9) }
 0x757   : > { %v5903_v14 = vpack.c.bf16 (!%p5682_p9), %v5267_v12, %v5266_v15  ;;  %v5306_v9 = vld [vmem:[%s8340_s25 + $0x1f0] sm:$0xff] (!%p5682_p9) }
 0x759   : > { %5874 = vmatpush1.bf16.msra.mxu1 %v5873_v7  ;;  %v5250_v7 = vld [vmem:[%s8340_s25 + $0x30] sm:$0xff] (!%p5682_p9) }
 0x75a   : > { %5876 = vmatprep.subr.bf16.mxu1 %v5875_v17  ;;  %v5933_v17 = vpack.c.bf16 (!%p5682_p9), %v5281_v10, %v5280_v53  ;;  %v5307_v53 = vld [vmem:[%s8340_s25 + $0x1f8] sm:$0xff] (!%p5682_p9)  ;;  %v5186_v10 = vrot.slane (!%p5682_p9), %v5169_v4, %v5185_v46 }
 0x75d   : > { %5878 = vmatpush1.bf16.msra.mxu1 %v5877_v52  ;;  %v5251_v52 = vld [vmem:[%s8340_s25 + $0x38] sm:$0xff] (!%p5682_p9) }
 0x75e   : > { %5880 = vmatprep.subr.bf16.mxu1 %v5879_v19  ;;  %v5298_v19 = vld [vmem:[%s8340_s25 + $0x1b0] sm:$0xff] (!%p5682_p9) }
 0x761   : > { %5882 = vmatpush1.bf16.msra.mxu1 %v5881_v24  ;;  %v5935_v24 = vpack.c.bf16 (!%p5682_p9), %v5299_v18, %v5298_v19  ;;  %v5258_v19 = vld [vmem:[%s8340_s25 + $0x70] sm:$0xff] (!%p5682_p9)  ;;  %v5259_v18 = vld [vmem:[%s8340_s25 + $0x78] sm:$0xff] (!%p5682_p9) }
 0x762   : > { %5884 = vmatprep.subr.bf16.mxu1 %v5883_v28  ;;  %v5282_v28 = vld [vmem:[%s8340_s25 + $0x130] sm:$0xff] (!%p5682_p9) }
 0x765   : > { %5886 = vmatpush1.bf16.msra.mxu1 %v5885_v30  ;;  %v5268_v30 = vld [vmem:[%s8340_s25 + $0xc0] sm:$0xff] (!%p5682_p9) }
 0x766   : > { %5888 = vmatprep.subr.bf16.mxu1 %v5887_v27  ;;  %v5269_v27 = vld [vmem:[%s8340_s25 + $0xc8] sm:$0xff] (!%p5682_p9) }
 0x769   : > { %5890 = vmatpush1.bf16.msra.mxu1 %v5889_v20  ;;  %v5905_v20 = vpack.c.bf16 (!%p5682_p9), %v5251_v52, %v5250_v7 }
 0x76a   : > { %5924 = vmatprep.subr.bf16.mxu1 (!%p5682_p9), %v5923_v38  ;;  %v5943_v38 = vpack.c.bf16 (!%p5682_p9), %v5303_v47, %v5302_v44 }
 0x76c   : > { %5134 = vmatmul.mubr.f32.vlgmr.msra.gmra.mrb[10].mxu1 %v4707_v57  ;;  %v5245_v57 = vld [vmem:[%s8340_s25 + $0x8] sm:$0xff] (!%p5682_p9) }
 0x76d   : > { %v5893_v22 = vpack.c.bf16 (!%p5682_p9), %v5245_v57, %v5244_v43  ;;  %5926 = vmatpush3.bf16.msra.mxu1 (!%p5682_p9), %v5925_v56  ;;  %v5181_v56 = vsub.s32 (!%p5682_p9), 2, %v6967_v39  ;;  %v5289_v39 = vld [vmem:[%s8340_s25 + $0x168] sm:$0xff] (!%p5682_p9) }
 0x76e   : > { %5928 = vmatprep.subr.bf16.mxu1 (!%p5682_p9), %v5927_v58  ;;  %v5288_v58 = vld [vmem:[%s8340_s25 + $0x160] sm:$0xff] (!%p5682_p9) }
 0x76f   : > { %5894 = vmatpush3.bf16.msra.mxu0 (!%p5682_p9), %v5893_v22  ;;  %v5286_v22 = vld [vmem:[%s8340_s25 + $0x150] sm:$0xff] (!%p5682_p9)  ;;  %v5182_v5 = vrot.slane (!%p5682_p9), %v5169_v4, %v5181_v56  ;;  %v5219_v15 = vrot.slane (!%p5682_p9), %v5206_v8, %v5181_v56  ;;  %v5949_v7 = vpack.c.bf16 (!%p5682_p9), %v5289_v39, %v5288_v58 }
 0x770   : > { %5896 = vmatprep.subr.bf16.mxu0 (!%p5682_p9), %v5895_v61  ;;  %v5913_v61 = vpack.c.bf16 (!%p5682_p9), %v5255_v45, %v5254_v49  ;;  %v5945_v2 = vpack.c.bf16 (!%p5682_p9), %v5287_v54, %v5286_v22  ;;  %v5683_v49 = vld [vmem:[#allocation15] ss:$0 sm:$0xff] (!%p5682_p9) }
 0x771   : > { %5930 = vmatpush3.bf16.msra.mxu1 (!%p5682_p9), %v5929_v1  ;;  %v5275_v1 = vld [vmem:[%s8340_s25 + $0xf8] sm:$0xff] (!%p5682_p9) }
 0x772   : > { %5932 = vmatprep.subr.bf16.mxu1 (!%p5682_p9), %v5931_v11  ;;  %v5215_v11 = vrot.slane (!%p5682_p9), %v5206_v8, %v8000_v25  ;;  %v5919_v52 = vpack.c.bf16 (!%p5682_p9), %v5275_v1, %v5274_v6  ;;  %v5951_v25 = vpack.c.bf16 (!%p5682_p9), %v5307_v53, %v5306_v9 }
 0x773   : > { %5898 = vmatpush3.bf16.msra.mxu0 (!%p5682_p9), %v5897_v0  ;;  %v5256_v0 = vld [vmem:[%s8340_s25 + $0x60] sm:$0xff] (!%p5682_p9) }
 0x774   : > { %5900 = vmatprep.subr.bf16.mxu0 (!%p5682_p9), %v5899_v34  ;;  %v5174_v34 = vrot.slane (!%p5682_p9), %v5169_v4, %v7996_v21  ;;  %v5917_v12 = vpack.c.bf16 (!%p5682_p9), %v5257_v62, %v5256_v0 }
 0x775   : > { %5934 = vmatpush3.bf16.msra.mxu1 (!%p5682_p9), %v5933_v17 }
 0x776   : > { %5936 = vmatprep.subr.bf16.mxu1 (!%p5682_p9), %v5935_v24  ;;  %v5187_v17 = vcombine.low (!%p5682_p9), %v5174_v34, %v5178_v3 }
 0x777   : > { %5902 = vmatpush3.bf16.msra.mxu0 (!%p5682_p9), %v5901_v13  ;;  %v5211_v13 = vrot.slane (!%p5682_p9), %v5206_v8, %v7996_v21  ;;  %v5188_v21 = vcombine.low (!%p5682_p9), %v5182_v5, %v5186_v10 }
 0x778   : > { %5904 = vmatprep.subr.bf16.mxu0 (!%p5682_p9), %v5903_v14  ;;  %v5223_v14 = vrot.slane (!%p5682_p9), %v5206_v8, %v5185_v46 }
 0x779   : > { %v5224_v24 = vcombine.low (!%p5682_p9), %v5211_v13, %v5215_v11 }
 0x77b   : > { %5906 = vmatpush3.bf16.msra.mxu0 (!%p5682_p9), %v5905_v20  ;;  %v5202_v20 = vrot.slane (!%p5682_p9), %v5188_v21, %v6976_v51 }
 0x7ff   : > { %v5064_v32 = vpop.f32.mrb[8].mxu1 }
 0x800   : > { %v5066_v29 = vpop.f32.mrb[9].mxu1 }
 0x801   : > { %v5144_v23 = vcombine.low %v5064_v32, %v5066_v29  ;;  %v5300_v32 = vld [vmem:[%s8340_s25 + $0x1c0] sm:$0xff] (!%p5682_p9)  ;;  %v5301_v29 = vld [vmem:[%s8340_s25 + $0x1c8] sm:$0xff] (!%p5682_p9) }
 0x803   : > { %v5152_v37 = vrot.slane %v5144_v23, %v6976_v51  ;;  %v5937_v23 = vpack.c.bf16 (!%p5682_p9), %v5283_v26, %v5282_v28  ;;  %v5290_v28 = vld [vmem:[%s8340_s25 + $0x170] sm:$0xff] (!%p5682_p9)  ;;  %v5291_v26 = vld [vmem:[%s8340_s25 + $0x178] sm:$0xff] (!%p5682_p9) }
 0x805   : > { %5938 = vmatpush3.bf16.msra.mxu1 (!%p5682_p9), %v5937_v23 }
 0x83f   : > { %v5135_v31 = vpop.f32.mrb[10].mxu1 }
 0x840   : > { %v5137_v33 = vpop.f32.mrb[11].mxu1 }
 0x841   : > { %v5145_v36 = vcombine.low %v5135_v31, %v5137_v33  ;;  %v5907_v31 = vpack.c.bf16 (!%p5682_p9), %v5269_v27, %v5268_v30  ;;  %v5252_v33 = vld [vmem:[%s8340_s25 + $0x40] sm:$0xff] (!%p5682_p9)  ;;  %v5195_v30 = vrot.slane (!%p5682_p9), %v5187_v17, %v6976_v51  ;;  %v5225_v27 = vcombine.low (!%p5682_p9), %v5219_v15, %v5223_v14 }
 0x843   : > { %v5159_v16 = vrot.slane %v5145_v36, %v6976_v51  ;;  %5167 = sbr.rel (%p5682_p9) target bundleno = 2676 (0xa74), region = 96  ;;  %v5253_v36 = vld [vmem:[%s8340_s25 + $0x48] sm:$0xff] (!%p5682_p9)  ;;  %5908 = vmatprep.subr.bf16.mxu0 (!%p5682_p9), %v5907_v31  ;;  %v5239_v31 = vrot.slane (!%p5682_p9), %v5225_v27, %v6976_v51 }
 0x844   : > { %v5909_v43 = vpack.c.bf16 (!%p5682_p9), %v5253_v36, %v5252_v33  ;;  %v5953_v33 = vpack.c.bf16 (!%p5682_p9), %v5291_v26, %v5290_v28  ;;  %v5203_v36 = vcombine.low (!%p5682_p9), %v5195_v30, %v5202_v20 }
 0x845   : > { %v5160_v41 = vcombine.low %v5152_v37, %v5159_v16  ;;  %v5284_v37 = vld [vmem:[%s8340_s25 + $0x140] sm:$0xff] (!%p5682_p9)  ;;  %v5939_v16 = vpack.c.bf16 (!%p5682_p9), %v5301_v29, %v5300_v32  ;;  %v5232_v32 = vrot.slane (!%p5682_p9), %v5224_v24, %v6976_v51  ;;  %v5921_v29 = vpack.c.bf16 (!%p5682_p9), %v5259_v18, %v5258_v19 }
 0x846   : > { %5910 = vmatpush3.bf16.msra.mxu0 (!%p5682_p9), %v5909_v43 }
 0x847   : > { %v5162_v42 = vadd.f32 %v5160_v41, %v4997_v40  ;;  %v5285_v40 = vld [vmem:[%s8340_s25 + $0x148] sm:$0xff] (!%p5682_p9)  ;;  %v5270_v41 = vld [vmem:[%s8340_s25 + $0xd0] sm:$0xff] (!%p5682_p9)  ;;  %5940 = vmatprep.subr.bf16.mxu1 (!%p5682_p9), %v5939_v16 }
 0x848   : > { %v5941_v35 = vpack.c.bf16 (!%p5682_p9), %v5285_v40, %v5284_v37  ;;  %v5240_v37 = vcombine.low (!%p5682_p9), %v5232_v32, %v5239_v31 }
 0x849   : > { %5163 = vst [vmem:[#allocation2] sm:$0xff] %v5162_v42  ;;  %v5271_v42 = vld [vmem:[%s8340_s25 + $0xd8] sm:$0xff] (!%p5682_p9) }
 0x84a   : > { %v5911_v57 = vpack.c.bf16 %v5271_v42, %v5270_v41  ;;  %5942 = vmatpush3.bf16.msra.mxu1 %v5941_v35 }
 0x84b   : > { %5944 = vmatprep.subr.bf16.mxu1 %v5943_v38 }
 0x84c   : > { %5912 = vmatprep.subr.bf16.mxu0 %v5911_v57 }
 0x84d   : > { %5914 = vmatpush3.bf16.msra.mxu0 %v5913_v61 }
 0x84e   : > { %5946 = vmatpush3.bf16.msra.mxu1 %v5945_v2  ;;  %5916 = vmatprep.subr.bf16.mxu0 %v5915_v63 }
 0x84f   : > { %5948 = vmatprep.subr.bf16.mxu1 %v5947_v55 }
 0x850   : > { %v5168_v23 = vld [vmem:[#allocation2] sm:$0xff] }
 0x851   : > { %5918 = vmatpush3.bf16.msra.mxu0 %v5917_v12  ;;  %v5205_v16 = vmul.f32 %v5203_v36, %v5168_v23 }
 0x852   : > { %5950 = vmatpush3.bf16.msra.mxu1 %v5949_v7  ;;  %5920 = vmatprep.subr.bf16.mxu0 %v5919_v52 }
 0x853   : > { %5952 = vmatprep.subr.bf16.mxu1 %v5951_v25  ;;  %v5242_v40 = vadd.f32 %v5240_v37, %v5205_v16 }
 0x855   : > { %5922 = vmatpush3.bf16.msra.mxu0 %v5921_v29  ;;  %v5243_v41 = vmax.f32 %v5242_v40, 0.0 }
 0x856   : > { %5954 = vmatpush3.bf16.msra.mxu1 %v5953_v33 }
 0x857   : > { %v5323_v42 = vrot.slane %v5243_v41, %v6976_v51  ;;  %v5316_v44 = vcombine.high %v5243_v41, %v5243_v41 }
 0x859   : > { %v5331_v47 = vcombine.high %v5323_v42, %v5323_v42  ;;  %v5330_v43 = vrot.slane %v5316_v44, %v6976_v51 }
 0x85b   : > { %5401 = vmatprep.mubr.f32.mxu0 %v5331_v47  ;;  %v5332_v35 = vcombine.high %v5330_v43, %v5330_v43 }
 0x85c   : > { %5402 = vmatmul.mubr.f32.vlgmr.msra.gmra.mrb[0].mxu0 %v5323_v42 }
 0x85d   : > { %5471 = vmatprep.mubr.f32.mxu1 %v5332_v35 }
 0x85e   : > { %5472 = vmatmul.mubr.f32.vlgmr.msra.gmra.mrb[0].mxu1 %v5330_v43 }
 0x92f   : > { %v5725_v57 = vpop.f32.mrb[0].mxu0 }
 0x930   : > { %v5726_v45 = vpop.f32.mrb[1].mxu0 }
 0x931   : > { %v5727_v22 = vadd.f32 %v5726_v45, %v5725_v57  ;;  %v5760_v38 = vpop.f32.mrb[0].mxu1 }
 0x932   : > { %v5761_v54 = vpop.f32.mrb[1].mxu1 }
 0x933   : > { %v5404_v48 = vadd.f32 %v5727_v22, %v5683_v49  ;;  %v5762_v50 = vadd.f32 %v5761_v54, %v5760_v38 }
 0x935   : > { %v5474_v56 = vadd.f32 %v5762_v50, %v5404_v48 }
 0x937   : > { %v5478_v59 = vsel %vm5477_vm1, %v5474_v56, -inf }
 0x938   : > { %5479 = vmax.xlane.f32.xlu0 %v5478_v59 }
 0x9c5   : > { %v5480_v60 = vpop.xlane.xlu0 %5479 }
 0x9c6   : > { %v5481_v51 = vsub.f32 %v5474_v56, %v5480_v60 }
 0x9c8   : > { %v5482_v46 = vmul.f32 1.442695, %v5481_v51 }
 0x9ca   : > { %6244 = vpow2.f32 %v5482_v46 }
 0x9d4   : > { %v6245_v61 = vpop.eup %6244 }
 0x9d5   : > { %v5484_v0 = vsel %vm5477_vm1, %v6245_v61, 0.0 }
 0x9d6   : > { %5485 = vadd.xlane.f32.xlu0 %v5484_v0 }
 0xa63   : > { %v5486_v62 = vpop.xlane.xlu0 %5485 }
 0xa64   : > { %6246 = vlog2.f32 %v5486_v62 }
 0xa6e   : > { %v6247_v2 = vpop.eup %6246 }
 0xa6f   : > { %v5488_v63 = vmul.f32 0.6931472, %v6247_v2 }
 0xa71   : > { %v5489_v58 = vsub.f32 %v5481_v51, %v5488_v63 }
 0xa73   : > { %5490 = vst.msk [vmem:[#allocation17] sm:$0x3] %vm5477_vm1, %v5489_v58 }
 0xa74 PF: > { %p6176_p6 = scmp.eq.s32.totalorder %s6649_s13, 3  ;;  %s6579_s23 = smov [#allocation17]  }
 0xa75   : > { %s5498_s27 = sshll.u32 %s6579_s23, 4  ;;  %s5499_s27 = int_to_ptr.vmem [resolvable:$true] %s5498_s27 }
 0xa76   : > { %s6481_s7 = scalar_lea.vmem %s5499_s27, 32  ;;  %p6488_p13 = scmp.lt.s32.totalorder %s5499_s27, %s5499_s27 }
 0xa77   : > { %p6482_p0 = scmp.ne.s32.totalorder %s5499_s27, %s6481_s7  ;;  %p6489_p3 = scmp.lt.s32.totalorder %s6481_s7, %s6481_s7 }
 0xa79   : > { %p6483_p7 = pnand %p6482_p0, %p6176_p6  ;;  %p6490_p8 = por %p6489_p3, %p6488_p13 }
 0xa7b   : > { %p6484_p2 = pneg %p6483_p7 }
 0xa7d   : > { %p6491_p12 = pnand %p6490_p8, %p6484_p2 }
 0xa7f   : > { %6494 = shalt.err (!%p6491_p12)
}
 0xa80   : > { %s8341_s12 = sld [smem:[#allocation31_spill]] }
 0xa86   : > { %s8342_s16 = smov %s8341_s12  ;;  %s6495_s24 = scalar_lea.hbm %s8341_s12, 32 }
 0xa87   : > { %p6496_p11 = scmp.ne.s32.totalorder %s8342_s16, %s6495_s24  ;;  %p6501_p5 = scmp.lt.u32.totalorder %s6495_s24, %s8342_s16 }
 0xa89   : > { %p6497_p4 = pnand %p6496_p11, %p6176_p6 }
 0xa8b   : > { %p6498_p1 = pneg %p6497_p4 }
 0xa8d   : > { %p6503_p10 = pnand %p6501_p5, %p6498_p1 }
 0xa8f   : > { %6506 = shalt.err (!%p6503_p10)
}
 0xa90   : > { %6138 = dma.vmem_to_hbm [thread:$0]  (%p6176_p6), %s5499_s27, 32, %s8342_s16, [#allocation5]  }
 0xa91   : > { %6544 = dma.done.wait (%p6176_p6), [#allocation5], 32  }
 0xa92   : > { %6546 = vsyncadd (%p6176_p6), [#allocation5], 4294967264 }
 0xa93 PF: > { %s8343_s12 = sld [smem:[#allocation26_spill]]  ;;  %s8344_s29 = sld [smem:[#allocation24_spill]] }
 0xa94   : > { %s8345_s11 = sld [smem:[#allocation27_spill]]  ;;  %s8346_s30 = smov %s6553_s10 }
 0xa99   : > { %p26_p9 = scmp.ge.s32.totalorder %s8343_s12, 6   ;;  %s8347_s10 = smov %s8344_s29 }
 0xa9b   :  { %28 = sbr.rel (!%p26_p9) target bundleno = 14 (0xe), region = 153 }
 0xaa2   :  { %5511 = vsyncpa [#allocation4], 1 }
 0xaa3   :  { %5513 = vsyncpa [#allocation4 + $0x1], 1 }
 0xaa4   :  { %5514 = vsyncpa [#allocation7], 1 }
 0xaa5   :  { %5516 = vsyncpa [#allocation7 + $0x1], 1 }
 0xaa6   :  { %5517 = vsyncpa [#allocation10], 1 }
 0xaa7   :  { %5519 = vsyncpa [#allocation10 + $0x1], 1 }
 0xaa8   :  { %5520 = vsyncpa [#allocation13], 1 }
 0xaa9   :  { %5521 = vsyncpa [#allocation16], 1 }
 0xaaa   :  { %5522 = vsyncpa [#allocation5], 1 }
 0xaab   :  { %5524 = vsyncpa [#allocation5 + $0x1], 1 }

</bundles_post_ra>
